<compile_context>
chip_gen: v7x
topology: tpu7x:2x2x1
jax: 0.10.0
libtpu: 0.0.40
codegen_flags: <defaults>
</compile_context>

<pallas_src>
import jax
import jax.numpy as jnp
from jax.experimental import pallas as pl
from jax.experimental.pallas import tpu as pltpu

_NLANE = 128  # lane-dense class padding for the output block


# ---------------------------------------------------------------------------
# In-kernel helpers (static shapes, traced once inside the Pallas kernel).
# ---------------------------------------------------------------------------
def _leaky_relu(x, slope=0.01):
    return jnp.where(x >= 0, x, slope * x)


def _conv1d_taps(y, w_ref, b_ref):
    """Conv over the length axis as k accumulating matmuls (no lane-axis concat).

    y: (B, L, C) f32, w_ref: (k, C, OC) bf16, b_ref: (1, OC) f32 -> (B, Lo, OC) f32.
    """
    B, L, C = y.shape
    k, _, OC = w_ref.shape
    Lo = L - k + 1
    acc = None
    for i in range(k):  # static unroll; each tap is one MXU push, data stays in place
        sl = y[:, i:i + Lo, :].reshape(B * Lo, C).astype(jnp.bfloat16)
        t = jnp.dot(sl, w_ref[i], preferred_element_type=jnp.float32)
        acc = t if acc is None else acc + t
    return acc.reshape(B, Lo, OC) + b_ref[...]


def _max_pool1d_k2(y):
    """PyTorch max_pool1d(kernel_size=2): one vectorized maximum over even/odd rows."""
    B, L, C = y.shape
    Lp = L // 2
    yr = y[:, :2 * Lp, :].reshape(B * Lp, 2, C)
    return jnp.maximum(yr[:, 0, :], yr[:, 1, :]).reshape(B, Lp, C)


def cnn_kernel(x_ref, w2d_ref, b2d_ref, w1_ref, b1_ref, w2_ref, b2_ref,
               w3_ref, b3_ref, wfc_ref, bfc_ref, out_ref):
    x = x_ref[...]                                              # (Bt, H, 40)

    # Conv2d(1->16, kernel=(4,40)): width collapses -> a 4-tap conv over H with C=40.
    y = jnp.maximum(_conv1d_taps(x, w2d_ref, b2d_ref), 0.0)     # relu (== squeeze(3))

    # Conv1d(16->16, k=4) + leaky_relu + max_pool1d(2)
    y = _leaky_relu(_conv1d_taps(y, w1_ref, b1_ref))
    y = _max_pool1d_k2(y)

    # Conv1d(16->32, k=3) + leaky_relu ; Conv1d(32->32, k=3) + leaky_relu + pool
    y = _leaky_relu(_conv1d_taps(y, w2_ref, b2_ref))
    y = _leaky_relu(_conv1d_taps(y, w3_ref, b3_ref))
    y = _max_pool1d_k2(y)

    # adaptive_avg_pool1d(1) + flatten -> mean over length
    y = jnp.mean(y, axis=1)                                     # (Bt, 32)

    # fc(32->3), classes padded to 128 lanes (padded bias -1e30 => exp() -> 0), softmax.
    logits = jnp.dot(y.astype(jnp.bfloat16), wfc_ref[...],
                     preferred_element_type=jnp.float32) + bfc_ref[...]
    logits = logits - jnp.max(logits, axis=1, keepdims=True)
    e = jnp.exp(logits)
    out_ref[...] = e * pl.reciprocal(jnp.sum(e, axis=1, keepdims=True), approx=True)


# ---------------------------------------------------------------------------
# Wrapper: parameter flattening (glue) + pallas_call with a parallel batch grid.
# ---------------------------------------------------------------------------
def cnn_forward(x_nchw, params, *, b_tile=16):
    B, C, H, W = x_nchw.shape
    assert C == 1 and W == 40, "model requires NCHW input with C=1, W=40"
    x = x_nchw[:, 0, :, :].astype(jnp.float32)                  # (B, H, 40)

    # Batch tile: multiple of 8 (sublane-aligned output rows); pad B up to it.
    b_tile = max(8, min(b_tile, ((B + 7) // 8) * 8))
    n_blocks = pl.cdiv(B, b_tile)
    b_pad = n_blocks * b_tile
    if b_pad != B:
        x = jnp.pad(x, ((0, b_pad - B), (0, 0), (0, 0)))

    w2d, b2d, w1, b1, w2, b2, w3, b3, wfc, bfc = params
    # Per-tap matmul weights (k, C_in, C_out); bf16 MXU operands, f32 accumulation.
    w2d_t = jnp.transpose(w2d[:, 0, :, :], (1, 2, 0)).astype(jnp.bfloat16)  # (4, 40, 16)
    w1_t = jnp.transpose(w1, (2, 1, 0)).astype(jnp.bfloat16)                # (4, 16, 16)
    w2_t = jnp.transpose(w2, (2, 1, 0)).astype(jnp.bfloat16)                # (3, 16, 32)
    w3_t = jnp.transpose(w3, (2, 1, 0)).astype(jnp.bfloat16)                # (3, 32, 32)
    # Lane-dense fc: pad 3 classes to 128 output lanes; padded bias -> -1e30 (softmax 0).
    wfc_p = jnp.zeros((32, _NLANE), jnp.bfloat16).at[:, :3].set(
        wfc.T.astype(jnp.bfloat16))
    bfc_p = jnp.full((1, _NLANE), -1e30, jnp.float32).at[0, :3].set(
        bfc.astype(jnp.float32))

    weights = (w2d_t, b2d.reshape(1, 16).astype(jnp.float32),
               w1_t, b1.reshape(1, 16).astype(jnp.float32),
               w2_t, b2.reshape(1, 32).astype(jnp.float32),
               w3_t, b3.reshape(1, 32).astype(jnp.float32),
               wfc_p, bfc_p)

    def const_spec(a):  # full-array block, resident across all grid steps
        nd = a.ndim
        return pl.BlockSpec(a.shape, lambda i, _nd=nd: (0,) * _nd)

    out = pl.pallas_call(
        cnn_kernel,
        out_shape=jax.ShapeDtypeStruct((b_pad, _NLANE), jnp.float32),
        grid=(n_blocks,),
        in_specs=[pl.BlockSpec((b_tile, H, W), lambda i: (i, 0, 0))]
                 + [const_spec(w) for w in weights],
        out_specs=pl.BlockSpec((b_tile, _NLANE), lambda i: (i, 0)),
        compiler_params=pltpu.CompilerParams(
            dimension_semantics=("parallel",)),
    )(x, *weights)

    return out[:B, :3]


def init_params(key):
    # Deterministic PyTorch-style uniform(-1/sqrt(fan_in), 1/sqrt(fan_in)) init.
    ks = jax.random.split(key, 10)

    def u(k, shape, fan_in):
        bound = 1.0 / jnp.sqrt(jnp.float32(fan_in))
        return jax.random.uniform(k, shape, jnp.float32, -bound, bound)

    w2d = u(ks[0], (16, 1, 4, 40), 1 * 4 * 40)
    b2d = u(ks[1], (16,), 1 * 4 * 40)
    w1 = u(ks[2], (16, 16, 4), 16 * 4)
    b1 = u(ks[3], (16,), 16 * 4)
    w2 = u(ks[4], (32, 16, 3), 16 * 3)
    b2 = u(ks[5], (32,), 16 * 3)
    w3 = u(ks[6], (32, 32, 3), 32 * 3)
    b3 = u(ks[7], (32,), 32 * 3)
    wfc = u(ks[8], (3, 32), 32)
    bfc = u(ks[9], (3,), 32)
    return (w2d, b2d, w1, b1, w2, b2, w3, b3, wfc, bfc)


if __name__ == "__main__":
    key = jax.random.PRNGKey(0)
    k_x, k_p = jax.random.split(key)

    # Input: (B=2, C=1, H=22, W=40) -> conv2d height 19, final pooled length 2.
    x = jax.random.normal(k_x, (2, 1, 22, 40), dtype=jnp.float32)
    params = init_params(k_p)

    out = jax.block_until_ready(cnn_forward(x, params))
    assert out.shape == (2, 3)
    assert bool(jnp.all(jnp.isfinite(out)))
    print("KERNEL_OK")
</pallas_src>

<mosaic_0001>
module attributes {stable_mosaic.version = 11 : i64} {
  func.func @cnn_kernel(%arg0: i32, %arg1: memref<8x22x40xf32, #tpu.memory_space<vmem>>, %arg2: memref<4x40x16xbf16, #tpu.memory_space<vmem>>, %arg3: memref<1x16xf32, #tpu.memory_space<vmem>>, %arg4: memref<4x16x16xbf16, #tpu.memory_space<vmem>>, %arg5: memref<1x16xf32, #tpu.memory_space<vmem>>, %arg6: memref<3x16x32xbf16, #tpu.memory_space<vmem>>, %arg7: memref<1x32xf32, #tpu.memory_space<vmem>>, %arg8: memref<3x32x32xbf16, #tpu.memory_space<vmem>>, %arg9: memref<1x32xf32, #tpu.memory_space<vmem>>, %arg10: memref<32x128xbf16, #tpu.memory_space<vmem>>, %arg11: memref<1x128xf32, #tpu.memory_space<vmem>>, %arg12: memref<8x128xf32, #tpu.memory_space<vmem>>) attributes {dimension_semantics = [#tpu.dimension_semantics<parallel>], iteration_bounds = array<i64: 1>, scalar_prefetch = 0 : i64, scratch_operands = 0 : i64, tpu.core_type = #tpu.core_type<tc>, window_params = [{transform_indices = @transform_0, window_bounds = array<i64: 8, 22, 40>}, {pipeline_mode = #tpu.pipeline_mode<synchronous>, transform_indices = @transform_1, window_bounds = array<i64: 4, 40, 16>}, {pipeline_mode = #tpu.pipeline_mode<synchronous>, transform_indices = @transform_2, window_bounds = array<i64: 1, 16>}, {pipeline_mode = #tpu.pipeline_mode<synchronous>, transform_indices = @transform_3, window_bounds = array<i64: 4, 16, 16>}, {pipeline_mode = #tpu.pipeline_mode<synchronous>, transform_indices = @transform_4, window_bounds = array<i64: 1, 16>}, {pipeline_mode = #tpu.pipeline_mode<synchronous>, transform_indices = @transform_5, window_bounds = array<i64: 3, 16, 32>}, {pipeline_mode = #tpu.pipeline_mode<synchronous>, transform_indices = @transform_6, window_bounds = array<i64: 1, 32>}, {pipeline_mode = #tpu.pipeline_mode<synchronous>, transform_indices = @transform_7, window_bounds = array<i64: 3, 32, 32>}, {pipeline_mode = #tpu.pipeline_mode<synchronous>, transform_indices = @transform_8, window_bounds = array<i64: 1, 32>}, {pipeline_mode = #tpu.pipeline_mode<synchronous>, transform_indices = @transform_9, window_bounds = array<i64: 32, 128>}, {pipeline_mode = #tpu.pipeline_mode<synchronous>, transform_indices = @transform_10, window_bounds = array<i64: 1, 128>}, {transform_indices = @transform_11, window_bounds = array<i64: 8, 128>}]} {
    %c0 = arith.constant 0 : index
    %c0_0 = arith.constant 0 : index
    %c0_1 = arith.constant 0 : index
    %0 = vector.load %arg1[%c0, %c0_0, %c0_1] : memref<8x22x40xf32, #tpu.memory_space<vmem>>, vector<8x22x40xf32>
    %1 = vector.extract_strided_slice %0 {offsets = [0, 0, 0], sizes = [8, 19, 40], strides = [1, 1, 1]} : vector<8x22x40xf32> to vector<8x19x40xf32>
    %2 = vector.shape_cast %1 : vector<8x19x40xf32> to vector<152x40xf32>
    %3 = arith.truncf %2 : vector<152x40xf32> to vector<152x40xbf16>
    %c0_2 = arith.constant 0 : index
    %c0_3 = arith.constant 0 : index
    %c0_4 = arith.constant 0 : index
    %4 = vector.load %arg2[%c0_2, %c0_3, %c0_4] : memref<4x40x16xbf16, #tpu.memory_space<vmem>>, vector<1x40x16xbf16>
    %5 = vector.shape_cast %4 : vector<1x40x16xbf16> to vector<40x16xbf16>
    %cst = arith.constant dense<0.000000e+00> : vector<152x16xf32>
    %6 = tpu.matmul %3, %5, %cst {dimension_numbers = #tpu.dot_dimension_numbers<[1], [0], [0], [1], [0, 0, 1, 1], [], []>} : vector<152x40xbf16>, vector<40x16xbf16>, vector<152x16xf32> -> vector<152x16xf32>
    %7 = vector.extract_strided_slice %0 {offsets = [0, 1, 0], sizes = [8, 19, 40], strides = [1, 1, 1]} : vector<8x22x40xf32> to vector<8x19x40xf32>
    %8 = vector.shape_cast %7 : vector<8x19x40xf32> to vector<152x40xf32>
    %9 = arith.truncf %8 : vector<152x40xf32> to vector<152x40xbf16>
    %c1 = arith.constant 1 : index
    %c0_5 = arith.constant 0 : index
    %c0_6 = arith.constant 0 : index
    %10 = vector.load %arg2[%c1, %c0_5, %c0_6] : memref<4x40x16xbf16, #tpu.memory_space<vmem>>, vector<1x40x16xbf16>
    %11 = vector.shape_cast %10 : vector<1x40x16xbf16> to vector<40x16xbf16>
    %cst_7 = arith.constant dense<0.000000e+00> : vector<152x16xf32>
    %12 = tpu.matmul %9, %11, %cst_7 {dimension_numbers = #tpu.dot_dimension_numbers<[1], [0], [0], [1], [0, 0, 1, 1], [], []>} : vector<152x40xbf16>, vector<40x16xbf16>, vector<152x16xf32> -> vector<152x16xf32>
    %13 = arith.addf %6, %12 : vector<152x16xf32>
    %14 = vector.extract_strided_slice %0 {offsets = [0, 2, 0], sizes = [8, 19, 40], strides = [1, 1, 1]} : vector<8x22x40xf32> to vector<8x19x40xf32>
    %15 = vector.shape_cast %14 : vector<8x19x40xf32> to vector<152x40xf32>
    %16 = arith.truncf %15 : vector<152x40xf32> to vector<152x40xbf16>
    %c2 = arith.constant 2 : index
    %c0_8 = arith.constant 0 : index
    %c0_9 = arith.constant 0 : index
    %17 = vector.load %arg2[%c2, %c0_8, %c0_9] : memref<4x40x16xbf16, #tpu.memory_space<vmem>>, vector<1x40x16xbf16>
    %18 = vector.shape_cast %17 : vector<1x40x16xbf16> to vector<40x16xbf16>
    %cst_10 = arith.constant dense<0.000000e+00> : vector<152x16xf32>
    %19 = tpu.matmul %16, %18, %cst_10 {dimension_numbers = #tpu.dot_dimension_numbers<[1], [0], [0], [1], [0, 0, 1, 1], [], []>} : vector<152x40xbf16>, vector<40x16xbf16>, vector<152x16xf32> -> vector<152x16xf32>
    %20 = arith.addf %13, %19 : vector<152x16xf32>
    %21 = vector.extract_strided_slice %0 {offsets = [0, 3, 0], sizes = [8, 19, 40], strides = [1, 1, 1]} : vector<8x22x40xf32> to vector<8x19x40xf32>
    %22 = vector.shape_cast %21 : vector<8x19x40xf32> to vector<152x40xf32>
    %23 = arith.truncf %22 : vector<152x40xf32> to vector<152x40xbf16>
    %c3 = arith.constant 3 : index
    %c0_11 = arith.constant 0 : index
    %c0_12 = arith.constant 0 : index
    %24 = vector.load %arg2[%c3, %c0_11, %c0_12] : memref<4x40x16xbf16, #tpu.memory_space<vmem>>, vector<1x40x16xbf16>
    %25 = vector.shape_cast %24 : vector<1x40x16xbf16> to vector<40x16xbf16>
    %cst_13 = arith.constant dense<0.000000e+00> : vector<152x16xf32>
    %26 = tpu.matmul %23, %25, %cst_13 {dimension_numbers = #tpu.dot_dimension_numbers<[1], [0], [0], [1], [0, 0, 1, 1], [], []>} : vector<152x40xbf16>, vector<40x16xbf16>, vector<152x16xf32> -> vector<152x16xf32>
    %27 = arith.addf %20, %26 : vector<152x16xf32>
    %28 = vector.shape_cast %27 : vector<152x16xf32> to vector<8x19x16xf32>
    %c0_14 = arith.constant 0 : index
    %c0_15 = arith.constant 0 : index
    %29 = vector.load %arg3[%c0_14, %c0_15] : memref<1x16xf32, #tpu.memory_space<vmem>>, vector<1x16xf32>
    %30 = vector.shape_cast %29 : vector<1x16xf32> to vector<1x1x16xf32>
    %31 = vector.broadcast %30 : vector<1x1x16xf32> to vector<8x19x16xf32>
    %32 = arith.addf %28, %31 : vector<8x19x16xf32>
    %cst_16 = arith.constant 0.000000e+00 : f32
    %33 = vector.broadcast %cst_16 : f32 to vector<8x19x16xf32>
    %34 = arith.maximumf %32, %33 : vector<8x19x16xf32>
    %35 = vector.extract_strided_slice %34 {offsets = [0, 0, 0], sizes = [8, 16, 16], strides = [1, 1, 1]} : vector<8x19x16xf32> to vector<8x16x16xf32>
    %36 = vector.shape_cast %35 : vector<8x16x16xf32> to vector<128x16xf32>
    %37 = arith.truncf %36 : vector<128x16xf32> to vector<128x16xbf16>
    %c0_17 = arith.constant 0 : index
    %c0_18 = arith.constant 0 : index
    %c0_19 = arith.constant 0 : index
    %38 = vector.load %arg4[%c0_17, %c0_18, %c0_19] : memref<4x16x16xbf16, #tpu.memory_space<vmem>>, vector<1x16x16xbf16>
    %39 = vector.shape_cast %38 : vector<1x16x16xbf16> to vector<16x16xbf16>
    %cst_20 = arith.constant dense<0.000000e+00> : vector<128x16xf32>
    %40 = tpu.matmul %37, %39, %cst_20 {dimension_numbers = #tpu.dot_dimension_numbers<[1], [0], [0], [1], [0, 0, 1, 1], [], []>} : vector<128x16xbf16>, vector<16x16xbf16>, vector<128x16xf32> -> vector<128x16xf32>
    %41 = vector.extract_strided_slice %34 {offsets = [0, 1, 0], sizes = [8, 16, 16], strides = [1, 1, 1]} : vector<8x19x16xf32> to vector<8x16x16xf32>
    %42 = vector.shape_cast %41 : vector<8x16x16xf32> to vector<128x16xf32>
    %43 = arith.truncf %42 : vector<128x16xf32> to vector<128x16xbf16>
    %c1_21 = arith.constant 1 : index
    %c0_22 = arith.constant 0 : index
    %c0_23 = arith.constant 0 : index
    %44 = vector.load %arg4[%c1_21, %c0_22, %c0_23] : memref<4x16x16xbf16, #tpu.memory_space<vmem>>, vector<1x16x16xbf16>
    %45 = vector.shape_cast %44 : vector<1x16x16xbf16> to vector<16x16xbf16>
    %cst_24 = arith.constant dense<0.000000e+00> : vector<128x16xf32>
    %46 = tpu.matmul %43, %45, %cst_24 {dimension_numbers = #tpu.dot_dimension_numbers<[1], [0], [0], [1], [0, 0, 1, 1], [], []>} : vector<128x16xbf16>, vector<16x16xbf16>, vector<128x16xf32> -> vector<128x16xf32>
    %47 = arith.addf %40, %46 : vector<128x16xf32>
    %48 = vector.extract_strided_slice %34 {offsets = [0, 2, 0], sizes = [8, 16, 16], strides = [1, 1, 1]} : vector<8x19x16xf32> to vector<8x16x16xf32>
    %49 = vector.shape_cast %48 : vector<8x16x16xf32> to vector<128x16xf32>
    %50 = arith.truncf %49 : vector<128x16xf32> to vector<128x16xbf16>
    %c2_25 = arith.constant 2 : index
    %c0_26 = arith.constant 0 : index
    %c0_27 = arith.constant 0 : index
    %51 = vector.load %arg4[%c2_25, %c0_26, %c0_27] : memref<4x16x16xbf16, #tpu.memory_space<vmem>>, vector<1x16x16xbf16>
    %52 = vector.shape_cast %51 : vector<1x16x16xbf16> to vector<16x16xbf16>
    %cst_28 = arith.constant dense<0.000000e+00> : vector<128x16xf32>
    %53 = tpu.matmul %50, %52, %cst_28 {dimension_numbers = #tpu.dot_dimension_numbers<[1], [0], [0], [1], [0, 0, 1, 1], [], []>} : vector<128x16xbf16>, vector<16x16xbf16>, vector<128x16xf32> -> vector<128x16xf32>
    %54 = arith.addf %47, %53 : vector<128x16xf32>
    %55 = vector.extract_strided_slice %34 {offsets = [0, 3, 0], sizes = [8, 16, 16], strides = [1, 1, 1]} : vector<8x19x16xf32> to vector<8x16x16xf32>
    %56 = vector.shape_cast %55 : vector<8x16x16xf32> to vector<128x16xf32>
    %57 = arith.truncf %56 : vector<128x16xf32> to vector<128x16xbf16>
    %c3_29 = arith.constant 3 : index
    %c0_30 = arith.constant 0 : index
    %c0_31 = arith.constant 0 : index
    %58 = vector.load %arg4[%c3_29, %c0_30, %c0_31] : memref<4x16x16xbf16, #tpu.memory_space<vmem>>, vector<1x16x16xbf16>
    %59 = vector.shape_cast %58 : vector<1x16x16xbf16> to vector<16x16xbf16>
    %cst_32 = arith.constant dense<0.000000e+00> : vector<128x16xf32>
    %60 = tpu.matmul %57, %59, %cst_32 {dimension_numbers = #tpu.dot_dimension_numbers<[1], [0], [0], [1], [0, 0, 1, 1], [], []>} : vector<128x16xbf16>, vector<16x16xbf16>, vector<128x16xf32> -> vector<128x16xf32>
    %61 = arith.addf %54, %60 : vector<128x16xf32>
    %62 = vector.shape_cast %61 : vector<128x16xf32> to vector<8x16x16xf32>
    %c0_33 = arith.constant 0 : index
    %c0_34 = arith.constant 0 : index
    %63 = vector.load %arg5[%c0_33, %c0_34] : memref<1x16xf32, #tpu.memory_space<vmem>>, vector<1x16xf32>
    %64 = vector.shape_cast %63 : vector<1x16xf32> to vector<1x1x16xf32>
    %65 = vector.broadcast %64 : vector<1x1x16xf32> to vector<8x16x16xf32>
    %66 = arith.addf %62, %65 : vector<8x16x16xf32>
    %cst_35 = arith.constant 0.000000e+00 : f32
    %67 = vector.broadcast %cst_35 : f32 to vector<8x16x16xf32>
    %68 = arith.cmpf oge, %66, %67 : vector<8x16x16xf32>
    %cst_36 = arith.constant 0.00999999977 : f32
    %69 = vector.broadcast %cst_36 : f32 to vector<8x16x16xf32>
    %70 = arith.mulf %69, %66 : vector<8x16x16xf32>
    %71 = arith.select %68, %66, %70 : vector<8x16x16xi1>, vector<8x16x16xf32>
    %72 = vector.shape_cast %71 : vector<8x16x16xf32> to vector<64x2x16xf32>
    %73 = vector.extract_strided_slice %72 {offsets = [0, 0, 0], sizes = [64, 1, 16], strides = [1, 1, 1]} : vector<64x2x16xf32> to vector<64x1x16xf32>
    %74 = vector.shape_cast %73 : vector<64x1x16xf32> to vector<64x16xf32>
    %75 = vector.extract_strided_slice %72 {offsets = [0, 1, 0], sizes = [64, 1, 16], strides = [1, 1, 1]} : vector<64x2x16xf32> to vector<64x1x16xf32>
    %76 = vector.shape_cast %75 : vector<64x1x16xf32> to vector<64x16xf32>
    %77 = arith.maximumf %74, %76 : vector<64x16xf32>
    %78 = vector.shape_cast %77 : vector<64x16xf32> to vector<8x8x16xf32>
    %79 = vector.extract_strided_slice %78 {offsets = [0, 0, 0], sizes = [8, 6, 16], strides = [1, 1, 1]} : vector<8x8x16xf32> to vector<8x6x16xf32>
    %80 = vector.shape_cast %79 : vector<8x6x16xf32> to vector<48x16xf32>
    %81 = arith.truncf %80 : vector<48x16xf32> to vector<48x16xbf16>
    %c0_37 = arith.constant 0 : index
    %c0_38 = arith.constant 0 : index
    %c0_39 = arith.constant 0 : index
    %82 = vector.load %arg6[%c0_37, %c0_38, %c0_39] : memref<3x16x32xbf16, #tpu.memory_space<vmem>>, vector<1x16x32xbf16>
    %83 = vector.shape_cast %82 : vector<1x16x32xbf16> to vector<16x32xbf16>
    %cst_40 = arith.constant dense<0.000000e+00> : vector<48x32xf32>
    %84 = tpu.matmul %81, %83, %cst_40 {dimension_numbers = #tpu.dot_dimension_numbers<[1], [0], [0], [1], [0, 0, 1, 1], [], []>} : vector<48x16xbf16>, vector<16x32xbf16>, vector<48x32xf32> -> vector<48x32xf32>
    %85 = vector.extract_strided_slice %78 {offsets = [0, 1, 0], sizes = [8, 6, 16], strides = [1, 1, 1]} : vector<8x8x16xf32> to vector<8x6x16xf32>
    %86 = vector.shape_cast %85 : vector<8x6x16xf32> to vector<48x16xf32>
    %87 = arith.truncf %86 : vector<48x16xf32> to vector<48x16xbf16>
    %c1_41 = arith.constant 1 : index
    %c0_42 = arith.constant 0 : index
    %c0_43 = arith.constant 0 : index
    %88 = vector.load %arg6[%c1_41, %c0_42, %c0_43] : memref<3x16x32xbf16, #tpu.memory_space<vmem>>, vector<1x16x32xbf16>
    %89 = vector.shape_cast %88 : vector<1x16x32xbf16> to vector<16x32xbf16>
    %cst_44 = arith.constant dense<0.000000e+00> : vector<48x32xf32>
    %90 = tpu.matmul %87, %89, %cst_44 {dimension_numbers = #tpu.dot_dimension_numbers<[1], [0], [0], [1], [0, 0, 1, 1], [], []>} : vector<48x16xbf16>, vector<16x32xbf16>, vector<48x32xf32> -> vector<48x32xf32>
    %91 = arith.addf %84, %90 : vector<48x32xf32>
    %92 = vector.extract_strided_slice %78 {offsets = [0, 2, 0], sizes = [8, 6, 16], strides = [1, 1, 1]} : vector<8x8x16xf32> to vector<8x6x16xf32>
    %93 = vector.shape_cast %92 : vector<8x6x16xf32> to vector<48x16xf32>
    %94 = arith.truncf %93 : vector<48x16xf32> to vector<48x16xbf16>
    %c2_45 = arith.constant 2 : index
    %c0_46 = arith.constant 0 : index
    %c0_47 = arith.constant 0 : index
    %95 = vector.load %arg6[%c2_45, %c0_46, %c0_47] : memref<3x16x32xbf16, #tpu.memory_space<vmem>>, vector<1x16x32xbf16>
    %96 = vector.shape_cast %95 : vector<1x16x32xbf16> to vector<16x32xbf16>
    %cst_48 = arith.constant dense<0.000000e+00> : vector<48x32xf32>
    %97 = tpu.matmul %94, %96, %cst_48 {dimension_numbers = #tpu.dot_dimension_numbers<[1], [0], [0], [1], [0, 0, 1, 1], [], []>} : vector<48x16xbf16>, vector<16x32xbf16>, vector<48x32xf32> -> vector<48x32xf32>
    %98 = arith.addf %91, %97 : vector<48x32xf32>
    %99 = vector.shape_cast %98 : vector<48x32xf32> to vector<8x6x32xf32>
    %c0_49 = arith.constant 0 : index
    %c0_50 = arith.constant 0 : index
    %100 = vector.load %arg7[%c0_49, %c0_50] : memref<1x32xf32, #tpu.memory_space<vmem>>, vector<1x32xf32>
    %101 = vector.shape_cast %100 : vector<1x32xf32> to vector<1x1x32xf32>
    %102 = vector.broadcast %101 : vector<1x1x32xf32> to vector<8x6x32xf32>
    %103 = arith.addf %99, %102 : vector<8x6x32xf32>
    %cst_51 = arith.constant 0.000000e+00 : f32
    %104 = vector.broadcast %cst_51 : f32 to vector<8x6x32xf32>
    %105 = arith.cmpf oge, %103, %104 : vector<8x6x32xf32>
    %cst_52 = arith.constant 0.00999999977 : f32
    %106 = vector.broadcast %cst_52 : f32 to vector<8x6x32xf32>
    %107 = arith.mulf %106, %103 : vector<8x6x32xf32>
    %108 = arith.select %105, %103, %107 : vector<8x6x32xi1>, vector<8x6x32xf32>
    %109 = vector.extract_strided_slice %108 {offsets = [0, 0, 0], sizes = [8, 4, 32], strides = [1, 1, 1]} : vector<8x6x32xf32> to vector<8x4x32xf32>
    %110 = vector.shape_cast %109 : vector<8x4x32xf32> to vector<32x32xf32>
    %111 = arith.truncf %110 : vector<32x32xf32> to vector<32x32xbf16>
    %c0_53 = arith.constant 0 : index
    %c0_54 = arith.constant 0 : index
    %c0_55 = arith.constant 0 : index
    %112 = vector.load %arg8[%c0_53, %c0_54, %c0_55] : memref<3x32x32xbf16, #tpu.memory_space<vmem>>, vector<1x32x32xbf16>
    %113 = vector.shape_cast %112 : vector<1x32x32xbf16> to vector<32x32xbf16>
    %cst_56 = arith.constant dense<0.000000e+00> : vector<32x32xf32>
    %114 = tpu.matmul %111, %113, %cst_56 {dimension_numbers = #tpu.dot_dimension_numbers<[1], [0], [0], [1], [0, 0, 1, 1], [], []>} : vector<32x32xbf16>, vector<32x32xbf16>, vector<32x32xf32> -> vector<32x32xf32>
    %115 = vector.extract_strided_slice %108 {offsets = [0, 1, 0], sizes = [8, 4, 32], strides = [1, 1, 1]} : vector<8x6x32xf32> to vector<8x4x32xf32>
    %116 = vector.shape_cast %115 : vector<8x4x32xf32> to vector<32x32xf32>
    %117 = arith.truncf %116 : vector<32x32xf32> to vector<32x32xbf16>
    %c1_57 = arith.constant 1 : index
    %c0_58 = arith.constant 0 : index
    %c0_59 = arith.constant 0 : index
    %118 = vector.load %arg8[%c1_57, %c0_58, %c0_59] : memref<3x32x32xbf16, #tpu.memory_space<vmem>>, vector<1x32x32xbf16>
    %119 = vector.shape_cast %118 : vector<1x32x32xbf16> to vector<32x32xbf16>
    %cst_60 = arith.constant dense<0.000000e+00> : vector<32x32xf32>
    %120 = tpu.matmul %117, %119, %cst_60 {dimension_numbers = #tpu.dot_dimension_numbers<[1], [0], [0], [1], [0, 0, 1, 1], [], []>} : vector<32x32xbf16>, vector<32x32xbf16>, vector<32x32xf32> -> vector<32x32xf32>
    %121 = arith.addf %114, %120 : vector<32x32xf32>
    %122 = vector.extract_strided_slice %108 {offsets = [0, 2, 0], sizes = [8, 4, 32], strides = [1, 1, 1]} : vector<8x6x32xf32> to vector<8x4x32xf32>
    %123 = vector.shape_cast %122 : vector<8x4x32xf32> to vector<32x32xf32>
    %124 = arith.truncf %123 : vector<32x32xf32> to vector<32x32xbf16>
    %c2_61 = arith.constant 2 : index
    %c0_62 = arith.constant 0 : index
    %c0_63 = arith.constant 0 : index
    %125 = vector.load %arg8[%c2_61, %c0_62, %c0_63] : memref<3x32x32xbf16, #tpu.memory_space<vmem>>, vector<1x32x32xbf16>
    %126 = vector.shape_cast %125 : vector<1x32x32xbf16> to vector<32x32xbf16>
    %cst_64 = arith.constant dense<0.000000e+00> : vector<32x32xf32>
    %127 = tpu.matmul %124, %126, %cst_64 {dimension_numbers = #tpu.dot_dimension_numbers<[1], [0], [0], [1], [0, 0, 1, 1], [], []>} : vector<32x32xbf16>, vector<32x32xbf16>, vector<32x32xf32> -> vector<32x32xf32>
    %128 = arith.addf %121, %127 : vector<32x32xf32>
    %129 = vector.shape_cast %128 : vector<32x32xf32> to vector<8x4x32xf32>
    %c0_65 = arith.constant 0 : index
    %c0_66 = arith.constant 0 : index
    %130 = vector.load %arg9[%c0_65, %c0_66] : memref<1x32xf32, #tpu.memory_space<vmem>>, vector<1x32xf32>
    %131 = vector.shape_cast %130 : vector<1x32xf32> to vector<1x1x32xf32>
    %132 = vector.broadcast %131 : vector<1x1x32xf32> to vector<8x4x32xf32>
    %133 = arith.addf %129, %132 : vector<8x4x32xf32>
    %cst_67 = arith.constant 0.000000e+00 : f32
    %134 = vector.broadcast %cst_67 : f32 to vector<8x4x32xf32>
    %135 = arith.cmpf oge, %133, %134 : vector<8x4x32xf32>
    %cst_68 = arith.constant 0.00999999977 : f32
    %136 = vector.broadcast %cst_68 : f32 to vector<8x4x32xf32>
    %137 = arith.mulf %136, %133 : vector<8x4x32xf32>
    %138 = arith.select %135, %133, %137 : vector<8x4x32xi1>, vector<8x4x32xf32>
    %139 = vector.shape_cast %138 : vector<8x4x32xf32> to vector<16x2x32xf32>
    %140 = vector.extract_strided_slice %139 {offsets = [0, 0, 0], sizes = [16, 1, 32], strides = [1, 1, 1]} : vector<16x2x32xf32> to vector<16x1x32xf32>
    %141 = vector.shape_cast %140 : vector<16x1x32xf32> to vector<16x32xf32>
    %142 = vector.extract_strided_slice %139 {offsets = [0, 1, 0], sizes = [16, 1, 32], strides = [1, 1, 1]} : vector<16x2x32xf32> to vector<16x1x32xf32>
    %143 = vector.shape_cast %142 : vector<16x1x32xf32> to vector<16x32xf32>
    %144 = arith.maximumf %141, %143 : vector<16x32xf32>
    %145 = vector.shape_cast %144 : vector<16x32xf32> to vector<8x2x32xf32>
    %cst_69 = arith.constant dense<0.000000e+00> : vector<8x32xf32>
    %146 = vector.multi_reduction <add>, %145, %cst_69 [1] : vector<8x2x32xf32> to vector<8x32xf32>
    %cst_70 = arith.constant 2.000000e+00 : f32
    %147 = vector.broadcast %cst_70 : f32 to vector<8x32xf32>
    %148 = arith.divf %146, %147 : vector<8x32xf32>
    %149 = arith.truncf %148 : vector<8x32xf32> to vector<8x32xbf16>
    %c0_71 = arith.constant 0 : index
    %c0_72 = arith.constant 0 : index
    %150 = vector.load %arg10[%c0_71, %c0_72] : memref<32x128xbf16, #tpu.memory_space<vmem>>, vector<32x128xbf16>
    %cst_73 = arith.constant dense<0.000000e+00> : vector<8x128xf32>
    %151 = tpu.matmul %149, %150, %cst_73 {dimension_numbers = #tpu.dot_dimension_numbers<[1], [0], [0], [1], [0, 0, 1, 1], [], []>} : vector<8x32xbf16>, vector<32x128xbf16>, vector<8x128xf32> -> vector<8x128xf32>
    %c0_74 = arith.constant 0 : index
    %c0_75 = arith.constant 0 : index
    %152 = vector.load %arg11[%c0_74, %c0_75] : memref<1x128xf32, #tpu.memory_space<vmem>>, vector<1x128xf32>
    %153 = vector.broadcast %152 : vector<1x128xf32> to vector<8x128xf32>
    %154 = arith.addf %151, %153 : vector<8x128xf32>
    %cst_76 = arith.constant dense<0xFF800000> : vector<8xf32>
    %155 = vector.multi_reduction <maximumf>, %154, %cst_76 [1] : vector<8x128xf32> to vector<8xf32>
    %156 = vector.shape_cast %155 : vector<8xf32> to vector<8x1xf32>
    %157 = vector.broadcast %156 : vector<8x1xf32> to vector<8x128xf32>
    %158 = arith.subf %154, %157 : vector<8x128xf32>
    %159 = math.exp %158 : vector<8x128xf32>
    %cst_77 = arith.constant dense<0.000000e+00> : vector<8xf32>
    %160 = vector.multi_reduction <add>, %159, %cst_77 [1] : vector<8x128xf32> to vector<8xf32>
    %161 = vector.shape_cast %160 : vector<8xf32> to vector<8x1xf32>
    %162 = tpu.reciprocal %161 {approx = true} : vector<8x1xf32> -> vector<8x1xf32>
    %163 = vector.broadcast %162 : vector<8x1xf32> to vector<8x128xf32>
    %164 = arith.mulf %159, %163 : vector<8x128xf32>
    %c0_78 = arith.constant 0 : index
    %c0_79 = arith.constant 0 : index
    %165 = vector.load %arg12[%c0_78, %c0_79] : memref<8x128xf32, #tpu.memory_space<vmem>>, vector<8x128xf32>
    tpu.vector_store %arg12[%c0_78, %c0_79], %164 {strides = array<i32>} : memref<8x128xf32, #tpu.memory_space<vmem>>, vector<8x128xf32>,
    return
  }
  func.func @transform_0(%arg0: i32) -> (i32, i32, i32) {
    %c0_i32 = arith.constant 0 : i32
    %c0_i32_0 = arith.constant 0 : i32
    %c0_i32_1 = arith.constant 0 : i32
    return %arg0, %c0_i32, %c0_i32_0 : i32, i32, i32
  }
  func.func @transform_1(%arg0: i32) -> (i32, i32, i32) {
    %c0_i32 = arith.constant 0 : i32
    %c0_i32_0 = arith.constant 0 : i32
    %c0_i32_1 = arith.constant 0 : i32
    %c0_i32_2 = arith.constant 0 : i32
    return %c0_i32, %c0_i32_0, %c0_i32_1 : i32, i32, i32
  }
  func.func @transform_2(%arg0: i32) -> (i32, i32) {
    %c0_i32 = arith.constant 0 : i32
    %c0_i32_0 = arith.constant 0 : i32
    %c0_i32_1 = arith.constant 0 : i32
    return %c0_i32, %c0_i32_0 : i32, i32
  }
  func.func @transform_3(%arg0: i32) -> (i32, i32, i32) {
    %c0_i32 = arith.constant 0 : i32
    %c0_i32_0 = arith.constant 0 : i32
    %c0_i32_1 = arith.constant 0 : i32
    %c0_i32_2 = arith.constant 0 : i32
    return %c0_i32, %c0_i32_0, %c0_i32_1 : i32, i32, i32
  }
  func.func @transform_4(%arg0: i32) -> (i32, i32) {
    %c0_i32 = arith.constant 0 : i32
    %c0_i32_0 = arith.constant 0 : i32
    %c0_i32_1 = arith.constant 0 : i32
    return %c0_i32, %c0_i32_0 : i32, i32
  }
  func.func @transform_5(%arg0: i32) -> (i32, i32, i32) {
    %c0_i32 = arith.constant 0 : i32
    %c0_i32_0 = arith.constant 0 : i32
    %c0_i32_1 = arith.constant 0 : i32
    %c0_i32_2 = arith.constant 0 : i32
    return %c0_i32, %c0_i32_0, %c0_i32_1 : i32, i32, i32
  }
  func.func @transform_6(%arg0: i32) -> (i32, i32) {
    %c0_i32 = arith.constant 0 : i32
    %c0_i32_0 = arith.constant 0 : i32
    %c0_i32_1 = arith.constant 0 : i32
    return %c0_i32, %c0_i32_0 : i32, i32
  }
  func.func @transform_7(%arg0: i32) -> (i32, i32, i32) {
    %c0_i32 = arith.constant 0 : i32
    %c0_i32_0 = arith.constant 0 : i32
    %c0_i32_1 = arith.constant 0 : i32
    %c0_i32_2 = arith.constant 0 : i32
    return %c0_i32, %c0_i32_0, %c0_i32_1 : i32, i32, i32
  }
  func.func @transform_8(%arg0: i32) -> (i32, i32) {
    %c0_i32 = arith.constant 0 : i32
    %c0_i32_0 = arith.constant 0 : i32
    %c0_i32_1 = arith.constant 0 : i32
    return %c0_i32, %c0_i32_0 : i32, i32
  }
  func.func @transform_9(%arg0: i32) -> (i32, i32) {
    %c0_i32 = arith.constant 0 : i32
    %c0_i32_0 = arith.constant 0 : i32
    %c0_i32_1 = arith.constant 0 : i32
    return %c0_i32, %c0_i32_0 : i32, i32
  }
  func.func @transform_10(%arg0: i32) -> (i32, i32) {
    %c0_i32 = arith.constant 0 : i32
    %c0_i32_0 = arith.constant 0 : i32
    %c0_i32_1 = arith.constant 0 : i32
    return %c0_i32, %c0_i32_0 : i32, i32
  }
  func.func @transform_11(%arg0: i32) -> (i32, i32) {
    %c0_i32 = arith.constant 0 : i32
    %c0_i32_0 = arith.constant 0 : i32
    return %arg0, %c0_i32 : i32, i32
  }
}

</mosaic_0001>

<bundles_post_ra>
// kernel: tpu_custom_call.1
= control target key start
LH: loop header
LB: loop body
LE: loop exit
PB: predicated region body
PF: predicated region fallthrough
CT: control target
= control target key end

     0   :  { %v92_v1 = vlaneseq  ;;  %v12804_v7 = vmov 1966171168   ;;  %vm3041_vm0 = vcmask 1043456   ;;  %vm3010_vm1 = vcmask 326656   ;;  %s17611_s0 = inlined_call_operand.vmem [shape: f32[8,22,40], index: 0, kind: input, shape index: {}]   ;;  %s17612_s1 = inlined_call_operand.vmem [shape: bf16[4,40,16], index: 1, kind: input, shape index: {}]   ;;  %s17613_s2 = inlined_call_operand.vmem [shape: f32[1,16], index: 2, kind: input, shape index: {}]   ;;  %s17614_s3 = inlined_call_operand.vmem [shape: bf16[4,16,16], index: 3, kind: input, shape index: {}]   ;;  %s17615_s4 = inlined_call_operand.vmem [shape: f32[1,16], index: 4, kind: input, shape index: {}]   ;;  %s17616_s5 = inlined_call_operand.vmem [shape: bf16[3,16,32], index: 5, kind: input, shape index: {}]   ;;  %s17617_s6 = inlined_call_operand.vmem [shape: f32[1,32], index: 6, kind: input, shape index: {}]   ;;  %s17618_s7 = inlined_call_operand.vmem [shape: bf16[3,32,32], index: 7, kind: input, shape index: {}]   ;;  %s17619_s8 = inlined_call_operand.vmem [shape: f32[1,32], index: 8, kind: input, shape index: {}]   ;;  %s17620_s9 = inlined_call_operand.vmem [shape: bf16[32,128], index: 9, kind: input, shape index: {}]   ;;  %s17621_s10 = inlined_call_operand.vmem [shape: f32[1,128], index: 10, kind: input, shape index: {}]   ;;  %s17622_s11 = inlined_call_operand.hbm [shape: f32[8,128], index: 11, kind: output, shape index: {}]  }
   0x1   :  { %v12713_v0 = vld [vmem:[%s17612_s1 + $0x14] sm:$0xff]   ;;  %v12714_v2 = vld [vmem:[%s17612_s1 + $0x1c] sm:$0xff]   ;;  %v12715_v3 = vld [vmem:[%s17612_s1 + $0x24] ss:$0 sps:$4 sm:$0xff]   ;;  %v90_v8 = vunpack.c.l.s4 %v12804_v7 }
   0x2   :  { %12314 = vmatprep.subr.bf16.mxu0 %v12713_v0  ;;  %v40_v4 = vld [vmem:[%s17611_s0] sm:$0xff]  ;;  %v41_v5 = vld [vmem:[%s17611_s0 + $0x8] sm:$0xff]  ;;  %v43_v6 = vld [vmem:[%s17611_s0 + $0x18] sm:$0xff]  ;;  %v12887_v9 = vshrl.u32 %v92_v1, 7  ;;  %v3043_v19 = vsel %vm3041_vm0, %v12715_v3, 0 }
   0x3   :  { %12315 = vmatpush3.bf16.msra.mxu0 %v12713_v0  ;;  %v12892_v10 = vld [vmem:[%s17611_s0 + $0x20] sm:$0xff]  ;;  %v88_v11 = vcombine.high %v40_v4, %v40_v4  ;;  %v91_v12 = vunpack.c.0.s8 %v90_v8  ;;  %v137_v13 = vcombine.high %v41_v5, %v41_v5  ;;  %v12897_v14 = vld [vmem:[%s17611_s0 + $0x30] sm:$0xff]  ;;  %v12902_v15 = vld [vmem:[%s17611_s0 + $0x38] sm:$0xff]  ;;  %v209_v18 = vcombine.high %v43_v6, %v43_v6 }
   0x4   :  { %12316 = vmatprep.subr.bf16.mxu0 %v12714_v2  ;;  %17968 = vst [vmem:[#allocation5_spill] sm:$0xff] %v12887_v9  ;;  %v12907_v16 = vld [vmem:[%s17611_s0 + $0x48] sm:$0xff]  ;;  %v12912_v17 = vld [vmem:[%s17611_s0 + $0x10] sm:$0x3f]  ;;  %v12924_v22 = vld [vmem:[%s17612_s1] sm:$0xff]   ;;  %v258_v24 = vcombine.high %v12892_v10, %v12892_v10  ;;  %v330_v25 = vcombine.high %v12897_v14, %v12897_v14 }
   0x5   :  { %v12917_v20 = vsub.s32 %v91_v12, %v12887_v9  ;;  %v3317_v21 = vcombine.high %v12912_v17, %v12912_v17  ;;  %v12929_v23 = vld [vmem:[%s17611_s0 + $0x50] sm:$0xff] }
   0x7   :  { %12317 = vmatpush3.bf16.msra.mxu0 %v12714_v2  ;;  %v95_v28 = vrot.slane %v40_v4, %v12917_v20  ;;  %v102_v29 = vrot.slane %v88_v11, %v12917_v20  ;;  %v144_v30 = vrot.slane %v41_v5, %v12917_v20  ;;  %v151_v31 = vrot.slane %v137_v13, %v12917_v20 }
   0x8   :  { %12704 = vmatprep.subr.msk.bf16.mxu0 %vm3041_vm0, %v12715_v3  ;;  %v192_v32 = vrot.slane %v12912_v17, %v12917_v20  ;;  %v12946_v33 = vrot.slane %v43_v6, %v12917_v20  ;;  %v12949_v34 = vrot.slane %v209_v18, %v12917_v20  ;;  %v13037_v18 = vld [vmem:[%s17611_s0 + $0x60] sm:$0xff] }
   0x9   :  { %v103_v36 = vcombine.high %v95_v28, %v95_v28  ;;  %v104_v37 = vcombine.high %v102_v29, %v102_v29  ;;  %v12954_v38 = vrot.slane %v95_v28, %v12917_v20  ;;  %v12957_v39 = vrot.slane %v102_v29, %v12917_v20 }
   0xa   :  { %v152_v40 = vcombine.high %v144_v30, %v144_v30  ;;  %v153_v41 = vcombine.high %v151_v31, %v151_v31  ;;  %v12961_v42 = vrot.slane %v144_v30, %v12917_v20  ;;  %v12964_v43 = vrot.slane %v151_v31, %v12917_v20 }
   0xb   :  { %12319 = vmatpush3.bf16.msra.mxu0 %v3043_v19  ;;  %v12967_v44 = vrot.slane %v103_v36, %v12917_v20  ;;  %v12970_v45 = vrot.slane %v104_v37, %v12917_v20  ;;  %v133_v46 = vcombine.high %v12954_v38, %v12954_v38  ;;  %v134_v47 = vcombine.high %v12957_v39, %v12957_v39 }
   0xc   :  { %12340 = vmatprep.subr.bf16.mxu0 %v12924_v22  ;;  %v12977_v48 = vrot.slane %v152_v40, %v12917_v20  ;;  %v12980_v49 = vrot.slane %v153_v41, %v12917_v20  ;;  %v182_v50 = vcombine.high %v12961_v42, %v12961_v42  ;;  %v183_v51 = vcombine.high %v12964_v43, %v12964_v43 }
   0xd   :  { %v135_v52 = vcombine.high %v12967_v44, %v12967_v44  ;;  %v136_v53 = vcombine.high %v12970_v45, %v12970_v45  ;;  %v193_v54 = vcombine.high %v192_v32, %v192_v32  ;;  %v12991_v55 = vrot.slane %v192_v32, %v12917_v20 }
   0xe   :  { %v184_v56 = vcombine.high %v12977_v48, %v12977_v48  ;;  %v185_v57 = vcombine.high %v12980_v49, %v12980_v49  ;;  %v12999_v58 = vrot.slane %v12946_v33, %v12917_v20  ;;  %v2029_v59 = vcombine.low %v12967_v44, %v133_v46 }
   0xf   :  { %v13003_v60 = vrot.slane %v193_v54, %v12917_v20  ;;  %v13007_v61 = vcombine.high %v12991_v55, %v12991_v55  ;;  %v2030_v62 = vcombine.low %v135_v52, %v12957_v39  ;;  %v2031_v63 = vcombine.low %v12970_v45, %v134_v47 }
  0x10   :  { %v2032_v0 = vcombine.low %v136_v53, %v12961_v42  ;;  %v2039_v1 = vrot.slane %v2029_v59, %v12917_v20  ;;  %v2078_v2 = vcombine.low %v12977_v48, %v182_v50  ;;  %v2079_v3 = vcombine.low %v184_v56, %v12964_v43 }
  0x11   :  { %v1155_v4 = vcombine.low %v13007_v61, %v12999_v58  ;;  %v13018_v5 = vrot.slane %v2030_v62, %v12917_v20  ;;  %v13021_v6 = vrot.slane %v2031_v63, %v12917_v20  ;;  %v2080_v7 = vcombine.low %v12980_v49, %v183_v51 }
  0x12   :  { %v13025_v8 = vrot.slane %v2032_v0, %v12917_v20  ;;  %v2081_v11 = vcombine.low %v185_v57, %v12991_v55  ;;  %v13029_v12 = vrot.slane %v2078_v2, %v12917_v20  ;;  %v13032_v13 = vrot.slane %v2079_v3, %v12917_v20 }
  0x13   :  { %17969 = vst [vmem:[#allocation6_spill] sm:$0xff] %v13018_v5  ;;  %17970 = vst [vmem:[#allocation7_spill] sm:$0xff] %v13021_v6  ;;  %v2061_v19 = vcombine.low %v2039_v1, %v13018_v5  ;;  %v13041_v28 = vrot.slane %v2080_v7, %v12917_v20  ;;  %v2127_v29 = vcombine.low %v13003_v60, %v13007_v61 }
  0x14   :  { %17971 = vst [vmem:[#allocation8_spill] sm:$0xff] %v13025_v8  ;;  %17972 = vst [vmem:[#allocation9_spill] sm:$0xff] %v13029_v12  ;;  %v265_v30 = vrot.slane %v12892_v10, %v12917_v20  ;;  %v2062_v31 = vcombine.low %v13021_v6, %v13025_v8  ;;  %v13050_v32 = vrot.slane %v2081_v11, %v12917_v20 }
  0x15   :  { %17973 = vst [vmem:[#allocation10_spill] sm:$0xff] %v13032_v13  ;;  %17974 = vst [vmem:[#allocation11_spill] sm:$0xff] %v13041_v28  ;;  %v2110_v36 = vcombine.low %v13029_v12, %v13032_v13  ;;  %v2069_v40 = vrot.slane %v2061_v19, %v12917_v20  ;;  %v13058_v41 = vrot.slane %v2127_v29, %v12917_v20 }
  0x16   :  { %17975 = vst [vmem:[#allocation12_spill] sm:$0xff] %v13050_v32  ;;  %v2076_v50 = vrot.slane %v2062_v31, %v12917_v20  ;;  %v2111_v51 = vcombine.low %v13041_v28, %v13050_v32  ;;  %v224_v53 = vcombine.high %v12946_v33, %v12946_v33  ;;  %v225_v56 = vcombine.high %v12949_v34, %v12949_v34 }
  0x17   :  { %17976 = vst [vmem:[#allocation13_spill] sm:$0xff] %v13058_v41  ;;  %v2118_v52 = vrot.slane %v2110_v36, %v12917_v20  ;;  %v13076_v57 = vrot.slane %v12949_v34, %v12917_v20  ;;  %v272_v33 = vrot.slane %v258_v24, %v12917_v20 }
  0x18   :  { %v2077_v61 = vcombine.low %v2069_v40, %v2076_v50  ;;  %v2125_v62 = vrot.slane %v2111_v51, %v12917_v20  ;;  %v13082_v63 = vrot.slane %v224_v53, %v12917_v20 }
  0x19   :  { %16 = vsyncpa [#allocation3], 0  ;;  %v13089_v0 = vrot.slane %v225_v56, %v12917_v20  ;;  %v273_v34 = vcombine.high %v265_v30, %v265_v30  ;;  %v13092_v1 = vrot.slane %v265_v30, %v12917_v20  ;;  %v2021_v2 = vcombine.high %v13003_v60, %v13003_v60  ;;  %s12808_s13 = smov [#allocation2]  }
  0x1a   :  { %v2126_v3 = vcombine.low %v2118_v52, %v2125_v62  ;;  %v274_v7 = vcombine.high %v272_v33, %v272_v33  ;;  %v13097_v11 = vrot.slane %v272_v33, %v12917_v20  ;;  %v11934_v10 = vcombine.high %v12999_v58, %v13082_v63  ;;  %s11910_s14 = sshll.u32 %s12808_s13, 4  ;;  %s11911_s14 = int_to_ptr.vmem [resolvable:$true] %s11910_s14 }
  0x1b   :  { %v13102_v24 = vrot.slane %v273_v34, %v12917_v20  ;;  %v2128_v19 = vcombine.low %v2021_v2, %v13082_v63  ;;  %v2130_v29 = vcombine.low %v13076_v57, %v13089_v0  ;;  %v11935_v30 = vcombine.high %v13076_v57, %v13089_v0  ;;  %p12785_p1 = scmp.lt.s32.totalorder %s11911_s14, %s11911_s14 }
  0x1c   :  { %v2979_v31 = vpack.c.bf16 %v2126_v3, %v2077_v61  ;;  %v13110_v36 = vrot.slane %v274_v7, %v12917_v20  ;;  %v2151_v40 = vrot.slane %v11934_v10, %v12917_v20  ;;  %v13117_v50 = vrot.slane %v3317_v21, %v12917_v20  ;;  %v12774_v7 = vld.sshfl [vmem:[%s17611_s0 + $0x28] sm:$0x77 pattern:$0x75316420] }
  0x1d   :  { %v2144_v51 = vrot.slane %v2128_v19, %v12917_v20  ;;  %v13121_v52 = vrot.slane %v2130_v29, %v12917_v20  ;;  %v2177_v53 = vcombine.low %v13092_v1, %v13102_v24  ;;  %v11936_v56 = vcombine.high %v13092_v1, %v13102_v24 }
  0x1e   :  { %17977 = vst [vmem:[#allocation14_spill] sm:$0xff] %v13117_v50  ;;  %v13128_v61 = vrot.slane %v1155_v4, %v12917_v20  ;;  %12320 = vmatprep.mubr.msk.bf16.mxu0 %vm3010_vm1, %v2979_v31  ;;  %v2179_v17 = vcombine.low %v13097_v11, %v13110_v36  ;;  %v13134_v21 = vrot.slane %v11935_v30, %v12917_v20  ;;  %vm7999_vm2 = vcmask 130048  }
  0x1f   :  { %v13138_v62 = vrot.slane %v13117_v50, %v12917_v20  ;;  %v2159_v33 = vcombine.low %v13058_v41, %v2144_v51  ;;  %v2160_v34 = vcombine.low %v2151_v40, %v13121_v52  ;;  %v13143_v3 = vrot.slane %v2177_v53, %v12917_v20 }
  0x20   :  { %v13146_v4 = vrot.slane %v11936_v56, %v12917_v20  ;;  %v13153_v10 = vcombine.high %v12999_v58, %v12999_v58  ;;  %v13156_v19 = vrot.slane %v2179_v17, %v12917_v20  ;;  %v4185_v30 = vcombine.low %v13121_v52, %v13134_v21 }
  0x21   :  { %17978 = vst [vmem:[#allocation15_spill] sm:$0xff] %v13138_v62  ;;  %17979 = vst [vmem:[#allocation16_spill] sm:$0xff] %v13143_v3  ;;  %v4168_v29 = vcombine.low %v2021_v2, %v13138_v62  ;;  %v2167_v31 = vrot.slane %v2159_v33, %v12917_v20  ;;  %v2174_v40 = vrot.slane %v2160_v34, %v12917_v20  ;;  %vm12807_vm4 = vmmov 0  }
  0x22   :  { %17980 = vst [vmem:[#allocation17_spill] sm:$0xff] %v13146_v4  ;;  %17981 = vst [vmem:[#allocation18_spill] sm:$0xff] %v13156_v19  ;;  %v2208_v51 = vcombine.low %v13134_v21, %v13143_v3  ;;  %v2209_v58 = vcombine.low %v13146_v4, %v13156_v19  ;;  %v337_v21 = vrot.slane %v12897_v14, %v12917_v20  ;;  %vm10113_vm7 = vcmask 1041409  }
  0x23   :  { %v2175_v52 = vcombine.low %v2167_v31, %v2174_v40  ;;  %v13175_v33 = vrot.slane %v4168_v29, %v12917_v20  ;;  %v314_v54 = vcombine.high %v12774_v7, %v12774_v7  ;;  %v13181_v47 = vrot.slane %v12774_v7, %v12917_v20 }
  0x24   :  { %v2216_v17 = vrot.slane %v2208_v51, %v12917_v20  ;;  %v2223_v34 = vrot.slane %v2209_v58, %v12917_v20  ;;  %v344_v2 = vrot.slane %v330_v25, %v12917_v20  ;;  %v345_v31 = vcombine.high %v337_v21, %v337_v21 }
  0x25   :  { %17982 = vst [vmem:[#allocation19_spill] sm:$0xff] %v13175_v33  ;;  %v13188_v40 = vrot.slane %v337_v21, %v12917_v20  ;;  %v386_v29 = vrot.slane %v12902_v15, %v12917_v20  ;;  %v11937_v51 = vcombine.high %v13097_v11, %v13110_v36  ;;  %v13195_v46 = vrot.slane %v314_v54, %v12917_v20 }
  0x26   :  { %v2224_v58 = vcombine.low %v2216_v17, %v2223_v34  ;;  %v346_v7 = vcombine.high %v344_v2, %v344_v2  ;;  %v13198_v37 = vrot.slane %v344_v2, %v12917_v20  ;;  %v13201_v14 = vrot.slane %v345_v31, %v12917_v20  ;;  %v12725_v34 = vld [vmem:[%s17612_s1 + $0x8] sm:$0xff]  }
  0x27   :  { %v375_v25 = vcombine.high %v13188_v40, %v13188_v40  ;;  %v394_v21 = vcombine.high %v386_v29, %v386_v29  ;;  %v13206_v53 = vrot.slane %v386_v29, %v12917_v20  ;;  %v2226_v2 = vcombine.low %v13181_v47, %v13195_v46 }
  0x28   :  { %v2980_v56 = vpack.c.bf16 %v2224_v58, %v2175_v52  ;;  %v13209_v17 = vrot.slane %v346_v7, %v12917_v20  ;;  %v376_v54 = vcombine.high %v13198_v37, %v13198_v37  ;;  %v377_v31 = vcombine.high %v13201_v14, %v13201_v14 }
  0x29   :  { %v13221_v29 = vrot.slane %v394_v21, %v12917_v20  ;;  %v424_v52 = vcombine.high %v13206_v53, %v13206_v53  ;;  %v11938_v58 = vcombine.high %v13181_v47, %v13195_v46  ;;  %v2228_v59 = vcombine.low %v13201_v14, %v375_v25 }
  0x2a   :  { %12321 = vmatmul.mubr.msk.bf16.vlgmr.msra.gmra.mrb[0].mxu0 %vm3010_vm1, %v2980_v56  ;;  %v378_v7 = vcombine.high %v13209_v17, %v13209_v17  ;;  %v13232_v35 = vrot.slane %v11937_v51, %v12917_v20  ;;  %v13235_v27 = vrot.slane %v2226_v2, %v12917_v20  ;;  %v2274_v26 = vcombine.low %v377_v31, %v13198_v37 }
  0x2b   :  { %12341 = vmatpush3.bf16.msra.mxu0 %v12924_v22  ;;  %v13239_v21 = vrot.slane %v11938_v58, %v12917_v20  ;;  %v2275_v56 = vcombine.low %v13209_v17, %v376_v54  ;;  %v2277_v9 = vcombine.low %v13221_v29, %v424_v52  ;;  %v2256_v33 = vrot.slane %v2228_v59, %v12917_v20  ;;  %v13253_v22 = vld [vmem:[%s17612_s1 + $0x10] ss:$0 sps:$4 sm:$0xff]   ;;  %v12775_v52 = vld.sshfl [vmem:[%s17611_s0 + $0x40] sm:$0x77 pattern:$0x75316420] }
  0x2c   :  { %17983 = vst [vmem:[#allocation20_spill] sm:$0xff] %v13232_v35  ;;  %17984 = vst [vmem:[#allocation21_spill] sm:$0xff] %v13235_v27  ;;  %v2257_v51 = vcombine.low %v13232_v35, %v13235_v27  ;;  %v2276_v25 = vcombine.low %v378_v7, %v13206_v53  ;;  %12342 = vmatprep.subr.bf16.mxu0 %v12725_v34  ;;  %v13256_v54 = vrot.slane %v2274_v26, %v12917_v20  ;;  %vm10116_vm8 = vcmask 1042434  }
  0x2d   :  { %17985 = vst [vmem:[#allocation22_spill] sm:$0xff] %v13239_v21  ;;  %v13259_v31 = vrot.slane %v2275_v56, %v12917_v20  ;;  %v13262_v59 = vrot.slane %v2277_v9, %v12917_v20  ;;  %v17989_v58 = vcombine.high %v12902_v15, %v12902_v15  ;;  %v13272_v2 = vrot.slane %v4185_v30, %v12917_v20 }
  0x2e   :  { %17986 = vst [vmem:[#allocation23_spill] sm:$0xff] %v13256_v54  ;;  %v2258_v26 = vcombine.low %v13239_v21, %v2256_v33  ;;  %v2265_v56 = vrot.slane %v2257_v51, %v12917_v20  ;;  %v13277_v27 = vrot.slane %v2276_v25, %v12917_v20  ;;  %v426_v15 = vcombine.high %v13221_v29, %v13221_v29 }
  0x2f   :  { %17987 = vst [vmem:[#allocation24_spill] sm:$0xff] %v13259_v31  ;;  %17988 = vst [vmem:[#allocation25_spill] sm:$0xff] %v13262_v59  ;;  %v393_v7 = vrot.slane %v17989_v58, %v12917_v20  ;;  %v2306_v9 = vcombine.low %v13256_v54, %v13259_v31  ;;  %12343 = vmatpush3.bf16.msra.mxu0 %v12725_v34  ;;  %v458_v51 = vrot.slane %v12907_v16, %v12917_v20  ;;  %vm10119_vm9 = vcmask 1043459  }
  0x30   :  { %17990 = vst [vmem:[#allocation26_spill] sm:$0xff] %v13272_v2  ;;  %17991 = vst [vmem:[#allocation27_spill] sm:$0xff] %v13277_v27  ;;  %v2272_v30 = vrot.slane %v2258_v26, %v12917_v20  ;;  %v2307_v33 = vcombine.low %v13277_v27, %v13262_v59  ;;  %12705 = vmatprep.subr.msk.bf16.mxu0 %vm3041_vm0, %v13253_v22  ;;  %v17992_v34 = vcombine.high %v12907_v16, %v12907_v16  ;;  %vm10122_vm11 = vcmask 1044484  }
  0x31   :  { %v395_v50 = vcombine.high %v393_v7, %v393_v7  ;;  %v13282_v41 = vrot.slane %v393_v7, %v12917_v20  ;;  %v2314_v25 = vrot.slane %v2306_v9, %v12917_v20  ;;  %v435_v21 = vcombine.high %v12775_v52, %v12775_v52 }
  0x32   :  { %v465_v26 = vrot.slane %v17992_v34, %v12917_v20  ;;  %v2273_v2 = vcombine.low %v2265_v56, %v2272_v30  ;;  %v2321_v54 = vrot.slane %v2307_v33, %v12917_v20  ;;  %v13305_v59 = vrot.slane %v12775_v52, %v12917_v20 }
  0x33   :  { %v13295_v58 = vrot.slane %v395_v50, %v12917_v20  ;;  %v425_v7 = vcombine.high %v13282_v41, %v13282_v41  ;;  %v466_v50 = vcombine.high %v458_v51, %v458_v51  ;;  %v13310_v27 = vrot.slane %v458_v51, %v12917_v20 }
  0x34   :  { %17993 = vst [vmem:[#allocation28_spill] sm:$0xff] %v13305_v59  ;;  %v467_v31 = vcombine.high %v465_v26, %v465_v26  ;;  %v2322_v32 = vcombine.low %v2314_v25, %v2321_v54  ;;  %v13313_v28 = vrot.slane %v435_v21, %v12917_v20  ;;  %v13317_v16 = vcombine.high %v13305_v59, %v13305_v59 }
  0x35   :  { %v427_v9 = vcombine.high %v13295_v58, %v13295_v58  ;;  %v13320_v56 = vrot.slane %v465_v26, %v12917_v20  ;;  %v13323_v52 = vrot.slane %v466_v50, %v12917_v20  ;;  %v2323_v33 = vcombine.low %v426_v15, %v13282_v41 }
  0x36   :  { %17994 = vst [vmem:[#allocation29_spill] sm:$0xff] %v13317_v16  ;;  %v13326_v30 = vrot.slane %v467_v31, %v12917_v20  ;;  %v2324_v54 = vcombine.low %v13295_v58, %v425_v7  ;;  %v2981_v51 = vpack.c.bf16 %v2322_v32, %v2273_v2  ;;  %v13332_v21 = vcombine.high %v13313_v28, %v13313_v28 }
  0x37   :  { %v2325_v25 = vcombine.low %v427_v9, %v13305_v59  ;;  %v2326_v34 = vcombine.low %v13313_v28, %v13317_v16  ;;  %v13338_v26 = vrot.slane %v2323_v33, %v12917_v20  ;;  %v11939_v15 = vcombine.high %v13310_v27, %v13323_v52  ;;  %v12776_v33 = vld.sshfl [vmem:[%s17611_s0 + $0x58] sm:$0x77 pattern:$0x75316420] }
  0x38   :  { %17995 = vst [vmem:[#allocation30_spill] sm:$0xff] %v13326_v30  ;;  %17996 = vst [vmem:[#allocation31_spill] sm:$0xff] %v13332_v21  ;;  %v13341_v31 = vrot.slane %v2324_v54, %v12917_v20  ;;  %v2374_v32 = vcombine.low %v13320_v56, %v13326_v30  ;;  %12324 = vmatprep.mubr.msk.bf16.mxu0 %vm3010_vm1, %v2981_v51  ;;  %v2372_v9 = vcombine.low %v13332_v21, %v13323_v52  ;;  %vm10125_vm12 = vcmask 1045509  }
  0x39   :  { %17997 = vst [vmem:[#allocation32_spill] sm:$0xff] %v13338_v26  ;;  %v13349_v2 = vrot.slane %v2325_v25, %v12917_v20  ;;  %v13352_v7 = vrot.slane %v2326_v34, %v12917_v20  ;;  %v11940_v50 = vcombine.high %v13320_v56, %v13326_v30  ;;  %v2389_v51 = vrot.slane %v11939_v15, %v12917_v20 }
  0x3a   :  { %17998 = vst [vmem:[#allocation33_spill] sm:$0xff] %v13341_v31  ;;  %v2355_v54 = vcombine.low %v13338_v26, %v13341_v31  ;;  %v13365_v25 = vrot.slane %v2374_v32, %v12917_v20  ;;  %v507_v34 = vrot.slane %v12929_v23, %v12917_v20  ;;  %v2382_v13 = vrot.slane %v2372_v9, %v12917_v20 }
  0x3b   :  { %17999 = vst [vmem:[#allocation34_spill] sm:$0xff] %v13349_v2  ;;  %18000 = vst [vmem:[#allocation35_spill] sm:$0xff] %v13352_v7  ;;  %v2356_v21 = vcombine.low %v13349_v2, %v13352_v7  ;;  %v13373_v12 = vrot.slane %v11940_v50, %v12917_v20  ;;  %v18003_v31 = vcombine.high %v12929_v23, %v12929_v23 }
  0x3c   :  { %18001 = vst [vmem:[#allocation36_spill] sm:$0xff] %v13365_v25  ;;  %v2363_v15 = vrot.slane %v2355_v54, %v12917_v20  ;;  %v515_v32 = vcombine.high %v507_v34, %v507_v34  ;;  %v13381_v8 = vrot.slane %v507_v34, %v12917_v20  ;;  %v2404_v5 = vcombine.low %v2382_v13, %v2389_v51 }
  0x3d   :  { %18002 = vst [vmem:[#allocation37_spill] sm:$0xff] %v13373_v12  ;;  %v514_v26 = vrot.slane %v18003_v31, %v12917_v20  ;;  %v2370_v6 = vrot.slane %v2356_v21, %v12917_v20  ;;  %v2405_v9 = vcombine.low %v13365_v25, %v13373_v12  ;;  %v556_v23 = vcombine.high %v12776_v33, %v12776_v33 }
  0x3e   :  { %18004 = vst [vmem:[#allocation38_spill] sm:$0xff] %v13381_v8  ;;  %v13390_v2 = vrot.slane %v515_v32, %v12917_v20  ;;  %v13393_v31 = vrot.slane %v12776_v33, %v12917_v20  ;;  %v2412_v34 = vrot.slane %v2404_v5, %v12917_v20  ;;  %v18010_v32 = vcombine.high %v13037_v18, %v13037_v18 }
  0x3f   :  { %v516_v7 = vcombine.high %v514_v26, %v514_v26  ;;  %v13387_v50 = vrot.slane %v514_v26, %v12917_v20  ;;  %v2371_v54 = vcombine.low %v2363_v15, %v2370_v6  ;;  %v2419_v21 = vrot.slane %v2405_v9, %v12917_v20 }
  0x40   :  { %18006 = vst [vmem:[#allocation40_spill] sm:$0xff] %v13390_v2  ;;  %18007 = vst [vmem:[#allocation41_spill] sm:$0xff] %v13393_v31  ;;  %v13401_v51 = vrot.slane %v556_v23, %v12917_v20  ;;  %v579_v26 = vrot.slane %v13037_v18, %v12917_v20  ;;  %v586_v33 = vrot.slane %v18010_v32, %v12917_v20 }
  0x41   :  { %18005 = vst [vmem:[#allocation39_spill] sm:$0xff] %v13387_v50  ;;  %v13398_v13 = vrot.slane %v516_v7, %v12917_v20  ;;  %v2421_v6 = vcombine.low %v13381_v8, %v13390_v2  ;;  %v2420_v5 = vcombine.low %v2412_v34, %v2419_v21  ;;  %v11941_v15 = vcombine.high %v13381_v8, %v13390_v2 }
  0x42   :  { %18009 = vst [vmem:[#allocation43_spill] sm:$0xff] %v13401_v51  ;;  %v587_v23 = vcombine.high %v579_v26, %v579_v26  ;;  %v13418_v12 = vrot.slane %v579_v26, %v12917_v20  ;;  %v13421_v18 = vrot.slane %v586_v33, %v12917_v20 }
  0x43   :  { %18008 = vst [vmem:[#allocation42_spill] sm:$0xff] %v13398_v13  ;;  %v2423_v7 = vcombine.low %v13387_v50, %v13398_v13  ;;  %v11942_v9 = vcombine.high %v13387_v50, %v13398_v13  ;;  %v13424_v32 = vrot.slane %v2421_v6, %v12917_v20  ;;  %v2982_v34 = vpack.c.bf16 %v2420_v5, %v2371_v54  ;;  %v53_v5 = vld [vmem:[%s17611_s0 + $0x68] sm:$0xff] }
  0x44   :  { %18011 = vst [vmem:[#allocation44_spill] sm:$0xff] %v13418_v12  ;;  %18012 = vst [vmem:[#allocation45_spill] sm:$0xff] %v13421_v18  ;;  %v13427_v21 = vrot.slane %v11941_v15, %v12917_v20  ;;  %v13436_v19 = vrot.slane %v587_v23, %v12917_v20  ;;  %v617_v26 = vcombine.high %v13418_v12, %v13418_v12 }
  0x45   :  { %18013 = vst [vmem:[#allocation46_spill] sm:$0xff] %v13424_v32  ;;  %v13430_v25 = vrot.slane %v2423_v7, %v12917_v20  ;;  %v13433_v35 = vrot.slane %v11942_v9, %v12917_v20  ;;  %v2470_v6 = vcombine.low %v13393_v31, %v13401_v51  ;;  %v11943_v54 = vcombine.high %v13393_v31, %v13401_v51 }
  0x46   :  { %18014 = vst [vmem:[#allocation47_spill] sm:$0xff] %v13427_v21  ;;  %18017 = vst [vmem:[#allocation50_spill] sm:$0xff] %v13436_v19  ;;  %12325 = vmatmul.mubr.msk.bf16.gmra.mrb[4].mxu0 %vm3010_vm1, %v2982_v34  ;;  %v2453_v15 = vcombine.low %v13424_v32, %v13427_v21  ;;  %v588_v9 = vcombine.high %v586_v33, %v586_v33  ;;  %v618_v23 = vcombine.high %v13421_v18, %v13421_v18  ;;  %v12777_v21 = vld.sshfl [vmem:[%s17611_s0 + $0x70] sm:$0x77 pattern:$0x75316420] }
  0x47   :  { %18015 = vst [vmem:[#allocation48_spill] sm:$0xff] %v13430_v25  ;;  %18016 = vst [vmem:[#allocation49_spill] sm:$0xff] %v13433_v35  ;;  %v2454_v7 = vcombine.low %v13430_v25, %v13433_v35  ;;  %v619_v4 = vcombine.high %v13436_v19, %v13436_v19  ;;  %v2472_v3 = vcombine.low %v13436_v19, %v617_v26 }
  0x48   :  { %v13458_v62 = vrot.slane %v2470_v6, %v12917_v20  ;;  %v13461_v34 = vrot.slane %v11943_v54, %v12917_v20  ;;  %v2461_v33 = vrot.slane %v2453_v15, %v12917_v20  ;;  %v13469_v25 = vrot.slane %v588_v9, %v12917_v20  ;;  %v55_v15 = vld [vmem:[%s17611_s0 + $0x78] sm:$0xff] }
  0x49   :  { %v2468_v35 = vrot.slane %v2454_v7, %v12917_v20  ;;  %v621_v32 = vcombine.high %v53_v5, %v53_v5  ;;  %v2473_v26 = vcombine.low %v619_v4, %v13421_v18  ;;  %v2494_v6 = vrot.slane %v2472_v3, %v12917_v20 }
  0x4a   :  { %18018 = vst [vmem:[#allocation51_spill] sm:$0xff] %v13458_v62  ;;  %18019 = vst [vmem:[#allocation52_spill] sm:$0xff] %v13461_v34  ;;  %v2502_v54 = vcombine.low %v13458_v62, %v13461_v34  ;;  %v628_v12 = vrot.slane %v53_v5, %v12917_v20  ;;  %v620_v7 = vcombine.high %v13469_v25, %v13469_v25 }
  0x4b   :  { %18020 = vst [vmem:[#allocation53_spill] sm:$0xff] %v13469_v25  ;;  %v2469_v19 = vcombine.low %v2461_v33, %v2468_v35  ;;  %v635_v9 = vrot.slane %v621_v32, %v12917_v20  ;;  %v13483_v51 = vrot.slane %v2473_v26, %v12917_v20  ;;  %v677_v33 = vcombine.high %v12777_v21, %v12777_v21 }
  0x4c   :  { %v2510_v3 = vrot.slane %v2502_v54, %v12917_v20  ;;  %v636_v4 = vcombine.high %v628_v12, %v628_v12  ;;  %v13487_v34 = vrot.slane %v628_v12, %v12917_v20  ;;  %v13493_v62 = vrot.slane %v12777_v21, %v12917_v20 }
  0x4d   :  { %18021 = vst [vmem:[#allocation54_spill] sm:$0xff] %v13483_v51  ;;  %v637_v5 = vcombine.high %v635_v9, %v635_v9  ;;  %v13490_v35 = vrot.slane %v635_v9, %v12917_v20  ;;  %v2503_v18 = vcombine.low %v2494_v6, %v13483_v51  ;;  %v700_v54 = vrot.slane %v55_v15, %v12917_v20 }
  0x4e   :  { %18022 = vst [vmem:[#allocation55_spill] sm:$0xff] %v13493_v62  ;;  %v13497_v32 = vrot.slane %v636_v4, %v12917_v20  ;;  %v666_v26 = vcombine.high %v13487_v34, %v13487_v34  ;;  %v13508_v31 = vrot.slane %v677_v33, %v12917_v20  ;;  %v13512_v21 = vcombine.high %v13493_v62, %v13493_v62 }
  0x4f   :  { %v13503_v12 = vrot.slane %v637_v5, %v12917_v20  ;;  %v667_v9 = vcombine.high %v13490_v35, %v13490_v35  ;;  %v2517_v6 = vrot.slane %v2503_v18, %v12917_v20  ;;  %v708_v51 = vcombine.high %v700_v54, %v700_v54 }
  0x50   :  { %18023 = vst [vmem:[#allocation56_spill] sm:$0xff] %v13508_v31  ;;  %18024 = vst [vmem:[#allocation57_spill] sm:$0xff] %v13512_v21  ;;  %v668_v4 = vcombine.high %v13497_v32, %v13497_v32  ;;  %v2519_v13 = vcombine.low %v13469_v25, %v618_v23  ;;  %v13522_v2 = vcombine.high %v13508_v31, %v13508_v31 }
  0x51   :  { %v669_v5 = vcombine.high %v13503_v12, %v13503_v12  ;;  %v2520_v33 = vcombine.low %v620_v7, %v13487_v34  ;;  %v2521_v50 = vcombine.low %v13497_v32, %v666_v26  ;;  %v2518_v8 = vcombine.low %v2510_v3, %v2517_v6  ;;  %v56_v6 = vld [vmem:[%s17611_s0 + $0x80] sm:$0xff] }
  0x52   :  { %18025 = vst [vmem:[#allocation58_spill] sm:$0xff] %v13522_v2  ;;  %v13527_v18 = vrot.slane %v708_v51, %v12917_v20  ;;  %v2522_v30 = vcombine.low %v668_v4, %v13490_v35  ;;  %v13531_v16 = vrot.slane %v2519_v13, %v12917_v20  ;;  %v2568_v59 = vcombine.low %v13503_v12, %v667_v9 }
  0x53   :  { %v13534_v23 = vrot.slane %v2520_v33, %v12917_v20  ;;  %v13537_v25 = vrot.slane %v2521_v50, %v12917_v20  ;;  %v2569_v7 = vcombine.low %v669_v5, %v13493_v62  ;;  %v2983_v26 = vpack.c.bf16 %v2518_v8, %v2469_v19  ;;  %v12778_v19 = vld.sshfl [vmem:[%s17611_s0 + $0x88] sm:$0x77 pattern:$0x75316420] }
  0x54   :  { %18026 = vst [vmem:[#allocation59_spill] sm:$0xff] %v13527_v18  ;;  %18027 = vst [vmem:[#allocation60_spill] sm:$0xff] %v13531_v16  ;;  %v13542_v3 = vrot.slane %v2522_v30, %v12917_v20  ;;  %v2570_v51 = vcombine.low %v13508_v31, %v13512_v21  ;;  %v2571_v13 = vcombine.low %v13522_v2, %v13527_v18 }
  0x55   :  { %18028 = vst [vmem:[#allocation61_spill] sm:$0xff] %v13534_v23  ;;  %18029 = vst [vmem:[#allocation62_spill] sm:$0xff] %v13537_v25  ;;  %v2551_v50 = vcombine.low %v13531_v16, %v13534_v23  ;;  %v13554_v9 = vrot.slane %v2568_v59, %v12917_v20  ;;  %v13557_v8 = vrot.slane %v2569_v7, %v12917_v20  ;;  %12328 = vmatprep.mubr.msk.bf16.mxu0 %vm3010_vm1, %v2983_v26 }
  0x56   :  { %18030 = vst [vmem:[#allocation63_spill] sm:$0xff] %v13542_v3  ;;  %v693_v30 = vcombine.high %v55_v15, %v55_v15  ;;  %v2552_v4 = vcombine.low %v13537_v25, %v13542_v3  ;;  %v13566_v5 = vrot.slane %v2570_v51, %v12917_v20  ;;  %v2599_v33 = vrot.slane %v2571_v13, %v12917_v20 }
  0x57   :  { %18031 = vst [vmem:[#allocation64_spill] sm:$0xff] %v13554_v9  ;;  %18032 = vst [vmem:[#allocation65_spill] sm:$0xff] %v13557_v8  ;;  %v13570_v59 = vrot.slane %v700_v54, %v12917_v20  ;;  %v2559_v7 = vrot.slane %v2551_v50, %v12917_v20  ;;  %v2600_v23 = vcombine.low %v13554_v9, %v13557_v8 }
  0x58   :  { %18033 = vst [vmem:[#allocation66_spill] sm:$0xff] %v13566_v5  ;;  %v707_v15 = vrot.slane %v693_v30, %v12917_v20  ;;  %v742_v2 = vcombine.high %v56_v6, %v56_v6  ;;  %v2566_v26 = vrot.slane %v2552_v4, %v12917_v20  ;;  %v2601_v3 = vcombine.low %v13566_v5, %v2599_v33 }
  0x59   :  { %18034 = vst [vmem:[#allocation67_spill] sm:$0xff] %v13570_v59  ;;  %v749_v51 = vrot.slane %v56_v6, %v12917_v20  ;;  %v2608_v25 = vrot.slane %v2600_v23, %v12917_v20  ;;  %v798_v23 = vcombine.high %v12778_v19, %v12778_v19 }
  0x5a   :  { %v709_v13 = vcombine.high %v707_v15, %v707_v15  ;;  %v13581_v54 = vrot.slane %v707_v15, %v12917_v20  ;;  %v756_v50 = vrot.slane %v742_v2, %v12917_v20  ;;  %v2567_v16 = vcombine.low %v2559_v7, %v2566_v26 }
  0x5b   :  { %v2615_v8 = vrot.slane %v2601_v3, %v12917_v20  ;;  %v757_v9 = vcombine.high %v749_v51, %v749_v51  ;;  %v13586_v30 = vrot.slane %v749_v51, %v12917_v20  ;;  %v13598_v2 = vrot.slane %v12778_v19, %v12917_v20 }
  0x5c   :  { %18035 = vst [vmem:[#allocation68_spill] sm:$0xff] %v13581_v54  ;;  %v13589_v4 = vrot.slane %v709_v13, %v12917_v20  ;;  %v758_v33 = vcombine.high %v756_v50, %v756_v50  ;;  %v13592_v6 = vrot.slane %v756_v50, %v12917_v20  ;;  %v11944_v3 = vcombine.high %v13570_v59, %v13527_v18 }
  0x5d   :  { %18036 = vst [vmem:[#allocation69_spill] sm:$0xff] %v13586_v30  ;;  %v2616_v5 = vcombine.low %v2608_v25, %v2615_v8  ;;  %v13595_v15 = vrot.slane %v757_v9, %v12917_v20  ;;  %v13606_v26 = vrot.slane %v798_v23, %v12917_v20  ;;  %v58_v9 = vld [vmem:[%s17611_s0 + $0x90] sm:$0xff] }
  0x5e   :  { %18037 = vst [vmem:[#allocation70_spill] sm:$0xff] %v13589_v4  ;;  %18038 = vst [vmem:[#allocation71_spill] sm:$0xff] %v13592_v6  ;;  %v13603_v7 = vrot.slane %v758_v33, %v12917_v20  ;;  %v2618_v51 = vcombine.low %v13581_v54, %v13589_v4  ;;  %v11945_v25 = vcombine.high %v13581_v54, %v13589_v4 }
  0x5f   :  { %18039 = vst [vmem:[#allocation72_spill] sm:$0xff] %v13595_v15  ;;  %18041 = vst [vmem:[#allocation74_spill] sm:$0xff] %v13606_v26  ;;  %v2984_v8 = vpack.c.bf16 %v2616_v5, %v2567_v16  ;;  %v2620_v19 = vcombine.low %v13586_v30, %v13595_v15  ;;  %v2627_v13 = vrot.slane %v11944_v3, %v12917_v20  ;;  %v59_v5 = vld [vmem:[%s17611_s0 + $0x98] sm:$0xff] }
  0x60   :  { %18040 = vst [vmem:[#allocation73_spill] sm:$0xff] %v13603_v7  ;;  %v11946_v50 = vcombine.high %v13586_v30, %v13595_v15  ;;  %v13621_v33 = vrot.slane %v2618_v51, %v12917_v20  ;;  %v13624_v23 = vrot.slane %v11945_v25, %v12917_v20  ;;  %v2667_v4 = vcombine.low %v13592_v6, %v13603_v7 }
  0x61   :  { %v11947_v16 = vcombine.high %v13592_v6, %v13603_v7  ;;  %12329 = vmatmul.mubr.msk.bf16.gmra.mrb[8].mxu0 %vm3010_vm1, %v2984_v8  ;;  %v13635_v3 = vrot.slane %v2620_v19, %v12917_v20  ;;  %v2669_v51 = vcombine.low %v13598_v2, %v13606_v26  ;;  %v814_v15 = vcombine.high %v58_v9, %v58_v9 }
  0x62   :  { %18042 = vst [vmem:[#allocation75_spill] sm:$0xff] %v13621_v33  ;;  %18043 = vst [vmem:[#allocation76_spill] sm:$0xff] %v13624_v23  ;;  %v13640_v25 = vrot.slane %v11946_v50, %v12917_v20  ;;  %v2649_v30 = vcombine.low %v2627_v13, %v13621_v33  ;;  %v13644_v7 = vrot.slane %v2667_v4, %v12917_v20 }
  0x63   :  { %18044 = vst [vmem:[#allocation77_spill] sm:$0xff] %v13635_v3  ;;  %v13647_v6 = vrot.slane %v11947_v16, %v12917_v20  ;;  %v821_v8 = vrot.slane %v58_v9, %v12917_v20  ;;  %v2650_v19 = vcombine.low %v13624_v23, %v13635_v3  ;;  %v13653_v18 = vrot.slane %v2669_v51, %v12917_v20 }
  0x64   :  { %18045 = vst [vmem:[#allocation78_spill] sm:$0xff] %v13640_v25  ;;  %18046 = vst [vmem:[#allocation79_spill] sm:$0xff] %v13644_v7  ;;  %v828_v50 = vrot.slane %v814_v15, %v12917_v20  ;;  %v863_v54 = vcombine.high %v59_v5, %v59_v5  ;;  %v2657_v21 = vrot.slane %v2649_v30, %v12917_v20 }
  0x65   :  { %18047 = vst [vmem:[#allocation80_spill] sm:$0xff] %v13647_v6  ;;  %18048 = vst [vmem:[#allocation81_spill] sm:$0xff] %v13653_v18  ;;  %v2698_v4 = vcombine.low %v13640_v25, %v13644_v7  ;;  %v829_v13 = vcombine.high %v821_v8, %v821_v8  ;;  %v13660_v16 = vrot.slane %v821_v8, %v12917_v20 }
  0x66   :  { %v2664_v9 = vrot.slane %v2650_v19, %v12917_v20  ;;  %v2699_v3 = vcombine.low %v13647_v6, %v13653_v18  ;;  %v830_v33 = vcombine.high %v828_v50, %v828_v50  ;;  %v13666_v51 = vrot.slane %v828_v50, %v12917_v20 }
  0x67   :  { %18049 = vst [vmem:[#allocation82_spill] sm:$0xff] %v13660_v16  ;;  %v2706_v15 = vrot.slane %v2698_v4, %v12917_v20  ;;  %v13670_v30 = vrot.slane %v829_v13, %v12917_v20  ;;  %v859_v7 = vcombine.high %v13660_v16, %v13660_v16  ;;  %v870_v8 = vrot.slane %v59_v5, %v12917_v20 }
  0x68   :  { %18050 = vst [vmem:[#allocation83_spill] sm:$0xff] %v13666_v51  ;;  %v2665_v25 = vcombine.low %v2657_v21, %v2664_v9  ;;  %v2713_v19 = vrot.slane %v2699_v3, %v12917_v20  ;;  %v13677_v23 = vrot.slane %v830_v33, %v12917_v20  ;;  %v860_v50 = vcombine.high %v13666_v51, %v13666_v51 }
  0x69   :  { %v861_v4 = vcombine.high %v13670_v30, %v13670_v30  ;;  %v877_v13 = vrot.slane %v863_v54, %v12917_v20  ;;  %v878_v18 = vcombine.high %v870_v8, %v870_v8  ;;  %v13685_v6 = vrot.slane %v870_v8, %v12917_v20 }
  0x6a   :  { %18051 = vst [vmem:[#allocation84_spill] sm:$0xff] %v13677_v23  ;;  %v2714_v16 = vcombine.low %v2706_v15, %v2713_v19  ;;  %v862_v21 = vcombine.high %v13677_v23, %v13677_v23  ;;  %v11948_v33 = vcombine.high %v13598_v2, %v13606_v26  ;;  %v2716_v5 = vcombine.low %v13670_v30, %v859_v7 }
  0x6b   :  { %18052 = vst [vmem:[#allocation85_spill] sm:$0xff] %v13685_v6  ;;  %v879_v3 = vcombine.high %v877_v13, %v877_v13  ;;  %v13693_v9 = vrot.slane %v877_v13, %v12917_v20  ;;  %v13696_v59 = vrot.slane %v878_v18, %v12917_v20  ;;  %v908_v54 = vcombine.high %v13685_v6, %v13685_v6 }
  0x6c   :  { %v2985_v8 = vpack.c.bf16 %v2714_v16, %v2665_v25  ;;  %v2717_v15 = vcombine.low %v861_v4, %v13666_v51  ;;  %v2718_v19 = vcombine.low %v13677_v23, %v860_v50  ;;  %v13703_v62 = vrot.slane %v11948_v33, %v12917_v20  ;;  %v13716_v25 = vld [vmem:[%s17612_s1 + $0x28] sm:$0xff]  }
  0x6d   :  { %18053 = vst [vmem:[#allocation86_spill] sm:$0xff] %v13693_v9  ;;  %18054 = vst [vmem:[#allocation87_spill] sm:$0xff] %v13696_v59  ;;  %v13706_v7 = vrot.slane %v879_v3, %v12917_v20  ;;  %v909_v13 = vcombine.high %v13693_v9, %v13693_v9  ;;  %v910_v18 = vcombine.high %v13696_v59, %v13696_v59 }
  0x6e   :  { %18055 = vst [vmem:[#allocation88_spill] sm:$0xff] %v13703_v62  ;;  %v2732_v26 = vrot.slane %v2716_v5, %v12917_v20  ;;  %12332 = vmatprep.mubr.msk.bf16.mxu0 %vm3010_vm1, %v2985_v8  ;;  %v13720_v16 = vrot.slane %v2717_v15, %v12917_v20  ;;  %v13723_v50 = vrot.slane %v2718_v19, %v12917_v20  ;;  %v12779_v5 = vld.sshfl [vmem:[%s17611_s0 + $0xa0] sm:$0x77 pattern:$0x75316420]  ;;  %v3203_v15 = vsel %vm3041_vm0, %v13253_v22, 0 }
  0x6f   :  { %18056 = vst [vmem:[#allocation89_spill] sm:$0xff] %v13706_v7  ;;  %v2764_v4 = vcombine.low %v862_v21, %v13685_v6  ;;  %v2765_v33 = vcombine.low %v13696_v59, %v908_v54  ;;  %v2766_v51 = vcombine.low %v910_v18, %v13693_v9  ;;  %v2767_v8 = vcombine.low %v13706_v7, %v909_v13  ;;  %v61_v19 = vld [vmem:[%s17611_s0 + $0xa8] sm:$0xff] }
  0x70   :  { %18057 = vst [vmem:[#allocation90_spill] sm:$0xff] %v13720_v16  ;;  %18058 = vst [vmem:[#allocation91_spill] sm:$0xff] %v13723_v50  ;;  %v2747_v3 = vcombine.low %v13703_v62, %v2732_v26  ;;  %v2748_v21 = vcombine.low %v13720_v16, %v13723_v50  ;;  %12345 = vmatpush3.bf16.msra.mxu0 %v3203_v15  ;;  %v62_v26 = vld [vmem:[%s17611_s0 + $0xb0] sm:$0xff]  ;;  %v911_v22 = vcombine.high %v13706_v7, %v13706_v7 }
  0x71   :  { %v13741_v54 = vrot.slane %v2764_v4, %v12917_v20  ;;  %v13744_v6 = vrot.slane %v2765_v33, %v12917_v20  ;;  %v13753_v18 = vrot.slane %v2766_v51, %v12917_v20  ;;  %v13756_v16 = vrot.slane %v2767_v8, %v12917_v20  ;;  %12366 = vmatprep.subr.bf16.mxu0 %v13716_v25 }
  0x72   :  { %v2755_v13 = vrot.slane %v2747_v3, %v12917_v20  ;;  %v2762_v4 = vrot.slane %v2748_v21, %v12917_v20  ;;  %v935_v15 = vcombine.high %v61_v19, %v61_v19  ;;  %v942_v50 = vrot.slane %v61_v19, %v12917_v20 }
  0x73   :  { %18059 = vst [vmem:[#allocation92_spill] sm:$0xff] %v13741_v54  ;;  %18060 = vst [vmem:[#allocation93_spill] sm:$0xff] %v13744_v6  ;;  %v2796_v33 = vcombine.low %v13741_v54, %v13744_v6  ;;  %v2797_v62 = vcombine.low %v13753_v18, %v13756_v16  ;;  %v919_v3 = vcombine.high %v12779_v5, %v12779_v5 }
  0x74   :  { %18061 = vst [vmem:[#allocation94_spill] sm:$0xff] %v13753_v18  ;;  %18062 = vst [vmem:[#allocation95_spill] sm:$0xff] %v13756_v16  ;;  %v13766_v51 = vrot.slane %v12779_v5, %v12917_v20  ;;  %v991_v8 = vrot.slane %v62_v26, %v12917_v20  ;;  %v2763_v9 = vcombine.low %v2755_v13, %v2762_v4 }
  0x75   :  { %v2804_v7 = vrot.slane %v2796_v33, %v12917_v20  ;;  %v949_v21 = vrot.slane %v935_v15, %v12917_v20  ;;  %v950_v59 = vcombine.high %v942_v50, %v942_v50  ;;  %v2811_v6 = vrot.slane %v2797_v62, %v12917_v20 }
  0x76   :  { %18063 = vst [vmem:[#allocation96_spill] sm:$0xff] %v13766_v51  ;;  %v13773_v54 = vrot.slane %v919_v3, %v12917_v20  ;;  %v13777_v19 = vcombine.high %v13766_v51, %v13766_v51  ;;  %v13780_v5 = vrot.slane %v942_v50, %v12917_v20  ;;  %v999_v33 = vcombine.high %v991_v8, %v991_v8 }
  0x77   :  { %v951_v16 = vcombine.high %v949_v21, %v949_v21  ;;  %v13783_v13 = vrot.slane %v949_v21, %v12917_v20  ;;  %v13786_v4 = vrot.slane %v950_v59, %v12917_v20  ;;  %v2812_v15 = vcombine.low %v2804_v7, %v2811_v6 }
  0x78   :  { %18064 = vst [vmem:[#allocation97_spill] sm:$0xff] %v13773_v54  ;;  %18065 = vst [vmem:[#allocation98_spill] sm:$0xff] %v13777_v19  ;;  %v13789_v62 = vrot.slane %v991_v8, %v12917_v20  ;;  %v13793_v3 = vcombine.high %v13773_v54, %v13773_v54  ;;  %v2813_v18 = vcombine.low %v911_v22, %v13766_v51 }
  0x79   :  { %v13797_v50 = vrot.slane %v951_v16, %v12917_v20  ;;  %v13800_v21 = vrot.slane %v999_v33, %v12917_v20  ;;  %v2814_v59 = vcombine.low %v13773_v54, %v13777_v19  ;;  %v11949_v6 = vcombine.high %v13780_v5, %v13786_v4  ;;  %v13814_v16 = vld [vmem:[%s17611_s0 + $0xb8] sm:$0x3f] }
  0x7a   :  { %18066 = vst [vmem:[#allocation99_spill] sm:$0xff] %v13789_v62  ;;  %18067 = vst [vmem:[#allocation100_spill] sm:$0xff] %v13793_v3  ;;  %v2986_v7 = vpack.c.bf16 %v2812_v15, %v2763_v9  ;;  %v2815_v8 = vcombine.low %v13793_v3, %v13786_v4  ;;  %v13809_v23 = vrot.slane %v2813_v18, %v12917_v20 }
  0x7b   :  { %18068 = vst [vmem:[#allocation101_spill] sm:$0xff] %v13797_v50  ;;  %18069 = vst [vmem:[#allocation102_spill] sm:$0xff] %v13800_v21  ;;  %v984_v22 = vcombine.high %v62_v26, %v62_v26  ;;  %v13817_v33 = vrot.slane %v2814_v59, %v12917_v20  ;;  %v2844_v19 = vrot.slane %v11949_v6, %v12917_v20 }
  0x7c   :  { %18070 = vst [vmem:[#allocation103_spill] sm:$0xff] %v13809_v23  ;;  %18071 = vst [vmem:[#allocation104_spill] sm:$0xff] %v13814_v16  ;;  %v2862_v9 = vcombine.low %v13783_v13, %v13797_v50  ;;  %v11950_v15 = vcombine.high %v13783_v13, %v13797_v50  ;;  %12333 = vmatmul.mubr.msk.bf16.gmra.mrb[12].mxu0 %vm3010_vm1, %v2986_v7  ;;  %v2837_v18 = vrot.slane %v2815_v8, %v12917_v20 }
  0x7d   :  { %18072 = vst [vmem:[#allocation105_spill] sm:$0xff] %v13817_v33  ;;  %v2864_v3 = vcombine.low %v13789_v62, %v13800_v21  ;;  %v11951_v26 = vcombine.high %v13789_v62, %v13800_v21  ;;  %v998_v59 = vrot.slane %v984_v22, %v12917_v20  ;;  %v2845_v6 = vcombine.low %v13809_v23, %v13817_v33 }
  0x7e   :  { %v13834_v51 = vrot.slane %v2862_v9, %v12917_v20  ;;  %v13837_v54 = vrot.slane %v11950_v15, %v12917_v20  ;;  %v1039_v7 = vrot.slane %v13814_v16, %v12917_v20  ;;  %v2846_v8 = vcombine.low %v2837_v18, %v2844_v19 }
  0x7f   :  { %v13842_v50 = vrot.slane %v2864_v3, %v12917_v20  ;;  %v13845_v21 = vrot.slane %v11951_v26, %v12917_v20  ;;  %v1000_v22 = vcombine.high %v998_v59, %v998_v59  ;;  %v2853_v62 = vrot.slane %v2845_v6, %v12917_v20 }
  0x80   :  { %18073 = vst [vmem:[#allocation106_spill] sm:$0xff] %v13834_v51  ;;  %18074 = vst [vmem:[#allocation107_spill] sm:$0xff] %v13837_v54  ;;  %v2894_v9 = vcombine.low %v13834_v51, %v13837_v54  ;;  %v13851_v33 = vrot.slane %v998_v59, %v12917_v20  ;;  %v1040_v15 = vcombine.high %v1039_v7, %v1039_v7 }
  0x81   :  { %18075 = vst [vmem:[#allocation108_spill] sm:$0xff] %v13842_v50  ;;  %18076 = vst [vmem:[#allocation109_spill] sm:$0xff] %v13845_v21  ;;  %v2860_v23 = vrot.slane %v2846_v8, %v12917_v20  ;;  %v2895_v19 = vcombine.low %v13842_v50, %v13845_v21  ;;  %v13857_v3 = vrot.slane %v1000_v22, %v12917_v20 }
  0x82   :  { %v13860_v18 = vrot.slane %v1039_v7, %v12917_v20  ;;  %v2902_v26 = vrot.slane %v2894_v9, %v12917_v20  ;;  %v13864_v6 = vrot.slane %v1040_v15, %v12917_v20  ;;  %v1056_v59 = vcombine.low %v12954_v38, %v12967_v44 }
  0x83   :  { %v11918_v8 = vcombine.high %v12954_v38, %v12967_v44  ;;  %v2861_v51 = vcombine.low %v2853_v62, %v2860_v23  ;;  %v2909_v21 = vrot.slane %v2895_v19, %v12917_v20  ;;  %v2911_v22 = vcombine.low %v13851_v33, %v13857_v3 }
  0x84   :  { %18077 = vst [vmem:[#allocation110_spill] sm:$0xff] %v13864_v6  ;;  %v11952_v7 = vcombine.high %v13851_v33, %v13857_v3  ;;  %v2913_v9 = vcombine.low %v13860_v18, %v13864_v6  ;;  %v11953_v15 = vcombine.high %v13860_v18, %v13864_v6  ;;  %v1058_v54 = vcombine.low %v12957_v39, %v12970_v45 }
  0x85   :  { %v11919_v38 = vcombine.high %v12957_v39, %v12970_v45  ;;  %v2910_v44 = vcombine.low %v2902_v26, %v2909_v21  ;;  %v13884_v23 = vrot.slane %v2911_v22, %v12917_v20  ;;  %v1066_v19 = vrot.slane %v1056_v59, %v12917_v20 }
  0x86   :  { %v13887_v62 = vrot.slane %v11952_v7, %v12917_v20  ;;  %v13891_v50 = vrot.slane %v2913_v9, %v12917_v20  ;;  %v13894_v16 = vrot.slane %v11953_v15, %v12917_v20  ;;  %v13897_v6 = vrot.slane %v11918_v8, %v12917_v20 }
  0x87   :  { %18078 = vst [vmem:[#allocation111_spill] sm:$0xff] %v13884_v23  ;;  %v13900_v39 = vrot.slane %v1058_v54, %v12917_v20  ;;  %v2987_v45 = vpack.c.bf16 %v2910_v44, %v2861_v51  ;;  %v13905_v26 = vrot.slane %v11919_v38, %v12917_v20  ;;  %v1105_v59 = vcombine.low %v12961_v42, %v12977_v48 }
  0x88   :  { %18079 = vst [vmem:[#allocation112_spill] sm:$0xff] %v13887_v62  ;;  %18080 = vst [vmem:[#allocation113_spill] sm:$0xff] %v13891_v50  ;;  %v2943_v21 = vcombine.low %v13884_v23, %v13887_v62  ;;  %v2944_v22 = vcombine.low %v13891_v50, %v13894_v16  ;;  %v1088_v7 = vcombine.low %v1066_v19, %v13897_v6 }
  0x89   :  { %18081 = vst [vmem:[#allocation114_spill] sm:$0xff] %v13894_v16  ;;  %v11920_v8 = vcombine.high %v12961_v42, %v12977_v48  ;;  %v1107_v54 = vcombine.low %v12964_v43, %v12980_v49  ;;  %12336 = vmatprep.mubr.msk.bf16.mxu0 %vm3010_vm1, %v2987_v45  ;;  %v1089_v9 = vcombine.low %v13900_v39, %v13905_v26 }
  0x8a   :  { %v2951_v51 = vrot.slane %v2943_v21, %v12917_v20  ;;  %v11921_v15 = vcombine.high %v12964_v43, %v12980_v49  ;;  %v13923_v38 = vrot.slane %v1105_v59, %v12917_v20  ;;  %v2958_v44 = vrot.slane %v2944_v22, %v12917_v20 }
  0x8b   :  { %v1096_v42 = vrot.slane %v1088_v7, %v12917_v20  ;;  %v13928_v48 = vrot.slane %v11920_v8, %v12917_v20  ;;  %v13931_v19 = vrot.slane %v1107_v54, %v12917_v20  ;;  %v1103_v45 = vrot.slane %v1089_v9, %v12917_v20 }
  0x8c   :  { %v13935_v21 = vrot.slane %v11921_v15, %v12917_v20  ;;  %v255_v43 = vcombine.high %v13076_v57, %v13076_v57  ;;  %v13941_v49 = vcombine.high %v13082_v63, %v13082_v63  ;;  %v2959_v59 = vcombine.low %v2951_v51, %v2958_v44 }
  0x8d   :  { %v1137_v22 = vcombine.low %v13923_v38, %v13928_v48  ;;  %v257_v7 = vcombine.high %v13089_v0, %v13089_v0  ;;  %v303_v8 = vcombine.high %v13092_v1, %v13092_v1  ;;  %v1104_v54 = vcombine.low %v1096_v42, %v1103_v45 }
  0x8e   :  { %18082 = vst [vmem:[#allocation115_spill] sm:$0xff] %v13935_v21  ;;  %18083 = vst [vmem:[#allocation116_spill] sm:$0xff] %v13941_v49  ;;  %v1138_v9 = vcombine.low %v13931_v19, %v13935_v21  ;;  %v305_v15 = vcombine.high %v13102_v24, %v13102_v24  ;;  %v1154_v16 = vcombine.low %v12991_v55, %v13003_v60 }
  0x8f   :  { %v2988_v51 = vpack.c.bf16 %v2959_v59, %v2959_v59  ;;  %v1145_v44 = vrot.slane %v1137_v22, %v12917_v20  ;;  %v1156_v62 = vcombine.low %v13082_v63, %v13153_v10  ;;  %v1157_v50 = vcombine.low %v13941_v49, %v13076_v57 }
  0x90   :  { %v1152_v42 = vrot.slane %v1138_v9, %v12917_v20  ;;  %v13962_v45 = vrot.slane %v1154_v16, %v12917_v20  ;;  %v1203_v23 = vcombine.low %v13089_v0, %v255_v43  ;;  %v1204_v21 = vcombine.low %v257_v7, %v13092_v1 }
  0x91   :  { %12337 = vmatmul.mubr.msk.bf16.gmra.mrb[16].mxu0 %vm3010_vm1, %v2988_v51  ;;  %v1178_v59 = vrot.slane %v1156_v62, %v12917_v20  ;;  %v13969_v22 = vrot.slane %v1157_v50, %v12917_v20  ;;  %v1205_v63 = vcombine.low %v13102_v24, %v303_v8  ;;  %v1206_v57 = vcombine.low %v305_v15, %v13097_v11 }
  0x92   :  { %v1153_v49 = vcombine.low %v1145_v44, %v1152_v42  ;;  %v1186_v16 = vcombine.low %v13962_v45, %v13128_v61  ;;  %v13976_v9 = vrot.slane %v1203_v23, %v12917_v20  ;;  %v13979_v0 = vrot.slane %v1204_v21, %v12917_v20 }
  0x93   :  { %v1187_v1 = vcombine.low %v1178_v59, %v13969_v22  ;;  %v13983_v62 = vrot.slane %v1205_v63, %v12917_v20  ;;  %v1234_v50 = vrot.slane %v1206_v57, %v12917_v20  ;;  %v304_v24 = vcombine.high %v13097_v11, %v13097_v11 }
  0x94   :  { %v2006_v43 = vpack.c.bf16 %v1153_v49, %v1104_v54  ;;  %v1194_v7 = vrot.slane %v1186_v16, %v12917_v20  ;;  %v1235_v61 = vcombine.low %v13976_v9, %v13979_v0  ;;  %v306_v23 = vcombine.high %v13110_v36, %v13110_v36 }
  0x95   :  { %v1201_v21 = vrot.slane %v1187_v1, %v12917_v20  ;;  %v1236_v8 = vcombine.low %v13983_v62, %v1234_v50  ;;  %v329_v15 = vcombine.high %v13181_v47, %v13181_v47  ;;  %v1252_v51 = vcombine.low %v13110_v36, %v304_v24 }
  0x96   :  { %12346 = vmatprep.mubr.msk.bf16.mxu0 %vm3010_vm1, %v2006_v43  ;;  %v1243_v11 = vrot.slane %v1235_v61, %v12917_v20  ;;  %v1253_v49 = vcombine.low %v306_v23, %v13181_v47  ;;  %v1255_v54 = vcombine.low %v13188_v40, %v13201_v14  ;;  %v11922_v44 = vcombine.high %v13188_v40, %v13201_v14 }
  0x97   :  { %v1202_v42 = vcombine.low %v1194_v7, %v1201_v21  ;;  %v1250_v59 = vrot.slane %v1236_v8, %v12917_v20  ;;  %v1254_v63 = vcombine.low %v13195_v46, %v329_v15  ;;  %v1262_v57 = vrot.slane %v1252_v51, %v12917_v20  ;;  %v12737_v51 = vld [vmem:[%s17612_s1 + $0x30] sm:$0xff]  }
  0x98   :  { %v14009_v36 = vrot.slane %v1253_v49, %v12917_v20  ;;  %v1283_v16 = vrot.slane %v1255_v54, %v12917_v20  ;;  %v1302_v47 = vcombine.low %v13198_v37, %v13209_v17  ;;  %v11923_v1 = vcombine.high %v13198_v37, %v13209_v17 }
  0x99   :  { %v1251_v24 = vcombine.low %v1243_v11, %v1250_v59  ;;  %v14017_v40 = vrot.slane %v1254_v63, %v12917_v20  ;;  %v1304_v14 = vcombine.low %v13206_v53, %v13221_v29  ;;  %v14022_v43 = vrot.slane %v11922_v44, %v12917_v20 }
  0x9a   :  { %v1284_v7 = vcombine.low %v1262_v57, %v14009_v36  ;;  %v14026_v61 = vrot.slane %v1302_v47, %v12917_v20  ;;  %v14029_v23 = vrot.slane %v11923_v1, %v12917_v20  ;;  %v3505_v21 = vcombine.low %v1234_v50, %v1262_v57  ;;  %v18087_v1 = vld [vmem:[#allocation28_spill] sm:$0xff] }
  0x9b   :  { %18084 = vst [vmem:[#allocation117_spill] sm:$0xff] %v14022_v43  ;;  %v2007_v37 = vpack.c.bf16 %v1251_v24, %v1202_v42  ;;  %v1285_v17 = vcombine.low %v14017_v40, %v1283_v16  ;;  %v14033_v8 = vrot.slane %v1304_v14, %v12917_v20  ;;  %v14037_v15 = vcombine.high %v13310_v27, %v13310_v27 }
  0x9c   :  { %v1292_v11 = vrot.slane %v1284_v7, %v12917_v20  ;;  %v1333_v49 = vcombine.low %v14022_v43, %v14026_v61  ;;  %v14046_v50 = vrot.slane %v3505_v21, %v12917_v20  ;;  %v497_v54 = vcombine.high %v13320_v56, %v13320_v56 }
  0x9d   :  { %18085 = vst [vmem:[#allocation118_spill] sm:$0xff] %v14037_v15  ;;  %12347 = vmatmul.mubr.msk.bf16.vlgmr.msra.gmra.mrb[0].mxu0 %vm3010_vm1, %v2007_v37  ;;  %v1299_v44 = vrot.slane %v1285_v17, %v12917_v20  ;;  %v1334_v42 = vcombine.low %v14029_v23, %v14033_v8  ;;  %v14056_v59 = vcombine.high %v13323_v52, %v13323_v52 }
  0x9e   :  { %v11924_v63 = vcombine.high %v13206_v53, %v13221_v29  ;;  %12367 = vmatpush3.bf16.msra.mxu0 %v13716_v25  ;;  %v1341_v57 = vrot.slane %v1333_v49, %v12917_v20  ;;  %v1351_v16 = vcombine.low %v13282_v41, %v13295_v58  ;;  %v11925_v47 = vcombine.high %v13282_v41, %v13295_v58  ;;  %v18088_v53 = vld [vmem:[#allocation29_spill] sm:$0xff]  ;;  %v14077_v25 = vld [vmem:[%s17612_s1 + $0x38] ss:$0 sps:$4 sm:$0xff]   ;;  %v18092_v49 = vld [vmem:[#allocation30_spill] sm:$0xff] }
  0x9f   :  { %18086 = vst [vmem:[#allocation119_spill] sm:$0xff] %v14056_v59  ;;  %v1353_v24 = vcombine.low %v18087_v1, %v13313_v28  ;;  %v1300_v14 = vcombine.low %v1292_v11, %v1299_v44  ;;  %v1348_v7 = vrot.slane %v1334_v42, %v12917_v20  ;;  %v1399_v29 = vcombine.low %v18088_v53, %v13310_v27 }
  0xa0   :  { %v14070_v21 = vrot.slane %v11924_v63, %v12917_v20  ;;  %12368 = vmatprep.subr.bf16.mxu0 %v12737_v51  ;;  %v14080_v41 = vrot.slane %v1351_v16, %v12917_v20  ;;  %v14083_v58 = vrot.slane %v11925_v47, %v12917_v20  ;;  %v1400_v17 = vcombine.low %v13323_v52, %v14037_v15  ;;  %v18099_v15 = vld [vmem:[#allocation41_spill] sm:$0xff] }
  0xa1   :  { %v14086_v37 = vrot.slane %v1353_v24, %v12917_v20  ;;  %v1349_v11 = vcombine.low %v1341_v57, %v1348_v7  ;;  %v1401_v27 = vcombine.low %v14056_v59, %v13320_v56  ;;  %v1402_v44 = vcombine.low %v18092_v49, %v497_v54  ;;  %v18095_v54 = vld [vmem:[#allocation38_spill] sm:$0xff] }
  0xa2   :  { %18089 = vst [vmem:[#allocation28_spill] sm:$0xff] %v14080_v41  ;;  %18090 = vst [vmem:[#allocation29_spill] sm:$0xff] %v14083_v58  ;;  %v1409_v42 = vrot.slane %v1399_v29, %v12917_v20  ;;  %v1382_v63 = vcombine.low %v14070_v21, %v14080_v41  ;;  %v1416_v47 = vrot.slane %v1400_v17, %v12917_v20  ;;  %12369 = vmatpush3.bf16.msra.mxu0 %v12737_v51  ;;  %v18096_v17 = vld [vmem:[#allocation39_spill] sm:$0xff] }
  0xa3   :  { %18091 = vst [vmem:[#allocation120_spill] sm:$0xff] %v14086_v37  ;;  %v1383_v16 = vcombine.low %v14083_v58, %v14086_v37  ;;  %v499_v52 = vcombine.high %v18092_v49, %v18092_v49  ;;  %v2008_v57 = vpack.c.bf16 %v1349_v11, %v1300_v14  ;;  %v14102_v24 = vrot.slane %v1401_v27, %v12917_v20  ;;  %v18097_v27 = vld [vmem:[#allocation40_spill] sm:$0xff] }
  0xa4   :  { %v14105_v56 = vrot.slane %v1402_v44, %v12917_v20  ;;  %v545_v7 = vcombine.high %v18095_v54, %v18095_v54  ;;  %12706 = vmatprep.subr.msk.bf16.mxu0 %vm3041_vm0, %v14077_v25  ;;  %v1390_v53 = vrot.slane %v1382_v63, %v12917_v20  ;;  %v1431_v29 = vcombine.low %v1409_v42, %v1416_v47  ;;  %v18098_v44 = vld [vmem:[#allocation42_spill] sm:$0xff] }
  0xa5   :  { %18093 = vst [vmem:[#allocation30_spill] sm:$0xff] %v14102_v24  ;;  %v1397_v51 = vrot.slane %v1383_v16, %v12917_v20  ;;  %v546_v14 = vcombine.high %v18096_v17, %v18096_v17  ;;  %12350 = vmatprep.mubr.msk.bf16.mxu0 %vm3010_vm1, %v2008_v57  ;;  %v547_v49 = vcombine.high %v18097_v27, %v18097_v27 }
  0xa6   :  { %18094 = vst [vmem:[#allocation121_spill] sm:$0xff] %v14105_v56  ;;  %v1432_v11 = vcombine.low %v14102_v24, %v14105_v56  ;;  %v548_v59 = vcombine.high %v18098_v44, %v18098_v44  ;;  %v571_v63 = vcombine.high %v18099_v15, %v18099_v15  ;;  %v1439_v42 = vrot.slane %v1431_v29, %v12917_v20  ;;  %v18102_v29 = vld [vmem:[#allocation50_spill] sm:$0xff] }
  0xa7   :  { %v1398_v43 = vcombine.low %v1390_v53, %v1397_v51  ;;  %v1448_v16 = vcombine.low %v499_v52, %v18095_v54  ;;  %v1449_v47 = vcombine.low %v18097_v27, %v545_v7  ;;  %v1450_v24 = vcombine.low %v547_v49, %v18096_v17  ;;  %v18101_v53 = vld [vmem:[#allocation43_spill] sm:$0xff]  ;;  %v18103_v52 = vld [vmem:[#allocation44_spill] sm:$0xff] }
  0xa8   :  { %v1446_v57 = vrot.slane %v1432_v11, %v12917_v20  ;;  %v1451_v37 = vcombine.low %v18098_v44, %v546_v14  ;;  %v1497_v56 = vcombine.low %v548_v59, %v18099_v15  ;;  %v1498_v51 = vcombine.low %v18101_v53, %v571_v63  ;;  %v18109_v63 = vld [vmem:[#allocation53_spill] sm:$0xff] }
  0xa9   :  { %v14132_v41 = vrot.slane %v1448_v16, %v12917_v20  ;;  %v14135_v58 = vrot.slane %v1449_v47, %v12917_v20  ;;  %v1499_v54 = vcombine.low %v18103_v52, %v18102_v29  ;;  %v14141_v11 = vrot.slane %v1450_v24, %v12917_v20 }
  0xaa   :  { %v1447_v7 = vcombine.low %v1439_v42, %v1446_v57  ;;  %v14144_v17 = vrot.slane %v1451_v37, %v12917_v20  ;;  %v11926_v15 = vcombine.high %v18103_v52, %v18102_v29  ;;  %v14151_v14 = vrot.slane %v1497_v56, %v12917_v20  ;;  %v18110_v42 = vld [vmem:[#allocation45_spill] sm:$0xff] }
  0xab   :  { %18100 = vst [vmem:[#allocation38_spill] sm:$0xff] %v14135_v58  ;;  %18104 = vst [vmem:[#allocation39_spill] sm:$0xff] %v14141_v11  ;;  %v1480_v59 = vcombine.low %v14132_v41, %v14135_v58  ;;  %v14154_v27 = vrot.slane %v1498_v51, %v12917_v20  ;;  %v1521_v49 = vrot.slane %v1499_v54, %v12917_v20 }
  0xac   :  { %18105 = vst [vmem:[#allocation40_spill] sm:$0xff] %v14144_v17  ;;  %18106 = vst [vmem:[#allocation42_spill] sm:$0xff] %v14151_v14  ;;  %v2009_v44 = vpack.c.bf16 %v1447_v7, %v1398_v43  ;;  %v1481_v24 = vcombine.low %v14141_v11, %v14144_v17  ;;  %v14160_v37 = vrot.slane %v11926_v15, %v12917_v20 }
  0xad   :  { %18107 = vst [vmem:[#allocation41_spill] sm:$0xff] %v14154_v27  ;;  %v1546_v16 = vcombine.low %v18110_v42, %v18109_v63  ;;  %v1488_v47 = vrot.slane %v1480_v59, %v12917_v20  ;;  %v1529_v56 = vcombine.low %v14151_v14, %v14154_v27  ;;  %v11927_v57 = vcombine.high %v18110_v42, %v18109_v63  ;;  %v18115_v42 = vld [vmem:[#allocation55_spill] sm:$0xff] }
  0xae   :  { %18108 = vst [vmem:[#allocation43_spill] sm:$0xff] %v14160_v37  ;;  %v1548_v43 = vcombine.low %v13487_v34, %v13497_v32  ;;  %12351 = vmatmul.mubr.msk.bf16.gmra.mrb[4].mxu0 %vm3010_vm1, %v2009_v44  ;;  %v1495_v51 = vrot.slane %v1481_v24, %v12917_v20  ;;  %v1530_v29 = vcombine.low %v1521_v49, %v14160_v37  ;;  %v18128_v37 = vld [vmem:[#allocation73_spill] sm:$0xff] }
  0xaf   :  { %v11928_v52 = vcombine.high %v13487_v34, %v13497_v32  ;;  %v14177_v54 = vrot.slane %v1546_v16, %v12917_v20  ;;  %v1537_v7 = vrot.slane %v1529_v56, %v12917_v20  ;;  %v14181_v15 = vrot.slane %v11927_v57, %v12917_v20  ;;  %v18116_v56 = vld [vmem:[#allocation67_spill] sm:$0xff]  ;;  %v18117_v57 = vld [vmem:[#allocation57_spill] sm:$0xff] }
  0xb0   :  { %v14184_v59 = vrot.slane %v1548_v43, %v12917_v20  ;;  %v1595_v44 = vcombine.low %v13490_v35, %v13503_v12  ;;  %v1496_v24 = vcombine.low %v1488_v47, %v1495_v51  ;;  %v1544_v49 = vrot.slane %v1530_v29, %v12917_v20 }
  0xb1   :  { %18111 = vst [vmem:[#allocation50_spill] sm:$0xff] %v14177_v54  ;;  %18112 = vst [vmem:[#allocation44_spill] sm:$0xff] %v14181_v15  ;;  %v14190_v63 = vrot.slane %v11928_v52, %v12917_v20  ;;  %v11929_v34 = vcombine.high %v13490_v35, %v13503_v12  ;;  %v1578_v32 = vcombine.low %v14177_v54, %v14181_v15  ;;  %v18125_v15 = vld [vmem:[#allocation69_spill] sm:$0xff] }
  0xb2   :  { %18113 = vst [vmem:[#allocation53_spill] sm:$0xff] %v14184_v59  ;;  %v1597_v16 = vcombine.low %v18115_v42, %v13508_v31  ;;  %v1598_v43 = vcombine.low %v18117_v57, %v18116_v56  ;;  %v14201_v27 = vrot.slane %v1595_v44, %v12917_v20  ;;  %v1545_v47 = vcombine.low %v1537_v7, %v1544_v49  ;;  %v18121_v44 = vld [vmem:[#allocation68_spill] sm:$0xff]  ;;  %v18122_v31 = vld [vmem:[#allocation59_spill] sm:$0xff] }
  0xb3   :  { %18114 = vst [vmem:[#allocation45_spill] sm:$0xff] %v14190_v63  ;;  %v1579_v51 = vcombine.low %v14184_v59, %v14190_v63  ;;  %v14206_v29 = vrot.slane %v11929_v34, %v12917_v20  ;;  %v14210_v35 = vcombine.high %v18116_v56, %v18116_v56  ;;  %v1586_v12 = vrot.slane %v1578_v32, %v12917_v20  ;;  %v18124_v63 = vld [vmem:[#allocation70_spill] sm:$0xff]  ;;  %v18126_v59 = vld [vmem:[#allocation71_spill] sm:$0xff] }
  0xb4   :  { %18118 = vst [vmem:[#allocation67_spill] sm:$0xff] %v14201_v27  ;;  %v14214_v52 = vrot.slane %v1597_v16, %v12917_v20  ;;  %v1626_v57 = vrot.slane %v1598_v43, %v12917_v20  ;;  %v739_v7 = vcombine.high %v18121_v44, %v18121_v44  ;;  %v2010_v49 = vpack.c.bf16 %v1545_v47, %v1496_v24 }
  0xb5   :  { %18119 = vst [vmem:[#allocation57_spill] sm:$0xff] %v14206_v29  ;;  %v1593_v42 = vrot.slane %v1579_v51, %v12917_v20  ;;  %v1627_v34 = vcombine.low %v14201_v27, %v14206_v29  ;;  %v14224_v56 = vcombine.high %v18122_v31, %v18122_v31  ;;  %v741_v16 = vcombine.high %v18124_v63, %v18124_v63  ;;  %v18127_v29 = vld [vmem:[#allocation72_spill] sm:$0xff] }
  0xb6   :  { %18120 = vst [vmem:[#allocation122_spill] sm:$0xff] %v14214_v52  ;;  %v1628_v32 = vcombine.low %v14214_v52, %v1626_v57  ;;  %v787_v43 = vcombine.high %v18125_v15, %v18125_v15  ;;  %v788_v24 = vcombine.high %v18126_v59, %v18126_v59  ;;  %12354 = vmatprep.mubr.msk.bf16.mxu0 %vm3010_vm1, %v2010_v49 }
  0xb7   :  { %18123 = vst [vmem:[#allocation68_spill] sm:$0xff] %v14224_v56  ;;  %v1594_v47 = vcombine.low %v1586_v12, %v1593_v42  ;;  %v1635_v51 = vrot.slane %v1627_v34, %v12917_v20  ;;  %v789_v27 = vcombine.high %v18127_v29, %v18127_v29  ;;  %v790_v57 = vcombine.high %v18128_v37, %v18128_v37 }
  0xb8   :  { %v1642_v52 = vrot.slane %v1628_v32, %v12917_v20  ;;  %v1644_v54 = vcombine.low %v18122_v31, %v14210_v35  ;;  %v1645_v17 = vcombine.low %v14224_v56, %v18121_v44  ;;  %v1646_v14 = vcombine.low %v18124_v63, %v739_v7  ;;  %v18130_v7 = vld [vmem:[#allocation82_spill] sm:$0xff] }
  0xb9   :  { %v1647_v42 = vcombine.low %v741_v16, %v18125_v15  ;;  %v1693_v12 = vcombine.low %v18127_v29, %v787_v43  ;;  %v1694_v49 = vcombine.low %v789_v27, %v18126_v59  ;;  %v1695_v34 = vcombine.low %v18128_v37, %v788_v24  ;;  %v18131_v16 = vld [vmem:[#allocation74_spill] sm:$0xff]  ;;  %v18132_v24 = vld [vmem:[#allocation84_spill] sm:$0xff] }
  0xba   :  { %v1643_v58 = vcombine.low %v1635_v51, %v1642_v52  ;;  %v1654_v11 = vrot.slane %v1644_v54, %v12917_v20  ;;  %v14251_v32 = vrot.slane %v1645_v17, %v12917_v20  ;;  %v14254_v31 = vrot.slane %v1646_v14, %v12917_v20 }
  0xbb   :  { %v14257_v44 = vrot.slane %v1647_v42, %v12917_v20  ;;  %v1696_v15 = vcombine.low %v790_v57, %v13598_v2  ;;  %v14261_v63 = vrot.slane %v1693_v12, %v12917_v20  ;;  %v14264_v27 = vrot.slane %v1694_v49, %v12917_v20 }
  0xbc   :  { %v2011_v37 = vpack.c.bf16 %v1643_v58, %v1594_v47  ;;  %v1676_v54 = vcombine.low %v1654_v11, %v14251_v32  ;;  %v14268_v17 = vrot.slane %v1695_v34, %v12917_v20  ;;  %v813_v14 = vcombine.high %v13598_v2, %v13598_v2  ;;  %v18133_v47 = vld [vmem:[#allocation83_spill] sm:$0xff] }
  0xbd   :  { %v1677_v59 = vcombine.low %v14254_v31, %v14257_v44  ;;  %v14275_v29 = vrot.slane %v1696_v15, %v12917_v20  ;;  %v1725_v52 = vcombine.low %v14261_v63, %v14264_v27  ;;  %v1743_v58 = vcombine.low %v18130_v7, %v13670_v30 }
  0xbe   :  { %12355 = vmatmul.mubr.msk.bf16.gmra.mrb[8].mxu0 %vm3010_vm1, %v2011_v37  ;;  %v1684_v11 = vrot.slane %v1676_v54, %v12917_v20  ;;  %v1742_v43 = vcombine.low %v18131_v16, %v813_v14  ;;  %v11930_v2 = vcombine.high %v18130_v7, %v13670_v30  ;;  %v1745_v51 = vcombine.low %v18133_v47, %v18132_v24  ;;  %v18138_v7 = vld [vmem:[#allocation85_spill] sm:$0xff]  ;;  %v18150_v16 = vld [vmem:[#allocation96_spill] sm:$0xff] }
  0xbf   :  { %18129 = vst [vmem:[#allocation59_spill] sm:$0xff] %v14275_v29  ;;  %v1691_v57 = vrot.slane %v1677_v59, %v12917_v20  ;;  %v1726_v42 = vcombine.low %v14268_v17, %v14275_v29  ;;  %v1733_v12 = vrot.slane %v1725_v52, %v12917_v20  ;;  %v1759_v49 = vrot.slane %v1743_v58, %v12917_v20  ;;  %v18137_v59 = vld [vmem:[#allocation87_spill] sm:$0xff] }
  0xc0   :  { %v14294_v34 = vrot.slane %v1742_v43, %v12917_v20  ;;  %v14297_v15 = vrot.slane %v11930_v2, %v12917_v20  ;;  %v14300_v30 = vrot.slane %v1745_v51, %v12917_v20  ;;  %v11931_v37 = vcombine.high %v18133_v47, %v18132_v24  ;;  %v14312_v43 = vld [vmem:[%s17612_s1 + $0x3c] sm:$0xff]   ;;  %v18139_v24 = vld [vmem:[#allocation89_spill] sm:$0xff] }
  0xc1   :  { %v1692_v54 = vcombine.low %v1684_v11, %v1691_v57  ;;  %v1740_v14 = vrot.slane %v1726_v42, %v12917_v20  ;;  %v1792_v52 = vcombine.low %v18138_v7, %v18137_v59  ;;  %v11932_v58 = vcombine.high %v18138_v7, %v18137_v59  ;;  %v18140_v11 = vld [vmem:[#allocation86_spill] sm:$0xff] }
  0xc2   :  { %18134 = vst [vmem:[#allocation70_spill] sm:$0xff] %v14294_v34  ;;  %18135 = vst [vmem:[#allocation69_spill] sm:$0xff] %v14297_v15  ;;  %v1774_v2 = vcombine.low %v14294_v34, %v1759_v49  ;;  %v1775_v51 = vcombine.low %v14297_v15, %v14300_v30  ;;  %v1794_v47 = vcombine.low %v18140_v11, %v18139_v24  ;;  %v3937_v7 = vsel %vm3041_vm0, %v14077_v25, 0 }
  0xc3   :  { %18136 = vst [vmem:[#allocation71_spill] sm:$0xff] %v14300_v30  ;;  %v14320_v57 = vrot.slane %v11931_v37, %v12917_v20  ;;  %v1741_v42 = vcombine.low %v1733_v12, %v1740_v14  ;;  %v14323_v56 = vrot.slane %v1792_v52, %v12917_v20  ;;  %v14326_v59 = vrot.slane %v11932_v58, %v12917_v20 }
  0xc4   :  { %v1782_v49 = vrot.slane %v1774_v2, %v12917_v20  ;;  %v1789_v15 = vrot.slane %v1775_v51, %v12917_v20  ;;  %v14333_v30 = vrot.slane %v1794_v47, %v12917_v20  ;;  %12371 = vmatpush3.bf16.msra.mxu0 %v3937_v7  ;;  %v14337_v12 = vcombine.high %v13780_v5, %v13780_v5  ;;  %v18147_v51 = vld [vmem:[#allocation101_spill] sm:$0xff] }
  0xc5   :  { %18141 = vst [vmem:[#allocation72_spill] sm:$0xff] %v14320_v57  ;;  %18142 = vst [vmem:[#allocation73_spill] sm:$0xff] %v14323_v56  ;;  %v2012_v37 = vpack.c.bf16 %v1741_v42, %v1692_v54  ;;  %v1823_v14 = vcombine.low %v14320_v57, %v14323_v56  ;;  %v981_v52 = vcombine.high %v13783_v13, %v13783_v13  ;;  %12392 = vmatprep.subr.bf16.mxu0 %v14312_v43  ;;  %v18148_v54 = vld [vmem:[#allocation99_spill] sm:$0xff]  ;;  %v18149_v56 = vld [vmem:[#allocation97_spill] sm:$0xff] }
  0xc6   :  { %18143 = vst [vmem:[#allocation82_spill] sm:$0xff] %v14326_v59  ;;  %18144 = vst [vmem:[#allocation84_spill] sm:$0xff] %v14333_v30  ;;  %v14345_v25 = vcombine.high %v13786_v4, %v13786_v4  ;;  %v1790_v58 = vcombine.low %v1782_v49, %v1789_v15  ;;  %v1824_v2 = vcombine.low %v14326_v59, %v14333_v30  ;;  %v18151_v15 = vld [vmem:[#allocation98_spill] sm:$0xff] }
  0xc7   :  { %18145 = vst [vmem:[#allocation83_spill] sm:$0xff] %v14337_v12  ;;  %v983_v47 = vcombine.high %v18147_v51, %v18147_v51  ;;  %v1029_v42 = vcombine.high %v18148_v54, %v18148_v54  ;;  %12358 = vmatprep.mubr.msk.bf16.mxu0 %vm3010_vm1, %v2012_v37  ;;  %v1831_v7 = vrot.slane %v1823_v14, %v12917_v20 }
  0xc8   :  { %18146 = vst [vmem:[#allocation87_spill] sm:$0xff] %v14345_v25  ;;  %v11933_v57 = vcombine.high %v18140_v11, %v18139_v24  ;;  %v1841_v29 = vcombine.low %v18150_v16, %v18149_v56  ;;  %v1842_v49 = vcombine.low %v18151_v15, %v13780_v5  ;;  %v1838_v30 = vrot.slane %v1824_v2, %v12917_v20  ;;  %v18152_v16 = vld [vmem:[#allocation102_spill] sm:$0xff] }
  0xc9   :  { %v1843_v59 = vcombine.low %v13786_v4, %v14337_v12  ;;  %v1889_v34 = vcombine.low %v14345_v25, %v13783_v13  ;;  %v1890_v37 = vcombine.low %v18147_v51, %v981_v52  ;;  %v1891_v5 = vcombine.low %v983_v47, %v18148_v54 }
  0xca   :  { %v14369_v14 = vrot.slane %v11933_v57, %v12917_v20  ;;  %v14372_v24 = vrot.slane %v1841_v29, %v12917_v20  ;;  %v1864_v11 = vrot.slane %v1842_v49, %v12917_v20  ;;  %v1839_v15 = vcombine.low %v1831_v7, %v1838_v30 }
  0xcb   :  { %v1871_v2 = vrot.slane %v1843_v59, %v12917_v20  ;;  %v1892_v4 = vcombine.low %v18152_v16, %v1029_v42  ;;  %v14379_v12 = vrot.slane %v1889_v34, %v12917_v20  ;;  %v14384_v57 = vrot.slane %v1890_v37, %v12917_v20 }
  0xcc   :  { %v1872_v13 = vcombine.low %v14369_v14, %v14372_v24  ;;  %v14387_v29 = vrot.slane %v1891_v5, %v12917_v20  ;;  %v1030_v52 = vcombine.high %v13851_v33, %v13851_v33  ;;  %v2013_v30 = vpack.c.bf16 %v1839_v15, %v1790_v58  ;;  %v18153_v15 = vld [vmem:[#allocation110_spill] sm:$0xff] }
  0xcd   :  { %v1873_v51 = vcombine.low %v1864_v11, %v1871_v2  ;;  %v14392_v59 = vrot.slane %v1892_v4, %v12917_v20  ;;  %v1031_v34 = vcombine.high %v18152_v16, %v18152_v16  ;;  %v1921_v54 = vcombine.low %v14379_v12, %v14384_v57 }
  0xce   :  { %v1880_v47 = vrot.slane %v1872_v13, %v12917_v20  ;;  %v1032_v42 = vcombine.high %v13857_v3, %v13857_v3  ;;  %v1055_v7 = vcombine.high %v13860_v18, %v13860_v18  ;;  %12359 = vmatmul.mubr.msk.bf16.gmra.mrb[12].mxu0 %vm3010_vm1, %v2013_v30  ;;  %v1939_v37 = vcombine.low %v13857_v3, %v1030_v52 }
  0xcf   :  { %v1887_v58 = vrot.slane %v1873_v51, %v12917_v20  ;;  %v1922_v49 = vcombine.low %v14387_v29, %v14392_v59  ;;  %v1938_v16 = vcombine.low %v1031_v34, %v13851_v33  ;;  %v1929_v11 = vrot.slane %v1921_v54, %v12917_v20 }
  0xd0   :  { %v1940_v5 = vcombine.low %v1032_v42, %v13860_v18  ;;  %v1941_v2 = vcombine.low %v18153_v15, %v1055_v7  ;;  %v3437_v4 = vcombine.low %v13897_v6, %v13900_v39  ;;  %v14419_v25 = vrot.slane %v1939_v37, %v12917_v20 }
  0xd1   :  { %v1888_v13 = vcombine.low %v1880_v47, %v1887_v58  ;;  %v1936_v30 = vrot.slane %v1922_v49, %v12917_v20  ;;  %v14416_v51 = vrot.slane %v1938_v16, %v12917_v20  ;;  %v3438_v18 = vcombine.low %v13905_v26, %v13923_v38  ;;  %v18154_v47 = vld [vmem:[#allocation115_spill] sm:$0xff] }
  0xd2   :  { %v14422_v33 = vrot.slane %v1940_v5, %v12917_v20  ;;  %v14425_v3 = vrot.slane %v1941_v2, %v12917_v20  ;;  %v3445_v6 = vrot.slane %v3437_v4, %v12917_v20  ;;  %v3454_v34 = vcombine.low %v13928_v48, %v13931_v19  ;;  %v18155_v38 = vld [vmem:[#allocation15_spill] sm:$0xff]  ;;  %v12768_v4 = vld [vmem:[%s17611_s0 + $0x28] sm:$0x3f] }
  0xd3   :  { %v1937_v39 = vcombine.low %v1929_v11, %v1936_v30  ;;  %v1970_v52 = vcombine.low %v14416_v51, %v14419_v25  ;;  %v3455_v54 = vcombine.low %v18154_v47, %v13962_v45  ;;  %v3452_v7 = vrot.slane %v3438_v18, %v12917_v20 }
  0xd4   :  { %v1971_v42 = vcombine.low %v14422_v33, %v14425_v3  ;;  %v11985_v26 = vcombine.high %v12991_v55, %v13003_v60  ;;  %v18156_v58 = vcombine.low %v18155_v38, %v13153_v10  ;;  %v3462_v48 = vrot.slane %v3454_v34, %v12917_v20 }
  0xd5   :  { %v2014_v16 = vpack.c.bf16 %v1937_v39, %v1888_v13  ;;  %v1978_v37 = vrot.slane %v1970_v52, %v12917_v20  ;;  %v3469_v19 = vrot.slane %v3455_v54, %v12917_v20  ;;  %v3453_v11 = vcombine.low %v3445_v6, %v3452_v7 }
  0xd6   :  { %v3486_v49 = vrot.slane %v18156_v58, %v12917_v20  ;;  %v1985_v45 = vrot.slane %v1971_v42, %v12917_v20  ;;  %v3479_v5 = vrot.slane %v11985_v26, %v12917_v20  ;;  %v3488_v55 = vcombine.low %v13969_v22, %v13976_v9 }
  0xd7   :  { %12362 = vmatprep.mubr.msk.bf16.mxu0 %vm3010_vm1, %v2014_v16  ;;  %v3470_v60 = vcombine.low %v3462_v48, %v3469_v19  ;;  %v3504_v10 = vcombine.low %v13979_v0, %v13983_v62  ;;  %v2022_v2 = vcombine.high %v13195_v46, %v13195_v46  ;;  %v3332_v13 = vcombine.high %v12768_v4, %v12768_v4 }
  0xd8   :  { %v1986_v30 = vcombine.low %v1978_v37, %v1985_v45  ;;  %v3487_v18 = vcombine.low %v3479_v5, %v3486_v49  ;;  %v3502_v6 = vrot.slane %v3488_v55, %v12917_v20  ;;  %v3529_v22 = vcombine.low %v14009_v36, %v14017_v40  ;;  %v18159_v49 = vld [vmem:[#allocation121_spill] sm:$0xff] }
  0xd9   :  { %v3875_v9 = vpack.c.bf16 %v3470_v60, %v3453_v11  ;;  %v3512_v39 = vrot.slane %v3504_v10, %v12917_v20  ;;  %v14465_v0 = vrot.slane %v3332_v13, %v12917_v20  ;;  %v3546_v46 = vcombine.low %v14026_v61, %v14029_v23  ;;  %v12769_v61 = vld [vmem:[%s17611_s0 + $0x40] sm:$0x3f]  ;;  %v18161_v10 = vld [vmem:[#allocation39_spill] sm:$0xff]  ;;  %v18163_v13 = vld [vmem:[#allocation42_spill] sm:$0xff] }
  0xda   :  { %v2015_v62 = vpack.c.bf16 %v1986_v30, %v1986_v30  ;;  %v3495_v52 = vrot.slane %v3487_v18, %v12917_v20  ;;  %v3537_v34 = vrot.slane %v3529_v22, %v12917_v20  ;;  %v3547_v47 = vcombine.low %v14033_v8, %v14070_v21  ;;  %v18158_v21 = vld [vmem:[#allocation28_spill] sm:$0xff]  ;;  %v18166_v22 = vld [vmem:[#allocation43_spill] sm:$0xff] }
  0xdb   :  { %v3520_v54 = vcombine.low %v3512_v39, %v14046_v50  ;;  %v14476_v36 = vrot.slane %v14465_v0, %v12917_v20  ;;  %v3554_v40 = vrot.slane %v3546_v46, %v12917_v20  ;;  %v3347_v23 = vcombine.high %v12769_v61, %v12769_v61  ;;  %v18157_v50 = vld [vmem:[#allocation29_spill] sm:$0xff]  ;;  %v18164_v30 = vld [vmem:[#allocation40_spill] sm:$0xff] }
  0xdc   :  { %12363 = vmatmul.mubr.msk.bf16.gmra.mrb[16].mxu0 %vm3010_vm1, %v2015_v62  ;;  %v3503_v42 = vcombine.low %v3495_v52, %v3502_v6  ;;  %v3561_v7 = vrot.slane %v3547_v47, %v12917_v20  ;;  %v11986_v8 = vcombine.high %v18087_v1, %v13313_v28  ;;  %v3571_v26 = vcombine.low %v18158_v21, %v18157_v50  ;;  %v18165_v6 = vld [vmem:[#allocation50_spill] sm:$0xff]  ;;  %v18167_v39 = vld [vmem:[#allocation117_spill] sm:$0xff] }
  0xdd   :  { %12372 = vmatprep.mubr.msk.bf16.mxu0 %vm3010_vm1, %v3875_v9  ;;  %v3521_v38 = vcombine.low %v2022_v2, %v14476_v36  ;;  %v14491_v58 = vrot.slane %v3347_v23, %v12917_v20  ;;  %v3597_v16 = vcombine.low %v18159_v49, %v14132_v41  ;;  %v2024_v37 = vcombine.high %v18101_v53, %v18101_v53  ;;  %v12770_v41 = vld [vmem:[%s17611_s0 + $0x58] sm:$0x3f]  ;;  %v18160_v53 = vld [vmem:[#allocation120_spill] sm:$0xff]  ;;  %v18162_v2 = vld [vmem:[#allocation38_spill] sm:$0xff] }
  0xde   :  { %v3876_v48 = vpack.c.bf16 %v3520_v54, %v3503_v42  ;;  %v3562_v19 = vcombine.low %v3554_v40, %v3561_v7  ;;  %v3570_v28 = vrot.slane %v11986_v8, %v12917_v20  ;;  %v3579_v1 = vrot.slane %v3571_v26, %v12917_v20  ;;  %v18168_v62 = vld [vmem:[#allocation118_spill] sm:$0xff]  ;;  %v12742_v23 = vld [vmem:[%s17612_s1 + $0x44] sm:$0xff]  }
  0xdf   :  { %v3528_v45 = vrot.slane %v3521_v38, %v12917_v20  ;;  %v14502_v11 = vrot.slane %v14491_v58, %v12917_v20  ;;  %v3611_v5 = vrot.slane %v3597_v16, %v12917_v20  ;;  %v3362_v55 = vcombine.high %v12770_v41, %v12770_v41  ;;  %v12771_v54 = vld [vmem:[%s17611_s0 + $0x70] sm:$0x3f] }
  0xe0   :  { %v3572_v60 = vcombine.low %v18160_v53, %v3570_v28  ;;  %v3613_v4 = vcombine.low %v18162_v2, %v18161_v10  ;;  %v3614_v18 = vcombine.low %v18164_v30, %v18163_v13  ;;  %v3639_v9 = vcombine.low %v18166_v22, %v18165_v6  ;;  %v18169_v28 = vld [vmem:[#allocation53_spill] sm:$0xff]  ;;  %v18173_v2 = vld [vmem:[#allocation30_spill] sm:$0xff]  ;;  %v18175_v6 = vld [vmem:[#allocation55_spill] sm:$0xff] }
  0xe1   :  { %v3530_v46 = vcombine.low %v3528_v45, %v18167_v39  ;;  %v3588_v52 = vcombine.low %v14502_v11, %v18168_v62  ;;  %v14519_v47 = vrot.slane %v3362_v55, %v12917_v20  ;;  %v3377_v40 = vcombine.high %v12771_v54, %v12771_v54  ;;  %v18170_v45 = vld [vmem:[#allocation44_spill] sm:$0xff]  ;;  %v18171_v55 = vld [vmem:[#allocation67_spill] sm:$0xff]  ;;  %v18172_v53 = vld [vmem:[#allocation45_spill] sm:$0xff] }
  0xe2   :  { %v3586_v61 = vrot.slane %v3572_v60, %v12917_v20  ;;  %v3621_v42 = vrot.slane %v3613_v4, %v12917_v20  ;;  %v3628_v7 = vrot.slane %v3614_v18, %v12917_v20  ;;  %v3653_v8 = vrot.slane %v3639_v9, %v12917_v20  ;;  %v18174_v18 = vld [vmem:[#allocation56_spill] sm:$0xff]  ;;  %v18176_v9 = vld [vmem:[#allocation122_spill] sm:$0xff]  ;;  %v18177_v39 = vld [vmem:[#allocation57_spill] sm:$0xff] }
  0xe3   :  { %v3544_v50 = vrot.slane %v3530_v46, %v12917_v20  ;;  %v3595_v21 = vrot.slane %v3588_v52, %v12917_v20  ;;  %v14535_v26 = vrot.slane %v14519_v47, %v12917_v20  ;;  %v14538_v38 = vrot.slane %v3377_v40, %v12917_v20 }
  0xe4   :  { %12373 = vmatmul.mubr.msk.bf16.vlgmr.msra.gmra.mrb[0].mxu0 %vm3010_vm1, %v3876_v48  ;;  %v3587_v49 = vcombine.low %v3579_v1, %v3586_v61  ;;  %v3629_v16 = vcombine.low %v3621_v42, %v3628_v7  ;;  %v3655_v41 = vcombine.low %v18170_v45, %v18169_v28  ;;  %v3656_v60 = vcombine.low %v18172_v53, %v18171_v55  ;;  %v18180_v55 = vld [vmem:[#allocation59_spill] sm:$0xff] }
  0xe5   :  { %12393 = vmatpush3.bf16.msra.mxu0 %v14312_v43  ;;  %v3545_v10 = vcombine.low %v3537_v34, %v3544_v50  ;;  %v3596_v4 = vcombine.low %v3595_v21, %v18173_v2  ;;  %v3630_v13 = vcombine.low %v2024_v37, %v14535_v26  ;;  %v14550_v30 = vrot.slane %v14538_v38, %v12917_v20  ;;  %v12746_v34 = vld [vmem:[%s17612_s1 + $0x4c] ss:$0 sps:$4 sm:$0xff]   ;;  %v18181_v2 = vld [vmem:[#allocation74_spill] sm:$0xff] }
  0xe6   :  { %12394 = vmatprep.subr.bf16.mxu0 %v12742_v23  ;;  %v3663_v48 = vrot.slane %v3655_v41, %v12917_v20  ;;  %v3670_v1 = vrot.slane %v3656_v60, %v12917_v20  ;;  %v11987_v22 = vcombine.high %v18175_v6, %v18174_v18  ;;  %v3688_v43 = vcombine.low %v18177_v39, %v18176_v9  ;;  %v18179_v41 = vld [vmem:[#allocation70_spill] sm:$0xff]  ;;  %v18184_v9 = vld [vmem:[#allocation84_spill] sm:$0xff] }
  0xe7   :  { %v3877_v37 = vpack.c.bf16 %v3562_v19, %v3545_v10  ;;  %v3604_v46 = vrot.slane %v3596_v4, %v12917_v20  ;;  %v3637_v62 = vrot.slane %v3630_v13, %v12917_v20  ;;  %v3673_v52 = vcombine.low %v14550_v30, %v14210_v35  ;;  %v18178_v19 = vld [vmem:[#allocation41_spill] sm:$0xff]  ;;  %v18182_v13 = vld [vmem:[#allocation82_spill] sm:$0xff] }
  0xe8   :  { %v3671_v54 = vcombine.low %v3663_v48, %v3670_v1  ;;  %v3680_v40 = vrot.slane %v11987_v22, %v12917_v20  ;;  %v3696_v61 = vrot.slane %v3688_v43, %v12917_v20  ;;  %v3705_v42 = vcombine.low %v14251_v32, %v14254_v31  ;;  %v18183_v48 = vld [vmem:[#allocation73_spill] sm:$0xff] }
  0xe9   :  { %12376 = vmatprep.mubr.msk.bf16.mxu0 %vm3010_vm1, %v3877_v37  ;;  %v3612_v7 = vcombine.low %v3604_v46, %v3611_v5  ;;  %12395 = vmatpush3.bf16.msra.mxu0 %v12742_v23  ;;  %v3638_v50 = vcombine.low %v18178_v19, %v3637_v62  ;;  %v3687_v21 = vrot.slane %v3673_v52, %v12917_v20  ;;  %v4634_v23 = vsel %vm3041_vm0, %v12746_v34, 0  ;;  %v18186_v37 = vld [vmem:[#allocation71_spill] sm:$0xff]  ;;  %v18187_v52 = vld [vmem:[#allocation16_spill] sm:$0xff] }
  0xea   :  { %v3706_v28 = vcombine.low %v14257_v44, %v14261_v63  ;;  %v3713_v35 = vrot.slane %v3705_v42, %v12917_v20  ;;  %v3722_v45 = vcombine.low %v14264_v27, %v14268_v17  ;;  %v3723_v53 = vcombine.low %v18180_v55, %v18179_v41  ;;  %12707 = vmatprep.subr.msk.bf16.mxu0 %vm3041_vm0, %v12746_v34  ;;  %v12772_v27 = vld [vmem:[%s17611_s0 + $0x88] sm:$0x3f]  ;;  %v18191_v41 = vld [vmem:[#allocation18_spill] sm:$0xff]  ;;  %v18192_v55 = vld [vmem:[#allocation20_spill] sm:$0xff] }
  0xeb   :  { %v3878_v32 = vpack.c.bf16 %v3612_v7, %v3587_v49  ;;  %v3646_v31 = vrot.slane %v3638_v50, %v12917_v20  ;;  %v3689_v5 = vcombine.low %v3680_v40, %v3687_v21  ;;  %v3392_v17 = vcombine.high %v12772_v27, %v12772_v27  ;;  %v18188_v40 = vld [vmem:[#allocation17_spill] sm:$0xff]  ;;  %v18190_v21 = vld [vmem:[#allocation96_spill] sm:$0xff]  ;;  %v18196_v27 = vld [vmem:[#allocation7_spill] sm:$0xff] }
  0xec   :  { %v3720_v60 = vrot.slane %v3706_v28, %v12917_v20  ;;  %v3730_v44 = vrot.slane %v3722_v45, %v12917_v20  ;;  %v3737_v63 = vrot.slane %v3723_v53, %v12917_v20  ;;  %v2026_v4 = vcombine.high %v18181_v2, %v18181_v2 }
  0xed   :  { %12377 = vmatmul.mubr.msk.bf16.gmra.mrb[4].mxu0 %vm3010_vm1, %v3878_v32  ;;  %v3654_v10 = vcombine.low %v3646_v31, %v3653_v8  ;;  %v3703_v49 = vrot.slane %v3689_v5, %v12917_v20  ;;  %v3764_v1 = vcombine.low %v18183_v48, %v18182_v13  ;;  %v14595_v22 = vrot.slane %v3392_v17, %v12917_v20  ;;  %v18185_v8 = vld [vmem:[#allocation72_spill] sm:$0xff]  ;;  %v18199_v48 = vld [vmem:[#allocation9_spill] sm:$0xff] }
  0xee   :  { %v3721_v18 = vcombine.low %v3713_v35, %v3720_v60  ;;  %v3738_v6 = vcombine.low %v3730_v44, %v3737_v63  ;;  %v3765_v39 = vcombine.low %v18184_v9, %v14369_v14  ;;  %12397 = vmatpush3.bf16.msra.mxu0 %v4634_v23  ;;  %v3748_v46 = vcombine.low %v18186_v37, %v18185_v8  ;;  %v18195_v63 = vld [vmem:[#allocation6_spill] sm:$0xff]  ;;  %v18198_v13 = vld [vmem:[#allocation8_spill] sm:$0xff]  ;;  %v18202_v9 = vld [vmem:[#allocation83_spill] sm:$0xff] }
  0xef   :  { %v3879_v43 = vpack.c.bf16 %v3654_v10, %v3629_v16  ;;  %v3704_v34 = vcombine.low %v3696_v61, %v3703_v49  ;;  %v3772_v62 = vrot.slane %v3764_v1, %v12917_v20  ;;  %v18189_v42 = vcombine.low %v18187_v52, %v18188_v40  ;;  %v12773_v16 = vld [vmem:[%s17611_s0 + $0xa0] sm:$0x3f]  ;;  %v18204_v8 = vld [vmem:[#allocation11_spill] sm:$0xff] }
  0xf0   :  { %v14610_v19 = vrot.slane %v14595_v22, %v12917_v20  ;;  %v3779_v14 = vrot.slane %v3765_v39, %v12917_v20  ;;  %v3407_v61 = vcombine.high %v12773_v16, %v12773_v16  ;;  %v11988_v28 = vcombine.high %v18190_v21, %v18149_v56  ;;  %v18209_v21 = vld [vmem:[#allocation14_spill] sm:$0xff] }
  0xf1   :  { %v14606_v7 = vrot.slane %v18189_v42, %v12917_v20  ;;  %12380 = vmatprep.mubr.msk.bf16.mxu0 %vm3010_vm1, %v3879_v43  ;;  %v3880_v50 = vpack.c.bf16 %v3704_v34, %v3671_v54  ;;  %v3814_v35 = vcombine.low %v14384_v57, %v14387_v29  ;;  %v3815_v45 = vcombine.low %v14392_v59, %v14416_v51  ;;  %v18194_v29 = vld [vmem:[#allocation104_spill] sm:$0xff]  ;;  %v18203_v34 = vld [vmem:[#allocation10_spill] sm:$0xff] }
  0xf2   :  { %v18193_v53 = vcombine.low %v18191_v41, %v18192_v55  ;;  %v3881_v31 = vpack.c.bf16 %v3738_v6, %v3721_v18  ;;  %v3739_v5 = vcombine.low %v2026_v4, %v14610_v19  ;;  %v14631_v54 = vrot.slane %v3407_v61, %v12917_v20  ;;  %v18206_v42 = vld [vmem:[#allocation12_spill] sm:$0xff] }
  0xf3   :  { %v3762_v56 = vrot.slane %v3748_v46, %v12917_v20  ;;  %v3780_v23 = vcombine.low %v3772_v62, %v3779_v14  ;;  %v3789_v57 = vrot.slane %v11988_v28, %v12917_v20  ;;  %v3422_v59 = vcombine.high %v18194_v29, %v18194_v29  ;;  %v18207_v14 = vld [vmem:[#allocation13_spill] sm:$0xff] }
  0xf4   :  { %v14627_v32 = vrot.slane %v18193_v53, %v12917_v20  ;;  %v3746_v51 = vrot.slane %v3739_v5, %v12917_v20  ;;  %v14640_v60 = vrot.slane %v14631_v54, %v12917_v20  ;;  %v2028_v44 = vcombine.high %v18153_v15, %v18153_v15  ;;  %v18201_v15 = vld [vmem:[#allocation69_spill] sm:$0xff] }
  0xf5   :  { %v18197_v17 = vcombine.low %v18195_v63, %v18196_v27  ;;  %12381 = vmatmul.mubr.msk.bf16.gmra.mrb[8].mxu0 %vm3010_vm1, %v3880_v50  ;;  %v3822_v49 = vrot.slane %v3814_v35, %v12917_v20  ;;  %v3829_v2 = vrot.slane %v3815_v45, %v12917_v20  ;;  %v14652_v4 = vrot.slane %v3422_v59, %v12917_v20 }
  0xf6   :  { %v18200_v1 = vcombine.low %v18198_v13, %v18199_v48  ;;  %12384 = vmatprep.mubr.msk.bf16.mxu0 %vm3010_vm1, %v3881_v31  ;;  %v3747_v6 = vcombine.low %v3746_v51, %v18201_v15  ;;  %v3782_v39 = vcombine.low %v14640_v60, %v18202_v9  ;;  %v3797_v43 = vcombine.low %v14372_v24, %v3789_v57  ;;  %v18211_v57 = vld [vmem:[#allocation116_spill] sm:$0xff]  ;;  %v18217_v15 = vld [vmem:[#allocation22_spill] sm:$0xff] }
  0xf7   :  { %v4142_v10 = vrot.slane %v18197_v17, %v12917_v20  ;;  %v18205_v37 = vcombine.low %v18203_v34, %v18204_v8  ;;  %v14669_v62 = vrot.slane %v14652_v4, %v12917_v20  ;;  %v3839_v52 = vcombine.low %v14419_v25, %v14422_v33 }
  0xf8   :  { %v4149_v18 = vrot.slane %v18200_v1, %v12917_v20  ;;  %v18208_v16 = vcombine.low %v18206_v42, %v18207_v14  ;;  %v3755_v24 = vrot.slane %v3747_v6, %v12917_v20  ;;  %v3796_v50 = vrot.slane %v3782_v39, %v12917_v20  ;;  %v18216_v1 = vld [vmem:[#allocation19_spill] sm:$0xff]  ;;  %v18218_v6 = vld [vmem:[#allocation21_spill] sm:$0xff] }
  0xf9   :  { %v4159_v46 = vrot.slane %v18205_v37, %v12917_v20  ;;  %v18210_v28 = vcombine.high %v18209_v21, %v18209_v21  ;;  %v4217_v45 = vcombine.low %v14606_v7, %v14627_v32  ;;  %v3830_v41 = vcombine.low %v3822_v49, %v3829_v2  ;;  %v18214_v49 = vld [vmem:[#allocation32_spill] sm:$0xff]  ;;  %v18215_v2 = vld [vmem:[#allocation25_spill] sm:$0xff]  ;;  %v18219_v39 = vld [vmem:[#allocation31_spill] sm:$0xff] }
  0xfa   :  { %v4150_v40 = vcombine.low %v4142_v10, %v4149_v18  ;;  %v4166_v61 = vrot.slane %v18208_v16, %v12917_v20  ;;  %v3831_v25 = vcombine.low %v2028_v44, %v14669_v62  ;;  %v4078_v55 = vcombine.high %v14465_v0, %v14465_v0  ;;  %v18212_v0 = vld [vmem:[#allocation27_spill] sm:$0xff] }
  0xfb   :  { %v4077_v35 = vrot.slane %v18210_v28, %v12917_v20  ;;  %v3763_v53 = vcombine.low %v3755_v24, %v3762_v56  ;;  %v3798_v31 = vcombine.low %v3796_v50, %v14379_v12  ;;  %v3805_v5 = vrot.slane %v3797_v43, %v12917_v20  ;;  %v18213_v56 = vld [vmem:[#allocation24_spill] sm:$0xff]  ;;  %v18221_v16 = vld [vmem:[#allocation119_spill] sm:$0xff] }
  0xfc   :  { %v4167_v33 = vcombine.low %v4159_v46, %v4166_v61  ;;  %v3838_v59 = vrot.slane %v3831_v25, %v12917_v20  ;;  %v3847_v51 = vrot.slane %v3839_v52, %v12917_v20  ;;  %v4085_v7 = vrot.slane %v4078_v55, %v12917_v20  ;;  %v18222_v61 = vld [vmem:[#allocation26_spill] sm:$0xff]  ;;  %v18224_v55 = vld [vmem:[#allocation33_spill] sm:$0xff] }
  0xfd   :  { %v4169_v29 = vcombine.low %v4077_v35, %v18211_v57  ;;  %v3882_v32 = vpack.c.bf16 %v3780_v23, %v3763_v53  ;;  %v3812_v44 = vrot.slane %v3798_v31, %v12917_v20  ;;  %v4243_v17 = vcombine.low %v18213_v56, %v18212_v0  ;;  %v18225_v31 = vld [vmem:[#allocation35_spill] sm:$0xff] }
  0xfe   :  { %v4572_v63 = vpack.c.bf16 %v4167_v33, %v4150_v40  ;;  %v3840_v12 = vcombine.low %v14425_v3, %v3838_v59  ;;  %v4218_v10 = vcombine.low %v14476_v36, %v4085_v7  ;;  %v4244_v13 = vcombine.low %v18215_v2, %v18214_v49  ;;  %v18220_v40 = vld [vmem:[#allocation23_spill] sm:$0xff]  ;;  %v18223_v33 = vld [vmem:[#allocation34_spill] sm:$0xff]  ;;  %v18226_v59 = vld [vmem:[#allocation36_spill] sm:$0xff] }
  0xff   :  { %v4183_v27 = vrot.slane %v4169_v29, %v12917_v20  ;;  %v4086_v48 = vcombine.high %v14491_v58, %v14491_v58  ;;  %12385 = vmatmul.mubr.msk.bf16.gmra.mrb[12].mxu0 %vm3010_vm1, %v3882_v32  ;;  %v3813_v23 = vcombine.low %v3805_v5, %v3812_v44  ;;  %v4226_v9 = vcombine.low %v18218_v6, %v18217_v15  ;;  %v18227_v7 = vld [vmem:[#allocation46_spill] sm:$0xff]  ;;  %v18228_v32 = vld [vmem:[#allocation37_spill] sm:$0xff]  ;;  %v18233_v2 = vld [vmem:[#allocation60_spill] sm:$0xff] }
 0x100   :  { %v4260_v43 = vcombine.low %v18219_v39, %v14502_v11  ;;  %v3854_v3 = vrot.slane %v3840_v12, %v12917_v20  ;;  %v4225_v36 = vrot.slane %v4218_v10, %v12917_v20  ;;  %v4251_v37 = vrot.slane %v4243_v17, %v12917_v20  ;;  %v18232_v17 = vld [vmem:[#allocation49_spill] sm:$0xff] }
 0x101   :  { %v4184_v18 = vcombine.low %v18216_v1, %v4183_v27  ;;  %v4093_v34 = vrot.slane %v4086_v48, %v12917_v20  ;;  %v3883_v8 = vpack.c.bf16 %v3830_v41, %v3813_v23  ;;  %v4258_v14 = vrot.slane %v4244_v13, %v12917_v20  ;;  %v18230_v27 = vld [vmem:[#allocation47_spill] sm:$0xff]  ;;  %v18234_v13 = vld [vmem:[#allocation54_spill] sm:$0xff] }
 0x102   :  { %v4267_v46 = vrot.slane %v4260_v43, %v12917_v20  ;;  %v3855_v52 = vcombine.low %v3847_v51, %v3854_v3  ;;  %v4227_v42 = vcombine.low %v4225_v36, %v18220_v40  ;;  %v4234_v50 = vrot.slane %v4226_v9, %v12917_v20  ;;  %v18236_v3 = vld [vmem:[#allocation52_spill] sm:$0xff] }
 0x103   :  { %v4192_v58 = vrot.slane %v4184_v18, %v12917_v20  ;;  %v4285_v11 = vcombine.low %v4093_v34, %v18221_v16  ;;  %12388 = vmatprep.mubr.msk.bf16.mxu0 %vm3010_vm1, %v3883_v8  ;;  %v4094_v21 = vcombine.high %v14519_v47, %v14519_v47  ;;  %v4268_v53 = vcombine.low %v18224_v55, %v18223_v33  ;;  %v18229_v47 = vld [vmem:[#allocation48_spill] sm:$0xff] }
 0x104   :  { %v3884_v28 = vpack.c.bf16 %v3855_v52, %v3855_v52  ;;  %v4241_v35 = vrot.slane %v4227_v42, %v12917_v20  ;;  %v4269_v5 = vcombine.low %v18225_v31, %v4267_v46  ;;  %v4259_v29 = vcombine.low %v4251_v37, %v4258_v14  ;;  %v18237_v34 = vld [vmem:[#allocation68_spill] sm:$0xff]  ;;  %v18238_v37 = vld [vmem:[#allocation62_spill] sm:$0xff]  ;;  %v18239_v46 = vld [vmem:[#allocation61_spill] sm:$0xff] }
 0x105   :  { %v4200_v24 = vcombine.low %v4192_v58, %v18222_v61  ;;  %v4292_v41 = vrot.slane %v4285_v11, %v12917_v20  ;;  %v4101_v57 = vrot.slane %v4094_v21, %v12917_v20  ;;  %v4294_v44 = vcombine.low %v18228_v32, %v18227_v7  ;;  %v18240_v40 = vld [vmem:[#allocation64_spill] sm:$0xff]  ;;  %v18241_v42 = vld [vmem:[#allocation63_spill] sm:$0xff]  ;;  %v18244_v21 = vld [vmem:[#allocation78_spill] sm:$0xff] }
 0x106   :  { %v4310_v0 = vcombine.low %v18230_v27, %v18229_v47  ;;  %v4242_v56 = vcombine.low %v4234_v50, %v4241_v35  ;;  %v4102_v49 = vcombine.high %v14538_v38, %v14538_v38  ;;  %v4336_v48 = vcombine.low %v18234_v13, %v18233_v2  ;;  %v18235_v38 = vld [vmem:[#allocation58_spill] sm:$0xff]  ;;  %v18242_v61 = vld [vmem:[#allocation76_spill] sm:$0xff] }
 0x107   :  { %v4573_v25 = vpack.c.bf16 %v4217_v45, %v4200_v24  ;;  %v4293_v51 = vcombine.low %v4292_v41, %v18226_v59  ;;  %12389 = vmatmul.mubr.msk.bf16.gmra.mrb[16].mxu0 %vm3010_vm1, %v3884_v28  ;;  %v18231_v45 = vld [vmem:[#allocation51_spill] sm:$0xff]  ;;  %v4327_v10 = vcombine.low %v14535_v26, %v4101_v57  ;;  %v4276_v23 = vrot.slane %v4268_v53, %v12917_v20  ;;  %v18245_v28 = vld [vmem:[#allocation77_spill] sm:$0xff]  ;;  %v18246_v55 = vld [vmem:[#allocation80_spill] sm:$0xff] }
 0x108   :  { %v4311_v12 = vcombine.low %v18232_v17, %v18231_v45  ;;  %12398 = vmatprep.mubr.msk.bf16.mxu0 %vm3010_vm1, %v4572_v63  ;;  %v4283_v1 = vrot.slane %v4269_v5, %v12917_v20  ;;  %v4109_v15 = vrot.slane %v4102_v49, %v12917_v20  ;;  %v4308_v26 = vrot.slane %v4294_v44, %v12917_v20  ;;  %v18243_v24 = vld [vmem:[#allocation75_spill] sm:$0xff]  ;;  %v18248_v5 = vld [vmem:[#allocation88_spill] sm:$0xff]  ;;  %v18249_v57 = vld [vmem:[#allocation81_spill] sm:$0xff] }
 0x109   :  { %v4334_v18 = vrot.slane %v4327_v10, %v12917_v20  ;;  %v4301_v6 = vrot.slane %v4293_v51, %v12917_v20  ;;  %v4318_v9 = vrot.slane %v4310_v0, %v12917_v20  ;;  %v4369_v63 = vcombine.low %v18235_v38, %v14550_v30  ;;  %v18247_v53 = vld [vmem:[#allocation79_spill] sm:$0xff]  ;;  %v18250_v59 = vld [vmem:[#allocation66_spill] sm:$0xff]  ;;  %v18251_v51 = vld [vmem:[#allocation65_spill] sm:$0xff] }
 0x10a   :  { %v4574_v39 = vpack.c.bf16 %v4259_v29, %v4242_v56  ;;  %v4325_v43 = vrot.slane %v4311_v12, %v12917_v20  ;;  %v4370_v8 = vcombine.low %v4109_v15, %v18237_v34  ;;  %v4350_v58 = vrot.slane %v4336_v48, %v12917_v20  ;;  %v18253_v38 = vld [vmem:[#allocation92_spill] sm:$0xff] }
 0x10b   :  { %v4335_v36 = vcombine.low %v18236_v3, %v4334_v18  ;;  %v4352_v52 = vcombine.low %v18239_v46, %v18238_v37  ;;  %v4353_v14 = vcombine.low %v18241_v42, %v18240_v40  ;;  %v4377_v16 = vrot.slane %v4369_v63, %v12917_v20  ;;  %v18254_v63 = vld [vmem:[#allocation91_spill] sm:$0xff]  ;;  %v18255_v3 = vld [vmem:[#allocation94_spill] sm:$0xff] }
 0x10c   :  { %v4384_v30 = vrot.slane %v4370_v8, %v12917_v20  ;;  %v4402_v50 = vcombine.low %v18243_v24, %v18242_v61  ;;  %v4403_v35 = vcombine.low %v18245_v28, %v18244_v21  ;;  %v4284_v41 = vcombine.low %v4276_v23, %v4283_v1  ;;  %v18252_v23 = vld [vmem:[#allocation100_spill] sm:$0xff]  ;;  %v18258_v37 = vld [vmem:[#allocation90_spill] sm:$0xff]  ;;  %v18260_v40 = vld [vmem:[#allocation95_spill] sm:$0xff] }
 0x10d   :  { %v4343_v11 = vrot.slane %v4335_v36, %v12917_v20  ;;  %v4309_v33 = vcombine.low %v4301_v6, %v4308_v26  ;;  %v4419_v31 = vcombine.low %v18247_v53, %v18246_v55  ;;  %v4420_v29 = vcombine.low %v18249_v57, %v18248_v5  ;;  %v18256_v36 = vld [vmem:[#allocation93_spill] sm:$0xff]  ;;  %v18266_v55 = vld [vmem:[#allocation106_spill] sm:$0xff] }
 0x10e   :  { %v4385_v7 = vcombine.low %v18251_v51, %v18250_v59  ;;  %v4386_v32 = vcombine.low %v4377_v16, %v4384_v30  ;;  %v4110_v44 = vcombine.high %v14595_v22, %v14595_v22  ;;  %v4326_v47 = vcombine.low %v4318_v9, %v4325_v43  ;;  %v18262_v16 = vld [vmem:[#allocation107_spill] sm:$0xff]  ;;  %v18263_v61 = vld [vmem:[#allocation105_spill] sm:$0xff] }
 0x10f   :  { %12399 = vmatmul.mubr.msk.bf16.vlgmr.msra.gmra.mrb[0].mxu0 %vm3010_vm1, %v4573_v25  ;;  %v4351_v27 = vcombine.low %v4343_v11, %v4350_v58  ;;  %v4360_v0 = vrot.slane %v4352_v52, %v12917_v20  ;;  %v4367_v56 = vrot.slane %v4353_v14, %v12917_v20  ;;  %v4410_v45 = vrot.slane %v4402_v50, %v12917_v20  ;;  %v18259_v52 = vld [vmem:[#allocation103_spill] sm:$0xff]  ;;  %v18261_v14 = vld [vmem:[#allocation108_spill] sm:$0xff]  ;;  %v18265_v21 = vld [vmem:[#allocation109_spill] sm:$0xff] }
 0x110   :  { %12402 = vmatprep.mubr.msk.bf16.mxu0 %vm3010_vm1, %v4574_v39  ;;  %v4417_v17 = vrot.slane %v4403_v35, %v12917_v20  ;;  %v4117_v25 = vrot.slane %v4110_v44, %v12917_v20  ;;  %v4575_v12 = vpack.c.bf16 %v4309_v33, %v4284_v41  ;;  %v4427_v10 = vrot.slane %v4419_v31, %v12917_v20  ;;  %v18264_v50 = vld [vmem:[#allocation111_spill] sm:$0xff] }
 0x111   :  { %v4434_v49 = vrot.slane %v4420_v29, %v12917_v20  ;;  %v4118_v22 = vcombine.high %v14631_v54, %v14631_v54  ;;  %v4393_v2 = vrot.slane %v4385_v7, %v12917_v20  ;;  %v4400_v13 = vrot.slane %v4386_v32, %v12917_v20 }
 0x112   :  { %v4436_v48 = vcombine.low %v14610_v19, %v4117_v25  ;;  %v4478_v1 = vcombine.low %v18252_v23, %v14640_v60  ;;  %v4576_v18 = vpack.c.bf16 %v4351_v27, %v4326_v47  ;;  %v4368_v15 = vcombine.low %v4360_v0, %v4367_v56  ;;  %v18257_v19 = vld [vmem:[#allocation87_spill] sm:$0xff]  ;;  %v18268_v0 = vld [vmem:[#allocation112_spill] sm:$0xff] }
 0x113   :  { %v4125_v6 = vrot.slane %v4118_v22, %v12917_v20  ;;  %v4418_v26 = vcombine.low %v4410_v45, %v4417_v17  ;;  %v4445_v39 = vcombine.low %v18254_v63, %v18253_v38  ;;  %v4435_v43 = vcombine.low %v4427_v10, %v4434_v49  ;;  %v18269_v45 = vld [vmem:[#allocation114_spill] sm:$0xff]  ;;  %v12025_v23 = vld [vmem:[%s17613_s2] ss:$0 sm:$0xff] }
 0x114   :  { %v4443_v9 = vrot.slane %v4436_v48, %v12917_v20  ;;  %v4486_v54 = vrot.slane %v4478_v1, %v12917_v20  ;;  %v4461_v34 = vcombine.low %v18256_v36, %v18255_v3  ;;  %v4126_v60 = vcombine.high %v14652_v4, %v14652_v4 }
 0x115   :  { %v4479_v8 = vcombine.low %v4125_v6, %v18257_v19  ;;  %v4401_v58 = vcombine.low %v4393_v2, %v4400_v13  ;;  %v4462_v42 = vcombine.low %v18260_v40, %v18259_v52  ;;  %v4511_v11 = vcombine.low %v18262_v16, %v18261_v14 }
 0x116   :  { %v4444_v46 = vcombine.low %v4443_v9, %v18258_v37  ;;  %v4494_v24 = vcombine.low %v18263_v61, %v4486_v54  ;;  %v4512_v4 = vcombine.low %v18265_v21, %v18264_v50  ;;  %v4133_v28 = vrot.slane %v4126_v60, %v12917_v20 }
 0x117   :  { %12403 = vmatmul.mubr.msk.bf16.gmra.mrb[4].mxu0 %vm3010_vm1, %v4575_v12  ;;  %v4493_v30 = vrot.slane %v4479_v8, %v12917_v20  ;;  %v4459_v35 = vrot.slane %v4445_v39, %v12917_v20  ;;  %v4578_v41 = vpack.c.bf16 %v4435_v43, %v4418_v26  ;;  %v4469_v33 = vrot.slane %v4461_v34, %v12917_v20 }
 0x118   :  { %12406 = vmatprep.mubr.msk.bf16.mxu0 %vm3010_vm1, %v4576_v18  ;;  %v4528_v31 = vcombine.low %v14669_v62, %v4133_v28  ;;  %v4577_v5 = vpack.c.bf16 %v4401_v58, %v4368_v15  ;;  %v4452_v57 = vrot.slane %v4444_v46, %v12917_v20  ;;  %v4476_v29 = vrot.slane %v4462_v42, %v12917_v20  ;;  %v18267_v62 = vld [vmem:[#allocation113_spill] sm:$0xff] }
 0x119   :  { %v4495_v53 = vcombine.low %v4493_v30, %v18266_v55  ;;  %v4519_v59 = vrot.slane %v4511_v11, %v12917_v20  ;;  %v4502_v51 = vrot.slane %v4494_v24, %v12917_v20  ;;  %v4526_v32 = vrot.slane %v4512_v4, %v12917_v20 }
 0x11a   :  { %v4535_v44 = vrot.slane %v4528_v31, %v12917_v20  ;;  %v4460_v47 = vcombine.low %v4452_v57, %v4459_v35  ;;  %v4477_v27 = vcombine.low %v4469_v33, %v4476_v29  ;;  %v4536_v56 = vcombine.low %v18268_v0, %v18267_v62 }
 0x11b   :  { %v4509_v7 = vrot.slane %v4495_v53, %v12917_v20  ;;  %v4527_v12 = vcombine.low %v4519_v59, %v4526_v32  ;;  %v5875_v1 = vcombine.high %v12025_v23, %v12025_v23  ;;  %v5882_v18 = vrot.slane %v12025_v23, %v12917_v20 }
 0x11c   :  { %v4537_v17 = vcombine.low %v18269_v45, %v4535_v44  ;;  %v4579_v10 = vpack.c.bf16 %v4477_v27, %v4460_v47  ;;  %v4544_v49 = vrot.slane %v4536_v56, %v12917_v20 }
 0x11d   :  { %v4510_v25 = vcombine.low %v4502_v51, %v4509_v7  ;;  %v5889_v15 = vrot.slane %v5875_v1, %v12917_v20  ;;  %v5890_v6 = vcombine.high %v5882_v18, %v5882_v18  ;;  %v14841_v9 = vrot.slane %v5882_v18, %v12917_v20 }
 0x11e   :  { %v4551_v22 = vrot.slane %v4537_v17, %v12917_v20 }
 0x11f   :  { %12407 = vmatmul.mubr.msk.bf16.gmra.mrb[8].mxu0 %vm3010_vm1, %v4577_v5  ;;  %v4580_v2 = vpack.c.bf16 %v4527_v12, %v4510_v25  ;;  %v5891_v26 = vcombine.high %v5889_v15, %v5889_v15  ;;  %v14844_v38 = vrot.slane %v5890_v6, %v12917_v20  ;;  %v14847_v63 = vrot.slane %v5889_v15, %v12917_v20 }
 0x120   :  { %12410 = vmatprep.mubr.msk.bf16.mxu0 %vm3010_vm1, %v4578_v41  ;;  %v4552_v13 = vcombine.low %v4544_v49, %v4551_v22  ;;  %v14855_v36 = vcombine.high %v14841_v9, %v14841_v9 }
 0x121   :  { %v14850_v39 = vrot.slane %v5891_v26, %v12917_v20  ;;  %v14859_v34 = vcombine.high %v14844_v38, %v14844_v38  ;;  %v14864_v58 = vcombine.high %v14847_v63, %v14847_v63 }
 0x122   :  { %v4581_v48 = vpack.c.bf16 %v4552_v13, %v4552_v13 }
 0x123   :  { %v14870_v46 = vcombine.high %v14850_v39, %v14850_v39 }
 0x127   :  { %12411 = vmatmul.mubr.msk.bf16.gmra.mrb[12].mxu0 %vm3010_vm1, %v4579_v10 }
 0x128   :  { %12414 = vmatprep.mubr.msk.bf16.mxu0 %vm3010_vm1, %v4580_v2 }
 0x12f   :  { %12415 = vmatmul.mubr.msk.bf16.gmra.mrb[16].mxu0 %vm3010_vm1, %v4581_v48 }
 0x1e2   :  { %v12400_v54 = vpop.f32.mrb[0].mxu0 }
 0x1e3   :  { %v4884_v43 = vcombine.high %v12400_v54, %v12400_v54  ;;  %v4891_v3 = vrot.slane %v12400_v54, %v12917_v20  ;;  %v4670_v19 = vpop.f32.mrb[1].mxu0 }
 0x1e4   :  { %v4786_v8 = vcombine.high %v4670_v19, %v4670_v19  ;;  %v4793_v60 = vrot.slane %v4670_v19, %v12917_v20  ;;  %v14866_v37 = vpop.f32.mrb[2].mxu0 }
 0x1e5   :  { %v4898_v52 = vrot.slane %v4884_v43, %v12917_v20  ;;  %v4899_v40 = vcombine.high %v4891_v3, %v4891_v3  ;;  %v4907_v42 = vrot.slane %v4891_v3, %v12917_v20  ;;  %v4933_v14 = vcombine.high %v14866_v37, %v14866_v37  ;;  %v14876_v16 = vpop.f32.mrb[3].mxu0 }
 0x1e6   :  { %v4800_v11 = vrot.slane %v4786_v8, %v12917_v20  ;;  %v4801_v30 = vcombine.high %v4793_v60, %v4793_v60  ;;  %v4809_v61 = vrot.slane %v4793_v60, %v12917_v20  ;;  %v14882_v24 = vrot.slane %v14866_v37, %v12917_v20 }
 0x1e7   :  { %v4900_v50 = vcombine.high %v4898_v52, %v4898_v52  ;;  %v4914_v21 = vrot.slane %v4898_v52, %v12917_v20  ;;  %v4921_v4 = vrot.slane %v4899_v40, %v12917_v20  ;;  %v4929_v28 = vcombine.high %v4907_v42, %v4907_v42 }
 0x1e8   :  { %v14887_v35 = vadd.f32 %v14841_v9, %v4907_v42  ;;  %v4802_v41 = vcombine.high %v4800_v11, %v4800_v11  ;;  %v4816_v33 = vrot.slane %v4800_v11, %v12917_v20  ;;  %v4823_v55 = vrot.slane %v4801_v30, %v12917_v20 }
 0x1e9   :  { %v14892_v53 = vrot.slane %v4900_v50, %v12917_v20  ;;  %v4930_v31 = vcombine.high %v4914_v21, %v4914_v21  ;;  %v4931_v5 = vcombine.high %v4921_v4, %v4921_v4  ;;  %v5949_v57 = vadd.f32 %v14844_v38, %v4921_v4 }
 0x1ea   :  { %v5950_v29 = vadd.f32 %v14855_v36, %v4929_v28  ;;  %v5952_v59 = vadd.f32 %v14844_v38, %v4914_v21  ;;  %v17802_v51 = vmax.f32 %v14887_v35, 0.0  ;;  %v14899_v7 = vrot.slane %v4802_v41, %v12917_v20  ;;  %v14901_v32 = vpop.f32.mrb[4].mxu0 }
 0x1eb   :  { %v4932_v44 = vcombine.high %v14892_v53, %v14892_v53  ;;  %v5951_v47 = vadd.f32 %v14841_v9, %v4931_v5  ;;  %v5953_v27 = vadd.f32 %v14855_v36, %v14892_v53  ;;  %v14909_v62 = vadd.f32 %v14859_v34, %v4930_v31  ;;  %v14911_v0 = vpop.f32.mrb[5].mxu0 }
 0x1ec   :  { %v6101_v56 = vmax.f32 %v5949_v57, 0.0  ;;  %v6102_v45 = vmax.f32 %v5950_v29, 0.0  ;;  %v6104_v17 = vmax.f32 %v5952_v59, 0.0  ;;  %v4831_v25 = vcombine.high %v4809_v61, %v4809_v61  ;;  %v14913_v12 = vpop.f32.mrb[6].mxu0 }
 0x1ed   :  { %v6103_v10 = vmax.f32 %v5951_v47, 0.0  ;;  %v6105_v49 = vmax.f32 %v5953_v27, 0.0  ;;  %v6106_v22 = vmax.f32 %v14909_v62, 0.0  ;;  %v4832_v2 = vcombine.high %v4816_v33, %v4816_v33  ;;  %v14916_v13 = vpop.f32.mrb[7].mxu0 }
 0x1ee   :  { %v14920_v48 = vcombine.low %v17802_v51, %v6101_v56  ;;  %v14922_v23 = vcombine.low %v6101_v56, %v6102_v45  ;;  %v4833_v1 = vcombine.high %v4823_v55, %v4823_v55  ;;  %v4834_v18 = vcombine.high %v14899_v7, %v14899_v7 }
 0x1ef   :  { %v6462_v15 = vcombine.low %v6103_v10, %v6104_v17  ;;  %v6463_v6 = vcombine.low %v6105_v49, %v6106_v22  ;;  %v14928_v26 = vcombine.low %v6104_v17, %v6105_v49  ;;  %v5932_v54 = vadd.f32 %v14841_v9, %v4809_v61 }
 0x1f0   :  { %18270 = vst [vmem:[#allocation85_spill] sm:$0xff] %v14920_v48  ;;  %18271 = vst [vmem:[#allocation89_spill] sm:$0xff] %v14922_v23  ;;  %v5933_v19 = vadd.f32 %v14844_v38, %v4823_v55  ;;  %v5934_v8 = vadd.f32 %v14855_v36, %v4831_v25  ;;  %v5935_v42 = vadd.f32 %v14859_v34, %v4833_v1 }
 0x1f1   :  { %18272 = vst [vmem:[#allocation86_spill] sm:$0xff] %v14928_v26  ;;  %v6472_v60 = vrot.slane %v6462_v15, %v12917_v20  ;;  %v14939_v52 = vrot.slane %v6463_v6, %v12917_v20  ;;  %v5936_v11 = vadd.f32 %v14847_v63, %v4816_v33  ;;  %v14947_v30 = vadd.f32 %v14850_v39, %v14899_v7 }
 0x1f2   :  { %v14950_v61 = vadd.f32 %v14864_v58, %v4832_v2  ;;  %v6084_v50 = vmax.f32 %v5932_v54, 0.0  ;;  %v14952_v21 = vpop.f32.mrb[8].mxu0  ;;  %v6085_v28 = vmax.f32 %v5933_v19, 0.0  ;;  %v6086_v41 = vmax.f32 %v5934_v8, 0.0 }
 0x1f3   :  { %v14955_v4 = vcombine.low %v6472_v60, %v14939_v52  ;;  %v6087_v55 = vmax.f32 %v5935_v42, 0.0  ;;  %v14957_v53 = vpop.f32.mrb[9].mxu0  ;;  %v6088_v31 = vmax.f32 %v5936_v11, 0.0  ;;  %v17803_v33 = vmax.f32 %v14947_v30, 0.0 }
 0x1f4   :  { %v4947_v57 = vrot.slane %v4933_v14, %v12917_v20  ;;  %v14965_v29 = vpop.f32.mrb[10].mxu0  ;;  %v6364_v47 = vcombine.low %v6084_v50, %v6085_v28  ;;  %v14969_v56 = vcombine.low %v6085_v28, %v6086_v41  ;;  %v4948_v37 = vcombine.high %v14882_v24, %v14882_v24 }
 0x1f5   :  { %v6502_v59 = vrot.slane %v14955_v4, %v12917_v20  ;;  %v6365_v27 = vcombine.low %v6086_v41, %v6087_v55  ;;  %v14971_v45 = vpop.f32.mrb[11].mxu0  ;;  %v6366_v17 = vcombine.low %v6088_v31, %v17803_v33  ;;  %v14975_v25 = vcombine.low %v6087_v55, %v6088_v31 }
 0x1f6   :  { %v4949_v14 = vcombine.high %v4947_v57, %v4947_v57  ;;  %v6374_v10 = vrot.slane %v6364_v47, %v12917_v20  ;;  %v4956_v2 = vrot.slane %v14882_v24, %v12917_v20  ;;  %v4963_v1 = vrot.slane %v4947_v57, %v12917_v20 }
 0x1f7   :  { %v14981_v49 = vrot.slane %v6365_v27, %v12917_v20  ;;  %v14987_v15 = vrot.slane %v6366_v17, %v12917_v20  ;;  %v4970_v6 = vrot.slane %v4948_v37, %v12917_v20  ;;  %v5955_v19 = vadd.f32 %v14847_v63, %v4932_v44 }
 0x1f8   :  { %v14991_v54 = vrot.slane %v4949_v14, %v12917_v20  ;;  %v4978_v60 = vcombine.high %v4956_v2, %v4956_v2  ;;  %v4979_v42 = vcombine.high %v4963_v1, %v4963_v1  ;;  %v5956_v11 = vadd.f32 %v14850_v39, %v4956_v2 }
 0x1f9   :  { %18273 = vst [vmem:[#allocation101_spill] sm:$0xff] %v14981_v49  ;;  %18274 = vst [vmem:[#allocation99_spill] sm:$0xff] %v14987_v15  ;;  %v14995_v8 = vcombine.low %v6374_v10, %v14981_v49  ;;  %v4980_v24 = vcombine.high %v4970_v6, %v4970_v6  ;;  %v5957_v28 = vadd.f32 %v14864_v58, %v4970_v6  ;;  %v6107_v47 = vmax.f32 %v5955_v19, 0.0 }
 0x1fa   :  { %v5960_v41 = vadd.f32 %v14844_v38, %v4963_v1  ;;  %v15002_v55 = vpop.f32.mrb[12].mxu0  ;;  %v5958_v31 = vadd.f32 %v14870_v46, %v4978_v60  ;;  %v5961_v44 = vadd.f32 %v14855_v36, %v14991_v54  ;;  %v15008_v57 = vadd.f32 %v14859_v34, %v4979_v42 }
 0x1fb   :  { %18275 = vst [vmem:[#allocation97_spill] sm:$0xff] %v14995_v8  ;;  %v15010_v27 = vpop.f32.mrb[13].mxu0  ;;  %v5959_v17 = vadd.f32 %v14841_v9, %v4980_v24  ;;  %v6108_v37 = vmax.f32 %v5956_v11, 0.0  ;;  %v6109_v14 = vmax.f32 %v5957_v28, 0.0  ;;  %v7281_v43 = vcombine.low %v6106_v22, %v6107_v47 }
 0x1fc   :  { %v6112_v10 = vmax.f32 %v5960_v41, 0.0  ;;  %v15013_v2 = vpop.f32.mrb[14].mxu0  ;;  %v6110_v1 = vmax.f32 %v5958_v31, 0.0  ;;  %v6113_v6 = vmax.f32 %v5961_v44, 0.0  ;;  %v17804_v60 = vmax.f32 %v15008_v57, 0.0 }
 0x1fd   :  { %v6111_v40 = vmax.f32 %v5959_v17, 0.0  ;;  %v6464_v42 = vcombine.low %v6107_v47, %v6108_v37  ;;  %v7282_v3 = vcombine.low %v6108_v37, %v6109_v14  ;;  %v4835_v19 = vcombine.high %v14876_v16, %v14876_v16 }
 0x1fe   :  { %v6465_v51 = vcombine.low %v6109_v14, %v6110_v1  ;;  %v6512_v11 = vcombine.low %v6113_v6, %v17804_v60  ;;  %v15023_v24 = vrot.slane %v7281_v43, %v12917_v20  ;;  %v7329_v28 = vcombine.low %v6112_v10, %v6113_v6 }
 0x1ff   :  { %v6486_v41 = vrot.slane %v6464_v42, %v12917_v20  ;;  %v6511_v31 = vcombine.low %v6111_v40, %v6112_v10  ;;  %v7283_v44 = vcombine.low %v6110_v1, %v6111_v40  ;;  %v15027_v62 = vrot.slane %v7282_v3, %v12917_v20 }
 0x200   :  { %18276 = vst [vmem:[#allocation98_spill] sm:$0xff] %v15023_v24  ;;  %v6493_v22 = vrot.slane %v6465_v51, %v12917_v20  ;;  %v15031_v47 = vrot.slane %v6512_v11, %v12917_v20  ;;  %v15034_v17 = vrot.slane %v7329_v28, %v12917_v20  ;;  %v4842_v43 = vrot.slane %v14876_v16, %v12917_v20 }
 0x201   :  { %18277 = vst [vmem:[#allocation102_spill] sm:$0xff] %v15027_v62  ;;  %v6521_v37 = vrot.slane %v6511_v31, %v12917_v20  ;;  %v15040_v14 = vrot.slane %v7283_v44, %v12917_v20  ;;  %v8298_v40 = vcombine.low %v14939_v52, %v6486_v41  ;;  %v8812_v3 = vcombine.low %v15023_v24, %v15027_v62  ;;  %v15059_v44 = vpop.f32.mrb[15].mxu0 }
 0x202   :  { %18278 = vst [vmem:[#allocation110_spill] sm:$0xff] %v15034_v17  ;;  %v6495_v51 = vcombine.low %v6486_v41, %v6493_v22  ;;  %v4849_v10 = vrot.slane %v4835_v19, %v12917_v20  ;;  %v4850_v1 = vcombine.high %v4842_v43, %v4842_v43  ;;  %v4858_v6 = vrot.slane %v4842_v43, %v12917_v20 }
 0x203   :  { %18279 = vst [vmem:[#allocation115_spill] sm:$0xff] %v15040_v14  ;;  %v6543_v42 = vcombine.low %v6521_v37, %v15031_v47  ;;  %v8299_v11 = vcombine.low %v6493_v22, %v6521_v37  ;;  %v15051_v28 = vrot.slane %v8298_v40, %v12917_v20  ;;  %v8813_v31 = vcombine.low %v15040_v14, %v15034_v17 }
 0x204   :  { %v6509_v52 = vrot.slane %v6495_v51, %v12917_v20  ;;  %v15057_v41 = vrot.slane %v8812_v3, %v12917_v20  ;;  %v4851_v19 = vcombine.high %v4849_v10, %v4849_v10  ;;  %v4865_v22 = vrot.slane %v4849_v10, %v12917_v20 }
 0x205   :  { %18280 = vst [vmem:[#allocation15_spill] sm:$0xff] %v15051_v28  ;;  %v15062_v43 = vrot.slane %v6543_v42, %v12917_v20  ;;  %v15065_v16 = vrot.slane %v8299_v11, %v12917_v20  ;;  %v4872_v37 = vrot.slane %v4850_v1, %v12917_v20  ;;  %v15075_v3 = vrot.slane %v8813_v31, %v12917_v20 }
 0x206   :  { %18281 = vst [vmem:[#allocation29_spill] sm:$0xff] %v15057_v41  ;;  %v15072_v40 = vcombine.low %v6502_v59, %v6509_v52  ;;  %v4879_v51 = vrot.slane %v4851_v19, %v12917_v20  ;;  %v4880_v33 = vcombine.high %v4858_v6, %v4858_v6  ;;  %v4881_v11 = vcombine.high %v4865_v22, %v4865_v22 }
 0x207   :  { %18282 = vst [vmem:[#allocation28_spill] sm:$0xff] %v15062_v43  ;;  %18283 = vst [vmem:[#allocation121_spill] sm:$0xff] %v15065_v16  ;;  %v4882_v60 = vcombine.high %v4872_v37, %v4872_v37  ;;  %v5939_v10 = vadd.f32 %v14870_v46, %v4834_v18  ;;  %v5940_v1 = vadd.f32 %v14841_v9, %v4858_v6 }
 0x208   :  { %18284 = vst [vmem:[#allocation120_spill] sm:$0xff] %v15072_v40  ;;  %18285 = vst [vmem:[#allocation39_spill] sm:$0xff] %v15075_v3  ;;  %v4883_v59 = vcombine.high %v4879_v51, %v4879_v51  ;;  %v5941_v52 = vadd.f32 %v14844_v38, %v4872_v37  ;;  %v5942_v31 = vadd.f32 %v14855_v36, %v4880_v33 }
 0x209   :  { %v5943_v19 = vadd.f32 %v14859_v34, %v4882_v60  ;;  %v5944_v42 = vadd.f32 %v14847_v63, %v4865_v22  ;;  %v15092_v50 = vadd.f32 %v14850_v39, %v4879_v51  ;;  %v15095_v7 = vadd.f32 %v14864_v58, %v4881_v11 }
 0x20a   :  { %v15098_v18 = vadd.f32 %v14870_v46, %v4883_v59  ;;  %v6091_v4 = vmax.f32 %v5939_v10, 0.0  ;;  %v6092_v5 = vmax.f32 %v5940_v1, 0.0  ;;  %v6093_v6 = vmax.f32 %v5941_v52, 0.0 }
 0x20b   :  { %v6094_v3 = vmax.f32 %v5942_v31, 0.0  ;;  %v6095_v37 = vmax.f32 %v5943_v19, 0.0  ;;  %v6096_v41 = vmax.f32 %v5944_v42, 0.0  ;;  %v17811_v33 = vmax.f32 %v15092_v50, 0.0 }
 0x20c   :  { %v17812_v60 = vmax.f32 %v15095_v7, 0.0  ;;  %v17810_v22 = vmax.f32 %v15098_v18, 0.0  ;;  %v18286_v51 = vmax.f32 %v14950_v61, 0.0  ;;  %v6413_v11 = vcombine.low %v6092_v5, %v6093_v6 }
 0x20d   :  { %v6414_v28 = vcombine.low %v6094_v3, %v6095_v37  ;;  %v15105_v48 = vcombine.low %v6091_v4, %v6092_v5  ;;  %v15107_v59 = vcombine.low %v6093_v6, %v6094_v3  ;;  %v6415_v42 = vcombine.low %v6096_v41, %v17811_v33 }
 0x20e   :  { %v6367_v16 = vcombine.low %v18286_v51, %v6091_v4  ;;  %v6416_v1 = vcombine.low %v17812_v60, %v17810_v22  ;;  %v15118_v52 = vcombine.low %v6095_v37, %v6096_v41  ;;  %v15121_v31 = vrot.slane %v6413_v11, %v12917_v20 }
 0x20f   :  { %v15124_v5 = vrot.slane %v6414_v28, %v12917_v20  ;;  %v5087_v3 = vrot.slane %v14901_v32, %v12917_v20  ;;  %v15131_v4 = vrot.slane %v6415_v42, %v12917_v20  ;;  %v4982_v41 = vcombine.high %v14911_v0, %v14911_v0  ;;  %v12749_v28 = vld [vmem:[%s17614_s3 + $0x8] sm:$0xff]  }
 0x210   :  { %v15110_v10 = vrot.slane %v6367_v16, %v12917_v20  ;;  %18288 = vst [vmem:[#allocation42_spill] sm:$0xff] %v15121_v31  ;;  %v5080_v16 = vcombine.high %v14901_v32, %v14901_v32  ;;  %v15134_v19 = vrot.slane %v6416_v1, %v12917_v20  ;;  %v4989_v6 = vrot.slane %v14911_v0, %v12917_v20 }
 0x211   :  { %18289 = vst [vmem:[#allocation40_spill] sm:$0xff] %v15124_v5  ;;  %18290 = vst [vmem:[#allocation50_spill] sm:$0xff] %v15131_v4  ;;  %v5095_v11 = vcombine.high %v5087_v3, %v5087_v3  ;;  %v5103_v42 = vrot.slane %v5087_v3, %v12917_v20  ;;  %v4996_v1 = vrot.slane %v4982_v41, %v12917_v20  ;;  %12418 = vmatprep.subr.bf16.mxu1 %v12749_v28 }
 0x212   :  { %18287 = vst [vmem:[#allocation38_spill] sm:$0xff] %v15110_v10  ;;  %18291 = vst [vmem:[#allocation43_spill] sm:$0xff] %v15134_v19  ;;  %v5094_v51 = vrot.slane %v5080_v16, %v12917_v20  ;;  %v4997_v22 = vcombine.high %v4989_v6, %v4989_v6  ;;  %v5005_v0 = vrot.slane %v4989_v6, %v12917_v20  ;;  %12419 = vmatpush3.bf16.msra.mxu1 %v12749_v28 }
 0x213   :  { %v5117_v49 = vrot.slane %v5095_v11, %v12917_v20  ;;  %v18292_v37 = vcombine.high %v14991_v54, %v14991_v54  ;;  %v5125_v16 = vcombine.high %v5103_v42, %v5103_v42  ;;  %v15158_v3 = vadd.f32 %v14855_v36, %v5103_v42 }
 0x214   :  { %v5096_v33 = vcombine.high %v5094_v51, %v5094_v51  ;;  %v5110_v60 = vrot.slane %v5094_v51, %v12917_v20  ;;  %v4998_v41 = vcombine.high %v4996_v1, %v4996_v1  ;;  %v5012_v40 = vrot.slane %v4996_v1, %v12917_v20 }
 0x215   :  { %v5963_v32 = vadd.f32 %v14847_v63, %v18292_v37  ;;  %v5127_v51 = vcombine.high %v5117_v49, %v5117_v49  ;;  %v5981_v11 = vadd.f32 %v14859_v34, %v5117_v49  ;;  %v5982_v31 = vadd.f32 %v14847_v63, %v5125_v16 }
 0x216   :  { %v15162_v6 = vrot.slane %v5096_v33, %v12917_v20  ;;  %v5126_v5 = vcombine.high %v5110_v60, %v5110_v60  ;;  %v5984_v54 = vadd.f32 %v14864_v58, %v5110_v60  ;;  %v5019_v37 = vrot.slane %v4997_v22, %v12917_v20 }
 0x217   :  { %v5983_v1 = vadd.f32 %v14850_v39, %v5127_v51  ;;  %v6133_v49 = vmax.f32 %v5981_v11, 0.0  ;;  %v6134_v19 = vmax.f32 %v5982_v31, 0.0  ;;  %v15178_v60 = vrot.slane %v4998_v41, %v12917_v20 }
 0x218   :  { %v5985_v33 = vadd.f32 %v14870_v46, %v15162_v6  ;;  %v15175_v4 = vadd.f32 %v14841_v9, %v5126_v5  ;;  %v6136_v16 = vmax.f32 %v5984_v54, 0.0  ;;  %v5027_v15 = vcombine.high %v5005_v0, %v5005_v0 }
 0x219   :  { %v6135_v28 = vmax.f32 %v5983_v1, 0.0  ;;  %v18293_v42 = vmax.f32 %v15158_v3, 0.0  ;;  %v7428_v10 = vcombine.low %v6133_v49, %v6134_v19  ;;  %v5028_v17 = vcombine.high %v5012_v40, %v5012_v40 }
 0x21a   :  { %v6137_v8 = vmax.f32 %v5985_v33, 0.0  ;;  %v17827_v22 = vmax.f32 %v15175_v4, 0.0  ;;  %v5029_v14 = vcombine.high %v5019_v37, %v5019_v37  ;;  %v5966_v33 = vadd.f32 %v14870_v46, %v5027_v15 }
 0x21b   :  { %v6610_v51 = vcombine.low %v18293_v42, %v6133_v49  ;;  %v6611_v62 = vcombine.low %v6134_v19, %v6135_v28  ;;  %v7429_v26 = vcombine.low %v6135_v28, %v6136_v16  ;;  %v15191_v11 = vrot.slane %v7428_v10, %v12917_v20 }
 0x21c   :  { %v6612_v5 = vcombine.low %v6136_v16, %v6137_v8  ;;  %v15185_v31 = vcombine.low %v6137_v8, %v17827_v22  ;;  %v5964_v42 = vadd.f32 %v14850_v39, %v5005_v0  ;;  %v5965_v28 = vadd.f32 %v14864_v58, %v5019_v37 }
 0x21d   :  { %v15188_v41 = vrot.slane %v6610_v51, %v12917_v20  ;;  %18295 = vst [vmem:[#allocation118_spill] sm:$0xff] %v15191_v11  ;;  %v15197_v1 = vrot.slane %v6611_v62, %v12917_v20  ;;  %v15203_v8 = vrot.slane %v7429_v26, %v12917_v20  ;;  %v5967_v10 = vadd.f32 %v14841_v9, %v5029_v14 }
 0x21e   :  { %v15200_v19 = vrot.slane %v6612_v5, %v12917_v20  ;;  %v5968_v49 = vadd.f32 %v14844_v38, %v5012_v40  ;;  %v5969_v0 = vadd.f32 %v14855_v36, %v15178_v60  ;;  %v15214_v16 = vadd.f32 %v14841_v9, %v5028_v17 }
 0x21f   :  { %18294 = vst [vmem:[#allocation117_spill] sm:$0xff] %v15188_v41  ;;  %18296 = vst [vmem:[#allocation53_spill] sm:$0xff] %v15197_v1  ;;  %v6115_v51 = vmax.f32 %v5963_v32, 0.0  ;;  %v6116_v26 = vmax.f32 %v5964_v42, 0.0  ;;  %v6117_v5 = vmax.f32 %v5965_v28, 0.0  ;;  %v6118_v54 = vmax.f32 %v5966_v33, 0.0 }
 0x220   :  { %18297 = vst [vmem:[#allocation44_spill] sm:$0xff] %v15200_v19  ;;  %18298 = vst [vmem:[#allocation67_spill] sm:$0xff] %v15203_v8  ;;  %v6119_v37 = vmax.f32 %v5967_v10, 0.0  ;;  %v6120_v22 = vmax.f32 %v5968_v49, 0.0  ;;  %v6121_v15 = vmax.f32 %v5969_v0, 0.0  ;;  %v18299_v40 = vmax.f32 %v15008_v57, 0.0 }
 0x221   :  { %v6513_v19 = vcombine.low %v6115_v51, %v6116_v26  ;;  %v6514_v11 = vcombine.low %v6117_v5, %v6118_v54  ;;  %v7331_v24 = vcombine.low %v6116_v26, %v6117_v5  ;;  %v5129_v28 = vcombine.high %v14913_v12, %v14913_v12 }
 0x222   :  { %v7330_v8 = vcombine.low %v18299_v40, %v6115_v51  ;;  %v7332_v23 = vcombine.low %v6118_v54, %v6119_v37  ;;  %v8315_v62 = vcombine.low %v6119_v37, %v6120_v22  ;;  %v8829_v42 = vcombine.low %v6120_v22, %v6121_v15 }
 0x223   :  { %v6535_v17 = vrot.slane %v6513_v19, %v12917_v20  ;;  %v6542_v33 = vrot.slane %v6514_v11, %v12917_v20  ;;  %v15227_v10 = vrot.slane %v7331_v24, %v12917_v20  ;;  %v5136_v22 = vrot.slane %v14913_v12, %v12917_v20 }
 0x224   :  { %v15221_v32 = vrot.slane %v7330_v8, %v12917_v20  ;;  %v15230_v57 = vrot.slane %v7332_v23, %v12917_v20  ;;  %v8322_v54 = vrot.slane %v8315_v62, %v12917_v20  ;;  %v8836_v19 = vrot.slane %v8829_v42, %v12917_v20 }
 0x225   :  { %v8323_v49 = vcombine.low %v15031_v47, %v6535_v17  ;;  %v5143_v8 = vrot.slane %v5129_v28, %v12917_v20  ;;  %v6544_v0 = vcombine.low %v6535_v17, %v6542_v33  ;;  %v5144_v47 = vcombine.high %v5136_v22, %v5136_v22 }
 0x226   :  { %v8324_v24 = vcombine.low %v6542_v33, %v8322_v54  ;;  %v8837_v23 = vcombine.low %v15221_v32, %v15227_v10  ;;  %v8838_v62 = vcombine.low %v15230_v57, %v8836_v19  ;;  %v5152_v15 = vrot.slane %v5136_v22, %v12917_v20 }
 0x227   :  { %v8331_v51 = vrot.slane %v8323_v49, %v12917_v20  ;;  %v5145_v26 = vcombine.high %v5143_v8, %v5143_v8  ;;  %v15245_v5 = vrot.slane %v6544_v0, %v12917_v20  ;;  %v5159_v17 = vrot.slane %v5143_v8, %v12917_v20 }
 0x228   :  { %v8338_v12 = vrot.slane %v8324_v24, %v12917_v20  ;;  %v8845_v37 = vrot.slane %v8837_v23, %v12917_v20  ;;  %v8852_v40 = vrot.slane %v8838_v62, %v12917_v20  ;;  %v5166_v42 = vrot.slane %v5144_v47, %v12917_v20 }
 0x229   :  { %18300 = vst [vmem:[#allocation45_spill] sm:$0xff] %v15245_v5  ;;  %v15254_v28 = vrot.slane %v5145_v26, %v12917_v20  ;;  %v5174_v49 = vcombine.high %v5152_v15, %v5152_v15  ;;  %v18302_v19 = vcombine.high %v15162_v6, %v15162_v6  ;;  %v5175_v24 = vcombine.high %v5159_v17, %v5159_v17 }
 0x22a   :  { %v15258_v54 = vcombine.low %v8331_v51, %v8338_v12  ;;  %v15264_v0 = vcombine.low %v8845_v37, %v8852_v40  ;;  %v5176_v8 = vcombine.high %v5166_v42, %v5166_v42  ;;  %v5988_v62 = vadd.f32 %v14855_v36, %v5152_v15  ;;  %v15272_v12 = vpop.f32.mrb[16].mxu0 }
 0x22b   :  { %v5987_v22 = vadd.f32 %v14844_v38, %v18302_v19  ;;  %v5989_v47 = vadd.f32 %v14841_v9, %v5166_v42  ;;  %v5990_v51 = vadd.f32 %v14844_v38, %v5174_v49  ;;  %v5992_v26 = vadd.f32 %v14859_v34, %v5159_v17 }
 0x22c   :  { %18301 = vst [vmem:[#allocation30_spill] sm:$0xff] %v15258_v54  ;;  %18303 = vst [vmem:[#allocation56_spill] sm:$0xff] %v15264_v0  ;;  %v5991_v6 = vadd.f32 %v14855_v36, %v5176_v8  ;;  %v5993_v37 = vadd.f32 %v14847_v63, %v15254_v28  ;;  %v15278_v40 = vadd.f32 %v14850_v39, %v5175_v24  ;;  %v6140_v33 = vmax.f32 %v5988_v62, 0.0 }
 0x22d   :  { %v6139_v19 = vmax.f32 %v5987_v22, 0.0  ;;  %v6141_v11 = vmax.f32 %v5989_v47, 0.0  ;;  %v6142_v15 = vmax.f32 %v5990_v51, 0.0  ;;  %v6144_v23 = vmax.f32 %v5992_v26, 0.0 }
 0x22e   :  { %v6143_v42 = vmax.f32 %v5991_v6, 0.0  ;;  %v6145_v14 = vmax.f32 %v5993_v37, 0.0  ;;  %v17833_v49 = vmax.f32 %v15278_v40, 0.0  ;;  %v15283_v17 = vrot.slane %v15185_v31, %v12917_v20  ;;  %v15299_v31 = vpop.f32.mrb[17].mxu0 }
 0x22f   :  { %v15285_v8 = vcombine.low %v6141_v11, %v6142_v15  ;;  %v18306_v0 = vmax.f32 %v15175_v4, 0.0  ;;  %v8871_v24 = vcombine.low %v6139_v19, %v6140_v33  ;;  %v5031_v22 = vcombine.high %v14916_v13, %v14916_v13  ;;  %v12417_v6 = vpop.f32.mrb[18].mxu0 }
 0x230   :  { %18304 = vst [vmem:[#allocation55_spill] sm:$0xff] %v15283_v17  ;;  %v6659_v62 = vcombine.low %v6143_v42, %v6144_v23  ;;  %v15295_v47 = vcombine.low %v6145_v14, %v17833_v49  ;;  %v15297_v51 = vcombine.low %v6142_v15, %v6143_v42  ;;  %v7477_v26 = vcombine.low %v6144_v23, %v6145_v14 }
 0x231   :  { %18305 = vst [vmem:[#allocation122_spill] sm:$0xff] %v15285_v8  ;;  %v15289_v54 = vcombine.low %v18306_v0, %v6139_v19  ;;  %v8878_v33 = vrot.slane %v8871_v24, %v12917_v20  ;;  %v5038_v0 = vrot.slane %v14916_v13, %v12917_v20  ;;  %v5045_v19 = vrot.slane %v5031_v22, %v12917_v20 }
 0x232   :  { %18308 = vst [vmem:[#allocation41_spill] sm:$0xff] %v15297_v51  ;;  %v15309_v37 = vrot.slane %v6659_v62, %v12917_v20  ;;  %v15314_v23 = vrot.slane %v7477_v26, %v12917_v20  ;;  %v18312_v13 = vcombine.high %v15178_v60, %v15178_v60  ;;  %v5276_v26 = vcombine.high %v14952_v21, %v14952_v21 }
 0x233   :  { %18307 = vst [vmem:[#allocation57_spill] sm:$0xff] %v15289_v54  ;;  %v15318_v15 = vcombine.low %v15283_v17, %v8878_v33  ;;  %v5046_v42 = vcombine.high %v5038_v0, %v5038_v0  ;;  %v5054_v24 = vrot.slane %v5038_v0, %v12917_v20  ;;  %v5047_v6 = vcombine.high %v5045_v19, %v5045_v19 }
 0x234   :  { %18309 = vst [vmem:[#allocation70_spill] sm:$0xff] %v15309_v37  ;;  %18310 = vst [vmem:[#allocation59_spill] sm:$0xff] %v15314_v23  ;;  %v5971_v62 = vadd.f32 %v14844_v38, %v18312_v13  ;;  %v5061_v4 = vrot.slane %v5045_v19, %v12917_v20  ;;  %v5283_v22 = vrot.slane %v14952_v21, %v12917_v20 }
 0x235   :  { %18311 = vst [vmem:[#allocation74_spill] sm:$0xff] %v15318_v15  ;;  %v5068_v33 = vrot.slane %v5046_v42, %v12917_v20  ;;  %v5076_v11 = vcombine.high %v5054_v24, %v5054_v24  ;;  %v5972_v14 = vadd.f32 %v14855_v36, %v5054_v24  ;;  %v5075_v49 = vrot.slane %v5047_v6, %v12917_v20 }
 0x236   :  { %v6123_v0 = vmax.f32 %v5971_v62, 0.0  ;;  %v5077_v60 = vcombine.high %v5061_v4, %v5061_v4  ;;  %v5976_v13 = vadd.f32 %v14864_v58, %v5061_v4  ;;  %v5290_v15 = vrot.slane %v5276_v26, %v12917_v20 }
 0x237   :  { %v5078_v19 = vcombine.high %v5068_v33, %v5068_v33  ;;  %v5973_v54 = vadd.f32 %v14859_v34, %v5068_v33  ;;  %v5974_v8 = vadd.f32 %v14847_v63, %v5076_v11  ;;  %v6124_v37 = vmax.f32 %v5972_v14, 0.0 }
 0x238   :  { %v5079_v21 = vcombine.high %v5075_v49, %v5075_v49  ;;  %v5977_v42 = vadd.f32 %v14870_v46, %v5075_v49  ;;  %v5978_v1 = vadd.f32 %v14841_v9, %v5077_v60  ;;  %v6128_v24 = vmax.f32 %v5976_v13, 0.0 }
 0x239   :  { %v5975_v62 = vadd.f32 %v14850_v39, %v5078_v19  ;;  %v6125_v6 = vmax.f32 %v5973_v54, 0.0  ;;  %v6126_v41 = vmax.f32 %v5974_v8, 0.0  ;;  %v18313_v4 = vmax.f32 %v15214_v16, 0.0 }
 0x23a   :  { %v5979_v26 = vadd.f32 %v14844_v38, %v5079_v21  ;;  %v6129_v43 = vmax.f32 %v5977_v42, 0.0  ;;  %v6130_v33 = vmax.f32 %v5978_v1, 0.0  ;;  %v7378_v51 = vcombine.low %v6123_v0, %v6124_v37 }
 0x23b   :  { %v6560_v5 = vcombine.low %v18313_v4, %v6123_v0  ;;  %v6127_v11 = vmax.f32 %v5975_v62, 0.0  ;;  %v6561_v14 = vcombine.low %v6124_v37, %v6125_v6  ;;  %v7379_v49 = vcombine.low %v6125_v6, %v6126_v41 }
 0x23c   :  { %v6131_v17 = vmax.f32 %v5979_v26, 0.0  ;;  %v6563_v60 = vcombine.low %v6128_v24, %v6129_v43  ;;  %v7381_v13 = vcombine.low %v6129_v43, %v6130_v33  ;;  %v7388_v19 = vrot.slane %v7378_v51, %v12917_v20 }
 0x23d   :  { %v6570_v23 = vrot.slane %v6560_v5, %v12917_v20  ;;  %v6562_v54 = vcombine.low %v6126_v41, %v6127_v11  ;;  %v15346_v8 = vrot.slane %v6561_v14, %v12917_v20  ;;  %v7380_v16 = vcombine.low %v6127_v11, %v6128_v24 }
 0x23e   :  { %v15349_v21 = vrot.slane %v7379_v49, %v12917_v20  ;;  %v15352_v1 = vrot.slane %v6563_v60, %v12917_v20  ;;  %v6609_v37 = vcombine.low %v6130_v33, %v6131_v17  ;;  %v15355_v5 = vrot.slane %v7381_v13, %v12917_v20 }
 0x23f   :  { %18314 = vst [vmem:[#allocation82_spill] sm:$0xff] %v15346_v8  ;;  %v18318_v0 = vmax.f32 %v15158_v3, 0.0  ;;  %v15362_v41 = vrot.slane %v6562_v54, %v12917_v20  ;;  %v15365_v51 = vcombine.low %v6570_v23, %v15346_v8  ;;  %v15368_v42 = vrot.slane %v7380_v16, %v12917_v20 }
 0x240   :  { %18315 = vst [vmem:[#allocation73_spill] sm:$0xff] %v15349_v21  ;;  %18316 = vst [vmem:[#allocation84_spill] sm:$0xff] %v15352_v1  ;;  %v15371_v24 = vcombine.low %v7388_v19, %v15349_v21  ;;  %v15374_v62 = vrot.slane %v6609_v37, %v12917_v20  ;;  %v5291_v6 = vcombine.high %v5283_v22, %v5283_v22 }
 0x241   :  { %18317 = vst [vmem:[#allocation72_spill] sm:$0xff] %v15355_v5  ;;  %v15359_v43 = vcombine.low %v6131_v17, %v18318_v0  ;;  %18320 = vst [vmem:[#allocation16_spill] sm:$0xff] %v15362_v41  ;;  %v5292_v4 = vcombine.high %v5290_v15, %v5290_v15  ;;  %v5299_v3 = vrot.slane %v5283_v22, %v12917_v20  ;;  %v15391_v22 = vpop.f32.mrb[19].mxu0 }
 0x242   :  { %18321 = vst [vmem:[#allocation17_spill] sm:$0xff] %v15365_v51  ;;  %18322 = vst [vmem:[#allocation96_spill] sm:$0xff] %v15368_v42  ;;  %v5306_v26 = vrot.slane %v5290_v15, %v12917_v20  ;;  %v5178_v23 = vcombine.high %v14957_v53, %v14957_v53  ;;  %v5185_v33 = vrot.slane %v14957_v53, %v12917_v20 }
 0x243   :  { %18319 = vst [vmem:[#allocation71_spill] sm:$0xff] %v15359_v43  ;;  %18323 = vst [vmem:[#allocation18_spill] sm:$0xff] %v15371_v24  ;;  %v5313_v11 = vrot.slane %v5291_v6, %v12917_v20  ;;  %v15386_v14 = vrot.slane %v5292_v4, %v12917_v20  ;;  %v5321_v49 = vcombine.high %v5299_v3, %v5299_v3 }
 0x244   :  { %18324 = vst [vmem:[#allocation20_spill] sm:$0xff] %v15374_v62  ;;  %v15389_v60 = vadd.f32 %v14847_v63, %v5299_v3  ;;  %v5322_v13 = vcombine.high %v5306_v26, %v5306_v26  ;;  %v6016_v15 = vadd.f32 %v14841_v9, %v5306_v26  ;;  %v5192_v19 = vrot.slane %v5178_v23, %v12917_v20 }
 0x245   :  { %v5193_v54 = vcombine.high %v5185_v33, %v5185_v33  ;;  %v5323_v16 = vcombine.high %v5313_v11, %v5313_v11  ;;  %v6013_v37 = vadd.f32 %v14850_v39, %v5313_v11  ;;  %v6014_v0 = vadd.f32 %v14864_v58, %v5321_v49 }
 0x246   :  { %v6017_v6 = vadd.f32 %v14844_v38, %v15386_v14  ;;  %v15402_v4 = vadd.f32 %v14855_v36, %v5322_v13  ;;  %v17852_v3 = vmax.f32 %v15389_v60, 0.0  ;;  %v6168_v26 = vmax.f32 %v6016_v15, 0.0 }
 0x247   :  { %v6015_v23 = vadd.f32 %v14870_v46, %v5323_v16  ;;  %v6165_v17 = vmax.f32 %v6013_v37, 0.0  ;;  %v6166_v21 = vmax.f32 %v6014_v0, 0.0  ;;  %v5194_v8 = vcombine.high %v5192_v19, %v5192_v19 }
 0x248   :  { %v6169_v62 = vmax.f32 %v6017_v6, 0.0  ;;  %v17853_v53 = vmax.f32 %v15402_v4, 0.0  ;;  %v5201_v11 = vrot.slane %v5185_v33, %v12917_v20  ;;  %v5208_v49 = vrot.slane %v5192_v19, %v12917_v20 }
 0x249   :  { %v6167_v51 = vmax.f32 %v6015_v23, 0.0  ;;  %v6758_v13 = vcombine.low %v17852_v3, %v6165_v17  ;;  %v7576_v41 = vcombine.low %v6165_v17, %v6166_v21  ;;  %v5215_v1 = vrot.slane %v5193_v54, %v12917_v20 }
 0x24a   :  { %v6805_v15 = vcombine.low %v6168_v26, %v6169_v62  ;;  %v7623_v16 = vcombine.low %v6169_v62, %v17853_v53  ;;  %v15415_v37 = vrot.slane %v5194_v8, %v12917_v20  ;;  %v5223_v0 = vcombine.high %v5201_v11, %v5201_v11 }
 0x24b   :  { %v6759_v6 = vcombine.low %v6166_v21, %v6167_v51  ;;  %v15418_v33 = vrot.slane %v6758_v13, %v12917_v20  ;;  %v7577_v19 = vcombine.low %v6167_v51, %v6168_v26  ;;  %v15421_v23 = vrot.slane %v7576_v41, %v12917_v20 }
 0x24c   :  { %v15424_v17 = vrot.slane %v6805_v15, %v12917_v20  ;;  %v5224_v54 = vcombine.high %v5208_v49, %v5208_v49  ;;  %v5225_v3 = vcombine.high %v5215_v1, %v5215_v1  ;;  %v5226_v62 = vcombine.high %v15415_v37, %v15415_v37 }
 0x24d   :  { %18325 = vst [vmem:[#allocation104_spill] sm:$0xff] %v15418_v33  ;;  %18326 = vst [vmem:[#allocation6_spill] sm:$0xff] %v15421_v23  ;;  %v15429_v8 = vrot.slane %v6759_v6, %v12917_v20  ;;  %v15432_v21 = vrot.slane %v7577_v19, %v12917_v20  ;;  %v18330_v51 = vcombine.high %v15254_v28, %v15254_v28  ;;  %v15446_v6 = vld [vmem:[%s17614_s3] sm:$0xff]  }
 0x24e   :  { %18327 = vst [vmem:[#allocation7_spill] sm:$0xff] %v15424_v17  ;;  %v5996_v26 = vadd.f32 %v14870_v46, %v5201_v11  ;;  %v5997_v13 = vadd.f32 %v14841_v9, %v5215_v1  ;;  %v5998_v15 = vadd.f32 %v14844_v38, %v5223_v0  ;;  %v5999_v53 = vadd.f32 %v14855_v36, %v5225_v3 }
 0x24f   :  { %18328 = vst [vmem:[#allocation8_spill] sm:$0xff] %v15429_v8  ;;  %18329 = vst [vmem:[#allocation9_spill] sm:$0xff] %v15432_v21  ;;  %v5995_v41 = vadd.f32 %v14864_v58, %v18330_v51  ;;  %v6000_v17 = vadd.f32 %v14859_v34, %v5208_v49  ;;  %v6001_v19 = vadd.f32 %v14847_v63, %v15415_v37  ;;  %12436 = vmatprep.subr.bf16.mxu1 %v15446_v6 }
 0x250   :  { %18331 = vst [vmem:[#allocation69_spill] sm:$0xff] %v15446_v6  ;;  %v15453_v11 = vadd.f32 %v14850_v39, %v5224_v54  ;;  %v6148_v0 = vmax.f32 %v5996_v26, 0.0  ;;  %v6149_v51 = vmax.f32 %v5997_v13, 0.0  ;;  %v6150_v3 = vmax.f32 %v5998_v15, 0.0 }
 0x251   :  { %v6147_v1 = vmax.f32 %v5995_v41, 0.0  ;;  %v6151_v23 = vmax.f32 %v5999_v53, 0.0  ;;  %v6152_v49 = vmax.f32 %v6000_v17, 0.0  ;;  %v6153_v21 = vmax.f32 %v6001_v19, 0.0 }
 0x252   :  { %v17861_v43 = vmax.f32 %v15453_v11, 0.0  ;;  %v15459_v28 = vrot.slane %v15295_v47, %v12917_v20  ;;  %v6707_v37 = vcombine.low %v6149_v51, %v6150_v3  ;;  %v18333_v54 = vmax.f32 %v15278_v40, 0.0 }
 0x253   :  { %v6661_v8 = vcombine.low %v6147_v1, %v6148_v0  ;;  %v7479_v41 = vcombine.low %v6148_v0, %v6149_v51  ;;  %v6708_v26 = vcombine.low %v6151_v23, %v6152_v49  ;;  %v7525_v13 = vcombine.low %v6150_v3, %v6151_v23 }
 0x254   :  { %18332 = vst [vmem:[#allocation83_spill] sm:$0xff] %v15459_v28  ;;  %v7478_v33 = vcombine.low %v18333_v54, %v6147_v1  ;;  %v15465_v53 = vcombine.low %v6153_v21, %v17861_v43  ;;  %v7526_v17 = vcombine.low %v6152_v49, %v6153_v21  ;;  %v15471_v19 = vrot.slane %v6707_v37, %v12917_v20 }
 0x255   :  { %v15468_v15 = vrot.slane %v6661_v8, %v12917_v20  ;;  %v15477_v40 = vrot.slane %v7479_v41, %v12917_v20  ;;  %v15480_v1 = vrot.slane %v6708_v26, %v12917_v20  ;;  %v15483_v0 = vrot.slane %v7525_v13, %v12917_v20 }
 0x256   :  { %18335 = vst [vmem:[#allocation11_spill] sm:$0xff] %v15471_v19  ;;  %v15474_v47 = vrot.slane %v7478_v33, %v12917_v20  ;;  %v15486_v23 = vrot.slane %v7526_v17, %v12917_v20  ;;  %v5325_v8 = vcombine.high %v14965_v29, %v14965_v29  ;;  %v5332_v3 = vrot.slane %v14965_v29, %v12917_v20 }
 0x257   :  { %18334 = vst [vmem:[#allocation10_spill] sm:$0xff] %v15468_v15  ;;  %18337 = vst [vmem:[#allocation13_spill] sm:$0xff] %v15477_v40  ;;  %v18341_v54 = vcombine.high %v15386_v14, %v15386_v14  ;;  %v15506_v26 = vrot.slane %v7623_v16, %v12917_v20  ;;  %v5227_v51 = vcombine.high %v14971_v45, %v14971_v45 }
 0x258   :  { %18336 = vst [vmem:[#allocation12_spill] sm:$0xff] %v15474_v47  ;;  %18338 = vst [vmem:[#allocation14_spill] sm:$0xff] %v15480_v1  ;;  %v5339_v37 = vrot.slane %v5325_v8, %v12917_v20  ;;  %v5340_v13 = vcombine.high %v5332_v3, %v5332_v3  ;;  %v5348_v17 = vrot.slane %v5332_v3, %v12917_v20  ;;  %v18343_v1 = vmax.f32 %v15402_v4, 0.0 }
 0x259   :  { %18339 = vst [vmem:[#allocation116_spill] sm:$0xff] %v15483_v0  ;;  %18340 = vst [vmem:[#allocation27_spill] sm:$0xff] %v15486_v23  ;;  %v6019_v41 = vadd.f32 %v14859_v34, %v18341_v54  ;;  %v5234_v29 = vrot.slane %v14971_v45, %v12917_v20  ;;  %v15515_v14 = vadd.f32 %v14864_v58, %v5226_v62 }
 0x25a   :  { %18342 = vst [vmem:[#allocation24_spill] sm:$0xff] %v15506_v26  ;;  %v5341_v49 = vcombine.high %v5339_v37, %v5339_v37  ;;  %v5355_v8 = vrot.slane %v5339_v37, %v12917_v20  ;;  %v5362_v54 = vrot.slane %v5340_v13, %v12917_v20  ;;  %v5370_v16 = vcombine.high %v5348_v17, %v5348_v17 }
 0x25b   :  { %v6171_v21 = vmax.f32 %v6019_v41, 0.0  ;;  %v6020_v33 = vadd.f32 %v14847_v63, %v5348_v17  ;;  %v5241_v3 = vrot.slane %v5227_v51, %v12917_v20 }
 0x25c   :  { %v15521_v43 = vrot.slane %v5341_v49, %v12917_v20  ;;  %v5371_v19 = vcombine.high %v5355_v8, %v5355_v8  ;;  %v6024_v45 = vadd.f32 %v14841_v9, %v5355_v8  ;;  %v5372_v41 = vcombine.high %v5362_v54, %v5362_v54 }
 0x25d   :  { %v6806_v37 = vcombine.low %v18343_v1, %v6171_v21  ;;  %v6021_v62 = vadd.f32 %v14850_v39, %v5362_v54  ;;  %v6022_v15 = vadd.f32 %v14864_v58, %v5370_v16  ;;  %v6172_v13 = vmax.f32 %v6020_v33, 0.0 }
 0x25e   :  { %v6025_v51 = vadd.f32 %v14844_v38, %v15521_v43  ;;  %v6026_v49 = vadd.f32 %v14855_v36, %v5371_v19  ;;  %v6176_v28 = vmax.f32 %v6024_v45, 0.0  ;;  %v6023_v8 = vadd.f32 %v14870_v46, %v5372_v41 }
 0x25f   :  { %v6173_v0 = vmax.f32 %v6021_v62, 0.0  ;;  %v6174_v4 = vmax.f32 %v6022_v15, 0.0  ;;  %v15535_v1 = vrot.slane %v6806_v37, %v12917_v20  ;;  %v7624_v16 = vcombine.low %v6171_v21, %v6172_v13 }
 0x260   :  { %v6177_v54 = vmax.f32 %v6025_v51, 0.0  ;;  %v6178_v23 = vmax.f32 %v6026_v49, 0.0  ;;  %v5242_v33 = vcombine.high %v5234_v29, %v5234_v29  ;;  %v6175_v40 = vmax.f32 %v6023_v8, 0.0 }
 0x261   :  { %18344 = vst [vmem:[#allocation32_spill] sm:$0xff] %v15535_v1  ;;  %v6807_v47 = vcombine.low %v6172_v13, %v6173_v0  ;;  %v7625_v17 = vcombine.low %v6173_v0, %v6174_v4  ;;  %v5243_v6 = vcombine.high %v5241_v3, %v5241_v3  ;;  %v15538_v24 = vrot.slane %v7624_v16, %v12917_v20 }
 0x262   :  { %v15540_v19 = vcombine.low %v6176_v28, %v6177_v54  ;;  %v15542_v45 = vcombine.low %v6177_v54, %v6178_v23  ;;  %v5250_v15 = vrot.slane %v5234_v29, %v12917_v20  ;;  %v6808_v41 = vcombine.low %v6174_v4, %v6175_v40 }
 0x263   :  { %18345 = vst [vmem:[#allocation25_spill] sm:$0xff] %v15538_v24  ;;  %v15546_v37 = vrot.slane %v6807_v47, %v12917_v20  ;;  %v7626_v62 = vcombine.low %v6175_v40, %v6176_v28  ;;  %v15549_v21 = vrot.slane %v7625_v17, %v12917_v20  ;;  %v5257_v51 = vrot.slane %v5241_v3, %v12917_v20 }
 0x264   :  { %18346 = vst [vmem:[#allocation19_spill] sm:$0xff] %v15540_v19  ;;  %18347 = vst [vmem:[#allocation22_spill] sm:$0xff] %v15542_v45  ;;  %v15559_v29 = vrot.slane %v6808_v41, %v12917_v20  ;;  %v5264_v17 = vrot.slane %v5242_v33, %v12917_v20  ;;  %v5271_v49 = vrot.slane %v5243_v6, %v12917_v20  ;;  %v6155_v41 = vmax.f32 %v15515_v14, 0.0 }
 0x265   :  { %18348 = vst [vmem:[#allocation21_spill] sm:$0xff] %v15546_v37  ;;  %18349 = vst [vmem:[#allocation31_spill] sm:$0xff] %v15549_v21  ;;  %v15562_v47 = vrot.slane %v7626_v62, %v12917_v20  ;;  %v5272_v8 = vcombine.high %v5250_v15, %v5250_v15  ;;  %v5273_v4 = vcombine.high %v5257_v51, %v5257_v51 }
 0x266   :  { %18350 = vst [vmem:[#allocation23_spill] sm:$0xff] %v15559_v29  ;;  %v6004_v54 = vadd.f32 %v14870_v46, %v5250_v15  ;;  %v6008_v16 = vadd.f32 %v14841_v9, %v5257_v51  ;;  %v5274_v62 = vcombine.high %v5264_v17, %v5264_v17  ;;  %v5275_v23 = vcombine.high %v5271_v49, %v5271_v49 }
 0x267   :  { %18351 = vst [vmem:[#allocation119_spill] sm:$0xff] %v15562_v47  ;;  %v6005_v28 = vadd.f32 %v14841_v9, %v5264_v17  ;;  %v6006_v40 = vadd.f32 %v14844_v38, %v5272_v8  ;;  %v6009_v33 = vadd.f32 %v14844_v38, %v5271_v49  ;;  %v6010_v6 = vadd.f32 %v14855_v36, %v5273_v4 }
 0x268   :  { %v6156_v13 = vmax.f32 %v6004_v54, 0.0  ;;  %v6160_v0 = vmax.f32 %v6008_v16, 0.0  ;;  %v6007_v3 = vadd.f32 %v14855_v36, %v5274_v62  ;;  %v6011_v15 = vadd.f32 %v14859_v34, %v5275_v23 }
 0x269   :  { %v6157_v45 = vmax.f32 %v6005_v28, 0.0  ;;  %v6158_v51 = vmax.f32 %v6006_v40, 0.0  ;;  %v6161_v19 = vmax.f32 %v6009_v33, 0.0  ;;  %v6162_v14 = vmax.f32 %v6010_v6, 0.0 }
 0x26a   :  { %v6710_v29 = vcombine.low %v6155_v41, %v6156_v13  ;;  %v15583_v17 = vrot.slane %v15465_v53, %v12917_v20  ;;  %v6159_v8 = vmax.f32 %v6007_v3, 0.0  ;;  %v6163_v37 = vmax.f32 %v6011_v15, 0.0 }
 0x26b   :  { %v18353_v49 = vmax.f32 %v15453_v11, 0.0  ;;  %v7528_v54 = vcombine.low %v6156_v13, %v6157_v45  ;;  %v15590_v62 = vcombine.low %v6160_v0, %v6161_v19  ;;  %v15592_v23 = vcombine.low %v6161_v19, %v6162_v14 }
 0x26c   :  { %18352 = vst [vmem:[#allocation26_spill] sm:$0xff] %v15583_v17  ;;  %v15588_v16 = vrot.slane %v6710_v29, %v12917_v20  ;;  %v8399_v28 = vcombine.low %v6157_v45, %v6158_v51  ;;  %v6757_v40 = vcombine.low %v6162_v14, %v6163_v37  ;;  %v18358_v3 = vmax.f32 %v15389_v60, 0.0 }
 0x26d   :  { %v7527_v4 = vcombine.low %v18353_v49, %v6155_v41  ;;  %18355 = vst [vmem:[#allocation33_spill] sm:$0xff] %v15590_v62  ;;  %18356 = vst [vmem:[#allocation35_spill] sm:$0xff] %v15592_v23  ;;  %v15598_v53 = vrot.slane %v7528_v54, %v12917_v20  ;;  %v8913_v60 = vcombine.low %v6158_v51, %v6159_v8 }
 0x26e   :  { %18354 = vst [vmem:[#allocation34_spill] sm:$0xff] %v15588_v16  ;;  %v15602_v11 = vcombine.low %v6163_v37, %v18358_v3  ;;  %v8406_v45 = vrot.slane %v8399_v28, %v12917_v20  ;;  %v15612_v29 = vrot.slane %v6757_v40, %v12917_v20  ;;  %v5472_v37 = vcombine.high %v15002_v55, %v15002_v55 }
 0x26f   :  { %v15595_v33 = vrot.slane %v7527_v4, %v12917_v20  ;;  %v5479_v15 = vrot.slane %v15002_v55, %v12917_v20  ;;  %v5374_v14 = vcombine.high %v15010_v27, %v15010_v27  ;;  %v5381_v49 = vrot.slane %v15010_v27, %v12917_v20 }
 0x270   :  { %18359 = vst [vmem:[#allocation46_spill] sm:$0xff] %v15612_v29  ;;  %v15619_v6 = vcombine.low %v15588_v16, %v8406_v45  ;;  %v8920_v4 = vrot.slane %v8913_v60, %v12917_v20  ;;  %v5486_v54 = vrot.slane %v5472_v37, %v12917_v20  ;;  %v18361_v51 = vcombine.high %v15521_v43, %v15521_v43 }
 0x271   :  { %18357 = vst [vmem:[#allocation36_spill] sm:$0xff] %v15595_v33  ;;  %v5487_v55 = vcombine.high %v5479_v15, %v5479_v15  ;;  %v5495_v40 = vrot.slane %v5479_v15, %v12917_v20  ;;  %v5388_v3 = vrot.slane %v5374_v14, %v12917_v20  ;;  %v5389_v45 = vcombine.high %v5381_v49, %v5381_v49 }
 0x272   :  { %18360 = vst [vmem:[#allocation37_spill] sm:$0xff] %v15619_v6  ;;  %v15633_v8 = vadd.f32 %v14841_v9, %v18361_v51  ;;  %v15640_v27 = vcombine.low %v15598_v53, %v8920_v4  ;;  %v5488_v60 = vcombine.high %v5486_v54, %v5486_v54  ;;  %v5502_v37 = vrot.slane %v5486_v54, %v12917_v20 }
 0x273   :  { %v5397_v43 = vrot.slane %v5381_v49, %v12917_v20  ;;  %v5509_v51 = vrot.slane %v5487_v55, %v12917_v20  ;;  %v5517_v0 = vcombine.high %v5495_v40, %v5495_v40  ;;  %v15646_v13 = vadd.f32 %v14844_v38, %v5495_v40 }
 0x274   :  { %18362 = vst [vmem:[#allocation48_spill] sm:$0xff] %v15640_v27  ;;  %v5390_v19 = vcombine.high %v5388_v3, %v5388_v3  ;;  %v15649_v15 = vrot.slane %v5488_v60, %v12917_v20  ;;  %v5518_v14 = vcombine.high %v5502_v37, %v5502_v37  ;;  %v6048_v41 = vadd.f32 %v14855_v36, %v5502_v37 }
 0x275   :  { %v5404_v4 = vrot.slane %v5388_v3, %v12917_v20  ;;  %v5519_v28 = vcombine.high %v5509_v51, %v5509_v51  ;;  %v6045_v54 = vadd.f32 %v14855_v36, %v5509_v51  ;;  %v6046_v49 = vadd.f32 %v14841_v9, %v5517_v0 }
 0x276   :  { %v5520_v40 = vcombine.high %v15649_v15, %v15649_v15  ;;  %v6049_v27 = vadd.f32 %v14859_v34, %v15649_v15  ;;  %v15661_v60 = vadd.f32 %v14847_v63, %v5518_v14  ;;  %v6200_v6 = vmax.f32 %v6048_v41, 0.0 }
 0x277   :  { %v6047_v37 = vadd.f32 %v14844_v38, %v5519_v28  ;;  %v6197_v3 = vmax.f32 %v6045_v54, 0.0  ;;  %v6198_v1 = vmax.f32 %v6046_v49, 0.0  ;;  %v5411_v51 = vrot.slane %v5389_v45, %v12917_v20 }
 0x278   :  { %v6201_v62 = vmax.f32 %v6049_v27, 0.0  ;;  %v17891_v0 = vmax.f32 %v15661_v60, 0.0  ;;  %v15667_v55 = vrot.slane %v5390_v19, %v12917_v20  ;;  %v5419_v29 = vcombine.high %v5397_v43, %v5397_v43 }
 0x279   :  { %v6199_v16 = vmax.f32 %v6047_v37, 0.0  ;;  %v18363_v15 = vmax.f32 %v15646_v13, 0.0  ;;  %v5420_v14 = vcombine.high %v5404_v4, %v5404_v4  ;;  %v5421_v41 = vcombine.high %v5411_v51, %v5411_v51 }
 0x27a   :  { %v6953_v23 = vcombine.low %v6200_v6, %v6201_v62  ;;  %v7771_v28 = vcombine.low %v6201_v62, %v17891_v0  ;;  %v6028_v27 = vadd.f32 %v14844_v38, %v5397_v43  ;;  %v6029_v37 = vadd.f32 %v14855_v36, %v5411_v51 }
 0x27b   :  { %v15671_v17 = vcombine.low %v18363_v15, %v6197_v3  ;;  %v15678_v54 = vcombine.low %v6198_v1, %v6199_v16  ;;  %v15680_v19 = vcombine.low %v6199_v16, %v6200_v6  ;;  %v6030_v15 = vadd.f32 %v14859_v34, %v5419_v29 }
 0x27c   :  { %v15686_v3 = vrot.slane %v6953_v23, %v12917_v20  ;;  %v6031_v62 = vadd.f32 %v14847_v63, %v5421_v41  ;;  %v6032_v45 = vadd.f32 %v14850_v39, %v5404_v4  ;;  %v6033_v6 = vadd.f32 %v14864_v58, %v15667_v55 }
 0x27d   :  { %18364 = vst [vmem:[#allocation47_spill] sm:$0xff] %v15671_v17  ;;  %18365 = vst [vmem:[#allocation51_spill] sm:$0xff] %v15678_v54  ;;  %v15698_v43 = vadd.f32 %v14870_v46, %v5420_v14  ;;  %v6179_v23 = vmax.f32 %v15633_v8, 0.0  ;;  %v6180_v51 = vmax.f32 %v6028_v27, 0.0  ;;  %v6181_v29 = vmax.f32 %v6029_v37, 0.0 }
 0x27e   :  { %18366 = vst [vmem:[#allocation49_spill] sm:$0xff] %v15680_v19  ;;  %18367 = vst [vmem:[#allocation60_spill] sm:$0xff] %v15686_v3  ;;  %v6182_v49 = vmax.f32 %v6030_v15, 0.0  ;;  %v6183_v41 = vmax.f32 %v6031_v62, 0.0  ;;  %v6184_v0 = vmax.f32 %v6032_v45, 0.0  ;;  %v6185_v4 = vmax.f32 %v6033_v6, 0.0 }
 0x27f   :  { %v17896_v17 = vmax.f32 %v15698_v43, 0.0  ;;  %v6854_v1 = vcombine.low %v6179_v23, %v6180_v51  ;;  %v7672_v3 = vcombine.low %v6180_v51, %v6181_v29  ;;  %v5528_v16 = vrot.slane %v15013_v2, %v12917_v20 }
 0x280   :  { %v6855_v54 = vcombine.low %v6181_v29, %v6182_v49  ;;  %v6856_v19 = vcombine.low %v6183_v41, %v6184_v0  ;;  %v7673_v8 = vcombine.low %v6182_v49, %v6183_v41  ;;  %v7674_v27 = vcombine.low %v6184_v0, %v6185_v4 }
 0x281   :  { %v15706_v14 = vcombine.low %v6185_v4, %v17896_v17  ;;  %v6864_v37 = vrot.slane %v6854_v1, %v12917_v20  ;;  %v7682_v15 = vrot.slane %v7672_v3, %v12917_v20  ;;  %v18369_v62 = vcombine.high %v15013_v2, %v15013_v2 }
 0x282   :  { %v15710_v45 = vrot.slane %v6855_v54, %v12917_v20  ;;  %v15718_v23 = vrot.slane %v6856_v19, %v12917_v20  ;;  %v15721_v51 = vrot.slane %v7673_v8, %v12917_v20  ;;  %v15724_v0 = vrot.slane %v7674_v27, %v12917_v20 }
 0x283   :  { %v5535_v6 = vrot.slane %v18369_v62, %v12917_v20  ;;  %v5536_v49 = vcombine.high %v5528_v16, %v5528_v16  ;;  %v5544_v3 = vrot.slane %v5528_v16, %v12917_v20  ;;  %v6051_v41 = vadd.f32 %v14850_v39, %v5520_v40 }
 0x284   :  { %18368 = vst [vmem:[#allocation54_spill] sm:$0xff] %v15710_v45  ;;  %18370 = vst [vmem:[#allocation58_spill] sm:$0xff] %v15718_v23  ;;  %v15727_v54 = vcombine.low %v6864_v37, %v15710_v45  ;;  %v15732_v2 = vcombine.low %v7682_v15, %v15721_v51  ;;  %v15737_v4 = vrot.slane %v7771_v28, %v12917_v20 }
 0x285   :  { %18371 = vst [vmem:[#allocation52_spill] sm:$0xff] %v15721_v51  ;;  %18372 = vst [vmem:[#allocation68_spill] sm:$0xff] %v15724_v0  ;;  %v5537_v1 = vcombine.high %v5535_v6, %v5535_v6  ;;  %v5551_v29 = vrot.slane %v5535_v6, %v12917_v20  ;;  %v5558_v19 = vrot.slane %v5536_v49, %v12917_v20  ;;  %v6203_v17 = vmax.f32 %v6051_v41, 0.0 }
 0x286   :  { %18373 = vst [vmem:[#allocation62_spill] sm:$0xff] %v15727_v54  ;;  %18374 = vst [vmem:[#allocation61_spill] sm:$0xff] %v15732_v2  ;;  %v5566_v27 = vcombine.high %v5544_v3, %v5544_v3  ;;  %v6052_v62 = vadd.f32 %v14864_v58, %v5544_v3  ;;  %v18376_v41 = vmax.f32 %v15661_v60, 0.0  ;;  %v5423_v24 = vcombine.high %v15059_v44, %v15059_v44 }
 0x287   :  { %18375 = vst [vmem:[#allocation64_spill] sm:$0xff] %v15737_v4  ;;  %v15740_v8 = vrot.slane %v5537_v1, %v12917_v20  ;;  %v5567_v37 = vcombine.high %v5551_v29, %v5551_v29  ;;  %v5568_v16 = vcombine.high %v5558_v19, %v5558_v19  ;;  %v6053_v6 = vadd.f32 %v14870_v46, %v5558_v19 }
 0x288   :  { %v6056_v15 = vadd.f32 %v14855_v36, %v5551_v29  ;;  %v6054_v40 = vadd.f32 %v14841_v9, %v5566_v27  ;;  %v6204_v3 = vmax.f32 %v6052_v62, 0.0  ;;  %v6954_v49 = vcombine.low %v18376_v41, %v6203_v17 }
 0x289   :  { %v6057_v28 = vadd.f32 %v14859_v34, %v15740_v8  ;;  %v15751_v1 = vadd.f32 %v14847_v63, %v5567_v37  ;;  %v6055_v51 = vadd.f32 %v14844_v38, %v5568_v16  ;;  %v6205_v45 = vmax.f32 %v6053_v6, 0.0 }
 0x28a   :  { %v6208_v54 = vmax.f32 %v6056_v15, 0.0  ;;  %v6206_v19 = vmax.f32 %v6054_v40, 0.0  ;;  %v7772_v0 = vcombine.low %v6203_v17, %v6204_v3  ;;  %v15760_v37 = vrot.slane %v6954_v49, %v12917_v20 }
 0x28b   :  { %v6209_v23 = vmax.f32 %v6057_v28, 0.0  ;;  %v17903_v29 = vmax.f32 %v15751_v1, 0.0  ;;  %v6207_v2 = vmax.f32 %v6055_v51, 0.0  ;;  %v6955_v27 = vcombine.low %v6204_v3, %v6205_v45 }
 0x28c   :  { %18377 = vst [vmem:[#allocation63_spill] sm:$0xff] %v15760_v37  ;;  %v7773_v62 = vcombine.low %v6205_v45, %v6206_v19  ;;  %v15770_v51 = vrot.slane %v7772_v0, %v12917_v20  ;;  %v5430_v45 = vrot.slane %v15059_v44, %v12917_v20 }
 0x28d   :  { %v7002_v16 = vcombine.low %v6208_v54, %v6209_v23  ;;  %v15764_v6 = vcombine.low %v6209_v23, %v17903_v29  ;;  %v15767_v15 = vrot.slane %v6955_v27, %v12917_v20  ;;  %v7001_v60 = vcombine.low %v6206_v19, %v6207_v2 }
 0x28e   :  { %18379 = vst [vmem:[#allocation75_spill] sm:$0xff] %v15770_v51  ;;  %v7819_v17 = vcombine.low %v6207_v2, %v6208_v54  ;;  %v15776_v49 = vrot.slane %v7773_v62, %v12917_v20  ;;  %v5437_v23 = vrot.slane %v5423_v24, %v12917_v20  ;;  %v5438_v19 = vcombine.high %v5430_v45, %v5430_v45 }
 0x28f   :  { %18378 = vst [vmem:[#allocation76_spill] sm:$0xff] %v15767_v15  ;;  %v15773_v40 = vrot.slane %v7002_v16, %v12917_v20  ;;  %v15784_v3 = vrot.slane %v7001_v60, %v12917_v20  ;;  %v5446_v44 = vrot.slane %v5430_v45, %v12917_v20  ;;  %v18384_v16 = vcombine.high %v15667_v55, %v15667_v55 }
 0x290   :  { %18381 = vst [vmem:[#allocation77_spill] sm:$0xff] %v15776_v49  ;;  %v15787_v0 = vrot.slane %v7819_v17, %v12917_v20  ;;  %v5439_v41 = vcombine.high %v5437_v23, %v5437_v23  ;;  %v5453_v27 = vrot.slane %v5437_v23, %v12917_v20  ;;  %v15803_v60 = vrot.slane %v15706_v14, %v12917_v20 }
 0x291   :  { %18380 = vst [vmem:[#allocation78_spill] sm:$0xff] %v15773_v40  ;;  %18382 = vst [vmem:[#allocation80_spill] sm:$0xff] %v15784_v3  ;;  %v6035_v62 = vadd.f32 %v14841_v9, %v18384_v16  ;;  %v5460_v17 = vrot.slane %v5438_v19, %v12917_v20  ;;  %v5468_v28 = vcombine.high %v5446_v44, %v5446_v44  ;;  %v18386_v29 = vmax.f32 %v14950_v61, 0.0 }
 0x292   :  { %18383 = vst [vmem:[#allocation79_spill] sm:$0xff] %v15787_v0  ;;  %18385 = vst [vmem:[#allocation88_spill] sm:$0xff] %v15803_v60  ;;  %v5467_v54 = vrot.slane %v5439_v41, %v12917_v20  ;;  %v6036_v45 = vadd.f32 %v14844_v38, %v5446_v44  ;;  %v5469_v2 = vcombine.high %v5453_v27, %v5453_v27  ;;  %v18387_v55 = vmax.f32 %v14947_v30, 0.0 }
 0x293   :  { %v6040_v24 = vadd.f32 %v14850_v39, %v5453_v27  ;;  %v6187_v23 = vmax.f32 %v6035_v62, 0.0  ;;  %v5470_v3 = vcombine.high %v5460_v17, %v5460_v17  ;;  %v6037_v14 = vadd.f32 %v14855_v36, %v5460_v17 }
 0x294   :  { %v7184_v16 = vcombine.low %v18387_v55, %v18386_v29  ;;  %v5471_v40 = vcombine.high %v5467_v54, %v5467_v54  ;;  %v6038_v19 = vadd.f32 %v14859_v34, %v5468_v28  ;;  %v6041_v41 = vadd.f32 %v14864_v58, %v5467_v54 }
 0x295   :  { %v6042_v15 = vadd.f32 %v14870_v46, %v5469_v2  ;;  %v6188_v44 = vmax.f32 %v6036_v45, 0.0  ;;  %v6192_v37 = vmax.f32 %v6040_v24, 0.0  ;;  %v6039_v27 = vadd.f32 %v14847_v63, %v5470_v3 }
 0x296   :  { %v6043_v62 = vadd.f32 %v14841_v9, %v5471_v40  ;;  %v6189_v61 = vmax.f32 %v6037_v14, 0.0  ;;  %v6190_v0 = vmax.f32 %v6038_v19, 0.0  ;;  %v6193_v30 = vmax.f32 %v6041_v41, 0.0 }
 0x297   :  { %v6194_v29 = vmax.f32 %v6042_v15, 0.0  ;;  %v6903_v55 = vcombine.low %v6187_v23, %v6188_v44  ;;  %v18388_v49 = vmax.f32 %v15698_v43, 0.0  ;;  %v6191_v51 = vmax.f32 %v6039_v27, 0.0 }
 0x298   :  { %v6195_v28 = vmax.f32 %v6043_v62, 0.0  ;;  %v6904_v4 = vcombine.low %v6189_v61, %v6190_v0  ;;  %v7721_v54 = vcombine.low %v6188_v44, %v6189_v61  ;;  %v7723_v40 = vcombine.low %v6192_v37, %v6193_v30 }
 0x299   :  { %v7675_v17 = vcombine.low %v18388_v49, %v6187_v23  ;;  %v6906_v26 = vcombine.low %v6193_v30, %v6194_v29  ;;  %v15822_v2 = vrot.slane %v6903_v55, %v12917_v20  ;;  %v6905_v24 = vcombine.low %v6191_v51, %v6192_v37 }
 0x29a   :  { %v15828_v45 = vrot.slane %v6904_v4, %v12917_v20  ;;  %v7722_v15 = vcombine.low %v6190_v0, %v6191_v51  ;;  %v7724_v14 = vcombine.low %v6194_v29, %v6195_v28  ;;  %v15834_v49 = vrot.slane %v7721_v54, %v12917_v20 }
 0x29b   :  { %v15825_v3 = vrot.slane %v7675_v17, %v12917_v20  ;;  %v15831_v43 = vrot.slane %v6906_v26, %v12917_v20  ;;  %v15837_v23 = vrot.slane %v7723_v40, %v12917_v20  ;;  %v15842_v41 = vrot.slane %v6905_v24, %v12917_v20 }
 0x29c   :  { %18390 = vst [vmem:[#allocation66_spill] sm:$0xff] %v15828_v45  ;;  %18392 = vst [vmem:[#allocation100_spill] sm:$0xff] %v15834_v49  ;;  %v15847_v37 = vrot.slane %v7722_v15, %v12917_v20  ;;  %v15850_v26 = vrot.slane %v7724_v14, %v12917_v20  ;;  %v18396_v51 = vmax.f32 %v15646_v13, 0.0  ;;  %v7192_v27 = vrot.slane %v14969_v56, %v12917_v20 }
 0x29d   :  { %18389 = vst [vmem:[#allocation81_spill] sm:$0xff] %v15825_v3  ;;  %18391 = vst [vmem:[#allocation65_spill] sm:$0xff] %v15831_v43  ;;  %v15862_v62 = vrot.slane %v14975_v25, %v12917_v20  ;;  %v15867_v30 = vrot.slane %v7184_v16, %v12917_v20  ;;  %v15871_v13 = vrot.slane %v15105_v48, %v12917_v20  ;;  %v18401_v29 = vmax.f32 %v15095_v7, 0.0 }
 0x29e   :  { %18393 = vst [vmem:[#allocation92_spill] sm:$0xff] %v15837_v23  ;;  %18394 = vst [vmem:[#allocation91_spill] sm:$0xff] %v15847_v37  ;;  %v15854_v0 = vcombine.low %v6195_v28, %v18396_v51  ;;  %v18402_v55 = vmax.f32 %v15092_v50, 0.0  ;;  %v18403_v25 = vmax.f32 %v14887_v35, 0.0  ;;  %v18404_v28 = vmax.f32 %v15098_v18, 0.0 }
 0x29f   :  { %18395 = vst [vmem:[#allocation94_spill] sm:$0xff] %v15850_v26  ;;  %18398 = vst [vmem:[#allocation87_spill] sm:$0xff] %v15862_v62  ;;  %v7214_v56 = vcombine.low %v7192_v27, %v15862_v62  ;;  %v15884_v16 = vrot.slane %v15107_v59, %v12917_v20  ;;  %v15888_v48 = vrot.slane %v15118_v52, %v12917_v20 }
 0x2a0   :  { %18397 = vst [vmem:[#allocation93_spill] sm:$0xff] %v15854_v0  ;;  %18399 = vst [vmem:[#allocation90_spill] sm:$0xff] %v15867_v30  ;;  %v7233_v17 = vcombine.low %v18402_v55, %v18401_v29  ;;  %v7234_v54 = vcombine.low %v18404_v28, %v18403_v25  ;;  %v7215_v7 = vcombine.low %v15867_v30, %v15871_v13  ;;  %v18408_v55 = vld [vmem:[#allocation89_spill] sm:$0xff] }
 0x2a1   :  { %18400 = vst [vmem:[#allocation103_spill] sm:$0xff] %v15871_v13  ;;  %18405 = vst [vmem:[#allocation95_spill] sm:$0xff] %v15884_v16  ;;  %v7222_v18 = vrot.slane %v7214_v56, %v12917_v20  ;;  %v7263_v59 = vcombine.low %v15884_v16, %v15888_v48  ;;  %v5668_v14 = vcombine.high %v15272_v12, %v15272_v12 }
 0x2a2   :  { %18406 = vst [vmem:[#allocation108_spill] sm:$0xff] %v15888_v48  ;;  %v15893_v50 = vrot.slane %v7233_v17, %v12917_v20  ;;  %v7262_v40 = vrot.slane %v7234_v54, %v12917_v20  ;;  %v7229_v24 = vrot.slane %v7215_v7, %v12917_v20  ;;  %v5675_v51 = vrot.slane %v15272_v12, %v12917_v20 }
 0x2a3   :  { %v7271_v29 = vrot.slane %v7263_v59, %v12917_v20  ;;  %v18409_v17 = vrot.slane %v18408_v55, %v12917_v20  ;;  %v5570_v25 = vcombine.high %v15299_v31, %v15299_v31  ;;  %v5682_v54 = vrot.slane %v5668_v14, %v12917_v20 }
 0x2a4   :  { %18407 = vst [vmem:[#allocation107_spill] sm:$0xff] %v15893_v50  ;;  %v7264_v27 = vcombine.low %v15893_v50, %v7262_v40  ;;  %v7230_v28 = vcombine.low %v7222_v18, %v7229_v24  ;;  %v5683_v7 = vcombine.high %v5675_v51, %v5675_v51  ;;  %v5691_v44 = vrot.slane %v5675_v51, %v12917_v20 }
 0x2a5   :  { %v15915_v56 = vcombine.low %v7262_v40, %v18409_v17  ;;  %v5577_v15 = vrot.slane %v15299_v31, %v12917_v20  ;;  %v5584_v59 = vrot.slane %v5570_v25, %v12917_v20  ;;  %v18411_v40 = vcombine.high %v15740_v8, %v15740_v8 }
 0x2a6   :  { %v7278_v12 = vrot.slane %v7264_v27, %v12917_v20  ;;  %v5684_v17 = vcombine.high %v5682_v54, %v5682_v54  ;;  %v5698_v18 = vrot.slane %v5682_v54, %v12917_v20  ;;  %v5705_v24 = vrot.slane %v5683_v7, %v12917_v20 }
 0x2a7   :  { %18410 = vst [vmem:[#allocation105_spill] sm:$0xff] %v15915_v56  ;;  %v15929_v55 = vadd.f32 %v14850_v39, %v18411_v40  ;;  %v5713_v14 = vcombine.high %v5691_v44, %v5691_v44  ;;  %v15934_v27 = vadd.f32 %v14859_v34, %v5691_v44  ;;  %v5585_v52 = vcombine.high %v5577_v15, %v5577_v15 }
 0x2a8   :  { %v7279_v51 = vcombine.low %v7271_v29, %v7278_v12  ;;  %v5586_v31 = vcombine.high %v5584_v59, %v5584_v59  ;;  %v5712_v25 = vrot.slane %v5684_v17, %v12917_v20  ;;  %v5714_v35 = vcombine.high %v5698_v18, %v5698_v18 }
 0x2a9   :  { %v5715_v19 = vcombine.high %v5705_v24, %v5705_v24  ;;  %v6077_v8 = vadd.f32 %v14847_v63, %v5705_v24  ;;  %v6078_v4 = vadd.f32 %v14850_v39, %v5713_v14  ;;  %v6080_v54 = vadd.f32 %v14870_v46, %v5698_v18 }
 0x2aa   :  { %v7982_v40 = vpack.c.bf16 %v7279_v51, %v7230_v28  ;;  %v5716_v61 = vcombine.high %v5712_v25, %v5712_v25  ;;  %v6081_v44 = vadd.f32 %v14841_v9, %v5712_v25  ;;  %v6082_v12 = vadd.f32 %v14844_v38, %v5714_v35 }
 0x2ab   :  { %v6079_v29 = vadd.f32 %v14864_v58, %v5715_v19  ;;  %v6229_v17 = vmax.f32 %v6077_v8, 0.0  ;;  %v6230_v56 = vmax.f32 %v6078_v4, 0.0  ;;  %v6232_v50 = vmax.f32 %v6080_v54, 0.0 }
 0x2ac   :  { %12420 = vmatprep.mubr.msk.bf16.mxu1 %vm7999_vm2, %v7982_v40  ;;  %v5593_v28 = vrot.slane %v5577_v15, %v12917_v20  ;;  %v6083_v24 = vadd.f32 %v14855_v36, %v5716_v61  ;;  %v6233_v18 = vmax.f32 %v6081_v44, 0.0  ;;  %v6234_v51 = vmax.f32 %v6082_v12, 0.0 }
 0x2ad   :  { %v6231_v14 = vmax.f32 %v6079_v29, 0.0  ;;  %v7101_v7 = vcombine.low %v6229_v17, %v6230_v56  ;;  %v18412_v48 = vmax.f32 %v15934_v27, 0.0  ;;  %v5600_v25 = vrot.slane %v5584_v59, %v12917_v20 }
 0x2ae   :  { %v5607_v35 = vrot.slane %v5585_v52, %v12917_v20  ;;  %v6235_v16 = vmax.f32 %v6083_v24, 0.0  ;;  %v7920_v4 = vcombine.low %v6232_v50, %v6233_v18  ;;  %v15957_v15 = vcombine.low %v6233_v18, %v6234_v51 }
 0x2af   :  { %v7918_v19 = vcombine.low %v18412_v48, %v6229_v17  ;;  %v7102_v40 = vcombine.low %v6231_v14, %v6232_v50  ;;  %v7919_v8 = vcombine.low %v6230_v56, %v6231_v14  ;;  %v15952_v54 = vrot.slane %v7101_v7, %v12917_v20 }
 0x2b0   :  { %18414 = vst [vmem:[#allocation109_spill] sm:$0xff] %v15957_v15  ;;  %v5614_v29 = vrot.slane %v5586_v31, %v12917_v20  ;;  %v15967_v52 = vrot.slane %v7920_v4, %v12917_v20  ;;  %v15969_v50 = vcombine.low %v6234_v51, %v6235_v16  ;;  %v5615_v7 = vcombine.high %v5593_v28, %v5593_v28 }
 0x2b1   :  { %v15955_v61 = vrot.slane %v7918_v19, %v12917_v20  ;;  %v15961_v48 = vrot.slane %v7102_v40, %v12917_v20  ;;  %v15964_v59 = vrot.slane %v7919_v8, %v12917_v20  ;;  %v5616_v44 = vcombine.high %v5600_v25, %v5600_v25 }
 0x2b2   :  { %18416 = vst [vmem:[#allocation113_spill] sm:$0xff] %v15967_v52  ;;  %18417 = vst [vmem:[#allocation112_spill] sm:$0xff] %v15969_v50  ;;  %v5617_v12 = vcombine.high %v5607_v35, %v5607_v35  ;;  %v5618_v24 = vcombine.high %v5614_v29, %v5614_v29  ;;  %v6060_v14 = vadd.f32 %v14864_v58, %v5593_v28  ;;  %v6211_v4 = vmax.f32 %v15929_v55, 0.0 }
 0x2b3   :  { %18413 = vst [vmem:[#allocation111_spill] sm:$0xff] %v15955_v61  ;;  %18415 = vst [vmem:[#allocation106_spill] sm:$0xff] %v15964_v59  ;;  %v6061_v18 = vadd.f32 %v14870_v46, %v5607_v35  ;;  %v6062_v16 = vadd.f32 %v14841_v9, %v5615_v7  ;;  %v6064_v19 = vadd.f32 %v14855_v36, %v5600_v25  ;;  %v18418_v35 = vmax.f32 %v15751_v1, 0.0 }
 0x2b4   :  { %v6063_v51 = vadd.f32 %v14844_v38, %v5617_v12  ;;  %v6065_v40 = vadd.f32 %v14841_v9, %v5614_v29  ;;  %v6066_v8 = vadd.f32 %v14844_v38, %v5616_v44  ;;  %v6212_v31 = vmax.f32 %v6060_v14, 0.0 }
 0x2b5   :  { %v6213_v56 = vmax.f32 %v6061_v18, 0.0  ;;  %v6214_v17 = vmax.f32 %v6062_v16, 0.0  ;;  %v6216_v13 = vmax.f32 %v6064_v19, 0.0  ;;  %v7003_v7 = vcombine.low %v18418_v35, %v6211_v4 }
 0x2b6   :  { %v6215_v50 = vmax.f32 %v6063_v51, 0.0  ;;  %v6217_v28 = vmax.f32 %v6065_v40, 0.0  ;;  %v6218_v30 = vmax.f32 %v6066_v8, 0.0  ;;  %v7821_v62 = vcombine.low %v6211_v4, %v6212_v31 }
 0x2b7   :  { %v7004_v12 = vcombine.low %v6212_v31, %v6213_v56  ;;  %v7822_v15 = vcombine.low %v6213_v56, %v6214_v17  ;;  %v15989_v25 = vrot.slane %v15764_v6, %v12917_v20  ;;  %v15992_v55 = vrot.slane %v7003_v7, %v12917_v20  ;;  %v18423_v31 = vld [vmem:[#allocation98_spill] sm:$0xff] }
 0x2b8   :  { %v8525_v29 = vcombine.low %v6214_v17, %v6215_v50  ;;  %v15994_v44 = vcombine.low %v6217_v28, %v6218_v30  ;;  %v15997_v14 = vrot.slane %v7821_v62, %v12917_v20  ;;  %v15999_v18 = vcombine.low %v6215_v50, %v6216_v13  ;;  %v18424_v17 = vld [vmem:[#allocation86_spill] sm:$0xff]  ;;  %v18427_v50 = vld [vmem:[#allocation115_spill] sm:$0xff] }
 0x2b9   :  { %18419 = vst [vmem:[#allocation114_spill] sm:$0xff] %v15989_v25  ;;  %v16002_v1 = vrot.slane %v7004_v12, %v12917_v20  ;;  %v16005_v56 = vrot.slane %v7822_v15, %v12917_v20  ;;  %v18425_v16 = vrot.slane %v18424_v17, %v12917_v20  ;;  %v18426_v13 = vld [vmem:[#allocation102_spill] sm:$0xff] }
 0x2ba   :  { %18420 = vst [vmem:[#allocation89_spill] sm:$0xff] %v15997_v14  ;;  %18421 = vst [vmem:[#allocation123_spill] sm:$0xff] %v15999_v18  ;;  %v8532_v6 = vrot.slane %v8525_v29, %v12917_v20  ;;  %v18428_v40 = vcombine.low %v18426_v13, %v18427_v50  ;;  %v18429_v15 = vld [vmem:[#allocation110_spill] sm:$0xff]  ;;  %v6067_v50 = vadd.f32 %v14855_v36, %v5618_v24  ;;  %v18433_v24 = vld [vmem:[#allocation71_spill] sm:$0xff] }
 0x2bb   :  { %18422 = vst [vmem:[#allocation124_spill] sm:$0xff] %v16005_v56  ;;  %v7312_v51 = vcombine.low %v18425_v16, %v18423_v31  ;;  %v7361_v4 = vcombine.low %v18429_v15, %v15221_v32  ;;  %v18431_v31 = vcombine.low %v15227_v10, %v15230_v57  ;;  %v5619_v32 = vcombine.high %v15391_v22, %v15391_v22  ;;  %v18435_v18 = vld [vmem:[#allocation69_spill] sm:$0xff] }
 0x2bc   :  { %v7327_v8 = vrot.slane %v18428_v40, %v12917_v20  ;;  %v16027_v7 = vcombine.low %v16002_v1, %v8532_v6  ;;  %v5626_v16 = vrot.slane %v15391_v22, %v12917_v20  ;;  %v7060_v6 = vrot.slane %v15994_v44, %v12917_v20 }
 0x2bd   :  { %v7320_v12 = vrot.slane %v7312_v51, %v12917_v20  ;;  %v7369_v29 = vrot.slane %v7361_v4, %v12917_v20  ;;  %v7376_v17 = vrot.slane %v18431_v31, %v12917_v20  ;;  %v7411_v51 = vcombine.low %v15368_v42, %v15355_v5  ;;  %v18432_v31 = vld [vmem:[#allocation18_spill] sm:$0xff] }
 0x2be   :  { %18430 = vst [vmem:[#allocation98_spill] sm:$0xff] %v16027_v7  ;;  %v5633_v15 = vrot.slane %v5619_v32, %v12917_v20  ;;  %v5634_v10 = vcombine.high %v5626_v16, %v5626_v16  ;;  %v5642_v57 = vrot.slane %v5626_v16, %v12917_v20  ;;  %v6219_v4 = vmax.f32 %v6067_v50, 0.0 }
 0x2bf   :  { %v7328_v13 = vcombine.low %v7320_v12, %v7327_v8  ;;  %v7377_v40 = vcombine.low %v7369_v29, %v7376_v17  ;;  %v7418_v62 = vrot.slane %v18432_v31, %v12917_v20  ;;  %v7425_v22 = vrot.slane %v7411_v51, %v12917_v20  ;;  %v16058_v17 = vld [vmem:[%s17614_s3 + $0x10] sm:$0xff]  }
 0x2c0   :  { %v16051_v8 = vrot.slane %v18433_v24, %v12917_v20  ;;  %v5635_v12 = vcombine.high %v5633_v15, %v5633_v15  ;;  %v5649_v19 = vrot.slane %v5633_v15, %v12917_v20  ;;  %v5656_v29 = vrot.slane %v5634_v10, %v12917_v20 }
 0x2c1   :  { %v7983_v44 = vpack.c.bf16 %v7377_v40, %v7328_v13  ;;  %v5664_v32 = vcombine.high %v5642_v57, %v5642_v57  ;;  %v6068_v16 = vadd.f32 %v14859_v34, %v5642_v57  ;;  %v7868_v50 = vcombine.low %v6218_v30, %v6219_v4 }
 0x2c2   :  { %18434 = vst [vmem:[#allocation86_spill] sm:$0xff] %v16051_v8  ;;  %v16061_v51 = vcombine.low %v7418_v62, %v7425_v22  ;;  %v5663_v13 = vrot.slane %v5635_v12, %v12917_v20  ;;  %v5665_v40 = vcombine.high %v5649_v19, %v5649_v19  ;;  %v5666_v31 = vcombine.high %v5656_v29, %v5656_v29 }
 0x2c3   :  { %12421 = vmatmul.mubr.msk.bf16.vlgmr.msra.gmra.mrb[0].mxu1 %vm7999_vm2, %v7983_v44  ;;  %v6069_v15 = vadd.f32 %v14847_v63, %v5656_v29  ;;  %v6070_v10 = vadd.f32 %v14850_v39, %v5664_v32  ;;  %v6072_v24 = vadd.f32 %v14870_v46, %v5649_v19  ;;  %v6220_v28 = vmax.f32 %v6068_v16, 0.0  ;;  %v18437_v16 = vld [vmem:[#allocation118_spill] sm:$0xff] }
 0x2c4   :  { %v7878_v35 = vrot.slane %v7868_v50, %v12917_v20  ;;  %12437 = vmatpush3.bf16.msra.mxu1 %v18435_v18  ;;  %v5667_v34 = vcombine.high %v5663_v13, %v5663_v13  ;;  %v6071_v30 = vadd.f32 %v14864_v58, %v5666_v31  ;;  %v6073_v62 = vadd.f32 %v14841_v9, %v5663_v13 }
 0x2c5   :  { %v6074_v57 = vadd.f32 %v14844_v38, %v5665_v40  ;;  %12454 = vmatprep.subr.bf16.mxu1 %v16058_v17  ;;  %v6221_v22 = vmax.f32 %v6069_v15, 0.0  ;;  %v6222_v63 = vmax.f32 %v6070_v10, 0.0  ;;  %v6224_v44 = vmax.f32 %v6072_v24, 0.0 }
 0x2c6   :  { %v7051_v39 = vcombine.low %v6219_v4, %v6220_v28  ;;  %v6075_v46 = vadd.f32 %v14855_v36, %v5667_v34  ;;  %v6223_v19 = vmax.f32 %v6071_v30, 0.0  ;;  %v6225_v12 = vmax.f32 %v6073_v62, 0.0 }
 0x2c7   :  { %v6226_v29 = vmax.f32 %v6074_v57, 0.0  ;;  %v7052_v32 = vcombine.low %v6221_v22, %v6222_v63  ;;  %v7869_v58 = vcombine.low %v6220_v28, %v6221_v22  ;;  %v7459_v9 = vcombine.low %v16051_v8, %v18437_v16  ;;  %v18456_v22 = vld [vmem:[#allocation6_spill] sm:$0xff] }
 0x2c8   :  { %v16076_v18 = vrot.slane %v7051_v39, %v12917_v20  ;;  %v6227_v38 = vmax.f32 %v6075_v46, 0.0  ;;  %v7053_v50 = vcombine.low %v6223_v19, %v6224_v44  ;;  %v7870_v40 = vcombine.low %v6222_v63, %v6223_v19  ;;  %v18442_v63 = vld [vmem:[#allocation55_spill] sm:$0xff] }
 0x2c9   :  { %v7099_v13 = vcombine.low %v6225_v12, %v6226_v29  ;;  %v16081_v31 = vrot.slane %v7052_v32, %v12917_v20  ;;  %v7871_v4 = vcombine.low %v6224_v44, %v6225_v12  ;;  %v16087_v15 = vrot.slane %v7869_v58, %v12917_v20  ;;  %v18443_v44 = vld [vmem:[#allocation67_spill] sm:$0xff]  ;;  %v18445_v12 = vld [vmem:[#allocation41_spill] sm:$0xff] }
 0x2ca   :  { %18436 = vst [vmem:[#allocation102_spill] sm:$0xff] %v16076_v18  ;;  %v16084_v36 = vcombine.low %v7060_v6, %v16076_v18  ;;  %v16090_v10 = vrot.slane %v7053_v50, %v12917_v20  ;;  %v18439_v28 = vmax.f32 %v15934_v27, 0.0  ;;  %v16100_v30 = vrot.slane %v7870_v40, %v12917_v20  ;;  %v18444_v19 = vld [vmem:[#allocation59_spill] sm:$0xff] }
 0x2cb   :  { %18438 = vst [vmem:[#allocation115_spill] sm:$0xff] %v16087_v15  ;;  %v16097_v34 = vrot.slane %v7099_v13, %v12917_v20  ;;  %v16103_v6 = vrot.slane %v7871_v4, %v12917_v20  ;;  %v7900_v62 = vcombine.low %v7878_v35, %v16087_v15  ;;  %v7917_v57 = vcombine.low %v6226_v29, %v6227_v38  ;;  %v18448_v35 = vld [vmem:[#allocation12_spill] sm:$0xff]  ;;  %v18449_v29 = vld [vmem:[#allocation13_spill] sm:$0xff]  ;;  %v18451_v40 = vld [vmem:[#allocation27_spill] sm:$0xff] }
 0x2cc   :  { %v16094_v24 = vcombine.low %v6227_v38, %v18439_v28  ;;  %18440 = vst [vmem:[#allocation110_spill] sm:$0xff] %v16100_v30  ;;  %v7460_v39 = vcombine.low %v18443_v44, %v18442_v63  ;;  %v7467_v46 = vrot.slane %v7459_v9, %v12917_v20  ;;  %v18446_v32 = vrot.slane %v18445_v12, %v12917_v20  ;;  %v18452_v4 = vld [vmem:[#allocation116_spill] sm:$0xff] }
 0x2cd   :  { %18441 = vst [vmem:[#allocation18_spill] sm:$0xff] %v16103_v6  ;;  %v16118_v50 = vrot.slane %v7917_v57, %v12917_v20  ;;  %v18450_v38 = vcombine.low %v18448_v35, %v18449_v29  ;;  %v7557_v28 = vcombine.low %v18452_v4, %v18451_v40  ;;  %v18453_v9 = vcombine.low %v15595_v33, %v15598_v53  ;;  %v18457_v4 = vld [vmem:[#allocation24_spill] sm:$0xff]  ;;  %v18458_v53 = vld [vmem:[#allocation25_spill] sm:$0xff] }
 0x2ce   :  { %v7508_v58 = vcombine.low %v18446_v32, %v18444_v19  ;;  %v7474_v27 = vrot.slane %v7460_v39, %v12917_v20  ;;  %v16134_v57 = vrot.slane %v15602_v11, %v12917_v20  ;;  %v18455_v32 = vld [vmem:[#allocation9_spill] sm:$0xff]  ;;  %v7656_v40 = vcombine.low %v15549_v21, %v15562_v47  ;;  %v18460_v39 = vld [vmem:[#allocation68_spill] sm:$0xff]  ;;  %v18461_v11 = vld [vmem:[#allocation35_spill] sm:$0xff] }
 0x2cf   :  { %18447 = vst [vmem:[#allocation71_spill] sm:$0xff] %v16118_v50  ;;  %v7523_v13 = vrot.slane %v18450_v38, %v12917_v20  ;;  %v7572_v63 = vrot.slane %v18453_v9, %v12917_v20  ;;  %v7607_v15 = vcombine.low %v18456_v22, %v18455_v32  ;;  %v7565_v38 = vrot.slane %v7557_v28, %v12917_v20  ;;  %v18463_v47 = vld [vmem:[#allocation61_spill] sm:$0xff] }
 0x2d0   :  { %v7516_v12 = vrot.slane %v7508_v58, %v12917_v20  ;;  %18454 = vst [vmem:[#allocation69_spill] sm:$0xff] %v16134_v57  ;;  %v18459_v9 = vcombine.low %v18457_v4, %v18458_v53  ;;  %v7705_v58 = vcombine.low %v18460_v39, %v15825_v3  ;;  %v7475_v29 = vcombine.low %v7467_v46, %v7474_v27  ;;  %v18503_v4 = vld [vmem:[#allocation46_spill] sm:$0xff] }
 0x2d1   :  { %v18462_v35 = vrot.slane %v18461_v11, %v12917_v20  ;;  %v7621_v28 = vrot.slane %v7607_v15, %v12917_v20  ;;  %v7573_v22 = vcombine.low %v7565_v38, %v7572_v63  ;;  %v7670_v21 = vrot.slane %v7656_v40, %v12917_v20  ;;  %v18466_v38 = vld [vmem:[#allocation49_spill] sm:$0xff] }
 0x2d2   :  { %v7663_v33 = vrot.slane %v18459_v9, %v12917_v20  ;;  %v7524_v19 = vcombine.low %v7516_v12, %v7523_v13  ;;  %v7712_v16 = vrot.slane %v18463_v47, %v12917_v20  ;;  %v7719_v9 = vrot.slane %v7705_v58, %v12917_v20  ;;  %v18465_v12 = vld [vmem:[#allocation64_spill] sm:$0xff]  ;;  %v18469_v11 = vld [vmem:[#allocation77_spill] sm:$0xff] }
 0x2d3   :  { %v7606_v32 = vcombine.low %v18462_v35, %v16134_v57  ;;  %v7984_v53 = vpack.c.bf16 %v7475_v29, %v16061_v51  ;;  %v7754_v46 = vcombine.low %v15837_v23, %v15850_v26  ;;  %v18464_v35 = vcombine.low %v15834_v49, %v15847_v37  ;;  %v18499_v37 = vld [vmem:[#allocation11_spill] sm:$0xff]  ;;  %v18504_v57 = vld [vmem:[#allocation33_spill] sm:$0xff] }
 0x2d4   :  { %v7985_v13 = vpack.c.bf16 %v7573_v22, %v7524_v19  ;;  %v7671_v63 = vcombine.low %v7663_v33, %v7670_v21  ;;  %v7720_v40 = vcombine.low %v7712_v16, %v7719_v9  ;;  %v18467_v47 = vrot.slane %v18466_v38, %v12917_v20 }
 0x2d5   :  { %v7614_v27 = vrot.slane %v7606_v32, %v12917_v20  ;;  %v7761_v15 = vrot.slane %v18464_v35, %v12917_v20  ;;  %12424 = vmatprep.mubr.msk.bf16.mxu1 %vm7999_vm2, %v7984_v53  ;;  %v7768_v29 = vrot.slane %v7754_v46, %v12917_v20  ;;  %v18468_v32 = vld [vmem:[#allocation75_spill] sm:$0xff]  ;;  %v18472_v33 = vcombine.low %v15997_v14, %v16005_v56  ;;  %v18479_v14 = vld [vmem:[#allocation40_spill] sm:$0xff]  ;;  %v18488_v56 = vld [vmem:[#allocation117_spill] sm:$0xff] }
 0x2d6   :  { %v7802_v58 = vcombine.low %v18467_v47, %v18465_v12  ;;  %v18470_v26 = vcombine.low %v18468_v32, %v18469_v11  ;;  %v18471_v35 = vld [vmem:[#allocation79_spill] sm:$0xff]  ;;  %12425 = vmatmul.mubr.msk.bf16.gmra.mrb[4].mxu1 %vm7999_vm2, %v7985_v13  ;;  %v7901_v19 = vcombine.low %v16100_v30, %v16103_v6  ;;  %v7908_v53 = vrot.slane %v7900_v62, %v12917_v20  ;;  %v18473_v47 = vld [vmem:[#allocation38_spill] sm:$0xff]  ;;  %v18490_v12 = vld [vmem:[#allocation44_spill] sm:$0xff] }
 0x2d7   :  { %v7622_v51 = vcombine.low %v7614_v27, %v7621_v28  ;;  %v7851_v22 = vcombine.low %v18471_v35, %v15989_v25  ;;  %v7866_v16 = vrot.slane %v18472_v33, %v12917_v20  ;;  %v7769_v9 = vcombine.low %v7761_v15, %v7768_v29  ;;  %v18491_v11 = vld [vmem:[#allocation53_spill] sm:$0xff] }
 0x2d8   :  { %v7817_v23 = vrot.slane %v18470_v26, %v12917_v20  ;;  %v7810_v21 = vrot.slane %v7802_v58, %v12917_v20  ;;  %v7949_v27 = vcombine.low %v16118_v50, %v15955_v61  ;;  %v7915_v13 = vrot.slane %v7901_v19, %v12917_v20  ;;  %v18474_v58 = vld [vmem:[#allocation99_spill] sm:$0xff]  ;;  %v18477_v19 = vld [vmem:[#allocation50_spill] sm:$0xff] }
 0x2d9   :  { %v7986_v28 = vpack.c.bf16 %v7671_v63, %v7622_v51  ;;  %v7859_v26 = vrot.slane %v7851_v22, %v12917_v20  ;;  %v7950_v38 = vcombine.low %v15964_v59, %v15967_v52  ;;  %v6397_v33 = vcombine.low %v18474_v58, %v18473_v47  ;;  %v18475_v63 = vld [vmem:[#allocation97_spill] sm:$0xff]  ;;  %v18478_v52 = vld [vmem:[#allocation42_spill] sm:$0xff] }
 0x2da   :  { %v7818_v46 = vcombine.low %v7810_v21, %v7817_v23  ;;  %v7987_v30 = vpack.c.bf16 %v7769_v9, %v7720_v40  ;;  %v7957_v15 = vrot.slane %v7949_v27, %v12917_v20  ;;  %v6404_v51 = vrot.slane %v18475_v63, %v12917_v20  ;;  %v18476_v21 = vld [vmem:[#allocation43_spill] sm:$0xff]  ;;  %v18482_v9 = vld [vmem:[#allocation28_spill] sm:$0xff] }
 0x2db   :  { %12428 = vmatprep.mubr.msk.bf16.mxu1 %vm7999_vm2, %v7986_v28  ;;  %v7867_v62 = vcombine.low %v7859_v26, %v7866_v16  ;;  %v7916_v29 = vcombine.low %v7908_v53, %v7915_v13  ;;  %v7964_v23 = vrot.slane %v7950_v38, %v12917_v20  ;;  %v6411_v22 = vrot.slane %v6397_v33, %v12917_v20  ;;  %v18481_v16 = vld [vmem:[#allocation120_spill] sm:$0xff]  ;;  %v18483_v26 = vld [vmem:[#allocation45_spill] sm:$0xff] }
 0x2dc   :  { %v6446_v59 = vcombine.low %v18477_v19, %v18476_v21  ;;  %v18480_v28 = vcombine.low %v18478_v52, %v18479_v14  ;;  %v18484_v27 = vcombine.low %v18482_v9, %v18483_v26  ;;  %v18485_v53 = vld [vmem:[#allocation84_spill] sm:$0xff]  ;;  %v6642_v9 = vcombine.low %v18491_v11, %v18490_v12  ;;  %v18493_v26 = vld [vmem:[#allocation122_spill] sm:$0xff] }
 0x2dd   :  { %v7988_v61 = vpack.c.bf16 %v7867_v62, %v7818_v46  ;;  %v18486_v13 = vld [vmem:[#allocation16_spill] sm:$0xff]  ;;  %v7965_v63 = vcombine.low %v7957_v15, %v7964_v23  ;;  %v6412_v33 = vcombine.low %v6404_v51, %v6411_v22  ;;  %v18487_v46 = vld [vmem:[#allocation17_spill] sm:$0xff]  ;;  %v18495_v51 = vld [vmem:[#allocation83_spill] sm:$0xff]  ;;  %v18505_v44 = vrot.slane %v18504_v57, %v12917_v20 }
 0x2de   :  { %v6453_v40 = vrot.slane %v18480_v28, %v12917_v20  ;;  %v16209_v25 = vpack.c.bf16 %v18484_v27, %v18481_v16  ;;  %v6593_v38 = vcombine.low %v18486_v13, %v18485_v53  ;;  %v6460_v6 = vrot.slane %v6446_v59, %v12917_v20  ;;  %v18489_v28 = vld [vmem:[#allocation20_spill] sm:$0xff]  ;;  %v18492_v16 = vld [vmem:[#allocation70_spill] sm:$0xff]  ;;  %12429 = vmatmul.mubr.msk.bf16.gmra.mrb[8].mxu1 %vm7999_vm2, %v7987_v30 }
 0x2df   :  { %v6600_v62 = vrot.slane %v18487_v46, %v12917_v20  ;;  %v6641_v32 = vcombine.low %v18489_v28, %v18488_v56  ;;  %v18494_v27 = vrot.slane %v18493_v26, %v12917_v20  ;;  %v7989_v15 = vpack.c.bf16 %v7965_v63, %v7916_v29  ;;  %v18496_v23 = vld [vmem:[#allocation10_spill] sm:$0xff]  ;;  %12432 = vmatprep.mubr.msk.bf16.mxu1 %vm7999_vm2, %v7988_v61 }
 0x2e0   :  { %v6607_v50 = vrot.slane %v6593_v38, %v12917_v20  ;;  %v6461_v59 = vcombine.low %v6453_v40, %v6460_v6  ;;  %v18497_v22 = vcombine.low %v18495_v51, %v18496_v23  ;;  %v18498_v46 = vld [vmem:[#allocation14_spill] sm:$0xff]  ;;  %v6656_v26 = vrot.slane %v6642_v9, %v12917_v20  ;;  %v18507_v9 = vld [vmem:[#allocation8_spill] sm:$0xff] }
 0x2e1   :  { %v6690_v35 = vcombine.low %v18494_v27, %v18492_v16  ;;  %v6739_v49 = vcombine.low %v18499_v37, %v18498_v46  ;;  %v6649_v39 = vrot.slane %v6641_v32, %v12917_v20  ;;  %v18500_v29 = vld [vmem:[#allocation26_spill] sm:$0xff]  ;;  %v6788_v61 = vcombine.low %v18505_v44, %v18503_v4  ;;  %v18506_v32 = vld [vmem:[#allocation104_spill] sm:$0xff] }
 0x2e2   :  { %v6705_v38 = vrot.slane %v18497_v22, %v12917_v20  ;;  %v6608_v3 = vcombine.low %v6600_v62, %v6607_v50  ;;  %v7164_v30 = vpack.c.bf16 %v6461_v59, %v6412_v33  ;;  %v18501_v40 = vld [vmem:[#allocation34_spill] sm:$0xff]  ;;  %v18508_v5 = vcombine.low %v18506_v32, %v18507_v9  ;;  %v18509_v33 = vld [vmem:[#allocation32_spill] sm:$0xff]  ;;  %v18510_v59 = vld [vmem:[#allocation7_spill] sm:$0xff] }
 0x2e3   :  { %v6698_v27 = vrot.slane %v6690_v35, %v12917_v20  ;;  %v6747_v6 = vrot.slane %v6739_v49, %v12917_v20  ;;  %v18502_v63 = vcombine.low %v18500_v29, %v18501_v40  ;;  %v6657_v50 = vcombine.low %v6649_v39, %v6656_v26  ;;  %v18511_v40 = vld [vmem:[#allocation21_spill] sm:$0xff]  ;;  %v18514_v44 = vld [vmem:[#allocation58_spill] sm:$0xff] }
 0x2e4   :  { %v6803_v35 = vrot.slane %v18508_v5, %v12917_v20  ;;  %v6837_v49 = vcombine.low %v18510_v59, %v18509_v33  ;;  %v6796_v42 = vrot.slane %v6788_v61, %v12917_v20  ;;  %v6887_v57 = vcombine.low %v18514_v44, %v15803_v60  ;;  %v18515_v26 = vld [vmem:[#allocation62_spill] sm:$0xff] }
 0x2e5   :  { %v6754_v22 = vrot.slane %v18502_v63, %v12917_v20  ;;  %v6706_v62 = vcombine.low %v6698_v27, %v6705_v38  ;;  %v18512_v63 = vld [vmem:[#allocation23_spill] sm:$0xff]  ;;  %v7166_v39 = vpack.c.bf16 %v6657_v50, %v6608_v3  ;;  %v6894_v5 = vrot.slane %v18515_v26, %v12917_v20  ;;  %v18518_v50 = vld [vmem:[#allocation60_spill] sm:$0xff] }
 0x2e6   :  { %v18513_v18 = vcombine.low %v18511_v40, %v18512_v63  ;;  %v6845_v38 = vrot.slane %v6837_v49, %v12917_v20  ;;  %v6936_v27 = vcombine.low %v15842_v41, %v15831_v43  ;;  %v6901_v61 = vrot.slane %v6887_v57, %v12917_v20  ;;  %v18519_v49 = vld [vmem:[#allocation51_spill] sm:$0xff]  ;;  %12433 = vmatmul.mubr.msk.bf16.gmra.mrb[12].mxu1 %vm7999_vm2, %v7989_v15  ;;  %v18524_v57 = vld [vmem:[#allocation78_spill] sm:$0xff] }
 0x2e7   :  { %v6755_v8 = vcombine.low %v6747_v6, %v6754_v22  ;;  %v6804_v22 = vcombine.low %v6796_v42, %v6803_v35  ;;  %v18520_v26 = vrot.slane %v18519_v49, %v12917_v20  ;;  %v18521_v43 = vld [vmem:[#allocation63_spill] sm:$0xff]  ;;  %12438 = vmatprep.mubr.msk.bf16.mxu1 %vm7999_vm2, %v7164_v30  ;;  %v7090_v15 = vrot.slane %v16084_v36, %v12917_v20 }
 0x2e8   :  { %v6852_v7 = vrot.slane %v18513_v18, %v12917_v20  ;;  %v18517_v18 = vcombine.low %v15822_v2, %v15828_v45  ;;  %v6950_v3 = vrot.slane %v6936_v27, %v12917_v20  ;;  %v6902_v35 = vcombine.low %v6894_v5, %v6901_v61 }
 0x2e9   :  { %v16263_v6 = vpack.c.bf16 %v6755_v8, %v6706_v62  ;;  %v6984_v44 = vcombine.low %v18520_v26, %v18518_v50  ;;  %v18522_v8 = vld [vmem:[#allocation76_spill] sm:$0xff]  ;;  %v7083_v27 = vcombine.low %v16081_v31, %v16090_v10  ;;  %v18528_v36 = vcombine.low %v18473_v47, %v18478_v52  ;;  %v18532_v52 = vld [vmem:[#allocation121_spill] sm:$0xff] }
 0x2ea   :  { %v6943_v0 = vrot.slane %v18517_v18, %v12917_v20  ;;  %v6853_v60 = vcombine.low %v6845_v38, %v6852_v7  ;;  %v18523_v62 = vcombine.low %v18521_v43, %v18522_v8  ;;  %v18526_v7 = vcombine.low %v15992_v55, %v16002_v1 }
 0x2eb   :  { %18516 = vst [vmem:[#allocation55_spill] sm:$0xff] %v16263_v6  ;;  %v18525_v6 = vld [vmem:[#allocation80_spill] sm:$0xff]  ;;  %v6992_v26 = vrot.slane %v6984_v44, %v12917_v20  ;;  %v7097_v61 = vrot.slane %v7083_v27, %v12917_v20  ;;  %v16298_v1 = vrot.slane %v16094_v24, %v12917_v20 }
 0x2ec   :  { %v6999_v42 = vrot.slane %v18523_v62, %v12917_v20  ;;  %v7033_v45 = vcombine.low %v18525_v6, %v18524_v57  ;;  %v7048_v38 = vrot.slane %v18526_v7, %v12917_v20  ;;  %v16289_v18 = vpack.c.bf16 %v6853_v60, %v6804_v22 }
 0x2ed   :  { %v6951_v49 = vcombine.low %v6943_v0, %v6950_v3  ;;  %v7132_v62 = vcombine.low %v15952_v54, %v15961_v48  ;;  %v18527_v0 = vld [vmem:[#allocation101_spill] sm:$0xff]  ;;  %v7098_v3 = vcombine.low %v7090_v15, %v7097_v61  ;;  %v7131_v24 = vcombine.low %v16097_v34, %v16298_v1 }
 0x2ee   :  { %v7041_v5 = vrot.slane %v7033_v45, %v12917_v20  ;;  %v7000_v60 = vcombine.low %v6992_v26, %v6999_v42  ;;  %v8256_v44 = vcombine.low %v18527_v0, %v18474_v58  ;;  %v8271_v45 = vrot.slane %v18528_v36, %v12917_v20  ;;  %v18531_v26 = vld [vmem:[#allocation15_spill] sm:$0xff]  ;;  %12439 = vmatmul.mubr.msk.bf16.vlgmr.msra.gmra.mrb[0].mxu1 %vm7999_vm2, %v16209_v25 }
 0x2ef   :  { %v16302_v30 = vpack.c.bf16 %v6951_v49, %v6902_v35  ;;  %v7146_v7 = vrot.slane %v7132_v62, %v12917_v20  ;;  %v8281_v42 = vcombine.low %v18479_v14, %v18477_v19  ;;  %v18529_v35 = vld [vmem:[#allocation85_spill] sm:$0xff]  ;;  %v18533_v47 = vcombine.low %v18531_v26, %v18532_v52  ;;  %v16332_v62 = vld [vmem:[%s17614_s3 + $0x18] sm:$0xff]   ;;  %12455 = vmatpush3.bf16.msra.mxu1 %v16058_v17 }
 0x2f0   :  { %v7049_v22 = vcombine.low %v7041_v5, %v7048_v38  ;;  %v8264_v27 = vrot.slane %v8256_v44, %v12917_v20  ;;  %v18530_v58 = vrot.slane %v18529_v35, %v12917_v20  ;;  %v18534_v38 = vld [vmem:[#allocation30_spill] sm:$0xff]  ;;  %v7139_v61 = vrot.slane %v7131_v24, %v12917_v20  ;;  %12442 = vmatprep.mubr.msk.bf16.mxu1 %vm7999_vm2, %v7166_v39  ;;  %v18541_v39 = vld [vmem:[#allocation37_spill] sm:$0xff]  ;;  %v18542_v52 = vld [vmem:[#allocation19_spill] sm:$0xff] }
 0x2f1   :  { %v16324_v15 = vpack.c.bf16 %v18534_v38, %v18533_v47  ;;  %v8341_v14 = vcombine.low %v18485_v53, %v18489_v28  ;;  %v8289_v36 = vrot.slane %v8281_v42, %v12917_v20  ;;  %v18540_v25 = vcombine.low %v18496_v23, %v18499_v37  ;;  %12472 = vmatprep.subr.bf16.mxu1 %v16332_v62 }
 0x2f2   :  { %v8282_v49 = vcombine.low %v18476_v21, %v18530_v58  ;;  %v16326_v5 = vpack.c.bf16 %v7049_v22, %v7000_v60  ;;  %v18535_v21 = vld [vmem:[#allocation82_spill] sm:$0xff]  ;;  %v8272_v44 = vcombine.low %v8264_v27, %v8271_v45  ;;  %v18537_v22 = vld [vmem:[#allocation57_spill] sm:$0xff]  ;;  %v7147_v58 = vcombine.low %v7139_v61, %v7146_v7 }
 0x2f3   :  { %v18536_v19 = vcombine.low %v18535_v21, %v18486_v13  ;;  %v18538_v24 = vrot.slane %v18537_v22, %v12917_v20  ;;  %v8355_v53 = vrot.slane %v8341_v14, %v12917_v20  ;;  %v18539_v13 = vcombine.low %v18488_v56, %v18491_v11  ;;  %v18546_v14 = vld [vmem:[#allocation54_spill] sm:$0xff] }
 0x2f4   :  { %v8296_v60 = vrot.slane %v8282_v49, %v12917_v20  ;;  %v8382_v45 = vcombine.low %v18492_v16, %v18495_v51  ;;  %v8397_v7 = vrot.slane %v18540_v25, %v12917_v20  ;;  %v16362_v42 = vpack.c.bf16 %v7147_v58, %v7098_v3 }
 0x2f5   :  { %v8348_v0 = vrot.slane %v18536_v19, %v12917_v20  ;;  %v8366_v35 = vcombine.low %v18490_v12, %v18538_v24  ;;  %v8373_v28 = vrot.slane %v18539_v13, %v12917_v20  ;;  %v8407_v17 = vcombine.low %v18498_v46, %v18500_v29 }
 0x2f6   :  { %v8297_v27 = vcombine.low %v8289_v36, %v8296_v60  ;;  %v8390_v11 = vrot.slane %v8382_v45, %v12917_v20  ;;  %v8422_v49 = vrot.slane %v18541_v39, %v12917_v20  ;;  %v8424_v37 = vcombine.low %v18503_v4, %v18506_v32  ;;  %v18545_v32 = vld [vmem:[#allocation58_spill] sm:$0xff]  ;;  %v18549_v60 = vld [vmem:[#allocation93_spill] sm:$0xff] }
 0x2f7   :  { %v8380_v12 = vrot.slane %v8366_v35, %v12917_v20  ;;  %v8356_v56 = vcombine.low %v8348_v0, %v8355_v53  ;;  %v8415_v3 = vrot.slane %v8407_v17, %v12917_v20  ;;  %v8425_v26 = vcombine.low %v18507_v9, %v18510_v59  ;;  %v18547_v0 = vld [vmem:[#allocation88_spill] sm:$0xff]  ;;  %v18551_v35 = vld [vmem:[#allocation55_spill] sm:$0xff] }
 0x2f8   :  { %v16368_v16 = vpack.c.bf16 %v8297_v27, %v8272_v44  ;;  %v8398_v23 = vcombine.low %v8390_v11, %v8397_v7  ;;  %v18543_v47 = vrot.slane %v18542_v52, %v12917_v20  ;;  %v8432_v38 = vrot.slane %v8424_v37, %v12917_v20  ;;  %12443 = vmatmul.mubr.msk.bf16.gmra.mrb[4].mxu1 %vm7999_vm2, %v18551_v35  ;;  %v18554_v7 = vld [vmem:[#allocation98_spill] sm:$0xff] }
 0x2f9   :  { %v8381_v51 = vcombine.low %v8373_v28, %v8380_v12  ;;  %v18544_v61 = vcombine.low %v18509_v33, %v18511_v40  ;;  %v8466_v21 = vcombine.low %v18546_v14, %v18545_v32  ;;  %v8423_v19 = vcombine.low %v8415_v3, %v8422_v49  ;;  %v18550_v33 = vld [vmem:[#allocation66_spill] sm:$0xff]  ;;  %12446 = vmatprep.mubr.msk.bf16.mxu1 %vm7999_vm2, %v16289_v18 }
 0x2fa   :  { %v8450_v46 = vcombine.low %v18512_v63, %v18543_v47  ;;  %v8439_v9 = vrot.slane %v8425_v26, %v12917_v20  ;;  %v18548_v63 = vcombine.low %v18547_v0, %v15822_v2  ;;  %v8490_v22 = vrot.slane %v18549_v60, %v12917_v20  ;;  %v18555_v11 = vld [vmem:[#allocation102_spill] sm:$0xff]  ;;  %v18562_v47 = vld [vmem:[#allocation103_spill] sm:$0xff]  ;;  %v18572_v60 = vld [vmem:[#allocation56_spill] sm:$0xff] }
 0x2fb   :  { %v16381_v29 = vpack.c.bf16 %v8381_v51, %v8356_v56  ;;  %v8457_v4 = vrot.slane %v18544_v61, %v12917_v20  ;;  %v8474_v36 = vrot.slane %v8466_v21, %v12917_v20  ;;  %v8491_v40 = vcombine.low %v18550_v33, %v15842_v41  ;;  %v18553_v41 = vld [vmem:[#allocation65_spill] sm:$0xff]  ;;  %v18566_v61 = vld [vmem:[#allocation107_spill] sm:$0xff]  ;;  %v18573_v33 = vld [vmem:[#allocation96_spill] sm:$0xff] }
 0x2fc   :  { %v8464_v59 = vrot.slane %v8450_v46, %v12917_v20  ;;  %v8481_v44 = vrot.slane %v18548_v63, %v12917_v20  ;;  %v8508_v24 = vcombine.low %v18518_v50, %v18521_v43  ;;  %v16405_v58 = vpack.c.bf16 %v8423_v19, %v8398_v23  ;;  %v18560_v23 = vld [vmem:[#allocation90_spill] sm:$0xff]  ;;  %v18568_v19 = vld [vmem:[#allocation105_spill] sm:$0xff] }
 0x2fd   :  { %v8440_v53 = vcombine.low %v8432_v38, %v8439_v9  ;;  %v18552_v2 = vcombine.low %v18522_v8, %v18525_v6  ;;  %v8492_v27 = vcombine.low %v18553_v41, %v8490_v22  ;;  %v8499_v43 = vrot.slane %v8491_v40, %v12917_v20  ;;  %v18565_v38 = vld [vmem:[#allocation108_spill] sm:$0xff]  ;;  %v18569_v63 = vld [vmem:[#allocation29_spill] sm:$0xff] }
 0x2fe   :  { %v8465_v13 = vcombine.low %v8457_v4, %v8464_v59  ;;  %v8482_v45 = vcombine.low %v8474_v36, %v8481_v44  ;;  %v8516_v50 = vrot.slane %v8508_v24, %v12917_v20  ;;  %v8533_v25 = vcombine.low %v18524_v57, %v15992_v55  ;;  %v18557_v57 = vld [vmem:[#allocation109_spill] sm:$0xff]  ;;  %v18570_v44 = vld [vmem:[#allocation39_spill] sm:$0xff] }
 0x2ff   :  { %v8523_v28 = vrot.slane %v18552_v2, %v12917_v20  ;;  %v8548_v56 = vrot.slane %v18554_v7, %v12917_v20  ;;  %v8551_v6 = vcombine.low %v16090_v10, %v16097_v34  ;;  %v8506_v8 = vrot.slane %v8492_v27, %v12917_v20  ;;  %v18559_v34 = vld [vmem:[#allocation87_spill] sm:$0xff]  ;;  %v18574_v40 = vld [vmem:[#allocation73_spill] sm:$0xff]  ;;  %v18575_v2 = vld [vmem:[#allocation86_spill] sm:$0xff] }
 0x300   :  { %v16416_v12 = vpack.c.bf16 %v8465_v13, %v8440_v53  ;;  %v18556_v17 = vcombine.low %v18555_v11, %v16081_v31  ;;  %v8575_v39 = vcombine.low %v16298_v1, %v15952_v54  ;;  %v8541_v49 = vrot.slane %v8533_v25, %v12917_v20  ;;  %v18563_v54 = vld [vmem:[#allocation95_spill] sm:$0xff]  ;;  %12447 = vmatmul.mubr.msk.bf16.gmra.mrb[8].mxu1 %vm7999_vm2, %v16302_v30  ;;  %v18579_v25 = vld [vmem:[#allocation74_spill] sm:$0xff] }
 0x301   :  { %v8524_v18 = vcombine.low %v8516_v50, %v8523_v28  ;;  %v8565_v55 = vrot.slane %v8551_v6, %v12917_v20  ;;  %v18558_v37 = vrot.slane %v18557_v57, %v12917_v20  ;;  %v18561_v3 = vcombine.low %v18559_v34, %v18560_v23  ;;  %v18576_v28 = vld [vmem:[#allocation72_spill] sm:$0xff]  ;;  %12450 = vmatprep.mubr.msk.bf16.mxu1 %vm7999_vm2, %v16326_v5  ;;  %v18577_v27 = vld [vmem:[#allocation67_spill] sm:$0xff] }
 0x302   :  { %v8558_v51 = vrot.slane %v18556_v17, %v12917_v20  ;;  %v8507_v52 = vcombine.low %v8499_v43, %v8506_v8  ;;  %v8583_v31 = vrot.slane %v8575_v39, %v12917_v20  ;;  %v18564_v1 = vcombine.low %v18562_v47, %v18563_v54  ;;  %v18578_v43 = vld [vmem:[#allocation118_spill] sm:$0xff]  ;;  %v18581_v30 = vld [vmem:[#allocation59_spill] sm:$0xff]  ;;  %v18582_v17 = vld [vmem:[#allocation13_spill] sm:$0xff] }
 0x303   :  { %v8576_v10 = vcombine.low %v15961_v48, %v18558_v37  ;;  %v8778_v26 = vrot.slane %v18561_v3, %v12917_v20  ;;  %v18567_v4 = vcombine.low %v18565_v38, %v18566_v61  ;;  %v8549_v14 = vcombine.low %v8541_v49, %v8548_v56  ;;  %v18580_v56 = vld [vmem:[#allocation12_spill] sm:$0xff]  ;;  %v18586_v37 = vld [vmem:[#allocation27_spill] sm:$0xff]  ;;  %v18591_v54 = vld [vmem:[#allocation9_spill] sm:$0xff] }
 0x304   :  { %v8785_v46 = vrot.slane %v18564_v1, %v12917_v20  ;;  %v8566_v48 = vcombine.low %v8558_v51, %v8565_v55  ;;  %v8810_v9 = vrot.slane %v18568_v19, %v12917_v20  ;;  %v16453_v59 = vpack.c.bf16 %v8507_v52, %v8482_v45  ;;  %v18583_v51 = vld [vmem:[#allocation116_spill] sm:$0xff]  ;;  %v18589_v52 = vld [vmem:[#allocation69_spill] sm:$0xff]  ;;  %v18594_v61 = vld [vmem:[#allocation119_spill] sm:$0xff] }
 0x305   :  { %v8803_v32 = vrot.slane %v18567_v4, %v12917_v20  ;;  %v8590_v21 = vrot.slane %v8576_v10, %v12917_v20  ;;  %v18571_v36 = vcombine.low %v18569_v63, %v18570_v44  ;;  %v8854_v24 = vcombine.low %v18574_v40, %v18573_v33  ;;  %v18585_v57 = vld [vmem:[#allocation36_spill] sm:$0xff]  ;;  %v18596_v19 = vld [vmem:[#allocation31_spill] sm:$0xff] }
 0x306   :  { %v8786_v0 = vcombine.low %v8778_v26, %v8785_v46  ;;  %v16465_v35 = vpack.c.bf16 %v8549_v14, %v8524_v18  ;;  %v8855_v45 = vcombine.low %v18576_v28, %v18575_v2  ;;  %v8879_v50 = vcombine.low %v18578_v43, %v18577_v27  ;;  %v18587_v34 = vld [vmem:[#allocation48_spill] sm:$0xff]  ;;  %v18588_v26 = vld [vmem:[#allocation6_spill] sm:$0xff]  ;;  %v18604_v27 = vld [vmem:[#allocation91_spill] sm:$0xff] }
 0x307   :  { %v16459_v22 = vpack.c.bf16 %v18572_v60, %v18571_v36  ;;  %v8591_v53 = vcombine.low %v8583_v31, %v8590_v21  ;;  %v8811_v13 = vcombine.low %v8803_v32, %v8810_v9  ;;  %v8862_v41 = vrot.slane %v8854_v24, %v12917_v20  ;;  %v18590_v47 = vld [vmem:[#allocation24_spill] sm:$0xff]  ;;  %v18592_v46 = vld [vmem:[#allocation22_spill] sm:$0xff]  ;;  %v18595_v21 = vld [vmem:[#allocation25_spill] sm:$0xff] }
 0x308   :  { %v8894_v7 = vrot.slane %v18579_v25, %v12917_v20  ;;  %v8896_v6 = vcombine.low %v18581_v30, %v18580_v56  ;;  %v8869_v11 = vrot.slane %v8855_v45, %v12917_v20  ;;  %v18584_v39 = vcombine.low %v18582_v17, %v18583_v51  ;;  %v18598_v60 = vld [vmem:[#allocation68_spill] sm:$0xff]  ;;  %12451 = vmatmul.mubr.msk.bf16.gmra.mrb[12].mxu1 %vm7999_vm2, %v16362_v42  ;;  %v18605_v56 = vld [vmem:[#allocation47_spill] sm:$0xff] }
 0x309   :  { %v8615_v8 = vpack.c.bf16 %v8591_v53, %v8566_v48  ;;  %v9122_v18 = vpack.c.bf16 %v8811_v13, %v8786_v0  ;;  %v8887_v49 = vrot.slane %v8879_v50, %v12917_v20  ;;  %v8921_v10 = vcombine.low %v18586_v37, %v18585_v57  ;;  %v18599_v33 = vld [vmem:[#allocation52_spill] sm:$0xff]  ;;  %v18600_v13 = vld [vmem:[#allocation81_spill] sm:$0xff]  ;;  %12456 = vmatprep.mubr.msk.bf16.mxu1 %vm7999_vm2, %v16368_v16 }
 0x30a   :  { %v8911_v5 = vrot.slane %v18584_v39, %v12917_v20  ;;  %v8904_v55 = vrot.slane %v8896_v6, %v12917_v20  ;;  %v8936_v23 = vrot.slane %v18587_v34, %v12917_v20  ;;  %v8870_v3 = vcombine.low %v8862_v41, %v8869_v11  ;;  %v18601_v2 = vld [vmem:[#allocation100_spill] sm:$0xff]  ;;  %v18607_v6 = vld [vmem:[#allocation94_spill] sm:$0xff]  ;;  %v18608_v39 = vld [vmem:[#allocation79_spill] sm:$0xff] }
 0x30b   :  { %v8938_v31 = vcombine.low %v18589_v52, %v18588_v26  ;;  %v8939_v1 = vcombine.low %v18591_v54, %v18590_v47  ;;  %v18593_v38 = vrot.slane %v18592_v46, %v12917_v20  ;;  %v8895_v32 = vcombine.low %v8887_v49, %v8894_v7  ;;  %v18603_v41 = vld [vmem:[#allocation92_spill] sm:$0xff]  ;;  %v18616_v47 = vld [vmem:[#allocation71_spill] sm:$0xff]  ;;  %v18617_v54 = vld [vmem:[#allocation18_spill] sm:$0xff] }
 0x30c   :  { %v8912_v14 = vcombine.low %v8904_v55, %v8911_v5  ;;  %v8929_v48 = vrot.slane %v8921_v10, %v12917_v20  ;;  %v18597_v9 = vcombine.low %v18595_v21, %v18596_v19  ;;  %v8980_v40 = vcombine.low %v18599_v33, %v18598_v60  ;;  %v18609_v5 = vld [vmem:[#allocation77_spill] sm:$0xff]  ;;  %v18610_v42 = vld [vmem:[#allocation64_spill] sm:$0xff]  ;;  %v18611_v55 = vld [vmem:[#allocation75_spill] sm:$0xff] }
 0x30d   :  { %v8964_v4 = vcombine.low %v18594_v61, %v18593_v38  ;;  %v8946_v63 = vrot.slane %v8938_v31, %v12917_v20  ;;  %v8953_v44 = vrot.slane %v8939_v1, %v12917_v20  ;;  %v9124_v24 = vpack.c.bf16 %v8895_v32, %v8870_v3  ;;  %v18613_v3 = vld [vmem:[#allocation123_spill] sm:$0xff]  ;;  %v18615_v52 = vld [vmem:[#allocation124_spill] sm:$0xff]  ;;  %v18618_v38 = vld [vmem:[#allocation114_spill] sm:$0xff] }
 0x30e   :  { %v8971_v0 = vrot.slane %v18597_v9, %v12917_v20  ;;  %v8937_v53 = vcombine.low %v8929_v48, %v8936_v23  ;;  %v18602_v28 = vcombine.low %v18600_v13, %v18601_v2  ;;  %v9005_v43 = vcombine.low %v18604_v27, %v18603_v41  ;;  %v18619_v61 = vld [vmem:[#allocation89_spill] sm:$0xff]  ;;  %v18621_v48 = vld [vmem:[#allocation112_spill] sm:$0xff]  ;;  %v18627_v13 = vld [vmem:[#allocation111_spill] sm:$0xff] }
 0x30f   :  { %v8978_v36 = vrot.slane %v8964_v4, %v12917_v20  ;;  %v8954_v50 = vcombine.low %v8946_v63, %v8953_v44  ;;  %v8988_v7 = vrot.slane %v8980_v40, %v12917_v20  ;;  %v18606_v30 = vrot.slane %v18605_v56, %v12917_v20  ;;  %v18623_v19 = vld [vmem:[#allocation113_spill] sm:$0xff]  ;;  %v18624_v63 = vld [vmem:[#allocation115_spill] sm:$0xff]  ;;  %v18625_v44 = vld [vmem:[#allocation110_spill] sm:$0xff] }
 0x310   :  { %v8995_v45 = vrot.slane %v18602_v28, %v12917_v20  ;;  %v9125_v17 = vpack.c.bf16 %v8937_v53, %v8912_v14  ;;  %v9013_v51 = vrot.slane %v9005_v43, %v12917_v20  ;;  %v9023_v49 = vcombine.low %v18609_v5, %v18608_v39  ;;  %v18628_v2 = vld [vmem:[#allocation106_spill] sm:$0xff]  ;;  %12457 = vmatmul.mubr.msk.bf16.vlgmr.msra.gmra.mrb[0].mxu1 %vm7999_vm2, %v16324_v15  ;;  %v12753_v15 = vld [vmem:[%s17616_s5 + $0x8] sm:$0xff]  }
 0x311   :  { %v8979_v25 = vcombine.low %v8971_v0, %v8978_v36  ;;  %v9006_v11 = vcombine.low %v18607_v6, %v18606_v30  ;;  %v18612_v57 = vcombine.low %v18610_v42, %v18611_v55  ;;  %v18614_v26 = vrot.slane %v18613_v3, %v12917_v20  ;;  %12473 = vmatpush3.bf16.msra.mxu1 %v16332_v62 }
 0x312   :  { %v8996_v34 = vcombine.low %v8988_v7, %v8995_v45  ;;  %v9037_v31 = vrot.slane %v9023_v49, %v12917_v20  ;;  %v9065_v1 = vcombine.low %v18617_v54, %v18616_v47  ;;  %v18620_v4 = vcombine.low %v18618_v38, %v18619_v61  ;;  %12460 = vmatprep.mubr.msk.bf16.mxu1 %vm7999_vm2, %v16381_v29 }
 0x313   :  { %v9030_v37 = vrot.slane %v18612_v57, %v12917_v20  ;;  %v9126_v10 = vpack.c.bf16 %v8979_v25, %v8954_v50  ;;  %v9020_v23 = vrot.slane %v9006_v11, %v12917_v20  ;;  %v9048_v16 = vcombine.low %v18615_v52, %v18614_v26 }
 0x314   :  { %v9055_v32 = vrot.slane %v18620_v4, %v12917_v20  ;;  %v18622_v21 = vrot.slane %v18621_v48, %v12917_v20  ;;  %v18626_v36 = vcombine.low %v18624_v63, %v18625_v44  ;;  %v9079_v33 = vrot.slane %v9065_v1, %v12917_v20 }
 0x315   :  { %v9021_v46 = vcombine.low %v9013_v51, %v9020_v23  ;;  %v9062_v14 = vrot.slane %v9048_v16, %v12917_v20  ;;  %v9038_v0 = vcombine.low %v9030_v37, %v9037_v31  ;;  %v18629_v28 = vcombine.low %v18627_v13, %v18628_v2 }
 0x316   :  { %v9090_v9 = vcombine.low %v18623_v19, %v18622_v21  ;;  %v9072_v60 = vrot.slane %v18626_v36, %v12917_v20  ;;  %v12806_v62 = vmov 1983009808  }
 0x317   :  { %v9127_v40 = vpack.c.bf16 %v9021_v46, %v8996_v34  ;;  %v9063_v53 = vcombine.low %v9055_v32, %v9062_v14  ;;  %v9097_v45 = vrot.slane %v18629_v28, %v12917_v20  ;;  %v9365_v29 = vunpack.c.l.s4 %v12806_v62 }
 0x318   :  { %v9104_v41 = vrot.slane %v9090_v9, %v12917_v20  ;;  %v9080_v27 = vcombine.low %v9072_v60, %v9079_v33  ;;  %12461 = vmatmul.mubr.msk.bf16.gmra.mrb[4].mxu1 %vm7999_vm2, %v16405_v58  ;;  %v17955_v20 = vmov 0.0   ;;  %v16587_v58 = vld [vmem:[%s17615_s4] ss:$0 sm:$0xff] }
 0x319   :  { %v9128_v43 = vpack.c.bf16 %v9063_v53, %v9038_v0  ;;  %12464 = vmatprep.mubr.msk.bf16.mxu1 %vm7999_vm2, %v16416_v12  ;;  %12490 = vmatprep.subr.bf16.mxu1 %v17955_v20  ;;  %v9366_v12 = vunpack.c.0.s8 %v9365_v29 }
 0x31a   :  { %v9105_v50 = vcombine.low %v9097_v45, %v9104_v41 }
 0x31c   :  { %v9129_v25 = vpack.c.bf16 %v9105_v50, %v9080_v27 }
 0x320   :  { %12465 = vmatmul.mubr.msk.bf16.gmra.mrb[8].mxu1 %vm7999_vm2, %v16453_v59 }
 0x321   :  { %12468 = vmatprep.mubr.msk.bf16.mxu1 %vm7999_vm2, %v16465_v35 }
 0x328   :  { %12469 = vmatmul.mubr.msk.bf16.gmra.mrb[12].mxu1 %vm7999_vm2, %v8615_v8  ;;  %v18630_v8 = vld [vmem:[#allocation5_spill] sm:$0xff] }
 0x329   :  { %12474 = vmatprep.mubr.msk.bf16.mxu1 %vm7999_vm2, %v9122_v18  ;;  %v16591_v18 = vsub.s32 %v9366_v12, %v18630_v8 }
 0x32b   :  { %18631 = vst [vmem:[#allocation41_spill] sm:$0xff] %v16591_v18 }
 0x330   :  { %12475 = vmatmul.mubr.msk.bf16.vlgmr.msra.gmra.mrb[0].mxu1 %vm7999_vm2, %v16459_v22 }
 0x331   :  { %12478 = vmatprep.mubr.msk.bf16.mxu1 %vm7999_vm2, %v9124_v24  ;;  %12491 = vmatpush3.bf16.msra.mxu1 %v12753_v15 }
 0x332   :  { %12504 = vmatprep.subr.bf16.mxu1 %v17955_v20 }
 0x338   :  { %12479 = vmatmul.mubr.msk.bf16.gmra.mrb[4].mxu1 %vm7999_vm2, %v9125_v17 }
 0x339   :  { %12482 = vmatprep.mubr.msk.bf16.mxu1 %vm7999_vm2, %v9126_v10 }
 0x340   :  { %12483 = vmatmul.mubr.msk.bf16.gmra.mrb[8].mxu1 %vm7999_vm2, %v9127_v40 }
 0x341   :  { %12486 = vmatprep.mubr.msk.bf16.mxu1 %vm7999_vm2, %v9128_v43 }
 0x348   :  { %12487 = vmatmul.mubr.msk.bf16.gmra.mrb[12].mxu1 %vm7999_vm2, %v9129_v25 }
 0x349   :  { %12492 = vmatprep.mubr.msk.bf16.mxu1 %vm12807_vm4, %v17955_v20 }
 0x403   :  { %v12476_v59 = vpop.f32.mrb[0].mxu1 }
 0x404   :  { %v9285_v22 = vadd.f32 %v12476_v59, %v16587_v58  ;;  %v9197_v35 = vpop.f32.mrb[1].mxu1 }
 0x405   :  { %v9283_v24 = vadd.f32 %v16587_v58, %v9197_v35  ;;  %v12477_v7 = vpop.f32.mrb[2].mxu1 }
 0x406   :  { %vm9301_vm3 = vcmp.ge.f32.partialorder %v9285_v22, 0.0  ;;  %v9317_v56 = vmul.f32 0.01, %v9285_v22  ;;  %v9286_v30 = vadd.f32 %v12477_v7, %v16587_v58  ;;  %v9200_v6 = vpop.f32.mrb[3].mxu1 }
 0x407   :  { %vm9299_vm5 = vcmp.ge.f32.partialorder %v9283_v24, 0.0  ;;  %v9315_v11 = vmul.f32 0.01, %v9283_v24  ;;  %v16601_v23 = vadd.f32 %v16587_v58, %v9200_v6 }
 0x408   :  { %v9333_v17 = vsel %vm9301_vm3, %v9285_v22, %v9317_v56  ;;  %vm9302_vm6 = vcmp.ge.f32.partialorder %v9286_v30, 0.0  ;;  %v9318_v51 = vmul.f32 0.01, %v9286_v30 }
 0x409   :  { %v9397_v39 = vcombine.high %v9333_v17, %v9333_v17  ;;  %v9404_v5 = vrot.slane %v9333_v17, %v16591_v18  ;;  %v9331_v49 = vsel %vm9299_vm5, %v9283_v24, %v9315_v11  ;;  %vm9300_vm10 = vcmp.ge.f32.partialorder %v16601_v23, 0.0 }
 0x40a   :  { %v9363_v42 = vcombine.high %v9331_v49, %v9331_v49  ;;  %v9370_v55 = vrot.slane %v9331_v49, %v16591_v18  ;;  %v9334_v57 = vsel %vm9302_vm6, %v9286_v30, %v9318_v51  ;;  %v9316_v59 = vmul.f32 0.01, %v16601_v23 }
 0x40b   :  { %v9411_v37 = vrot.slane %v9397_v39, %v16591_v18  ;;  %v9412_v10 = vcombine.high %v9404_v5, %v9404_v5  ;;  %v12077_v34 = vrot.slane %v9404_v5, 9  ;;  %v16603_v3 = vpop.f32.mrb[4].mxu1  ;;  %v9414_v31 = vcombine.high %v9334_v57, %v9334_v57 }
 0x40c   :  { %v9377_v26 = vrot.slane %v9363_v42, %v16591_v18  ;;  %v9378_v52 = vcombine.high %v9370_v55, %v9370_v55  ;;  %v12069_v16 = vrot.slane %v9370_v55, 9  ;;  %v16606_v47 = vpop.f32.mrb[5].mxu1  ;;  %v9421_v25 = vrot.slane %v9334_v57, %v16591_v18 }
 0x40d   :  { %v9413_v54 = vcombine.high %v9411_v37, %v9411_v37  ;;  %v12078_v1 = vrot.slane %v9412_v10, 9  ;;  %v12079_v46 = vrot.slane %v9411_v37, 9  ;;  %v9899_v38 = vmax.f32 %v9404_v5, %v12077_v34  ;;  %v16608_v61 = vpop.f32.mrb[6].mxu1 }
 0x40e   :  { %v9379_v4 = vcombine.high %v9377_v26, %v9377_v26  ;;  %v12070_v32 = vrot.slane %v9378_v52, 9  ;;  %v12071_v14 = vrot.slane %v9377_v26, 9  ;;  %v9891_v48 = vmax.f32 %v9370_v55, %v12069_v16  ;;  %v16610_v21 = vpop.f32.mrb[7].mxu1 }
 0x40f   :  { %v12080_v19 = vrot.slane %v9413_v54, 9  ;;  %v9900_v9 = vmax.f32 %v9412_v10, %v12078_v1  ;;  %v9901_v0 = vmax.f32 %v9411_v37, %v12079_v46  ;;  %v9961_v63 = vpack.c.bf16 %v9899_v38, %v9899_v38 }
 0x410   :  { %v12072_v44 = vrot.slane %v9379_v4, 9  ;;  %v9892_v36 = vmax.f32 %v9378_v52, %v12070_v32  ;;  %v9893_v60 = vmax.f32 %v9377_v26, %v12071_v14  ;;  %v9955_v33 = vpack.c.bf16 %v9891_v48, %v9891_v48 }
 0x411   :  { %v9902_v40 = vmax.f32 %v9413_v54, %v12080_v19  ;;  %v9962_v53 = vpack.c.bf16 %v9900_v9, %v9900_v9  ;;  %v9963_v13 = vpack.c.bf16 %v9901_v0, %v9901_v0  ;;  %v16612_v2 = vunpack.c.l.b16 %v9961_v63 }
 0x412   :  { %v9894_v28 = vmax.f32 %v9379_v4, %v12072_v44  ;;  %v9956_v45 = vpack.c.bf16 %v9892_v36, %v9892_v36  ;;  %v9957_v41 = vpack.c.bf16 %v9893_v60, %v9893_v60  ;;  %v10286_v7 = vunpack.c.l.b16 %v9955_v33 }
 0x413   :  { %v9964_v27 = vpack.c.bf16 %v9902_v40, %v9902_v40  ;;  %v16615_v43 = vunpack.c.l.b16 %v9962_v53  ;;  %v16617_v50 = vunpack.c.l.b16 %v9963_v13  ;;  %v16620_v15 = vpop.f32.mrb[8].mxu1  ;;  %v9428_v56 = vrot.slane %v9414_v31, %v16591_v18 }
 0x414   :  { %v9958_v62 = vpack.c.bf16 %v9894_v28, %v9894_v28  ;;  %v10064_v29 = vunpack.c.l.b16 %v9956_v45  ;;  %v10065_v12 = vunpack.c.l.b16 %v9957_v41  ;;  %v16623_v22 = vpop.f32.mrb[9].mxu1  ;;  %v9429_v55 = vcombine.high %v9421_v25, %v9421_v25 }
 0x415   :  { %v16625_v35 = vunpack.c.l.b16 %v9964_v27  ;;  %v16629_v30 = vpop.f32.mrb[10].mxu1  ;;  %v9430_v31 = vcombine.high %v9428_v56, %v9428_v56  ;;  %v12081_v46 = vrot.slane %v9421_v25, 9  ;;  %v12083_v32 = vrot.slane %v9428_v56, 9 }
 0x416   :  { %v10066_v11 = vunpack.c.l.b16 %v9958_v62  ;;  %v10112_v17 = vrot.slane %v10065_v12, 7  ;;  %v10294_v51 = vrot.slane %v10064_v29, 7  ;;  %v16632_v39 = vpop.f32.mrb[11].mxu1  ;;  %v10296_v42 = vrot.slane %v10065_v12, 6 }
 0x417   :  { %18632 = vst [vmem:[#allocation35_spill] sm:$0xff] %v16625_v35  ;;  %v10308_v49 = vrot.slane %v16625_v35, 7  ;;  %v12082_v38 = vrot.slane %v9429_v55, 9  ;;  %v12084_v14 = vrot.slane %v9430_v31, 9  ;;  %v9332_v48 = vsel %vm9300_vm10, %v16601_v23, %v9316_v59 }
 0x418   :  { %v10114_v37 = vsel %vm10113_vm7, %v10112_v17, %v10064_v29  ;;  %v10115_v10 = vrot.slane %v10066_v11, 6  ;;  %v10295_v34 = vsel %vm10113_vm7, %v10294_v51, %v10286_v7  ;;  %v10298_v16 = vrot.slane %v10066_v11, 5 }
 0x419   :  { %v10309_v26 = vsel %vm10113_vm7, %v10308_v49, %v16617_v50  ;;  %v10297_v54 = vsel %vm10116_vm8, %v10296_v42, %v10295_v34  ;;  %v10480_v1 = vrot.slane %v10066_v11, 7  ;;  %v9903_v9 = vmax.f32 %v9421_v25, %v12081_v46 }
 0x41a   :  { %v16644_v4 = vsel %vm10116_vm8, %v10115_v10, %v10114_v37  ;;  %v9904_v0 = vmax.f32 %v9429_v55, %v12082_v38  ;;  %v9380_v63 = vcombine.high %v9332_v48, %v9332_v48  ;;  %v9387_v44 = vrot.slane %v9332_v48, %v16591_v18 }
 0x41b   :  { %v16649_v19 = vpop.f32.mrb[12].mxu1  ;;  %v16655_v60 = vsel %vm10119_vm9, %v10298_v16, %v10297_v54  ;;  %v9905_v33 = vmax.f32 %v9428_v56, %v12083_v32  ;;  %v9906_v40 = vmax.f32 %v9430_v31, %v12084_v14  ;;  %v16659_v53 = vadd.f32 %v16603_v3, %v16587_v58 }
 0x41c   :  { %v16652_v36 = vpop.f32.mrb[13].mxu1  ;;  %v9965_v23 = vpack.c.bf16 %v9903_v9, %v9903_v9  ;;  %v9966_v28 = vpack.c.bf16 %v9904_v0, %v9904_v0  ;;  %v9394_v45 = vrot.slane %v9380_v63, %v16591_v18  ;;  %v9395_v41 = vcombine.high %v9387_v44, %v9387_v44 }
 0x41d   :  { %v16661_v13 = vpop.f32.mrb[14].mxu1  ;;  %v10481_v25 = vsel %vm10113_vm7, %v10480_v1, %v10065_v12  ;;  %v10006_v62 = vpack.c.bf16 %v9905_v33, %v9905_v33  ;;  %v10454_v29 = vpack.c.bf16 %v9906_v40, %v9906_v40  ;;  %v12073_v59 = vrot.slane %v9387_v44, 9 }
 0x41e   :  { %v16664_v27 = vpop.f32.mrb[15].mxu1  ;;  %v10073_v7 = vunpack.c.l.b16 %v9965_v23  ;;  %v16667_v56 = vunpack.c.l.b16 %v9966_v28  ;;  %v9396_v11 = vcombine.high %v9394_v45, %v9394_v45  ;;  %v12074_v3 = vrot.slane %v9395_v41, 9 }
 0x41f   :  { %v10075_v17 = vunpack.c.l.b16 %v10006_v62  ;;  %v12075_v51 = vrot.slane %v9394_v45, 9  ;;  %v9895_v49 = vmax.f32 %v9387_v44, %v12073_v59  ;;  %v9287_v42 = vadd.f32 %v16587_v58, %v16606_v47 }
 0x420   :  { %v10133_v55 = vrot.slane %v10073_v7, 7  ;;  %v10135_v37 = vrot.slane %v16667_v56, 6  ;;  %v10310_v12 = vrot.slane %v10073_v7, 6  ;;  %v10473_v10 = vunpack.c.l.b16 %v10454_v29 }
 0x421   :  { %vm9305_vm13 = vcmp.ge.f32.partialorder %v16659_v53, 0.0  ;;  %v10137_v34 = vrot.slane %v10075_v17, 5  ;;  %v10312_v16 = vrot.slane %v16667_v56, 5  ;;  %v10494_v31 = vrot.slane %v16667_v56, 7 }
 0x422   :  { %v10496_v54 = vrot.slane %v10075_v17, 6  ;;  %v10134_v1 = vsel %vm10113_vm7, %v10133_v55, %v16625_v35  ;;  %v10311_v46 = vsel %vm10116_vm8, %v10310_v12, %v10309_v26  ;;  %v12076_v38 = vrot.slane %v9396_v11, 9 }
 0x423   :  { %v9896_v47 = vmax.f32 %v9395_v41, %v12074_v3  ;;  %v10136_v32 = vsel %vm10116_vm8, %v10135_v37, %v10134_v1  ;;  %v10495_v14 = vsel %vm10113_vm7, %v10494_v31, %v10073_v7  ;;  %v9897_v48 = vmax.f32 %v9394_v45, %v12075_v51 }
 0x424   :  { %v9959_v9 = vpack.c.bf16 %v9895_v49, %v9895_v49  ;;  %v16681_v0 = vsel %vm10119_vm9, %v10137_v34, %v10136_v32  ;;  %v10498_v63 = vrot.slane %v10473_v10, 5  ;;  %v9898_v44 = vmax.f32 %v9396_v11, %v12076_v38 }
 0x425   :  { %v9960_v33 = vpack.c.bf16 %v9896_v47, %v9896_v47  ;;  %v10497_v40 = vsel %vm10116_vm8, %v10496_v54, %v10495_v14  ;;  %v10005_v23 = vpack.c.bf16 %v9897_v48, %v9897_v48  ;;  %v9321_v26 = vmul.f32 0.01, %v16659_v53 }
 0x426   :  { %v10067_v28 = vunpack.c.l.b16 %v9959_v9  ;;  %v10453_v41 = vpack.c.bf16 %v9898_v44, %v9898_v44  ;;  %vm9303_vm14 = vcmp.ge.f32.partialorder %v9287_v42, 0.0  ;;  %v9319_v29 = vmul.f32 0.01, %v9287_v42 }
 0x427   :  { %v10068_v62 = vunpack.c.l.b16 %v9960_v33  ;;  %v10069_v59 = vunpack.c.l.b16 %v10005_v23  ;;  %v10313_v44 = vsel %vm10119_vm9, %v10312_v16, %v10311_v46  ;;  %v16711_v33 = vadd.f32 %v16608_v61, %v16587_v58 }
 0x428   :  { %v10118_v7 = vrot.slane %v10067_v28, 5  ;;  %v10300_v45 = vrot.slane %v10067_v28, 4  ;;  %v10482_v56 = vrot.slane %v10067_v28, 6  ;;  %v10472_v51 = vunpack.c.l.b16 %v10453_v41 }
 0x429   :  { %v10121_v3 = vrot.slane %v10068_v62, 4  ;;  %v10302_v17 = vrot.slane %v10068_v62, 3  ;;  %v10484_v49 = vrot.slane %v10068_v62, 5  ;;  %v10124_v55 = vrot.slane %v10069_v59, 3 }
 0x42a   :  { %v10120_v11 = vsel %vm10119_vm9, %v10118_v7, %v16644_v4  ;;  %v10301_v37 = vsel %vm10122_vm11, %v10300_v45, %v16655_v60  ;;  %v10483_v12 = vsel %vm10116_vm8, %v10482_v56, %v10481_v25  ;;  %v10486_v54 = vrot.slane %v10069_v59, 4 }
 0x42b   :  { %v10123_v10 = vsel %vm10122_vm11, %v10121_v3, %v10120_v11  ;;  %v16692_v34 = vsel %vm10125_vm12, %v10302_v17, %v10301_v37  ;;  %v10485_v31 = vsel %vm10119_vm9, %v10484_v49, %v10483_v12  ;;  %v10488_v38 = vrot.slane %v10472_v51, 3 }
 0x42c   :  { %v16696_v1 = vsel %vm10125_vm12, %v10124_v55, %v10123_v10  ;;  %v9337_v4 = vsel %vm9305_vm13, %v16659_v53, %v9321_v26  ;;  %v9335_v60 = vsel %vm9303_vm14, %v9287_v42, %v9319_v29  ;;  %v10487_v25 = vsel %vm10122_vm11, %v10486_v54, %v10485_v31 }
 0x42d   :  { %v9465_v47 = vcombine.high %v9337_v4, %v9337_v4  ;;  %v9472_v32 = vrot.slane %v9337_v4, %v16591_v18  ;;  %v9431_v14 = vcombine.high %v9335_v60, %v9335_v60  ;;  %v16705_v48 = vsel %vm10125_vm12, %v10488_v38, %v10487_v25 }
 0x42e   :  { %18633 = vst [vmem:[#allocation61_spill] sm:$0xff] %v16705_v48  ;;  %v9438_v9 = vrot.slane %v9335_v60, %v16591_v18  ;;  %v10499_v62 = vsel %vm10119_vm9, %v10498_v63, %v10497_v40  ;;  %vm9306_vm15 = vcmp.ge.f32.partialorder %v16711_v33, 0.0  ;;  %vm10128_vm5 = vcmask 1046534  }
 0x42f   :  { %v9479_v53 = vrot.slane %v9465_v47, %v16591_v18  ;;  %v9480_v42 = vcombine.high %v9472_v32, %v9472_v32  ;;  %v12093_v23 = vrot.slane %v9472_v32, 9  ;;  %v9445_v28 = vrot.slane %v9431_v14, %v16591_v18 }
 0x430   :  { %v9446_v41 = vcombine.high %v9438_v9, %v9438_v9  ;;  %v12085_v29 = vrot.slane %v9438_v9, 9 }
 0x431   :  { %v9481_v59 = vcombine.high %v9479_v53, %v9479_v53  ;;  %v12094_v7 = vrot.slane %v9480_v42, 9  ;;  %v12095_v45 = vrot.slane %v9479_v53, 9  ;;  %v9915_v16 = vmax.f32 %v9472_v32, %v12093_v23 }
 0x432   :  { %v9447_v46 = vcombine.high %v9445_v28, %v9445_v28  ;;  %v12086_v56 = vrot.slane %v9446_v41, 9  ;;  %v12087_v61 = vrot.slane %v9445_v28, 9  ;;  %v9907_v3 = vmax.f32 %v9438_v9, %v12085_v29 }
 0x433   :  { %v12096_v17 = vrot.slane %v9481_v59, 9  ;;  %v9916_v51 = vmax.f32 %v9480_v42, %v12094_v7  ;;  %v9917_v49 = vmax.f32 %v9479_v53, %v12095_v45  ;;  %v9973_v11 = vpack.c.bf16 %v9915_v16, %v9915_v16 }
 0x434   :  { %v12088_v55 = vrot.slane %v9447_v46, 9  ;;  %v9908_v37 = vmax.f32 %v9446_v41, %v12086_v56  ;;  %v9909_v12 = vmax.f32 %v9445_v28, %v12087_v61  ;;  %v9967_v63 = vpack.c.bf16 %v9907_v3, %v9907_v3 }
 0x435   :  { %v9918_v40 = vmax.f32 %v9481_v59, %v12096_v17  ;;  %v9974_v10 = vpack.c.bf16 %v9916_v51, %v9916_v51  ;;  %v9975_v31 = vpack.c.bf16 %v9917_v49, %v9917_v49  ;;  %v16718_v54 = vunpack.c.l.b16 %v9973_v11 }
 0x436   :  { %v9910_v38 = vmax.f32 %v9447_v46, %v12088_v55  ;;  %v9968_v4 = vpack.c.bf16 %v9908_v37, %v9908_v37  ;;  %v9969_v60 = vpack.c.bf16 %v9909_v12, %v9909_v12  ;;  %v10288_v25 = vunpack.c.l.b16 %v9967_v63 }
 0x437   :  { %v9976_v47 = vpack.c.bf16 %v9918_v40, %v9918_v40  ;;  %v16720_v32 = vunpack.c.l.b16 %v9974_v10  ;;  %v16722_v14 = vunpack.c.l.b16 %v9975_v31  ;;  %v9322_v9 = vmul.f32 0.01, %v16711_v33 }
 0x438   :  { %v9970_v53 = vpack.c.bf16 %v9910_v38, %v9910_v38  ;;  %v10076_v42 = vunpack.c.l.b16 %v9968_v4  ;;  %v16725_v23 = vunpack.c.l.b16 %v9969_v60  ;;  %v10314_v28 = vrot.slane %v10288_v25, 4 }
 0x439   :  { %v16727_v41 = vunpack.c.l.b16 %v9976_v47  ;;  %v10324_v7 = vrot.slane %v16718_v54, 6  ;;  %v9338_v10 = vsel %vm9306_vm15, %v16711_v33, %v9322_v9  ;;  %v9293_v31 = vadd.f32 %v16620_v15, %v16587_v58 }
 0x43a   :  { %v16734_v46 = vunpack.c.l.b16 %v9970_v53  ;;  %v10139_v56 = vrot.slane %v10076_v42, 4  ;;  %v10141_v3 = vrot.slane %v16725_v23, 3  ;;  %v10315_v17 = vsel %vm10122_vm11, %v10314_v28, %v10313_v44 }
 0x43b   :  { %v10316_v51 = vrot.slane %v10076_v42, 3  ;;  %v10500_v40 = vrot.slane %v16725_v23, 4  ;;  %v9291_v38 = vadd.f32 %v16587_v58, %v16623_v22  ;;  %v9482_v25 = vcombine.high %v9338_v10, %v9338_v10 }
 0x43c   :  { %v10140_v11 = vsel %vm10122_vm11, %v10139_v56, %v16681_v0  ;;  %v10502_v44 = vrot.slane %v16734_v46, 3  ;;  %v9288_v0 = vadd.f32 %v16587_v58, %v16610_v21  ;;  %v9489_v47 = vrot.slane %v9338_v10, %v16591_v18 }
 0x43d   :  { %v16745_v12 = vsel %vm10125_vm12, %v10141_v3, %v10140_v11  ;;  %v16748_v63 = vsel %vm10125_vm12, %v10316_v51, %v10315_v17  ;;  %v10501_v60 = vsel %vm10122_vm11, %v10500_v40, %v10499_v62  ;;  %vm9309_vm1 = vcmp.ge.f32.partialorder %v9293_v31, 0.0 }
 0x43e   :  { %vm9304_vm0 = vcmp.ge.f32.partialorder %v9288_v0, 0.0  ;;  %v9320_v53 = vmul.f32 0.01, %v9288_v0  ;;  %v16765_v33 = vsel %vm10125_vm12, %v10502_v44, %v10501_v60  ;;  %v9496_v21 = vrot.slane %v9482_v25, %v16591_v18 }
 0x43f   :  { %v9497_v9 = vcombine.high %v9489_v47, %v9489_v47  ;;  %v12097_v15 = vrot.slane %v9489_v47, 9  ;;  %v9325_v42 = vmul.f32 0.01, %v9293_v31  ;;  %vm9307_vm3 = vcmp.ge.f32.partialorder %v9291_v38, 0.0 }
 0x440   :  { %v9336_v28 = vsel %vm9304_vm0, %v9288_v0, %v9320_v53  ;;  %v9323_v22 = vmul.f32 0.01, %v9291_v38  ;;  %v16770_v62 = vadd.f32 %v16629_v30, %v16587_v58  ;;  %v16772_v56 = vcombine.high %v9496_v21, %v9496_v21 }
 0x441   :  { %v12098_v3 = vrot.slane %v9497_v9, 9  ;;  %v12099_v17 = vrot.slane %v9496_v21, 9  ;;  %v9919_v51 = vmax.f32 %v9489_v47, %v12097_v15  ;;  %v9448_v11 = vcombine.high %v9336_v28, %v9336_v28 }
 0x442   :  { %18634 = vst [vmem:[#allocation49_spill] sm:$0xff] %v16772_v56  ;;  %v9455_v40 = vrot.slane %v9336_v28, %v16591_v18  ;;  %v9341_v44 = vsel %vm9309_vm1, %v9293_v31, %v9325_v42  ;;  %v16775_v10 = vsel %vm9307_vm3, %v9291_v38, %v9323_v22  ;;  %vm9310_vm6 = vcmp.ge.f32.partialorder %v16770_v62, 0.0 }
 0x443   :  { %v9920_v0 = vmax.f32 %v9497_v9, %v12098_v3  ;;  %v9921_v25 = vmax.f32 %v9496_v21, %v12099_v17  ;;  %v9977_v53 = vpack.c.bf16 %v9919_v51, %v9919_v51  ;;  %v9462_v49 = vrot.slane %v9448_v11, %v16591_v18 }
 0x444   :  { %v9463_v30 = vcombine.high %v9455_v40, %v9455_v40  ;;  %v12089_v61 = vrot.slane %v9455_v40, 9  ;;  %v9533_v26 = vcombine.high %v9341_v44, %v9341_v44  ;;  %v9540_v47 = vrot.slane %v9341_v44, %v16591_v18 }
 0x445   :  { %v9978_v52 = vpack.c.bf16 %v9920_v0, %v9920_v0  ;;  %v10008_v16 = vpack.c.bf16 %v9921_v25, %v9921_v25  ;;  %v16779_v4 = vunpack.c.l.b16 %v9977_v53  ;;  %v9464_v15 = vcombine.high %v9462_v49, %v9462_v49 }
 0x446   :  { %v12090_v31 = vrot.slane %v9463_v30, 9  ;;  %v12091_v38 = vrot.slane %v9462_v49, 9  ;;  %v9911_v42 = vmax.f32 %v9455_v40, %v12089_v61  ;;  %v9547_v0 = vrot.slane %v9533_v26, %v16591_v18 }
 0x447   :  { %v16782_v28 = vunpack.c.l.b16 %v9978_v52  ;;  %v16784_v21 = vunpack.c.l.b16 %v10008_v16  ;;  %v12092_v3 = vrot.slane %v9464_v15, 9  ;;  %v9548_v44 = vcombine.high %v9540_v47, %v9540_v47 }
 0x448   :  { %v9912_v17 = vmax.f32 %v9463_v30, %v12090_v31  ;;  %v9913_v51 = vmax.f32 %v9462_v49, %v12091_v38  ;;  %v9971_v11 = vpack.c.bf16 %v9911_v42, %v9911_v42  ;;  %v12109_v25 = vrot.slane %v9540_v47, 9 }
 0x449   :  { %v9499_v61 = vcombine.high %v16775_v10, %v16775_v10  ;;  %v9914_v40 = vmax.f32 %v9464_v15, %v12092_v3  ;;  %v9549_v60 = vcombine.high %v9547_v0, %v9547_v0  ;;  %v12110_v22 = vrot.slane %v9548_v44, 9 }
 0x44a   :  { %v9972_v52 = vpack.c.bf16 %v9912_v17, %v9912_v17  ;;  %v10007_v53 = vpack.c.bf16 %v9913_v51, %v9913_v51  ;;  %v16791_v16 = vunpack.c.l.b16 %v9971_v11  ;;  %v12111_v57 = vrot.slane %v9547_v0, 9 }
 0x44b   :  { %v9931_v30 = vmax.f32 %v9540_v47, %v12109_v25  ;;  %v10455_v38 = vpack.c.bf16 %v9914_v40, %v9914_v40  ;;  %v12112_v45 = vrot.slane %v9549_v60, 9  ;;  %v9932_v15 = vmax.f32 %v9548_v44, %v12110_v22 }
 0x44c   :  { %v16794_v49 = vunpack.c.l.b16 %v9972_v52  ;;  %v10081_v31 = vunpack.c.l.b16 %v10007_v53  ;;  %v10504_v42 = vrot.slane %v16791_v16, 2  ;;  %v9933_v3 = vmax.f32 %v9547_v0, %v12111_v57 }
 0x44d   :  { %v10474_v11 = vunpack.c.l.b16 %v10455_v38  ;;  %v9934_v25 = vmax.f32 %v9549_v60, %v12112_v45  ;;  %v9985_v52 = vpack.c.bf16 %v9931_v30, %v9931_v30  ;;  %v9986_v53 = vpack.c.bf16 %v9932_v15, %v9932_v15 }
 0x44e   :  { %18635 = vst [vmem:[#allocation38_spill] sm:$0xff] %v16794_v49  ;;  %v10147_v17 = vrot.slane %v10081_v31, 7  ;;  %v10322_v51 = vrot.slane %v16794_v49, 7  ;;  %v16802_v47 = vsel %vm10128_vm5, %v10504_v42, %v16765_v33  ;;  %v9987_v0 = vpack.c.bf16 %v9933_v3, %v9933_v3 }
 0x44f   :  { %18636 = vst [vmem:[#allocation99_spill] sm:$0xff] %v16802_v47  ;;  %v10508_v22 = vrot.slane %v10474_v11, 7  ;;  %v9988_v38 = vpack.c.bf16 %v9934_v25, %v9934_v25  ;;  %v16815_v33 = vunpack.c.l.b16 %v9986_v53  ;;  %v16817_v45 = vunpack.c.l.b16 %v9985_v52 }
 0x450   :  { %v16806_v40 = vsel %vm10113_vm7, %v10147_v17, %v16794_v49  ;;  %v10323_v57 = vsel %vm10113_vm7, %v10322_v51, %v16791_v16  ;;  %v16822_v30 = vunpack.c.l.b16 %v9987_v0  ;;  %v9506_v42 = vrot.slane %v16775_v10, %v16591_v18 }
 0x451   :  { %v16813_v44 = vsel %vm10116_vm8, %v10324_v7, %v10323_v57  ;;  %v16820_v60 = vsel %vm10113_vm7, %v10508_v22, %v10081_v31  ;;  %v9513_v15 = vrot.slane %v9499_v61, %v16591_v18  ;;  %v16827_v3 = vunpack.c.l.b16 %v9988_v38 }
 0x452   :  { %18637 = vst [vmem:[#allocation97_spill] sm:$0xff] %v16820_v60  ;;  %v9326_v7 = vmul.f32 0.01, %v16770_v62  ;;  %v9292_v17 = vadd.f32 %v16587_v58, %v16632_v39  ;;  %v9514_v51 = vcombine.high %v9506_v42, %v9506_v42  ;;  %v12101_v31 = vrot.slane %v9506_v42, 9 }
 0x453   :  { %18638 = vst [vmem:[#allocation43_spill] sm:$0xff] %v16827_v3  ;;  %v9515_v11 = vcombine.high %v9513_v15, %v9513_v15  ;;  %v12103_v25 = vrot.slane %v9513_v15, 9  ;;  %v10350_v52 = vrot.slane %v16827_v3, 7  ;;  %vm10131_vm0 = vcmask 1047559  }
 0x454   :  { %v9342_v10 = vsel %vm9310_vm6, %v16770_v62, %v9326_v7  ;;  %vm9308_vm10 = vcmp.ge.f32.partialorder %v9292_v17, 0.0  ;;  %v9324_v61 = vmul.f32 0.01, %v9292_v17  ;;  %v12102_v53 = vrot.slane %v9514_v51, 9 }
 0x455   :  { %v12104_v57 = vrot.slane %v9515_v11, 9  ;;  %v9923_v22 = vmax.f32 %v9506_v42, %v12101_v31  ;;  %v9925_v0 = vmax.f32 %v9513_v15, %v12103_v25  ;;  %v16839_v38 = vsel %vm10113_vm7, %v10350_v52, %v16822_v30 }
 0x456   :  { %v9550_v39 = vcombine.high %v9342_v10, %v9342_v10  ;;  %v9557_v37 = vrot.slane %v9342_v10, %v16591_v18  ;;  %v9340_v54 = vsel %vm9308_vm10, %v9292_v17, %v9324_v61  ;;  %v9924_v24 = vmax.f32 %v9514_v51, %v12102_v53 }
 0x457   :  { %v9926_v9 = vmax.f32 %v9515_v11, %v12104_v57  ;;  %v9979_v20 = vpack.c.bf16 %v9923_v22, %v9923_v22  ;;  %v9981_v59 = vpack.c.bf16 %v9925_v0, %v9925_v0  ;;  %v9516_v29 = vcombine.high %v9340_v54, %v9340_v54 }
 0x458   :  { %v9564_v62 = vrot.slane %v9550_v39, %v16591_v18  ;;  %v9565_v7 = vcombine.high %v9557_v37, %v9557_v37  ;;  %v12113_v26 = vrot.slane %v9557_v37, 9  ;;  %v9980_v55 = vpack.c.bf16 %v9924_v24, %v9924_v24 }
 0x459   :  { %v9982_v42 = vpack.c.bf16 %v9926_v9, %v9926_v9  ;;  %v10089_v15 = vunpack.c.l.b16 %v9981_v59  ;;  %v10290_v31 = vunpack.c.l.b16 %v9979_v20  ;;  %v9298_v24 = vadd.f32 %v16661_v13, %v16587_v58 }
 0x45a   :  { %v9566_v25 = vcombine.high %v9564_v62, %v9564_v62  ;;  %v12114_v52 = vrot.slane %v9565_v7, 9  ;;  %v12115_v5 = vrot.slane %v9564_v62, 9  ;;  %v9935_v6 = vmax.f32 %v9557_v37, %v12113_v26 }
 0x45b   :  { %v10088_v8 = vunpack.c.l.b16 %v9980_v55  ;;  %v16843_v10 = vunpack.c.l.b16 %v9982_v42  ;;  %v10161_v17 = vrot.slane %v10089_v15, 7  ;;  %v10338_v51 = vrot.slane %v10089_v15, 6 }
 0x45c   :  { %v12116_v11 = vrot.slane %v9566_v25, 9  ;;  %v9936_v61 = vmax.f32 %v9565_v7, %v12114_v52  ;;  %v9937_v53 = vmax.f32 %v9564_v62, %v12115_v5  ;;  %v9989_v57 = vpack.c.bf16 %v9935_v6, %v9935_v6 }
 0x45d   :  { %v16846_v22 = vsel %vm10113_vm7, %v10161_v17, %v10088_v8  ;;  %v10336_v59 = vrot.slane %v10088_v8, 7  ;;  %v10522_v9 = vrot.slane %v16843_v10, 7  ;;  %v9523_v5 = vrot.slane %v9340_v54, %v16591_v18 }
 0x45e   :  { %v9938_v37 = vmax.f32 %v9566_v25, %v12116_v11  ;;  %v9990_v55 = vpack.c.bf16 %v9936_v61, %v9936_v61  ;;  %v10010_v26 = vpack.c.bf16 %v9937_v53, %v9937_v53  ;;  %v16852_v39 = vunpack.c.l.b16 %v9989_v57 }
 0x45f   :  { %v10337_v0 = vsel %vm10113_vm7, %v10336_v59, %v10290_v31  ;;  %v9530_v6 = vrot.slane %v9516_v29, %v16591_v18  ;;  %v16860_v8 = vsel %vm10113_vm7, %v10522_v9, %v10089_v15  ;;  %v9531_v17 = vcombine.high %v9523_v5, %v9523_v5 }
 0x460   :  { %v16857_v62 = vsel %vm10116_vm8, %v10338_v51, %v10337_v0  ;;  %18639 = vst [vmem:[#allocation50_spill] sm:$0xff] %v16860_v8  ;;  %v16862_v7 = vunpack.c.l.b16 %v9990_v55  ;;  %v16864_v42 = vunpack.c.l.b16 %v10010_v26  ;;  %v10175_v25 = vrot.slane %v16852_v39, 7 }
 0x461   :  { %v10458_v52 = vpack.c.bf16 %v9938_v37, %v9938_v37  ;;  %v9532_v57 = vcombine.high %v9530_v6, %v9530_v6  ;;  %v12105_v9 = vrot.slane %v9523_v5, 9  ;;  %v12106_v37 = vrot.slane %v9531_v17, 9 }
 0x462   :  { %v10536_v11 = vrot.slane %v16862_v7, 7  ;;  %v16874_v15 = vsel %vm10113_vm7, %v10175_v25, %v16827_v3  ;;  %v10538_v53 = vrot.slane %v16864_v42, 6  ;;  %v12107_v55 = vrot.slane %v9530_v6, 9 }
 0x463   :  { %v16876_v61 = vunpack.c.l.b16 %v10458_v52  ;;  %v12108_v51 = vrot.slane %v9532_v57, 9  ;;  %v9297_v25 = vadd.f32 %v16649_v19, %v16587_v58  ;;  %v9927_v52 = vmax.f32 %v9523_v5, %v12105_v9 }
 0x464   :  { %v10537_v59 = vsel %vm10113_vm7, %v10536_v11, %v16852_v39  ;;  %v9928_v31 = vmax.f32 %v9531_v17, %v12106_v37  ;;  %v9929_v20 = vmax.f32 %v9530_v6, %v12107_v55  ;;  %v9295_v29 = vadd.f32 %v16587_v58, %v16652_v36 }
 0x465   :  { %18640 = vst [vmem:[#allocation42_spill] sm:$0xff] %v16876_v61  ;;  %v16882_v26 = vsel %vm10116_vm8, %v10538_v53, %v10537_v59  ;;  %v9930_v54 = vmax.f32 %v9532_v57, %v12108_v51  ;;  %vm9313_vm13 = vcmp.ge.f32.partialorder %v9297_v25, 0.0  ;;  %v9329_v11 = vmul.f32 0.01, %v9297_v25 }
 0x466   :  { %18641 = vst [vmem:[#allocation40_spill] sm:$0xff] %v16882_v26  ;;  %v9983_v53 = vpack.c.bf16 %v9927_v52, %v9927_v52  ;;  %v9984_v59 = vpack.c.bf16 %v9928_v31, %v9928_v31  ;;  %v10009_v26 = vpack.c.bf16 %v9929_v20, %v9929_v20  ;;  %vm9311_vm14 = vcmp.ge.f32.partialorder %v9295_v29, 0.0 }
 0x467   :  { %v10457_v0 = vpack.c.bf16 %v9930_v54, %v9930_v54  ;;  %v9345_v61 = vsel %vm9313_vm13, %v9297_v25, %v9329_v11  ;;  %v9327_v3 = vmul.f32 0.01, %v9295_v29  ;;  %vm9314_vm15 = vcmp.ge.f32.partialorder %v9298_v24, 0.0 }
 0x468   :  { %v16891_v19 = vunpack.c.l.b16 %v9983_v53  ;;  %v16893_v5 = vunpack.c.l.b16 %v9984_v59  ;;  %v16895_v6 = vunpack.c.l.b16 %v10009_v26  ;;  %v9601_v36 = vcombine.high %v9345_v61, %v9345_v61 }
 0x469   :  { %v16897_v17 = vunpack.c.l.b16 %v10457_v0  ;;  %v9608_v51 = vrot.slane %v9345_v61, %v16591_v18  ;;  %v9343_v13 = vsel %vm9311_vm14, %v9295_v29, %v9327_v3  ;;  %v9330_v57 = vmul.f32 0.01, %v9298_v24 }
 0x46a   :  { %v9615_v61 = vrot.slane %v9601_v36, %v16591_v18  ;;  %v9567_v25 = vcombine.high %v9343_v13, %v9343_v13  ;;  %v9574_v52 = vrot.slane %v9343_v13, %v16591_v18  ;;  %v16913_v53 = vadd.f32 %v16587_v58, %v16664_v27 }
 0x46b   :  { %18642 = vst [vmem:[#allocation120_spill] sm:$0xff] %v16897_v17  ;;  %v9616_v3 = vcombine.high %v9608_v51, %v9608_v51  ;;  %v12125_v29 = vrot.slane %v9608_v51, 9  ;;  %v9346_v11 = vsel %vm9314_vm15, %v9298_v24, %v9330_v57  ;;  %v18643_v59 = vrot.slane %v16615_v43, 2 }
 0x46c   :  { %v9617_v55 = vcombine.high %v9615_v61, %v9615_v61  ;;  %v12127_v37 = vrot.slane %v9615_v61, 9  ;;  %v9581_v9 = vrot.slane %v9567_v25, %v16591_v18  ;;  %v9582_v54 = vcombine.high %v9574_v52, %v9574_v52 }
 0x46d   :  { %v10129_v26 = vsel %vm10128_vm5, %v18643_v59, %v16696_v1  ;;  %v12126_v0 = vrot.slane %v9616_v3, 9  ;;  %v9947_v36 = vmax.f32 %v9608_v51, %v12125_v29  ;;  %v12117_v31 = vrot.slane %v9574_v52, 9 }
 0x46e   :  { %v9618_v13 = vcombine.high %v9346_v11, %v9346_v11  ;;  %v12128_v20 = vrot.slane %v9617_v55, 9  ;;  %v9949_v57 = vmax.f32 %v9615_v61, %v12127_v37  ;;  %v9583_v58 = vcombine.high %v9581_v9, %v9581_v9 }
 0x46f   :  { %v9948_v24 = vmax.f32 %v9616_v3, %v12126_v0  ;;  %v9997_v17 = vpack.c.bf16 %v9947_v36, %v9947_v36  ;;  %v12118_v27 = vrot.slane %v9582_v54, 9  ;;  %v12119_v8 = vrot.slane %v9581_v9, 9 }
 0x470   :  { %v9939_v60 = vmax.f32 %v9574_v52, %v12117_v31  ;;  %v9950_v56 = vmax.f32 %v9617_v55, %v12128_v20  ;;  %v9999_v59 = vpack.c.bf16 %v9949_v57, %v9949_v57  ;;  %v12120_v51 = vrot.slane %v9583_v58, 9 }
 0x471   :  { %v9998_v1 = vpack.c.bf16 %v9948_v24, %v9948_v24  ;;  %v16920_v49 = vunpack.c.l.b16 %v9997_v17  ;;  %v9940_v29 = vmax.f32 %v9582_v54, %v12118_v27  ;;  %v9941_v25 = vmax.f32 %v9581_v9, %v12119_v8 }
 0x472   :  { %v9991_v47 = vpack.c.bf16 %v9939_v60, %v9939_v60  ;;  %v10000_v35 = vpack.c.bf16 %v9950_v56, %v9950_v56  ;;  %v16924_v0 = vunpack.c.l.b16 %v9999_v59  ;;  %v9942_v61 = vmax.f32 %v9583_v58, %v12120_v51 }
 0x473   :  { %v16922_v48 = vunpack.c.l.b16 %v9998_v1  ;;  %v9992_v3 = vpack.c.bf16 %v9940_v29, %v9940_v29  ;;  %v9993_v36 = vpack.c.bf16 %v9941_v25, %v9941_v25  ;;  %v9632_v1 = vrot.slane %v9618_v13, %v16591_v18 }
 0x474   :  { %v16927_v31 = vunpack.c.l.b16 %v9991_v47  ;;  %v16929_v20 = vunpack.c.l.b16 %v10000_v35  ;;  %v9994_v9 = vpack.c.bf16 %v9942_v61, %v9942_v61  ;;  %v9625_v47 = vrot.slane %v9346_v11, %v16591_v18 }
 0x475   :  { %v16936_v55 = vunpack.c.l.b16 %v9992_v3  ;;  %v16939_v24 = vunpack.c.l.b16 %v9993_v36  ;;  %vm9312_vm1 = vcmp.ge.f32.partialorder %v16913_v53, 0.0  ;;  %v16950_v25 = vcombine.high %v9632_v1, %v9632_v1 }
 0x476   :  { %v16943_v57 = vunpack.c.l.b16 %v9994_v9  ;;  %v9633_v51 = vcombine.high %v9625_v47, %v9625_v47  ;;  %v12129_v29 = vrot.slane %v9625_v47, 9  ;;  %v12131_v61 = vrot.slane %v9632_v1, 9 }
 0x477   :  { %18644 = vst [vmem:[#allocation28_spill] sm:$0xff] %v16950_v25  ;;  %v9328_v3 = vmul.f32 0.01, %v16913_v53  ;;  %v18645_v11 = vrot.slane %v16617_v50, 1  ;;  %v18646_v13 = vrot.slane %v16734_v46, 2  ;;  %v18647_v59 = vrot.slane %v16720_v32, 6 }
 0x478   :  { %v12130_v9 = vrot.slane %v9633_v51, 9  ;;  %v9951_v52 = vmax.f32 %v9625_v47, %v12129_v29  ;;  %v9953_v60 = vmax.f32 %v9632_v1, %v12131_v61  ;;  %v18648_v54 = vrot.slane %v16791_v16, 1 }
 0x479   :  { %v10132_v36 = vsel %vm10131_vm0, %v18645_v11, %v10129_v26  ;;  %v10144_v8 = vsel %vm10128_vm5, %v18646_v13, %v16745_v12  ;;  %v10150_v56 = vsel %vm10116_vm8, %v18647_v59, %v16806_v40  ;;  %v9344_v35 = vsel %vm9312_vm1, %v16913_v53, %v9328_v3  ;;  %v12754_v12 = vld [vmem:[%s17616_s5] sm:$0xff]  }
 0x47a   :  { %v10146_v26 = vsel %vm10131_vm0, %v18648_v54, %v10144_v8  ;;  %v9952_v47 = vmax.f32 %v9633_v51, %v12130_v9  ;;  %v10001_v29 = vpack.c.bf16 %v9951_v52, %v9951_v52  ;;  %v9584_v11 = vcombine.high %v9344_v35, %v9344_v35 }
 0x47b   :  { %v9591_v17 = vrot.slane %v9344_v35, %v16591_v18  ;;  %v10012_v13 = vpack.c.bf16 %v9953_v60, %v9953_v60  ;;  %v10203_v40 = vpack.c.b16 %v10146_v26, %v10132_v36  ;;  %v18649_v59 = vrot.slane %v16722_v14, 5 }
 0x47c   :  { %v10153_v53 = vrot.slane %v16727_v41, 4  ;;  %v10002_v16 = vpack.c.bf16 %v9952_v47, %v9952_v47  ;;  %v16977_v61 = vunpack.c.l.b16 %v10001_v29  ;;  %v9598_v54 = vrot.slane %v9584_v11, %v16591_v18 }
 0x47d   :  { %v10152_v1 = vsel %vm10119_vm9, %v18649_v59, %v10150_v56  ;;  %v9599_v8 = vcombine.high %v9591_v17, %v9591_v17  ;;  %v16980_v52 = vunpack.c.l.b16 %v10012_v13  ;;  %v12121_v35 = vrot.slane %v9591_v17, 9  ;;  %12493 = vmatmul.mubr.msk.bf16.vlgmr.msra.gmra.mrb[16].mxu1 %vm7999_vm2, %v10203_v40 }
 0x47e   :  { %v10154_v60 = vsel %vm10122_vm11, %v10153_v53, %v10152_v1  ;;  %v10157_v51 = vrot.slane %v16782_v28, 2  ;;  %v16985_v3 = vunpack.c.l.b16 %v10002_v16  ;;  %v9600_v9 = vcombine.high %v9598_v54, %v9598_v54  ;;  %12505 = vmatpush3.bf16.msra.mxu1 %v12754_v12 }
 0x47f   :  { %v18650_v26 = vmov 0.0   ;;  %v12122_v47 = vrot.slane %v9599_v8, 9  ;;  %v12123_v29 = vrot.slane %v9598_v54, 9  ;;  %v9943_v11 = vmax.f32 %v9591_v17, %v12121_v35 }
 0x480   :  { %12496 = vmatprep.mubr.msk.bf16.mxu1 %vm12807_vm4, %v18650_v26  ;;  %v18651_v13 = vrot.slane %v16779_v4, 3  ;;  %12518 = vmatprep.subr.bf16.mxu1 %v18650_v26  ;;  %v12124_v59 = vrot.slane %v9600_v9, 9  ;;  %v10159_v53 = vrot.slane %v16784_v21, 1  ;;  %v18652_v12 = vrot.slane %v16843_v10, 6 }
 0x481   :  { %v9944_v36 = vmax.f32 %v9599_v8, %v12122_v47  ;;  %v9945_v27 = vmax.f32 %v9598_v54, %v12123_v29  ;;  %v9995_v56 = vpack.c.bf16 %v9943_v11, %v9943_v11  ;;  %v18653_v17 = vrot.slane %v16891_v19, 5 }
 0x482   :  { %v10156_v40 = vsel %vm10125_vm12, %v18651_v13, %v10154_v60  ;;  %v10164_v16 = vsel %vm10116_vm8, %v18652_v12, %v16846_v22  ;;  %v9946_v60 = vmax.f32 %v9600_v9, %v12124_v59  ;;  %v18654_v37 = vrot.slane %v16893_v5, 4 }
 0x483   :  { %v10158_v1 = vsel %vm10128_vm5, %v10157_v51, %v10156_v40  ;;  %v10166_v35 = vsel %vm10119_vm9, %v18653_v17, %v10164_v16  ;;  %v10171_v40 = vrot.slane %v16815_v33, 2  ;;  %v9996_v58 = vpack.c.bf16 %v9944_v36, %v9944_v36 }
 0x484   :  { %v10160_v13 = vsel %vm10131_vm0, %v10159_v53, %v10158_v1  ;;  %v10168_v51 = vsel %vm10122_vm11, %v18654_v37, %v10166_v35  ;;  %v10011_v18 = vpack.c.bf16 %v9945_v27, %v9945_v27  ;;  %v17009_v25 = vunpack.c.l.b16 %v9995_v56 }
 0x485   :  { %v18655_v22 = vrot.slane %v16895_v6, 3  ;;  %v10459_v8 = vpack.c.bf16 %v9946_v60, %v9946_v60  ;;  %v10173_v9 = vrot.slane %v16822_v30, 1  ;;  %v18656_v29 = vrot.slane %v16862_v7, 6 }
 0x486   :  { %v17020_v11 = vunpack.c.l.b16 %v9996_v58  ;;  %v10105_v36 = vunpack.c.l.b16 %v10011_v18  ;;  %v18657_v27 = vrot.slane %v16864_v42, 5  ;;  %v10183_v59 = vrot.slane %v16939_v24, 3 }
 0x487   :  { %v10170_v54 = vsel %vm10125_vm12, %v18655_v22, %v10168_v51  ;;  %v10178_v37 = vsel %vm10116_vm8, %v18656_v29, %v16874_v15  ;;  %v10478_v1 = vunpack.c.l.b16 %v10459_v8  ;;  %v18658_v12 = vrot.slane %v16936_v55, 4 }
 0x488   :  { %v10172_v47 = vsel %vm10128_vm5, %v10171_v40, %v10170_v54  ;;  %v10180_v56 = vsel %vm10119_vm9, %v18657_v27, %v10178_v37  ;;  %v10185_v17 = vrot.slane %v16943_v57, 2  ;;  %v10189_v35 = vrot.slane %v10105_v36, 7 }
 0x489   :  { %v10174_v53 = vsel %vm10131_vm0, %v10173_v9, %v10172_v47  ;;  %v10182_v16 = vsel %vm10122_vm11, %v18658_v12, %v10180_v56  ;;  %v10364_v15 = vrot.slane %v17020_v11, 7  ;;  %v10550_v42 = vrot.slane %v10478_v1, 7 }
 0x48a   :  { %v10204_v58 = vpack.c.b16 %v10174_v53, %v10160_v13  ;;  %v10184_v18 = vsel %vm10125_vm12, %v10183_v59, %v10182_v16  ;;  %v10187_v51 = vrot.slane %v17009_v25, 1  ;;  %v10195_v40 = vrot.slane %v16929_v20, 4 }
 0x48b   :  { %v10186_v60 = vsel %vm10128_vm5, %v10185_v17, %v10184_v18  ;;  %v10190_v22 = vsel %vm10113_vm7, %v10189_v35, %v17020_v11  ;;  %v10365_v54 = vsel %vm10113_vm7, %v10364_v15, %v17009_v25  ;;  %v10199_v8 = vrot.slane %v16985_v3, 2 }
 0x48c   :  { %12497 = vmatmul.mubr.msk.bf16.gmra.mrb[20].mxu1 %vm7999_vm2, %v10204_v58  ;;  %v10201_v13 = vrot.slane %v16980_v52, 1  ;;  %v18659_v47 = vrot.slane %v16920_v49, 6  ;;  %v17047_v29 = vsel %vm10113_vm7, %v10550_v42, %v10105_v36  ;;  %v10188_v37 = vsel %vm10131_vm0, %v10187_v51, %v10186_v60 }
 0x48d   :  { %12500 = vmatprep.mubr.msk.bf16.mxu1 %vm12807_vm4, %v18650_v26  ;;  %v18660_v27 = vrot.slane %v16922_v48, 6  ;;  %v18661_v59 = vrot.slane %v16924_v0, 5  ;;  %v18662_v49 = vrot.slane %v16612_v2, 2  ;;  %v18663_v36 = vrot.slane %v16725_v23, 2 }
 0x48e   :  { %v10367_v9 = vsel %vm10116_vm8, %v18659_v47, %v10365_v54  ;;  %v18664_v16 = vrot.slane %v16720_v32, 5  ;;  %v18665_v15 = vrot.slane %v16615_v43, 1  ;;  %v18666_v2 = vrot.slane %v16734_v46, 1 }
 0x48f   :  { %v10192_v56 = vsel %vm10116_vm8, %v18660_v27, %v10190_v22  ;;  %v10305_v53 = vsel %vm10128_vm5, %v18662_v49, %v16692_v34  ;;  %v10319_v12 = vsel %vm10128_vm5, %v18663_v36, %v16748_v63  ;;  %v18667_v18 = vrot.slane %v16722_v14, 4 }
 0x490   :  { %v10194_v1 = vsel %vm10119_vm9, %v18661_v59, %v10192_v56  ;;  %v10327_v17 = vsel %vm10119_vm9, %v18664_v16, %v16813_v44  ;;  %v10307_v58 = vsel %vm10131_vm0, %v18665_v15, %v10305_v53  ;;  %v10321_v34 = vsel %vm10131_vm0, %v18666_v2, %v10319_v12 }
 0x491   :  { %v10196_v35 = vsel %vm10122_vm11, %v10195_v40, %v10194_v1  ;;  %v10329_v23 = vsel %vm10122_vm11, %v18667_v18, %v10327_v17  ;;  %v18668_v63 = vrot.slane %v16977_v61, 3  ;;  %v10378_v42 = vpack.c.b16 %v10321_v34, %v10307_v58 }
 0x492   :  { %v10330_v44 = vrot.slane %v16727_v41, 3  ;;  %v10332_v60 = vrot.slane %v16779_v4, 2  ;;  %v10334_v51 = vrot.slane %v16782_v28, 1  ;;  %v18669_v46 = vrot.slane %v16843_v10, 5 }
 0x493   :  { %v10198_v32 = vsel %vm10125_vm12, %v18668_v63, %v10196_v35  ;;  %v10344_v22 = vrot.slane %v16893_v5, 3  ;;  %v18670_v27 = vrot.slane %v16891_v19, 4  ;;  %v10348_v59 = vrot.slane %v16815_v33, 1 }
 0x494   :  { %v10200_v43 = vsel %vm10128_vm5, %v10199_v8, %v10198_v32  ;;  %v10341_v40 = vsel %vm10119_vm9, %v18669_v46, %v16857_v62  ;;  %v10331_v47 = vsel %vm10125_vm12, %v10330_v44, %v10329_v23  ;;  %v18671_v10 = vrot.slane %v16852_v39, 6  ;;  %v18678_v23 = vld [vmem:[#allocation61_spill] sm:$0xff]  ;;  %v18682_v46 = vld [vmem:[#allocation99_spill] sm:$0xff] }
 0x495   :  { %v10202_v54 = vsel %vm10131_vm0, %v10201_v13, %v10200_v43  ;;  %v10343_v56 = vsel %vm10122_vm11, %v18670_v27, %v10341_v40  ;;  %v10333_v1 = vsel %vm10128_vm5, %v10332_v60, %v10331_v47  ;;  %v18672_v53 = vrot.slane %v16817_v45, 2  ;;  %v18680_v60 = vld [vmem:[#allocation35_spill] sm:$0xff]  ;;  %v18683_v40 = vld [vmem:[#allocation38_spill] sm:$0xff] }
 0x496   :  { %v10205_v8 = vpack.c.b16 %v10202_v54, %v10188_v37  ;;  %v10345_v49 = vsel %vm10125_vm12, %v10344_v22, %v10343_v56  ;;  %v10353_v62 = vsel %vm10116_vm8, %v18671_v10, %v16839_v38  ;;  %v17105_v13 = vsel %vm10131_vm0, %v10334_v51, %v10333_v1  ;;  %v18685_v56 = vld [vmem:[#allocation49_spill] sm:$0xff]  ;;  %v12755_v10 = vld [vmem:[%s17616_s5 + $0x10] sm:$0xff]  }
 0x497   :  { %v10347_v36 = vsel %vm10128_vm5, %v18672_v53, %v10345_v49  ;;  %v18673_v12 = vrot.slane %v16862_v7, 5  ;;  %v10360_v37 = vrot.slane %v16939_v24, 2  ;;  %v18674_v38 = vrot.slane %v16927_v31, 4 }
 0x498   :  { %12501 = vmatmul.mubr.msk.bf16.gmra.mrb[24].mxu1 %vm7999_vm2, %v10205_v8  ;;  %v17116_v16 = vsel %vm10131_vm0, %v10348_v59, %v10347_v36  ;;  %v10362_v17 = vrot.slane %v16943_v57, 1  ;;  %v18675_v45 = vrot.slane %v16922_v48, 5  ;;  %v18676_v15 = vrot.slane %v16936_v55, 3  ;;  %v18687_v8 = vld [vmem:[#allocation97_spill] sm:$0xff] }
 0x499   :  { %v10355_v33 = vsel %vm10119_vm9, %v18673_v12, %v10353_v62  ;;  %12506 = vmatprep.mubr.msk.bf16.mxu1 %vm12807_vm4, %v18650_v26  ;;  %v10379_v7 = vpack.c.b16 %v17116_v16, %v17105_v13  ;;  %v18677_v31 = vrot.slane %v16924_v0, 4  ;;  %v10372_v34 = vrot.slane %v16929_v20, 3 }
 0x49a   :  { %v10357_v39 = vsel %vm10122_vm11, %v18674_v38, %v10355_v33  ;;  %v10369_v35 = vsel %vm10119_vm9, %v18675_v45, %v10367_v9  ;;  %v10374_v9 = vrot.slane %v16977_v61, 2  ;;  %v10376_v18 = vrot.slane %v16985_v3, 1  ;;  %v18691_v38 = vld [vmem:[#allocation50_spill] sm:$0xff] }
 0x49b   :  { %v10359_v58 = vsel %vm10125_vm12, %v18676_v15, %v10357_v39  ;;  %v10371_v2 = vsel %vm10122_vm11, %v18677_v31, %v10369_v35  ;;  %v18679_v63 = vrot.slane %v16617_v50, 2  ;;  %v18681_v43 = vrot.slane %v18680_v60, 1 }
 0x49c   :  { %v10361_v48 = vsel %vm10128_vm5, %v10360_v37, %v10359_v58  ;;  %v10373_v44 = vsel %vm10125_vm12, %v10372_v34, %v10371_v2  ;;  %v18684_v22 = vrot.slane %v18683_v40, 1  ;;  %v18686_v50 = vrot.slane %v18685_v56, 9  ;;  %v18696_v2 = vld [vmem:[#allocation28_spill] sm:$0xff] }
 0x49d   :  { %v10491_v32 = vsel %vm10128_vm5, %v18679_v63, %v18678_v23  ;;  %v10363_v55 = vsel %vm10131_vm0, %v10362_v17, %v10361_v48  ;;  %v10375_v47 = vsel %vm10128_vm5, %v10374_v9, %v10373_v44  ;;  %v18688_v1 = vrot.slane %v16722_v14, 6 }
 0x49e   :  { %v10493_v51 = vsel %vm10131_vm0, %v18681_v43, %v10491_v32  ;;  %v10507_v54 = vsel %vm10131_vm0, %v18684_v22, %v18682_v46  ;;  %v9922_v59 = vmax.f32 %v18685_v56, %v18686_v50  ;;  %v10377_v62 = vsel %vm10131_vm0, %v10376_v18, %v10375_v47  ;;  %v18701_v18 = vld [vmem:[#allocation42_spill] sm:$0xff] }
 0x49f   :  { %v10564_v27 = vpack.c.b16 %v10507_v54, %v10493_v51  ;;  %v10511_v49 = vsel %vm10116_vm8, %v18688_v1, %v18687_v8  ;;  %v18689_v13 = vrot.slane %v16727_v41, 5  ;;  %v10516_v36 = vrot.slane %v16782_v28, 3 }
 0x4a0   :  { %v10518_v12 = vrot.slane %v16784_v21, 2  ;;  %v10380_v33 = vpack.c.b16 %v10377_v62, %v10363_v55  ;;  %v10456_v37 = vpack.c.bf16 %v9922_v59, %v9922_v59  ;;  %v18690_v14 = vrot.slane %v16779_v4, 4  ;;  %v18694_v21 = vld [vmem:[#allocation43_spill] sm:$0xff]  ;;  %12507 = vmatmul.mubr.msk.bf16.vlgmr.msra.gmra.mrb[16].mxu1 %vm7999_vm2, %v10378_v42  ;;  %v18700_v42 = vld [vmem:[#allocation40_spill] sm:$0xff] }
 0x4a1   :  { %v10513_v53 = vsel %vm10119_vm9, %v18689_v13, %v10511_v49  ;;  %v18692_v39 = vrot.slane %v16891_v19, 6  ;;  %v18693_v41 = vrot.slane %v16893_v5, 5  ;;  %v10532_v28 = vrot.slane %v16822_v30, 2  ;;  %12519 = vmatpush3.bf16.msra.mxu1 %v12755_v10  ;;  %12510 = vmatprep.mubr.msk.bf16.mxu1 %vm12807_vm4, %v18650_v26  ;;  %v18698_v30 = vld [vmem:[#allocation120_spill] sm:$0xff] }
 0x4a2   :  { %v10515_v16 = vsel %vm10122_vm11, %v18690_v14, %v10513_v53  ;;  %v10534_v15 = vrot.slane %v18694_v21, 1  ;;  %v10475_v4 = vunpack.c.l.b16 %v10456_v37  ;;  %v18695_v31 = vrot.slane %v16895_v6, 4  ;;  %v18707_v53 = vld [vmem:[#allocation41_spill] sm:$0xff] }
 0x4a3   :  { %v10525_v17 = vsel %vm10116_vm8, %v18692_v39, %v18691_v38  ;;  %v10517_v45 = vsel %vm10125_vm12, %v10516_v36, %v10515_v16  ;;  %v18697_v34 = vrot.slane %v18696_v2, 9  ;;  %v18699_v5 = vrot.slane %v18698_v30, 3 }
 0x4a4   :  { %v10527_v35 = vsel %vm10119_vm9, %v18693_v41, %v10525_v17  ;;  %v10519_v58 = vsel %vm10128_vm5, %v10518_v12, %v10517_v45  ;;  %v18702_v23 = vrot.slane %v18701_v18, 5  ;;  %v10544_v6 = vrot.slane %v16943_v57, 3 }
 0x4a5   :  { %v10529_v19 = vsel %vm10122_vm11, %v18695_v31, %v10527_v35  ;;  %v9954_v48 = vmax.f32 %v18696_v2, %v18697_v34  ;;  %v10546_v32 = vrot.slane %v17009_v25, 2  ;;  %v10520_v55 = vrot.slane %v10475_v4, 1 }
 0x4a6   :  { %v10531_v9 = vsel %vm10125_vm12, %v18699_v5, %v10529_v19  ;;  %v10541_v63 = vsel %vm10119_vm9, %v18702_v23, %v18700_v42  ;;  %v18703_v43 = vrot.slane %v16939_v24, 4  ;;  %v10548_v22 = vrot.slane %v17020_v11, 1 }
 0x4a7   :  { %v10533_v44 = vsel %vm10128_vm5, %v10532_v28, %v10531_v9  ;;  %v10460_v60 = vpack.c.bf16 %v9954_v48, %v9954_v48  ;;  %v18704_v54 = vrot.slane %v16924_v0, 6  ;;  %v10521_v25 = vsel %vm10131_vm0, %v10520_v55, %v10519_v58 }
 0x4a8   :  { %v10543_v51 = vsel %vm10122_vm11, %v18703_v43, %v10541_v63  ;;  %v10535_v46 = vsel %vm10131_vm0, %v10534_v15, %v10533_v44  ;;  %v18705_v24 = vrot.slane %v16929_v20, 5  ;;  %v18706_v1 = vrot.slane %v16977_v61, 4  ;;  %12511 = vmatmul.mubr.msk.bf16.gmra.mrb[20].mxu1 %vm7999_vm2, %v10379_v7  ;;  %v12756_v61 = vld [vmem:[%s17618_s7 + $0x10] sm:$0xff]   ;;  %v12149_v7 = vld [vmem:[%s17617_s6] ss:$0 sm:$0xff] }
 0x4a9   :  { %v10545_v40 = vsel %vm10125_vm12, %v10544_v6, %v10543_v51  ;;  %v10553_v57 = vsel %vm10116_vm8, %v18704_v54, %v17047_v29  ;;  %v10479_v47 = vunpack.c.l.b16 %v10460_v60  ;;  %v10565_v59 = vpack.c.b16 %v10535_v46, %v10521_v25  ;;  %12514 = vmatprep.mubr.msk.bf16.mxu1 %vm12807_vm4, %v18650_v26  ;;  %12532 = vmatprep.subr.bf16.mxu0 %v12756_v61 }
 0x4aa   :  { %v10547_v56 = vsel %vm10128_vm5, %v10546_v32, %v10545_v40  ;;  %v10555_v50 = vsel %vm10119_vm9, %v18705_v24, %v10553_v57  ;;  %v10558_v0 = vrot.slane %v16985_v3, 3  ;;  %v10560_v29 = vrot.slane %v16980_v52, 2  ;;  %12533 = vmatpush3.bf16.msra.mxu0 %v12756_v61  ;;  %v12757_v52 = vld [vmem:[%s17618_s7 + $0x18] sm:$0xff]   ;;  %v17248_v3 = vld [vmem:[%s17618_s7] sm:$0xff]  }
 0x4ab   :  { %v10549_v8 = vsel %vm10131_vm0, %v10548_v22, %v10547_v56  ;;  %v10557_v11 = vsel %vm10122_vm11, %v18706_v1, %v10555_v50  ;;  %v10562_v10 = vrot.slane %v10479_v47, 1  ;;  %12534 = vmatprep.subr.bf16.mxu0 %v12757_v52  ;;  %v17255_v36 = vrot.slane %v12149_v7, %v18707_v53 }
 0x4ac   :  { %v10559_v49 = vsel %vm10125_vm12, %v10558_v0, %v10557_v11 }
 0x4ad   :  { %v10561_v20 = vsel %vm10128_vm5, %v10560_v29, %v10559_v49  ;;  %v17263_v16 = vcombine.high %v17255_v36, %v17255_v36 }
 0x4ae   :  { %v10563_v62 = vsel %vm10131_vm0, %v10562_v10, %v10561_v20  ;;  %12535 = vmatpush3.bf16.msra.mxu0 %v12757_v52 }
 0x4af   :  { %v10566_v13 = vpack.c.b16 %v10563_v62, %v10549_v8  ;;  %12540 = vmatprep.subr.bf16.mxu0 %v17248_v3 }
 0x4b0   :  { %12515 = vmatmul.mubr.msk.bf16.gmra.mrb[24].mxu1 %vm7999_vm2, %v10380_v33 }
 0x4b1   :  { %12520 = vmatprep.mubr.msk.bf16.mxu1 %vm12807_vm4, %v18650_v26 }
 0x4b8   :  { %12521 = vmatmul.mubr.msk.bf16.vlgmr.msra.gmra.mrb[16].mxu1 %vm7999_vm2, %v10564_v27  ;;  %v10783_v27 = vcombine.high %v12149_v7, %v12149_v7 }
 0x4b9   :  { %12524 = vmatprep.mubr.msk.bf16.mxu1 %vm12807_vm4, %v18650_v26 }
 0x4ba   :  { %v17259_v14 = vrot.slane %v10783_v27, %v18707_v53 }
 0x4c0   :  { %12525 = vmatmul.mubr.msk.bf16.gmra.mrb[20].mxu1 %vm7999_vm2, %v10565_v59 }
 0x4c1   :  { %12528 = vmatprep.mubr.msk.bf16.mxu1 %vm12807_vm4, %v18650_v26 }
 0x4c8   :  { %12529 = vmatmul.mubr.msk.bf16.gmra.mrb[24].mxu1 %vm7999_vm2, %v10566_v13  ;;  %vm11000_vm2 = vcmask 1040384  }
 0x4c9   :  { %vm11001_vm3 = vmor %vm11000_vm2, %vm10116_vm8 }
 0x4ca   :  { %vm17272_vm10 = vmor %vm11001_vm3, %vm10122_vm11 }
 0x4cb   :  { %vm17285_vm1 = vmor %vm17272_vm10, %vm10128_vm5 }
 0x58b   :  { %v10616_v12 = vpop.f32.mrb[16].mxu1 }
 0x58c   :  { %v10651_v33 = vcombine.high %v10616_v12, %v10616_v12  ;;  %v10658_v37 = vrot.slane %v10616_v12, %v18707_v53  ;;  %v12522_v38 = vpop.f32.mrb[17].mxu1 }
 0x58d   :  { %v10619_v39 = vpop.f32.mrb[18].mxu1 }
 0x58e   :  { %v10665_v17 = vrot.slane %v10651_v33, %v18707_v53  ;;  %v10666_v45 = vcombine.high %v10658_v37, %v10658_v37  ;;  %v10802_v41 = vadd.f32 %v17255_v36, %v10658_v37  ;;  %v10668_v35 = vcombine.high %v10619_v39, %v10619_v39  ;;  %v12523_v28 = vpop.f32.mrb[19].mxu1 }
 0x58f   :  { %v10675_v21 = vrot.slane %v10619_v39, %v18707_v53 }
 0x590   :  { %v10667_v15 = vcombine.high %v10665_v17, %v10665_v17  ;;  %v10803_v4 = vadd.f32 %v17263_v16, %v10666_v45  ;;  %v10804_v58 = vadd.f32 %v17259_v14, %v10665_v17  ;;  %vm10826_vm6 = vcmp.ge.f32.partialorder %v10802_v41, 0.0 }
 0x591   :  { %v10850_v31 = vmul.f32 0.01, %v10802_v41  ;;  %v10682_v2 = vrot.slane %v10668_v35, %v18707_v53  ;;  %v10683_v34 = vcombine.high %v10675_v21, %v10675_v21  ;;  %v10806_v48 = vadd.f32 %v17263_v16, %v10675_v21 }
 0x592   :  { %v10805_v30 = vadd.f32 %v17255_v36, %v10667_v15  ;;  %vm10827_vm13 = vcmp.ge.f32.partialorder %v10803_v4, 0.0  ;;  %vm10828_vm14 = vcmp.ge.f32.partialorder %v10804_v58, 0.0  ;;  %v10851_v5 = vmul.f32 0.01, %v10803_v4 }
 0x593   :  { %v10852_v9 = vmul.f32 0.01, %v10804_v58  ;;  %v10874_v42 = vsel %vm10826_vm6, %v10802_v41, %v10850_v31  ;;  %v10684_v18 = vcombine.high %v10682_v2, %v10682_v2  ;;  %v10807_v23 = vadd.f32 %v17259_v14, %v10683_v34  ;;  %v10624_v63 = vpop.f32.mrb[20].mxu1 }
 0x594   :  { %vm10829_vm15 = vcmp.ge.f32.partialorder %v10805_v30, 0.0  ;;  %v10853_v6 = vmul.f32 0.01, %v10805_v30  ;;  %v17280_v32 = vsel %vm10827_vm13, %v10803_v4, %v10851_v5  ;;  %v12150_v44 = vrot.slane %v10874_v42, 9  ;;  %v12526_v60 = vpop.f32.mrb[21].mxu1 }
 0x595   :  { %v17289_v43 = vsel %vm10828_vm14, %v10804_v58, %v10852_v9  ;;  %v10914_v51 = vcombine.low %v10874_v42, %v17280_v32  ;;  %v11006_v46 = vrot.slane %v17280_v32, 7  ;;  %v10808_v40 = vadd.f32 %v17255_v36, %v10682_v2  ;;  %v10627_v22 = vpop.f32.mrb[22].mxu1 }
 0x596   :  { %v11009_v54 = vrot.slane %v17289_v43, 7  ;;  %v10809_v25 = vadd.f32 %v17263_v16, %v10684_v18  ;;  %vm10830_vm2 = vcmp.ge.f32.partialorder %v10806_v48, 0.0  ;;  %v12527_v47 = vpop.f32.mrb[23].mxu1  ;;  %vm10831_vm3 = vcmp.ge.f32.partialorder %v10807_v23, 0.0 }
 0x597   :  { %v17299_v56 = vrot.slane %v10914_v51, %v18707_v53  ;;  %v17303_v24 = vsel %vm17285_vm1, %v12150_v44, %v11006_v46  ;;  %v17305_v50 = vrot.slane %v11006_v46, 2  ;;  %vm10832_vm6 = vcmp.ge.f32.partialorder %v10808_v40, 0.0 }
 0x598   :  { %vm10833_vm10 = vcmp.ge.f32.partialorder %v10809_v25, 0.0  ;;  %v10854_v59 = vmul.f32 0.01, %v10806_v48  ;;  %v10855_v8 = vmul.f32 0.01, %v10807_v23  ;;  %v17308_v0 = vsel %vm10829_vm15, %v10805_v30, %v10853_v6 }
 0x599   :  { %v10856_v1 = vmul.f32 0.01, %v10808_v40  ;;  %v10857_v11 = vmul.f32 0.01, %v10809_v25  ;;  %v10685_v29 = vcombine.high %v10624_v63, %v10624_v63  ;;  %v12151_v20 = vrot.slane %v17308_v0, 9 }
 0x59a   :  { %v17310_v49 = vsel %vm10830_vm2, %v10806_v48, %v10854_v59  ;;  %v17312_v10 = vsel %vm10831_vm3, %v10807_v23, %v10855_v8  ;;  %v10692_v62 = vrot.slane %v10624_v63, %v18707_v53  ;;  %v10702_v4 = vcombine.high %v10627_v22, %v10627_v22 }
 0x59b   :  { %v17316_v13 = vsel %vm10832_vm6, %v10808_v40, %v10856_v1  ;;  %v17318_v61 = vsel %vm10833_vm10, %v10809_v25, %v10857_v11  ;;  %v10915_v52 = vcombine.low %v17308_v0, %v17310_v49  ;;  %v11013_v7 = vrot.slane %v17310_v49, 7  ;;  %v10632_v27 = vpop.f32.mrb[24].mxu1 }
 0x59c   :  { %v10931_v12 = vcombine.low %v17316_v13, %v17318_v61  ;;  %v11016_v33 = vrot.slane %v17312_v10, 7  ;;  %v12152_v37 = vrot.slane %v17316_v13, 9  ;;  %v11020_v38 = vrot.slane %v17318_v61, 7  ;;  %v12530_v39 = vpop.f32.mrb[25].mxu1 }
 0x59d   :  { %v17330_v17 = vrot.slane %v11013_v7, 2  ;;  %v10699_v41 = vrot.slane %v10685_v29, %v18707_v53  ;;  %v10700_v35 = vcombine.high %v10692_v62, %v10692_v62  ;;  %v17335_v28 = vpop.f32.mrb[26].mxu1  ;;  %v10810_v15 = vadd.f32 %v17259_v14, %v10692_v62 }
 0x59e   :  { %v11022_v21 = vrot.slane %v11020_v38, 2  ;;  %v10709_v58 = vrot.slane %v10627_v22, %v18707_v53  ;;  %v12531_v31 = vpop.f32.mrb[27].mxu1  ;;  %v10719_v48 = vcombine.high %v10632_v27, %v10632_v27  ;;  %v10716_v5 = vrot.slane %v10702_v4, %v18707_v53 }
 0x59f   :  { %v10701_v19 = vcombine.high %v10699_v41, %v10699_v41  ;;  %v10811_v2 = vadd.f32 %v17255_v36, %v10700_v35  ;;  %v10812_v34 = vadd.f32 %v17263_v16, %v10699_v41  ;;  %vm10834_vm13 = vcmp.ge.f32.partialorder %v10810_v15, 0.0 }
 0x5a0   :  { %v10858_v30 = vmul.f32 0.01, %v10810_v15  ;;  %v10717_v9 = vcombine.high %v10709_v58, %v10709_v58  ;;  %v10718_v6 = vcombine.high %v10716_v5, %v10716_v5  ;;  %v10814_v44 = vadd.f32 %v17255_v36, %v10709_v58 }
 0x5a1   :  { %v10813_v42 = vadd.f32 %v17259_v14, %v10701_v19  ;;  %vm10835_vm14 = vcmp.ge.f32.partialorder %v10811_v2, 0.0  ;;  %vm10836_vm15 = vcmp.ge.f32.partialorder %v10812_v34, 0.0  ;;  %v10859_v18 = vmul.f32 0.01, %v10811_v2 }
 0x5a2   :  { %v10860_v23 = vmul.f32 0.01, %v10812_v34  ;;  %v10882_v63 = vsel %vm10834_vm13, %v10810_v15, %v10858_v30  ;;  %v10815_v47 = vadd.f32 %v17263_v16, %v10717_v9  ;;  %v10816_v41 = vadd.f32 %v17259_v14, %v10716_v5 }
 0x5a3   :  { %vm10837_vm2 = vcmp.ge.f32.partialorder %v10813_v42, 0.0  ;;  %v10861_v60 = vmul.f32 0.01, %v10813_v42  ;;  %v17346_v51 = vsel %vm10835_vm14, %v10811_v2, %v10859_v18  ;;  %v11023_v46 = vrot.slane %v10882_v63, 7 }
 0x5a4   :  { %v17348_v40 = vsel %vm10836_vm15, %v10812_v34, %v10860_v23  ;;  %v12153_v22 = vrot.slane %v17346_v51, 9  ;;  %v11291_v25 = vcombine.low %v17318_v61, %v10882_v63  ;;  %v10817_v15 = vadd.f32 %v17255_v36, %v10718_v6 }
 0x5a5   :  { %v17353_v59 = vsel %vm10837_vm2, %v10813_v42, %v10861_v60  ;;  %v10932_v8 = vcombine.low %v17346_v51, %v17348_v40  ;;  %v17359_v1 = vsel %vm17285_vm1, %v11022_v21, %v11023_v46  ;;  %v11027_v11 = vrot.slane %v17348_v40, 7 }
 0x5a6   :  { %v11030_v29 = vrot.slane %v17353_v59, 7  ;;  %v17366_v39 = vrot.slane %v11291_v25, %v18707_v53  ;;  %vm10838_vm3 = vcmp.ge.f32.partialorder %v10814_v44, 0.0  ;;  %vm10839_vm6 = vcmp.ge.f32.partialorder %v10815_v47, 0.0 }
 0x5a7   :  { %v17371_v35 = vrot.slane %v11027_v11, 2  ;;  %vm10840_vm10 = vcmp.ge.f32.partialorder %v10816_v41, 0.0  ;;  %v10862_v21 = vmul.f32 0.01, %v10814_v44  ;;  %v10863_v4 = vmul.f32 0.01, %v10815_v47 }
 0x5a8   :  { %v10726_v58 = vrot.slane %v10632_v27, %v18707_v53  ;;  %vm10841_vm13 = vcmp.ge.f32.partialorder %v10817_v15, 0.0  ;;  %v10864_v31 = vmul.f32 0.01, %v10816_v41  ;;  %v10865_v19 = vmul.f32 0.01, %v10817_v15 }
 0x5a9   :  { %v10733_v2 = vrot.slane %v10719_v48, %v18707_v53  ;;  %v10886_v34 = vsel %vm10838_vm3, %v10814_v44, %v10862_v21  ;;  %v10887_v30 = vsel %vm10839_vm6, %v10815_v47, %v10863_v4  ;;  %v10929_v55 = vrot.slane %v10915_v52, %v18707_v53 }
 0x5aa   :  { %v10734_v5 = vcombine.high %v10726_v58, %v10726_v58  ;;  %v10818_v9 = vadd.f32 %v17263_v16, %v10726_v58  ;;  %v10888_v42 = vsel %vm10840_vm10, %v10816_v41, %v10864_v31  ;;  %v10948_v18 = vcombine.low %v10886_v34, %v10887_v30 }
 0x5ab   :  { %v12154_v23 = vrot.slane %v10886_v34, 9  ;;  %v11034_v63 = vrot.slane %v10887_v30, 7  ;;  %v11037_v6 = vrot.slane %v10888_v42, 7  ;;  %v11308_v60 = vcombine.low %v10887_v30, %v10888_v42 }
 0x5ac   :  { %v10735_v46 = vcombine.high %v10733_v2, %v10733_v2  ;;  %v10819_v25 = vadd.f32 %v17259_v14, %v10734_v5  ;;  %v17379_v27 = vrot.slane %v10948_v18, %v18707_v53  ;;  %v10820_v47 = vadd.f32 %v17255_v36, %v10733_v2 }
 0x5ad   :  { %v11035_v48 = vsel %vm17285_vm1, %v12154_v23, %v11034_v63  ;;  %v11036_v44 = vrot.slane %v11034_v63, 2  ;;  %v17385_v21 = vrot.slane %v11308_v60, %v18707_v53  ;;  %vm10842_vm14 = vcmp.ge.f32.partialorder %v10818_v9, 0.0 }
 0x5ae   :  { %v10821_v41 = vadd.f32 %v17263_v16, %v10735_v46  ;;  %vm10843_vm15 = vcmp.ge.f32.partialorder %v10819_v25, 0.0  ;;  %vm10844_vm2 = vcmp.ge.f32.partialorder %v10820_v47, 0.0  ;;  %v10866_v58 = vmul.f32 0.01, %v10818_v9 }
 0x5af   :  { %v11038_v4 = vsel %vm17285_vm1, %v11036_v44, %v11037_v6  ;;  %v10867_v31 = vmul.f32 0.01, %v10819_v25  ;;  %v10868_v30 = vmul.f32 0.01, %v10820_v47  ;;  %v10889_v42 = vsel %vm10841_vm13, %v10817_v15, %v10865_v19 }
 0x5b0   :  { %v11094_v34 = vcombine.low %v11035_v48, %v11038_v4  ;;  %vm10845_vm3 = vcmp.ge.f32.partialorder %v10821_v41, 0.0  ;;  %v10869_v5 = vmul.f32 0.01, %v10821_v41  ;;  %v10890_v2 = vsel %vm10842_vm14, %v10818_v9, %v10866_v58 }
 0x5b1   :  { %v10891_v18 = vsel %vm10843_vm15, %v10819_v25, %v10867_v31  ;;  %v10736_v23 = vcombine.high %v17335_v28, %v17335_v28  ;;  %v10892_v60 = vsel %vm10844_vm2, %v10820_v47, %v10868_v30  ;;  %v10949_v6 = vcombine.low %v10889_v42, %v10890_v2 }
 0x5b2   :  { %v17394_v63 = vrot.slane %v11094_v34, %v18707_v53  ;;  %v10893_v46 = vsel %vm10845_vm3, %v10821_v41, %v10869_v5  ;;  %v12155_v62 = vrot.slane %v10889_v42, 9  ;;  %v11041_v45 = vrot.slane %v10890_v2, 7 }
 0x5b3   :  { %v10965_v44 = vcombine.low %v10892_v60, %v10893_v46  ;;  %v11044_v48 = vrot.slane %v10891_v18, 7  ;;  %v17397_v4 = vrot.slane %v10949_v6, %v18707_v53  ;;  %v12156_v57 = vrot.slane %v10892_v60, 9 }
 0x5b4   :  { %v11048_v15 = vrot.slane %v10893_v46, 7  ;;  %v11309_v19 = vcombine.low %v10890_v2, %v10891_v18  ;;  %v11042_v25 = vsel %vm17285_vm1, %v12155_v62, %v11041_v45  ;;  %v11043_v58 = vrot.slane %v11041_v45, 2 }
 0x5b5   :  { %v17400_v9 = vrot.slane %v10965_v44, %v18707_v53  ;;  %v10743_v47 = vrot.slane %v17335_v28, %v18707_v53  ;;  %v10750_v34 = vrot.slane %v10736_v23, %v18707_v53  ;;  %v11010_v45 = vsel %vm17285_vm1, %v17305_v50, %v11009_v54 }
 0x5b6   :  { %v11050_v41 = vrot.slane %v11048_v15, 2  ;;  %v17407_v31 = vrot.slane %v11309_v19, %v18707_v53  ;;  %v11049_v30 = vsel %vm17285_vm1, %v12156_v57, %v11048_v15  ;;  %v11045_v5 = vsel %vm17285_vm1, %v11043_v58, %v11044_v48 }
 0x5b7   :  { %v10751_v42 = vcombine.high %v10743_v47, %v10743_v47  ;;  %v10822_v2 = vadd.f32 %v17259_v14, %v10743_v47  ;;  %v11095_v28 = vcombine.low %v11042_v25, %v11045_v5  ;;  %v10752_v62 = vcombine.high %v10750_v34, %v10750_v34 }
 0x5b8   :  { %v10824_v18 = vadd.f32 %v17263_v16, %v10750_v34  ;;  %v11014_v57 = vsel %vm17285_vm1, %v12151_v20, %v11013_v7  ;;  %v11017_v54 = vsel %vm17285_vm1, %v17330_v17, %v11016_v33  ;;  %vm11151_vm15 = vcmask 261120  }
 0x5b9   :  { %v10823_v23 = vadd.f32 %v17255_v36, %v10751_v42  ;;  %vm10846_vm6 = vcmp.ge.f32.partialorder %v10822_v2, 0.0  ;;  %v10870_v60 = vmul.f32 0.01, %v10822_v2  ;;  %v11109_v50 = vrot.slane %v11095_v28, %v18707_v53 }
 0x5ba   :  { %v10825_v16 = vadd.f32 %v17259_v14, %v10752_v62  ;;  %vm10848_vm10 = vcmp.ge.f32.partialorder %v10824_v18, 0.0  ;;  %v10872_v6 = vmul.f32 0.01, %v10824_v18  ;;  %v11021_v36 = vsel %vm17285_vm1, %v12152_v37, %v11020_v38 }
 0x5bb   :  { %vm10847_vm13 = vcmp.ge.f32.partialorder %v10823_v23, 0.0  ;;  %v10871_v44 = vmul.f32 0.01, %v10823_v23  ;;  %v10894_v48 = vsel %vm10846_vm6, %v10822_v2, %v10870_v60  ;;  %v11028_v14 = vsel %vm17285_vm1, %v12153_v22, %v11027_v11 }
 0x5bc   :  { %vm10849_vm14 = vcmp.ge.f32.partialorder %v10825_v16, 0.0  ;;  %v10873_v20 = vmul.f32 0.01, %v10825_v16  ;;  %v10896_v7 = vsel %vm10848_vm10, %v10824_v18, %v10872_v6  ;;  %v11051_v33 = vrot.slane %v10894_v48, 7 }
 0x5bd   :  { %v10895_v17 = vsel %vm10847_vm13, %v10823_v23, %v10871_v44  ;;  %v11055_v15 = vrot.slane %v10896_v7, 7  ;;  %v11325_v19 = vcombine.low %v10893_v46, %v10894_v48  ;;  %v11031_v22 = vsel %vm17285_vm1, %v17371_v35, %v11030_v29 }
 0x5be   :  { %v10897_v25 = vsel %vm10849_vm14, %v10825_v16, %v10873_v20  ;;  %v10966_v58 = vcombine.low %v10895_v17, %v10896_v7  ;;  %v11052_v47 = vsel %vm17285_vm1, %v11050_v41, %v11051_v33  ;;  %v12157_v37 = vrot.slane %v10895_v17, 9 }
 0x5bf   :  { %v11057_v38 = vrot.slane %v11055_v15, 2  ;;  %v11058_v34 = vrot.slane %v10897_v25, 7  ;;  %v11111_v5 = vcombine.low %v11049_v30, %v11052_v47  ;;  %v11326_v42 = vcombine.low %v10896_v7, %v10897_v25 }
 0x5c0   :  { %v10980_v46 = vrot.slane %v10966_v58, %v18707_v53  ;;  %v11056_v2 = vsel %vm17285_vm1, %v12157_v37, %v11055_v15  ;;  %v11333_v28 = vrot.slane %v11325_v19, %v18707_v53  ;;  %v11060_v62 = vcombine.low %v17303_v24, %v11010_v45 }
 0x5c1   :  { %v11059_v11 = vsel %vm17285_vm1, %v11057_v38, %v11058_v34  ;;  %v11119_v41 = vrot.slane %v11111_v5, %v18707_v53  ;;  %v11340_v30 = vrot.slane %v11326_v42, %v18707_v53  ;;  %v11061_v23 = vcombine.low %v11014_v57, %v11017_v54 }
 0x5c2   :  { %v11112_v18 = vcombine.low %v11056_v2, %v11059_v11  ;;  %v11077_v60 = vcombine.low %v11021_v36, %v17359_v1  ;;  %v11078_v16 = vcombine.low %v11028_v14, %v11031_v22  ;;  %v11068_v44 = vrot.slane %v11060_v62, %v18707_v53 }
 0x5c3   :  { %v11341_v6 = vcombine.low %v11333_v28, %v11340_v30  ;;  %v11110_v48 = vcombine.low %v17394_v63, %v11109_v50  ;;  %v11075_v35 = vrot.slane %v11061_v23, %v18707_v53  ;;  %v10930_v1 = vcombine.low %v17299_v56, %v10929_v55 }
 0x5c4   :  { %v11126_v29 = vrot.slane %v11112_v18, %v18707_v53  ;;  %v11085_v24 = vrot.slane %v11077_v60, %v18707_v53  ;;  %v11092_v45 = vrot.slane %v11078_v16, %v18707_v53  ;;  %v10939_v63 = vrot.slane %v10931_v12, %v18707_v53 }
 0x5c5   :  { %v10946_v0 = vrot.slane %v10932_v8, %v18707_v53  ;;  %v10964_v52 = vcombine.low %v17379_v27, %v17397_v4  ;;  %v11076_v54 = vcombine.low %v11068_v44, %v11075_v35  ;;  %v10981_v36 = vcombine.low %v17400_v9, %v10980_v46 }
 0x5c6   :  { %v11127_v57 = vcombine.low %v11119_v41, %v11126_v29  ;;  %v11093_v50 = vcombine.low %v11085_v24, %v11092_v45  ;;  %v18712_v56 = vcombine.low %v17280_v32, %v17289_v43  ;;  %v18713_v61 = vcombine.low %v17310_v49, %v17312_v10  ;;  %v12759_v32 = vld [vmem:[%s17618_s7 + $0x8] sm:$0xff]  }
 0x5c7   :  { %v10947_v20 = vcombine.low %v10939_v63, %v10946_v0  ;;  %v18714_v51 = vcombine.low %v17348_v40, %v17353_v59  ;;  %v10987_v7 = vpack.c.bf16 %v10981_v36, %v10964_v52  ;;  %v11324_v9 = vcombine.low %v17385_v21, %v17407_v31  ;;  %v12760_v59 = vld [vmem:[%s17618_s7 + $0x20] sm:$0xff]   ;;  %v12763_v21 = vld [vmem:[%s17620_s9 + $0x8] sm:$0xff]  }
 0x5c8   :  { %v11282_v13 = vrot.slane %v18712_v56, %v18707_v53  ;;  %v11289_v12 = vrot.slane %v18713_v61, %v18707_v53  ;;  %v11132_v27 = vpack.c.bf16 %v11093_v50, %v11076_v54  ;;  %v11133_v4 = vpack.c.bf16 %v11127_v57, %v11110_v48  ;;  %v17530_v31 = vld [vmem:[%s17619_s8] ss:$0 sm:$0xff]  ;;  %v18715_v36 = vld [vmem:[#allocation5_spill] sm:$0xff] }
 0x5c9   :  { %v11306_v8 = vrot.slane %v18714_v51, %v18707_v53  ;;  %v10986_v33 = vpack.c.bf16 %v10947_v20, %v10930_v1  ;;  %v11347_v10 = vpack.c.bf16 %v11341_v6, %v11324_v9  ;;  %v17545_v20 = vsub.s32 0, %v18715_v36 }
 0x5ca   :  { %v11290_v43 = vcombine.low %v11282_v13, %v11289_v12  ;;  %12536 = vmatprep.mubr.msk.bf16.mxu0 %vm11151_vm15, %v11132_v27  ;;  %vm11723_vm13 = vcmask 254976  }
 0x5cb   :  { %v11307_v49 = vcombine.low %v17366_v39, %v11306_v8  ;;  %12537 = vmatmul.mubr.msk.bf16.vlgmr.msra.gmra.mrb[20].mxu0 %vm11151_vm15, %v11133_v4  ;;  %v12761_v39 = vld [vmem:[%s17618_s7 + $0x28] sm:$0xff]  }
 0x5cc   :  { %12541 = vmatpush3.bf16.msra.mxu0 %v17248_v3  ;;  %12544 = vmatprep.mubr.msk.bf16.mxu0 %vm11151_vm15, %v10986_v33  ;;  %v12762_v3 = vld [vmem:[%s17620_s9] sm:$0xff]  }
 0x5cd   :  { %v11346_v40 = vpack.c.bf16 %v11307_v49, %v11290_v43  ;;  %12542 = vmatprep.subr.bf16.mxu0 %v12759_v32 }
 0x5d0   :  { %12543 = vmatpush3.bf16.msra.mxu0 %v12759_v32 }
 0x5d1   :  { %12548 = vmatprep.subr.bf16.mxu0 %v12760_v59 }
 0x5d7   :  { %12545 = vmatmul.mubr.msk.bf16.vlgmr.msra.gmra.mrb[20].mxu0 %vm11151_vm15, %v10987_v7 }
 0x5d8   :  { %12549 = vmatpush3.bf16.msra.mxu0 %v12760_v59  ;;  %12552 = vmatprep.mubr.msk.bf16.mxu0 %vm11151_vm15, %v11346_v40 }
 0x5d9   :  { %12550 = vmatprep.subr.bf16.mxu0 %v12761_v39 }
 0x5dc   :  { %12551 = vmatpush3.bf16.msra.mxu0 %v12761_v39 }
 0x5dd   :  { %12556 = vmatprep.subr.bf16.mxu0 %v18650_v26 }
 0x5e3   :  { %12553 = vmatmul.mubr.msk.bf16.vlgmr.msra.gmra.mrb[20].mxu0 %vm11151_vm15, %v11347_v10 }
 0x5e4   :  { %12560 = vmatprep.mubr.msk.bf16.mxu0 %vm12807_vm4, %v18650_v26  ;;  %12557 = vmatpush3.bf16.msra.mxu0 %v12762_v3 }
 0x5e5   :  { %12558 = vmatprep.subr.bf16.mxu0 %v18650_v26 }
 0x5e8   :  { %12559 = vmatpush3.bf16.msra.mxu0 %v12763_v21 }
 0x6b6   :  { %v12554_v17 = vpop.f32.mrb[20].mxu0 }
 0x6b7   :  { %v11430_v15 = vcombine.high %v12554_v17, %v12554_v17  ;;  %v11447_v19 = vadd.f32 %v12554_v17, %v17530_v31  ;;  %v11405_v14 = vpop.f32.mrb[21].mxu0 }
 0x6b8   :  { %v11428_v25 = vcombine.high %v11405_v14, %v11405_v14  ;;  %v11443_v58 = vadd.f32 %v17530_v31, %v11405_v14  ;;  %v12555_v47 = vpop.f32.mrb[22].mxu0 }
 0x6b9   :  { %v11448_v37 = vadd.f32 %v17530_v31, %v11430_v15  ;;  %vm11455_vm4 = vcmp.ge.f32.partialorder %v11447_v19, 0.0  ;;  %v11463_v38 = vmul.f32 0.01, %v11447_v19  ;;  %v17535_v26 = vpop.f32.mrb[23].mxu0  ;;  %v11431_v2 = vcombine.high %v12555_v47, %v12555_v47 }
 0x6ba   :  { %v11444_v34 = vadd.f32 %v17530_v31, %v11428_v25  ;;  %vm11451_vm1 = vcmp.ge.f32.partialorder %v11443_v58, 0.0  ;;  %v11459_v5 = vmul.f32 0.01, %v11443_v58  ;;  %v11449_v62 = vadd.f32 %v12555_v47, %v17530_v31 }
 0x6bb   :  { %vm11456_vm2 = vcmp.ge.f32.partialorder %v11448_v37, 0.0  ;;  %v11464_v42 = vmul.f32 0.01, %v11448_v37  ;;  %v11471_v46 = vsel %vm11455_vm4, %v11447_v19, %v11463_v38  ;;  %v11450_v44 = vadd.f32 %v17530_v31, %v11431_v2 }
 0x6bc   :  { %v11521_v28 = vrot.slane %v11471_v46, %v18707_v53  ;;  %vm11452_vm3 = vcmp.ge.f32.partialorder %v11444_v34, 0.0  ;;  %v11460_v22 = vmul.f32 0.01, %v11444_v34  ;;  %v11467_v11 = vsel %vm11451_vm1, %v11443_v58, %v11459_v5 }
 0x6bd   :  { %v11472_v41 = vsel %vm11456_vm2, %v11448_v37, %v11464_v42  ;;  %v11489_v30 = vrot.slane %v11467_v11, %v18707_v53  ;;  %v11465_v24 = vmul.f32 0.01, %v11449_v62  ;;  %vm11457_vm6 = vcmp.ge.f32.partialorder %v11449_v62, 0.0 }
 0x6be   :  { %v11522_v18 = vcombine.high %v11521_v28, %v11521_v28  ;;  %v11529_v23 = vrot.slane %v11472_v41, %v18707_v53  ;;  %v11468_v60 = vsel %vm11452_vm3, %v11444_v34, %v11460_v22  ;;  %vm11458_vm10 = vcmp.ge.f32.partialorder %v11450_v44, 0.0 }
 0x6bf   :  { %v11490_v16 = vcombine.high %v11489_v30, %v11489_v30  ;;  %v11497_v6 = vrot.slane %v11468_v60, %v18707_v53  ;;  %v12179_v1 = vrot.slane %v11489_v30, 9  ;;  %v12187_v57 = vrot.slane %v11521_v28, 9 }
 0x6c0   :  { %v11530_v48 = vcombine.high %v11529_v23, %v11529_v23  ;;  %v12188_v45 = vrot.slane %v11522_v18, 9  ;;  %v12189_v54 = vrot.slane %v11529_v23, 9  ;;  %v11466_v50 = vmul.f32 0.01, %v11450_v44 }
 0x6c1   :  { %v11498_v55 = vcombine.high %v11497_v6, %v11497_v6  ;;  %v12180_v29 = vrot.slane %v11490_v16, 9  ;;  %v12181_v35 = vrot.slane %v11497_v6, 9  ;;  %v11473_v61 = vsel %vm11457_vm6, %v11449_v62, %v11465_v24 }
 0x6c2   :  { %v12190_v63 = vrot.slane %v11530_v48, 9  ;;  %v11620_v12 = vmax.f32 %v11522_v18, %v12188_v45  ;;  %v11611_v51 = vmax.f32 %v11489_v30, %v12179_v1  ;;  %v11474_v8 = vsel %vm11458_vm10, %v11450_v44, %v11466_v50 }
 0x6c3   :  { %v12182_v0 = vrot.slane %v11498_v55, 9  ;;  %v11613_v52 = vmax.f32 %v11497_v6, %v12181_v35  ;;  %v11612_v56 = vmax.f32 %v11490_v16, %v12180_v29  ;;  %v11537_v27 = vrot.slane %v11473_v61, %v18707_v53 }
 0x6c4   :  { %v11622_v4 = vmax.f32 %v11530_v48, %v12190_v63  ;;  %v11545_v33 = vrot.slane %v11474_v8, %v18707_v53  ;;  %v11619_v32 = vmax.f32 %v11521_v28, %v12187_v57  ;;  %v11621_v43 = vmax.f32 %v11529_v23, %v12189_v54 }
 0x6c5   :  { %v11614_v13 = vmax.f32 %v11498_v55, %v12182_v0  ;;  %v11654_v7 = vrot.slane %v11613_v52, %v17545_v20  ;;  %v11538_v49 = vcombine.high %v11537_v27, %v11537_v27  ;;  %v11650_v10 = vrot.slane %v11612_v56, %v17545_v20 }
 0x6c6   :  { %v11546_v59 = vcombine.high %v11545_v33, %v11545_v33  ;;  %v11682_v39 = vrot.slane %v11620_v12, %v17545_v20  ;;  %v12191_v21 = vrot.slane %v11537_v27, 9  ;;  %v11690_v17 = vrot.slane %v11622_v4, %v17545_v20 }
 0x6c7   :  { %v11658_v9 = vrot.slane %v11614_v13, %v17545_v20  ;;  %v11646_v15 = vrot.slane %v11611_v51, %v17545_v20  ;;  %v12192_v19 = vrot.slane %v11538_v49, 9  ;;  %v12193_v14 = vrot.slane %v11545_v33, 9 }
 0x6c8   :  { %v11678_v25 = vrot.slane %v11619_v32, %v17545_v20  ;;  %v11686_v58 = vrot.slane %v11621_v43, %v17545_v20  ;;  %v12194_v47 = vrot.slane %v11546_v59, 9  ;;  %v11623_v37 = vmax.f32 %v11537_v27, %v12191_v21 }
 0x6c9   :  { %v11708_v40 = vsel %vm10113_vm7, %v11658_v9, %v11654_v7  ;;  %v11707_v38 = vsel %vm10113_vm7, %v11650_v10, %v11646_v15  ;;  %v11624_v5 = vmax.f32 %v11538_v49, %v12192_v19  ;;  %v11625_v42 = vmax.f32 %v11545_v33, %v12193_v14 }
 0x6ca   :  { %v11731_v3 = vsel %vm11723_vm13, %v11708_v40, 0.0  ;;  %v11711_v46 = vsel %vm10113_vm7, %v11682_v39, %v11678_v25  ;;  %v11626_v2 = vmax.f32 %v11546_v59, %v12194_v47  ;;  %v11712_v28 = vsel %vm10113_vm7, %v11690_v17, %v11686_v58 }
 0x6cb   :  { %v11732_v34 = vrot.slane %v11731_v3, 4  ;;  %v11694_v22 = vrot.slane %v11623_v37, %v17545_v20  ;;  %v11698_v11 = vrot.slane %v11624_v5, %v17545_v20  ;;  %v11724_v41 = vsel %vm11723_vm13, %v11707_v38, 0.0 }
 0x6cc   :  { %v11702_v30 = vrot.slane %v11625_v42, %v17545_v20  ;;  %v11706_v62 = vrot.slane %v11626_v2, %v17545_v20  ;;  %v11429_v18 = vcombine.high %v17535_v26, %v17535_v26  ;;  %v11752_v23 = vsel %vm11723_vm13, %v11711_v46, 0.0 }
 0x6cd   :  { %v11733_v60 = vadd.f32 %v11732_v34, %v11731_v3  ;;  %v11713_v16 = vsel %vm10113_vm7, %v11698_v11, %v11694_v22  ;;  %v11445_v6 = vadd.f32 %v17530_v31, %v17535_v26  ;;  %v11759_v44 = vsel %vm11723_vm13, %v11712_v28, 0.0 }
 0x6ce   :  { %v11714_v48 = vsel %vm10113_vm7, %v11706_v62, %v11702_v30  ;;  %v11446_v55 = vadd.f32 %v17530_v31, %v11429_v18  ;;  %v11725_v29 = vrot.slane %v11724_v41, 4  ;;  %v11766_v35 = vsel %vm11723_vm13, %v11713_v16, 0.0 }
 0x6cf   :  { %v11753_v24 = vrot.slane %v11752_v23, 4  ;;  %v11773_v45 = vsel %vm11723_vm13, %v11714_v48, 0.0  ;;  %vm11453_vm14 = vcmp.ge.f32.partialorder %v11445_v6, 0.0  ;;  %v11760_v1 = vrot.slane %v11759_v44, 4 }
 0x6d0   :  { %v11734_v63 = vrot.slane %v11733_v60, 2  ;;  %vm11454_vm4 = vcmp.ge.f32.partialorder %v11446_v55, 0.0  ;;  %v11461_v0 = vmul.f32 0.01, %v11445_v6  ;;  %v11767_v52 = vrot.slane %v11766_v35, 4 }
 0x6d1   :  { %v11462_v57 = vmul.f32 0.01, %v11446_v55  ;;  %v11726_v26 = vadd.f32 %v11725_v29, %v11724_v41  ;;  %v11774_v54 = vrot.slane %v11773_v45, 4  ;;  %v11754_v36 = vadd.f32 %v11753_v24, %v11752_v23 }
 0x6d2   :  { %v11469_v50 = vsel %vm11453_vm14, %v11445_v6, %v11461_v0  ;;  %v11761_v13 = vadd.f32 %v11760_v1, %v11759_v44  ;;  %v11735_v61 = vadd.f32 %v11734_v63, %v11733_v60  ;;  %v11768_v51 = vadd.f32 %v11767_v52, %v11766_v35 }
 0x6d3   :  { %v11470_v56 = vsel %vm11454_vm4, %v11446_v55, %v11462_v57  ;;  %v11505_v31 = vrot.slane %v11469_v50, %v18707_v53  ;;  %v11727_v4 = vrot.slane %v11726_v26, 2  ;;  %v11775_v7 = vadd.f32 %v11774_v54, %v11773_v45 }
 0x6d4   :  { %v11513_v12 = vrot.slane %v11470_v56, %v18707_v53  ;;  %v11755_v32 = vrot.slane %v11754_v36, 2  ;;  %v11762_v10 = vrot.slane %v11761_v13, 2  ;;  %v11736_v40 = vrot.slane %v11735_v61, 1 }
 0x6d5   :  { %v11506_v8 = vcombine.high %v11505_v31, %v11505_v31  ;;  %v12183_v27 = vrot.slane %v11505_v31, 9  ;;  %v11769_v3 = vrot.slane %v11768_v51, 2  ;;  %v11728_v17 = vadd.f32 %v11727_v4, %v11726_v26 }
 0x6d6   :  { %v11514_v9 = vcombine.high %v11513_v12, %v11513_v12  ;;  %v12185_v33 = vrot.slane %v11513_v12, 9  ;;  %v11776_v19 = vrot.slane %v11775_v7, 2  ;;  %v11756_v53 = vadd.f32 %v11755_v32, %v11754_v36 }
 0x6d7   :  { %v12184_v43 = vrot.slane %v11506_v8, 9  ;;  %v11615_v49 = vmax.f32 %v11505_v31, %v12183_v27  ;;  %v11763_v58 = vadd.f32 %v11762_v10, %v11761_v13  ;;  %v11737_v47 = vadd.f32 %v11736_v40, %v11735_v61 }
 0x6d8   :  { %v12186_v59 = vrot.slane %v11514_v9, 9  ;;  %v11617_v39 = vmax.f32 %v11513_v12, %v12185_v33  ;;  %v11770_v34 = vadd.f32 %v11769_v3, %v11768_v51  ;;  %v11729_v42 = vrot.slane %v11728_v17, 1 }
 0x6d9   :  { %v11616_v21 = vmax.f32 %v11506_v8, %v12184_v43  ;;  %v11662_v14 = vrot.slane %v11615_v49, %v17545_v20  ;;  %v11777_v28 = vadd.f32 %v11776_v19, %v11775_v7  ;;  %v11757_v22 = vrot.slane %v11756_v53, 1 }
 0x6da   :  { %v11618_v15 = vmax.f32 %v11514_v9, %v12186_v59  ;;  %v11670_v37 = vrot.slane %v11617_v39, %v17545_v20  ;;  %v11782_v30 = vmul.f32 0.5, %v11737_v47  ;;  %v11764_v18 = vrot.slane %v11763_v58, 1 }
 0x6db   :  { %v11666_v25 = vrot.slane %v11616_v21, %v17545_v20  ;;  %v11771_v60 = vrot.slane %v11770_v34, 1  ;;  %v11730_v16 = vadd.f32 %v11729_v42, %v11728_v17  ;;  %v11778_v6 = vrot.slane %v11777_v28, 1 }
 0x6dc   :  { %v11674_v38 = vrot.slane %v11618_v15, %v17545_v20  ;;  %v11758_v44 = vadd.f32 %v11757_v22, %v11756_v53  ;;  %v11790_v55 = vpack.c.bf16 %v11782_v30, %v11782_v30  ;;  %v11765_v35 = vadd.f32 %v11764_v18, %v11763_v58 }
 0x6dd   :  { %v11709_v5 = vsel %vm10113_vm7, %v11666_v25, %v11662_v14  ;;  %v11772_v45 = vadd.f32 %v11771_v60, %v11770_v34  ;;  %v11781_v1 = vmul.f32 0.5, %v11730_v16  ;;  %v11779_v0 = vadd.f32 %v11778_v6, %v11777_v28 }
 0x6de   :  { %v11710_v46 = vsel %vm10113_vm7, %v11674_v38, %v11670_v37  ;;  %v11738_v2 = vsel %vm11723_vm13, %v11709_v5, 0.0  ;;  %v11785_v52 = vmul.f32 0.5, %v11758_v44  ;;  %v11817_v26 = vunpack.c.l.b16 %v11790_v55 }
 0x6df   :  { %v11739_v11 = vrot.slane %v11738_v2, 4  ;;  %v11745_v41 = vsel %vm11723_vm13, %v11710_v46, 0.0  ;;  %v11786_v50 = vmul.f32 0.5, %v11765_v35  ;;  %v11787_v56 = vmul.f32 0.5, %v11772_v45  ;;  %v12195_v46 = vld [vmem:[%s17621_s10] ss:$0 sm:$0xff] }
 0x6e0   :  { %v11746_v62 = vrot.slane %v11745_v41, 4  ;;  %v11789_v31 = vpack.c.bf16 %v11781_v1, %v11781_v1  ;;  %v11788_v61 = vmul.f32 0.5, %v11779_v0  ;;  %v11793_v51 = vpack.c.bf16 %v11785_v52, %v11785_v52  ;;  %s12780_s10 = scalar_lea.vmem %s11911_s14, 128 }
 0x6e1   :  { %v11740_v23 = vadd.f32 %v11739_v11, %v11738_v2  ;;  %v11824_v8 = vrot.slane %v11817_v26, 7  ;;  %v11794_v4 = vpack.c.bf16 %v11786_v50, %v11786_v50  ;;  %v11795_v9 = vpack.c.bf16 %v11787_v56, %v11787_v56  ;;  %p12781_p0 = scmp.ne.s32.totalorder %s11911_s14, %s12780_s10  ;;  %p12786_p2 = scmp.lt.s32.totalorder %s12780_s10, %s12780_s10 }
 0x6e2   :  { %v11747_v20 = vadd.f32 %v11746_v62, %v11745_v41  ;;  %v11816_v33 = vunpack.c.l.b16 %v11789_v31  ;;  %v11796_v43 = vpack.c.bf16 %v11788_v61, %v11788_v61  ;;  %v11820_v10 = vunpack.c.l.b16 %v11793_v51 }
 0x6e3   :  { %v11741_v48 = vrot.slane %v11740_v23, 2  ;;  %v11821_v59 = vunpack.c.l.b16 %v11794_v4  ;;  %v11822_v21 = vunpack.c.l.b16 %v11795_v9  ;;  %p12787_p3 = por %p12786_p2, %p12785_p1 }
 0x6e4   :  { %v11748_v29 = vrot.slane %v11747_v20, 2  ;;  %v11825_v39 = vsel %vm10113_vm7, %v11824_v8, %v11816_v33  ;;  %v11823_v17 = vunpack.c.l.b16 %v11796_v43  ;;  %v11830_v53 = vrot.slane %v11820_v10, 4 }
 0x6e5   :  { %v11742_v24 = vadd.f32 %v11741_v48, %v11740_v23  ;;  %v11832_v25 = vrot.slane %v11821_v59, 3  ;;  %v11834_v47 = vrot.slane %v11822_v21, 2  ;;  %p12788_p4 = pnand %p12787_p3, %p12781_p0 }
 0x6e6   :  { %v11749_v63 = vadd.f32 %v11748_v29, %v11747_v20  ;;  %v11836_v38 = vrot.slane %v11823_v17, 1 }
 0x6e7   :  { %v11743_v57 = vrot.slane %v11742_v24, 1 }
 0x6e8   :  { %v11750_v54 = vrot.slane %v11749_v63, 1 }
 0x6e9   :  { %v11744_v36 = vadd.f32 %v11743_v57, %v11742_v24 }
 0x6ea   :  { %v11751_v13 = vadd.f32 %v11750_v54, %v11749_v63 }
 0x6eb   :  { %v11783_v12 = vmul.f32 0.5, %v11744_v36 }
 0x6ec   :  { %v11784_v27 = vmul.f32 0.5, %v11751_v13 }
 0x6ed   :  { %v11791_v7 = vpack.c.bf16 %v11783_v12, %v11783_v12 }
 0x6ee   :  { %v11792_v32 = vpack.c.bf16 %v11784_v27, %v11784_v27 }
 0x6ef   :  { %v11818_v49 = vunpack.c.l.b16 %v11791_v7 }
 0x6f0   :  { %v11819_v40 = vunpack.c.l.b16 %v11792_v32 }
 0x6f1   :  { %v11826_v3 = vrot.slane %v11818_v49, 6 }
 0x6f2   :  { %v11828_v15 = vrot.slane %v11819_v40, 5 }
 0x6f3   :  { %v11827_v19 = vsel %vm10116_vm8, %v11826_v3, %v11825_v39 }
 0x6f4   :  { %v11829_v14 = vsel %vm10119_vm9, %v11828_v15, %v11827_v19 }
 0x6f5   :  { %v11831_v58 = vsel %vm10122_vm11, %v11830_v53, %v11829_v14 }
 0x6f6   :  { %v11833_v37 = vsel %vm10125_vm12, %v11832_v25, %v11831_v58 }
 0x6f7   :  { %v11835_v34 = vsel %vm10128_vm5, %v11834_v47, %v11833_v37 }
 0x6f8   :  { %v11837_v5 = vsel %vm10131_vm0, %v11836_v38, %v11835_v34 }
 0x6f9   :  { %v11838_v42 = vpack.c.b16 %v11837_v5, %v11837_v5 }
 0x6fb   :  { %12561 = vmatmul.mubr.msk.bf16.vlgmr.msra.gmra.mrb[24].mxu0 %vm11151_vm15, %v11838_v42 }
 0x7ce   :  { %v11888_v2 = vpop.f32.mrb[24].mxu0 }
 0x7cf   :  { %v11889_v28 = vadd.f32 %v12195_v46, %v11888_v2  ;;  %v12562_v22 = vpop.f32.mrb[25].mxu0 }
 0x7d0   :  { %v11891_v11 = vpop.f32.mrb[26].mxu0 }
 0x7d1   :  { %11894 = vmax.xlane.f32.xlu0 %v11889_v28  ;;  %v12563_v41 = vpop.f32.mrb[27].mxu0 }
 0x85e   :  { %v11895_v30 = vpop.xlane.xlu0 %11894 }
 0x85f   :  { %v11896_v62 = vsub.f32 %v11889_v28, %v11895_v30 }
 0x861   :  { %v11897_v18 = vmul.f32 1.442695, %v11896_v62 }
 0x863   :  { %12764 = vpow2.f32 %v11897_v18 }
 0x86d   :  { %v12765_v23 = vpop.eup %12764 }
 0x86e   :  { %11899 = vadd.xlane.f32.xlu0 %v12765_v23 }
 0x8fb   :  { %v11900_v60 = vpop.xlane.xlu0 %11899 }
 0x8fc   :  { %12766 = vrcp.f32 %v11900_v60 }
 0x906   :  { %v12767_v16 = vpop.eup %12766 }
 0x907   :  { %v11902_v20 = vmul.f32 %v12767_v16, %v12765_v23 }
 0x909   :  { %11903 = vst [vmem:[#allocation2] sm:$0xff] %v11902_v20 }
 0x90a   :  { %12791 = shalt.err (!%p12788_p4)
}
 0x90b   :  { %s12792_s16 = scalar_lea.hbm %s17622_s11, 128 }
 0x90c   :  { %p12793_p5 = scmp.ne.s32.totalorder %s17622_s11, %s12792_s16  ;;  %p12796_p6 = scmp.lt.u32.totalorder %s12792_s16, %s17622_s11 }
 0x90e   :  { %p12798_p7 = pnand %p12796_p6, %p12793_p5 }
 0x910   :  { %12801 = shalt.err (!%p12798_p7)
}
 0x911   :  { %11913 = dma.vmem_to_hbm [thread:$0]  %s11911_s14, 128, %s17622_s11, [#allocation3]  }
 0x912   :  { %12802 = dma.done.wait [#allocation3], 128  }
 0x913   :  { %12803 = vsyncadd [#allocation3], 4294967168 }
 0x914   :  { %11917 = vsyncpa [#allocation3], 1 }

</bundles_post_ra>
